<compile_context>
chip_gen: v5e
topology: v5e:2x2
jax: 0.10.0
libtpu: 0.0.40
codegen_flags: <defaults>
</compile_context>

<pallas_src>
import jax
import jax.numpy as jnp
from jax.experimental import pallas as pl
from jax.experimental.pallas import tpu as pltpu

BN_EPS = 1e-5
KH = KW = 5            # conv kernel size
CIN1_PAD = 16          # layer-1 input-channel pad (bf16 sublane pack)
COUT_PAD = 128         # padded conv output channels (lane-dense)
CLS_PAD = 128          # padded logits width (sliced back to num_classes outside the kernel)

VMEM_SPEC = pl.BlockSpec(memory_space=pltpu.MemorySpace.VMEM)
ANY_SPEC = pl.BlockSpec(memory_space=pl.ANY)


# --------------------------------------------------------------------------- kernel
def _fused_smallconvnet_kernel(
    x_ref,                                   # (N, H, W, CIN1_PAD) bf16
    w1_ref,                                  # (KH, KW*CIN1_PAD, COUT_PAD) bf16 (VMEM)
    vecs_ref,                                # (10, 128) f32: b/g/beta x3 layers + linear bias
    w2_hbm, w3_hbm, wl_hbm,                  # later-layer weights, raw HBM refs (pl.ANY)
    o_ref,                                   # (N, CLS_PAD) f32
    w2_vmem, w3_vmem, wl_vmem, sem,          # VMEM scratch + DMA semaphores
):
    """Whole SmallConvNet forward in one Pallas program."""

    # Prefetch later-layer weights HBM -> VMEM; overlap the transfers with conv1 compute.
    cp2 = pltpu.make_async_copy(w2_hbm, w2_vmem, sem.at[0])
    cp3 = pltpu.make_async_copy(w3_hbm, w3_vmem, sem.at[1])
    cpl = pltpu.make_async_copy(wl_hbm, wl_vmem, sem.at[2])
    cp2.start()
    cp3.start()
    cpl.start()

    vecs = vecs_ref[...]                                             # (10, 128) f32

    def conv_relu_bn(x_bf, w_ref, bias, gamma, beta):
        # x_bf: (n, h, w, c) bf16.  w_ref: (KH, KW*c, COUT_PAD) bf16, rows ordered (kw, cin).
        n, h, wdim, c = x_bf.shape
        ho, wo = h - KH + 1, wdim - KW + 1
        m = n * ho * wo

        # 5 accumulate-dots over kh; per step the operand is a kw-concat (K = KW*c).
        acc = None
        for kh in range(KH):
            row = jnp.concatenate(
                [x_bf[:, kh:kh + ho, kw:kw + wo, :] for kw in range(KW)],
                axis=-1,
            ).reshape(m, KW * c)
            d = jnp.dot(row, w_ref[kh], preferred_element_type=jnp.float32)
            acc = d if acc is None else acc + d

        y = jnp.maximum(acc + bias, 0.0)                             # conv bias + ReLU (f32)

        # BatchNorm2d (training-mode batch stats) via sublane reductions (XLU), all f32.
        inv_m = 1.0 / m
        mean = jnp.sum(y, axis=0, keepdims=True) * inv_m
        var = jnp.maximum(jnp.sum(y * y, axis=0, keepdims=True) * inv_m - mean * mean, 0.0)
        y = (y - mean) * jax.lax.rsqrt(var + BN_EPS) * gamma + beta
        return y.reshape(n, ho, wo, COUT_PAD)                        # f32

    # TODO(synk): eval-mode BatchNorm (running stats) is not modeled; training-mode batch
    # statistics are used, matching the module's default forward behaviour.
    h1 = conv_relu_bn(x_ref[...], w1_ref, vecs[0:1], vecs[1:2], vecs[2:3])
    cp2.wait()
    h2 = conv_relu_bn(h1.astype(jnp.bfloat16), w2_vmem, vecs[3:4], vecs[4:5], vecs[5:6])
    cp3.wait()
    h3 = conv_relu_bn(h2.astype(jnp.bfloat16), w3_vmem, vecs[6:7], vecs[7:8], vecs[8:9])
    cpl.wait()

    # NHWC-major flatten; the linear weight rows were pre-permuted (and channel-padded) to
    # match, so no transpose sits between conv3 and the Linear.  bf16 operands, f32 acc.
    n = h3.shape[0]
    flat = h3.reshape(n, -1).astype(jnp.bfloat16)                    # (n, Hf*Wf*COUT_PAD)
    o_ref[...] = (jnp.dot(flat, wl_vmem[...], preferred_element_type=jnp.float32)
                  + vecs[9:10])


# --------------------------------------------------------------------------- packing
def _pack_conv_layer(layer, cin_pad):
    """(KH,KW,Cin,Cout) conv params -> (KH, KW*Cin_pad, COUT_PAD) bf16 + (1,128) f32 vectors."""
    w, b, gamma, beta = layer["w"], layer["b"], layer["gamma"], layer["beta"]
    _, _, cin, cout = w.shape
    w = jnp.pad(w, ((0, 0), (0, 0), (0, cin_pad - cin), (0, COUT_PAD - cout)))
    w3d = w.reshape(KH, KW * cin_pad, COUT_PAD).astype(jnp.bfloat16)  # rows = (kw, cin)
    b = jnp.pad(b, (0, COUT_PAD - cout)).reshape(1, COUT_PAD).astype(jnp.float32)
    gamma = jnp.pad(gamma, (0, COUT_PAD - cout),
                    constant_values=1.0).reshape(1, COUT_PAD).astype(jnp.float32)
    beta = jnp.pad(beta, (0, COUT_PAD - cout)).reshape(1, COUT_PAD).astype(jnp.float32)
    return w3d, b, gamma, beta


def _pack_linear(lin_w, lin_b, cout, hf, wf, num_classes):
    """Fold torch's NCHW flatten into a row permutation of the linear weight + padding (bf16)."""
    lw = lin_w.reshape(cout, hf, wf, num_classes)                    # rows were NCHW-ordered
    lw = jnp.transpose(lw, (1, 2, 0, 3))                             # -> (hf, wf, c, classes)
    lw = jnp.pad(lw, ((0, 0), (0, 0), (0, COUT_PAD - cout), (0, CLS_PAD - num_classes)))
    lw = lw.reshape(hf * wf * COUT_PAD, CLS_PAD).astype(jnp.bfloat16)
    lb = jnp.pad(lin_b, (0, CLS_PAD - num_classes)).reshape(1, CLS_PAD).astype(jnp.float32)
    return lw, lb


# --------------------------------------------------------------------------- forward
def small_conv_net_forward(x_nchw, params, num_classes=10):
    n, cin, h, w = x_nchw.shape

    # NCHW -> NHWC, zero-pad channels only to CIN1_PAD, cast to bf16 (MXU-native operand).
    x = jnp.transpose(x_nchw, (0, 2, 3, 1))
    x = jnp.pad(x, ((0, 0), (0, 0), (0, 0), (0, CIN1_PAD - cin))).astype(jnp.bfloat16)

    c0, c1, c2 = params["conv"]
    w1, b1, g1, be1 = _pack_conv_layer(c0, CIN1_PAD)
    w2, b2, g2, be2 = _pack_conv_layer(c1, COUT_PAD)
    w3, b3, g3, be3 = _pack_conv_layer(c2, COUT_PAD)

    hf, wf = h - 3 * (KH - 1), w - 3 * (KW - 1)
    cout = c2["w"].shape[-1]
    lw, lb = _pack_linear(params["lin_w"], params["lin_b"], cout, hf, wf, num_classes)

    # Pack all per-channel vectors into one tiny operand (one DMA instead of ten).
    vecs = jnp.concatenate([b1, g1, be1, b2, g2, be2, b3, g3, be3, lb], axis=0)  # (10,128) f32

    out = pl.pallas_call(
        _fused_smallconvnet_kernel,
        out_shape=jax.ShapeDtypeStruct((n, CLS_PAD), jnp.float32),
        in_specs=[
            VMEM_SPEC,          # x
            VMEM_SPEC,          # w1 (needed immediately)
            VMEM_SPEC,          # packed bias/gamma/beta/linear-bias vectors
            ANY_SPEC,           # w2 (prefetched in-kernel, overlapped with conv1)
            ANY_SPEC,           # w3
            ANY_SPEC,           # linear weight
        ],
        out_specs=VMEM_SPEC,
        scratch_shapes=[
            pltpu.VMEM((KH, KW * COUT_PAD, COUT_PAD), jnp.bfloat16),   # w2 landing buffer
            pltpu.VMEM((KH, KW * COUT_PAD, COUT_PAD), jnp.bfloat16),   # w3 landing buffer
            pltpu.VMEM((hf * wf * COUT_PAD, CLS_PAD), jnp.bfloat16),   # linear-weight buffer
            pltpu.SemaphoreType.DMA((3,)),
        ],
        compiler_params=pltpu.CompilerParams(vmem_limit_bytes=32 * 1024 * 1024),
    )(x, w1, vecs, w2, w3, lw)

    return out[:, :num_classes]                                      # drop class padding


# --------------------------------------------------------------------------- params
def init_params(key, image_shape=(3, 16, 16), num_classes=10):
    c, h, w = image_shape
    chans = [c, 64, 64, 64]
    conv = []
    for i in range(3):
        key, k = jax.random.split(key)
        cin, cout = chans[i], chans[i + 1]
        fan_in = cin * KH * KW
        wgt = jax.random.normal(k, (KH, KW, cin, cout), jnp.float32) * jnp.sqrt(2.0 / fan_in)
        conv.append(dict(
            w=wgt,
            b=jnp.zeros((cout,), jnp.float32),
            gamma=jnp.ones((cout,), jnp.float32),
            beta=jnp.zeros((cout,), jnp.float32),
        ))
        h, w = h - (KH - 1), w - (KW - 1)
    feat = chans[-1] * h * w                       # NCHW-flatten feature count (torch order)
    key, k = jax.random.split(key)
    lin_w = jax.random.normal(k, (feat, num_classes), jnp.float32) * 0.001
    lin_b = jnp.zeros((num_classes,), jnp.float32)
    return dict(conv=conv, lin_w=lin_w, lin_b=lin_b)


# --------------------------------------------------------------------------- main
if __name__ == "__main__":
    key = jax.random.PRNGKey(0)
    key, kx = jax.random.split(key)

    image_shape = (3, 16, 16)     # small image: whole net (weights + activations) fits VMEM
    num_classes = 10
    batch = 2

    params = init_params(key, image_shape=image_shape, num_classes=num_classes)
    x = jax.random.normal(kx, (batch, *image_shape), jnp.float32)

    fwd = jax.jit(lambda xx: small_conv_net_forward(xx, params, num_classes=num_classes))
    logits = fwd(x)
    jax.block_until_ready(logits)

    assert logits.shape == (batch, num_classes)
    assert bool(jnp.all(jnp.isfinite(logits)))
    print("KERNEL_OK")
</pallas_src>

<mosaic_0001>
module attributes {stable_mosaic.version = 11 : i64} {
  func.func @_fused_smallconvnet_kernel(%arg0: memref<2x16x16x16xbf16, #tpu.memory_space<vmem>>, %arg1: memref<5x80x128xbf16, #tpu.memory_space<vmem>>, %arg2: memref<10x128xf32, #tpu.memory_space<vmem>>, %arg3: memref<5x640x128xbf16, #tpu.memory_space<any>>, %arg4: memref<5x640x128xbf16, #tpu.memory_space<any>>, %arg5: memref<2048x128xbf16, #tpu.memory_space<any>>, %arg6: memref<2x128xf32, #tpu.memory_space<vmem>>, %arg7: memref<5x640x128xbf16, #tpu.memory_space<vmem>>, %arg8: memref<5x640x128xbf16, #tpu.memory_space<vmem>>, %arg9: memref<2048x128xbf16, #tpu.memory_space<vmem>>, %arg10: memref<3x!tpu.dma_semaphore, #tpu.memory_space<semaphore_mem>>) attributes {dimension_semantics = [], scalar_prefetch = 0 : i64, scratch_operands = 4 : i64, tpu.core_type = #tpu.core_type<tc>} {
    %c0_i32 = arith.constant 0 : i32
    %0 = tpu.memref_slice %arg10[%c0_i32] : memref<3x!tpu.dma_semaphore, #tpu.memory_space<semaphore_mem>> -> memref<1x!tpu.dma_semaphore, #tpu.memory_space<semaphore_mem>>
    %1 = tpu.memref_squeeze %0 : memref<1x!tpu.dma_semaphore, #tpu.memory_space<semaphore_mem>> -> memref<!tpu.dma_semaphore, #tpu.memory_space<semaphore_mem>>
    tpu.enqueue_dma source(%arg3 : memref<5x640x128xbf16, #tpu.memory_space<any>>) target(%arg7 : memref<5x640x128xbf16, #tpu.memory_space<vmem>>) target_semaphore(%1 : memref<!tpu.dma_semaphore, #tpu.memory_space<semaphore_mem>>)
    %c1_i32 = arith.constant 1 : i32
    %2 = tpu.memref_slice %arg10[%c1_i32] : memref<3x!tpu.dma_semaphore, #tpu.memory_space<semaphore_mem>> -> memref<1x!tpu.dma_semaphore, #tpu.memory_space<semaphore_mem>>
    %3 = tpu.memref_squeeze %2 : memref<1x!tpu.dma_semaphore, #tpu.memory_space<semaphore_mem>> -> memref<!tpu.dma_semaphore, #tpu.memory_space<semaphore_mem>>
    tpu.enqueue_dma source(%arg4 : memref<5x640x128xbf16, #tpu.memory_space<any>>) target(%arg8 : memref<5x640x128xbf16, #tpu.memory_space<vmem>>) target_semaphore(%3 : memref<!tpu.dma_semaphore, #tpu.memory_space<semaphore_mem>>)
    %c2_i32 = arith.constant 2 : i32
    %4 = tpu.memref_slice %arg10[%c2_i32] : memref<3x!tpu.dma_semaphore, #tpu.memory_space<semaphore_mem>> -> memref<1x!tpu.dma_semaphore, #tpu.memory_space<semaphore_mem>>
    %5 = tpu.memref_squeeze %4 : memref<1x!tpu.dma_semaphore, #tpu.memory_space<semaphore_mem>> -> memref<!tpu.dma_semaphore, #tpu.memory_space<semaphore_mem>>
    tpu.enqueue_dma source(%arg5 : memref<2048x128xbf16, #tpu.memory_space<any>>) target(%arg9 : memref<2048x128xbf16, #tpu.memory_space<vmem>>) target_semaphore(%5 : memref<!tpu.dma_semaphore, #tpu.memory_space<semaphore_mem>>)
    %c0 = arith.constant 0 : index
    %c0_0 = arith.constant 0 : index
    %6 = vector.load %arg2[%c0, %c0_0] : memref<10x128xf32, #tpu.memory_space<vmem>>, vector<10x128xf32>
    %c0_1 = arith.constant 0 : index
    %c0_2 = arith.constant 0 : index
    %c0_3 = arith.constant 0 : index
    %c0_4 = arith.constant 0 : index
    %7 = vector.load %arg0[%c0_1, %c0_2, %c0_3, %c0_4] : memref<2x16x16x16xbf16, #tpu.memory_space<vmem>>, vector<2x16x16x16xbf16>
    %8 = vector.extract_strided_slice %6 {offsets = [0, 0], sizes = [1, 128], strides = [1, 1]} : vector<10x128xf32> to vector<1x128xf32>
    %9 = vector.extract_strided_slice %6 {offsets = [1, 0], sizes = [1, 128], strides = [1, 1]} : vector<10x128xf32> to vector<1x128xf32>
    %10 = vector.extract_strided_slice %6 {offsets = [2, 0], sizes = [1, 128], strides = [1, 1]} : vector<10x128xf32> to vector<1x128xf32>
    %11 = vector.extract_strided_slice %7 {offsets = [0, 0, 0, 0], sizes = [2, 12, 12, 16], strides = [1, 1, 1, 1]} : vector<2x16x16x16xbf16> to vector<2x12x12x16xbf16>
    %12 = vector.extract_strided_slice %7 {offsets = [0, 0, 1, 0], sizes = [2, 12, 12, 16], strides = [1, 1, 1, 1]} : vector<2x16x16x16xbf16> to vector<2x12x12x16xbf16>
    %13 = vector.extract_strided_slice %7 {offsets = [0, 0, 2, 0], sizes = [2, 12, 12, 16], strides = [1, 1, 1, 1]} : vector<2x16x16x16xbf16> to vector<2x12x12x16xbf16>
    %14 = vector.extract_strided_slice %7 {offsets = [0, 0, 3, 0], sizes = [2, 12, 12, 16], strides = [1, 1, 1, 1]} : vector<2x16x16x16xbf16> to vector<2x12x12x16xbf16>
    %15 = vector.extract_strided_slice %7 {offsets = [0, 0, 4, 0], sizes = [2, 12, 12, 16], strides = [1, 1, 1, 1]} : vector<2x16x16x16xbf16> to vector<2x12x12x16xbf16>
    %16 = tpu.concatenate %11, %12, %13, %14, %15 in 3 : vector<2x12x12x16xbf16>, vector<2x12x12x16xbf16>, vector<2x12x12x16xbf16>, vector<2x12x12x16xbf16>, vector<2x12x12x16xbf16> -> vector<2x12x12x80xbf16>
    %17 = vector.shape_cast %16 : vector<2x12x12x80xbf16> to vector<288x80xbf16>
    %c0_5 = arith.constant 0 : index
    %c0_6 = arith.constant 0 : index
    %c0_7 = arith.constant 0 : index
    %18 = vector.load %arg1[%c0_5, %c0_6, %c0_7] : memref<5x80x128xbf16, #tpu.memory_space<vmem>>, vector<1x80x128xbf16>
    %19 = vector.shape_cast %18 : vector<1x80x128xbf16> to vector<80x128xbf16>
    %cst = arith.constant dense<0.000000e+00> : vector<288x128xf32>
    %20 = tpu.matmul %17, %19, %cst {dimension_numbers = #tpu.dot_dimension_numbers<[1], [0], [0], [1], [0, 0, 1, 1], [], []>} : vector<288x80xbf16>, vector<80x128xbf16>, vector<288x128xf32> -> vector<288x128xf32>
    %21 = vector.extract_strided_slice %7 {offsets = [0, 1, 0, 0], sizes = [2, 12, 12, 16], strides = [1, 1, 1, 1]} : vector<2x16x16x16xbf16> to vector<2x12x12x16xbf16>
    %22 = vector.extract_strided_slice %7 {offsets = [0, 1, 1, 0], sizes = [2, 12, 12, 16], strides = [1, 1, 1, 1]} : vector<2x16x16x16xbf16> to vector<2x12x12x16xbf16>
    %23 = vector.extract_strided_slice %7 {offsets = [0, 1, 2, 0], sizes = [2, 12, 12, 16], strides = [1, 1, 1, 1]} : vector<2x16x16x16xbf16> to vector<2x12x12x16xbf16>
    %24 = vector.extract_strided_slice %7 {offsets = [0, 1, 3, 0], sizes = [2, 12, 12, 16], strides = [1, 1, 1, 1]} : vector<2x16x16x16xbf16> to vector<2x12x12x16xbf16>
    %25 = vector.extract_strided_slice %7 {offsets = [0, 1, 4, 0], sizes = [2, 12, 12, 16], strides = [1, 1, 1, 1]} : vector<2x16x16x16xbf16> to vector<2x12x12x16xbf16>
    %26 = tpu.concatenate %21, %22, %23, %24, %25 in 3 : vector<2x12x12x16xbf16>, vector<2x12x12x16xbf16>, vector<2x12x12x16xbf16>, vector<2x12x12x16xbf16>, vector<2x12x12x16xbf16> -> vector<2x12x12x80xbf16>
    %27 = vector.shape_cast %26 : vector<2x12x12x80xbf16> to vector<288x80xbf16>
    %c1 = arith.constant 1 : index
    %c0_8 = arith.constant 0 : index
    %c0_9 = arith.constant 0 : index
    %28 = vector.load %arg1[%c1, %c0_8, %c0_9] : memref<5x80x128xbf16, #tpu.memory_space<vmem>>, vector<1x80x128xbf16>
    %29 = vector.shape_cast %28 : vector<1x80x128xbf16> to vector<80x128xbf16>
    %cst_10 = arith.constant dense<0.000000e+00> : vector<288x128xf32>
    %30 = tpu.matmul %27, %29, %cst_10 {dimension_numbers = #tpu.dot_dimension_numbers<[1], [0], [0], [1], [0, 0, 1, 1], [], []>} : vector<288x80xbf16>, vector<80x128xbf16>, vector<288x128xf32> -> vector<288x128xf32>
    %31 = arith.addf %20, %30 : vector<288x128xf32>
    %32 = vector.extract_strided_slice %7 {offsets = [0, 2, 0, 0], sizes = [2, 12, 12, 16], strides = [1, 1, 1, 1]} : vector<2x16x16x16xbf16> to vector<2x12x12x16xbf16>
    %33 = vector.extract_strided_slice %7 {offsets = [0, 2, 1, 0], sizes = [2, 12, 12, 16], strides = [1, 1, 1, 1]} : vector<2x16x16x16xbf16> to vector<2x12x12x16xbf16>
    %34 = vector.extract_strided_slice %7 {offsets = [0, 2, 2, 0], sizes = [2, 12, 12, 16], strides = [1, 1, 1, 1]} : vector<2x16x16x16xbf16> to vector<2x12x12x16xbf16>
    %35 = vector.extract_strided_slice %7 {offsets = [0, 2, 3, 0], sizes = [2, 12, 12, 16], strides = [1, 1, 1, 1]} : vector<2x16x16x16xbf16> to vector<2x12x12x16xbf16>
    %36 = vector.extract_strided_slice %7 {offsets = [0, 2, 4, 0], sizes = [2, 12, 12, 16], strides = [1, 1, 1, 1]} : vector<2x16x16x16xbf16> to vector<2x12x12x16xbf16>
    %37 = tpu.concatenate %32, %33, %34, %35, %36 in 3 : vector<2x12x12x16xbf16>, vector<2x12x12x16xbf16>, vector<2x12x12x16xbf16>, vector<2x12x12x16xbf16>, vector<2x12x12x16xbf16> -> vector<2x12x12x80xbf16>
    %38 = vector.shape_cast %37 : vector<2x12x12x80xbf16> to vector<288x80xbf16>
    %c2 = arith.constant 2 : index
    %c0_11 = arith.constant 0 : index
    %c0_12 = arith.constant 0 : index
    %39 = vector.load %arg1[%c2, %c0_11, %c0_12] : memref<5x80x128xbf16, #tpu.memory_space<vmem>>, vector<1x80x128xbf16>
    %40 = vector.shape_cast %39 : vector<1x80x128xbf16> to vector<80x128xbf16>
    %cst_13 = arith.constant dense<0.000000e+00> : vector<288x128xf32>
    %41 = tpu.matmul %38, %40, %cst_13 {dimension_numbers = #tpu.dot_dimension_numbers<[1], [0], [0], [1], [0, 0, 1, 1], [], []>} : vector<288x80xbf16>, vector<80x128xbf16>, vector<288x128xf32> -> vector<288x128xf32>
    %42 = arith.addf %31, %41 : vector<288x128xf32>
    %43 = vector.extract_strided_slice %7 {offsets = [0, 3, 0, 0], sizes = [2, 12, 12, 16], strides = [1, 1, 1, 1]} : vector<2x16x16x16xbf16> to vector<2x12x12x16xbf16>
    %44 = vector.extract_strided_slice %7 {offsets = [0, 3, 1, 0], sizes = [2, 12, 12, 16], strides = [1, 1, 1, 1]} : vector<2x16x16x16xbf16> to vector<2x12x12x16xbf16>
    %45 = vector.extract_strided_slice %7 {offsets = [0, 3, 2, 0], sizes = [2, 12, 12, 16], strides = [1, 1, 1, 1]} : vector<2x16x16x16xbf16> to vector<2x12x12x16xbf16>
    %46 = vector.extract_strided_slice %7 {offsets = [0, 3, 3, 0], sizes = [2, 12, 12, 16], strides = [1, 1, 1, 1]} : vector<2x16x16x16xbf16> to vector<2x12x12x16xbf16>
    %47 = vector.extract_strided_slice %7 {offsets = [0, 3, 4, 0], sizes = [2, 12, 12, 16], strides = [1, 1, 1, 1]} : vector<2x16x16x16xbf16> to vector<2x12x12x16xbf16>
    %48 = tpu.concatenate %43, %44, %45, %46, %47 in 3 : vector<2x12x12x16xbf16>, vector<2x12x12x16xbf16>, vector<2x12x12x16xbf16>, vector<2x12x12x16xbf16>, vector<2x12x12x16xbf16> -> vector<2x12x12x80xbf16>
    %49 = vector.shape_cast %48 : vector<2x12x12x80xbf16> to vector<288x80xbf16>
    %c3 = arith.constant 3 : index
    %c0_14 = arith.constant 0 : index
    %c0_15 = arith.constant 0 : index
    %50 = vector.load %arg1[%c3, %c0_14, %c0_15] : memref<5x80x128xbf16, #tpu.memory_space<vmem>>, vector<1x80x128xbf16>
    %51 = vector.shape_cast %50 : vector<1x80x128xbf16> to vector<80x128xbf16>
    %cst_16 = arith.constant dense<0.000000e+00> : vector<288x128xf32>
    %52 = tpu.matmul %49, %51, %cst_16 {dimension_numbers = #tpu.dot_dimension_numbers<[1], [0], [0], [1], [0, 0, 1, 1], [], []>} : vector<288x80xbf16>, vector<80x128xbf16>, vector<288x128xf32> -> vector<288x128xf32>
    %53 = arith.addf %42, %52 : vector<288x128xf32>
    %54 = vector.extract_strided_slice %7 {offsets = [0, 4, 0, 0], sizes = [2, 12, 12, 16], strides = [1, 1, 1, 1]} : vector<2x16x16x16xbf16> to vector<2x12x12x16xbf16>
    %55 = vector.extract_strided_slice %7 {offsets = [0, 4, 1, 0], sizes = [2, 12, 12, 16], strides = [1, 1, 1, 1]} : vector<2x16x16x16xbf16> to vector<2x12x12x16xbf16>
    %56 = vector.extract_strided_slice %7 {offsets = [0, 4, 2, 0], sizes = [2, 12, 12, 16], strides = [1, 1, 1, 1]} : vector<2x16x16x16xbf16> to vector<2x12x12x16xbf16>
    %57 = vector.extract_strided_slice %7 {offsets = [0, 4, 3, 0], sizes = [2, 12, 12, 16], strides = [1, 1, 1, 1]} : vector<2x16x16x16xbf16> to vector<2x12x12x16xbf16>
    %58 = vector.extract_strided_slice %7 {offsets = [0, 4, 4, 0], sizes = [2, 12, 12, 16], strides = [1, 1, 1, 1]} : vector<2x16x16x16xbf16> to vector<2x12x12x16xbf16>
    %59 = tpu.concatenate %54, %55, %56, %57, %58 in 3 : vector<2x12x12x16xbf16>, vector<2x12x12x16xbf16>, vector<2x12x12x16xbf16>, vector<2x12x12x16xbf16>, vector<2x12x12x16xbf16> -> vector<2x12x12x80xbf16>
    %60 = vector.shape_cast %59 : vector<2x12x12x80xbf16> to vector<288x80xbf16>
    %c4 = arith.constant 4 : index
    %c0_17 = arith.constant 0 : index
    %c0_18 = arith.constant 0 : index
    %61 = vector.load %arg1[%c4, %c0_17, %c0_18] : memref<5x80x128xbf16, #tpu.memory_space<vmem>>, vector<1x80x128xbf16>
    %62 = vector.shape_cast %61 : vector<1x80x128xbf16> to vector<80x128xbf16>
    %cst_19 = arith.constant dense<0.000000e+00> : vector<288x128xf32>
    %63 = tpu.matmul %60, %62, %cst_19 {dimension_numbers = #tpu.dot_dimension_numbers<[1], [0], [0], [1], [0, 0, 1, 1], [], []>} : vector<288x80xbf16>, vector<80x128xbf16>, vector<288x128xf32> -> vector<288x128xf32>
    %64 = arith.addf %53, %63 : vector<288x128xf32>
    %65 = vector.broadcast %8 : vector<1x128xf32> to vector<288x128xf32>
    %66 = arith.addf %64, %65 : vector<288x128xf32>
    %cst_20 = arith.constant 0.000000e+00 : f32
    %67 = vector.broadcast %cst_20 : f32 to vector<288x128xf32>
    %68 = arith.maximumf %66, %67 : vector<288x128xf32>
    %cst_21 = arith.constant dense<0.000000e+00> : vector<128xf32>
    %69 = vector.multi_reduction <add>, %68, %cst_21 [0] : vector<288x128xf32> to vector<128xf32>
    %70 = vector.shape_cast %69 : vector<128xf32> to vector<1x128xf32>
    %cst_22 = arith.constant 0.00347222225 : f32
    %71 = vector.broadcast %cst_22 : f32 to vector<1x128xf32>
    %72 = arith.mulf %70, %71 : vector<1x128xf32>
    %73 = arith.mulf %68, %68 : vector<288x128xf32>
    %cst_23 = arith.constant dense<0.000000e+00> : vector<128xf32>
    %74 = vector.multi_reduction <add>, %73, %cst_23 [0] : vector<288x128xf32> to vector<128xf32>
    %75 = vector.shape_cast %74 : vector<128xf32> to vector<1x128xf32>
    %cst_24 = arith.constant 0.00347222225 : f32
    %76 = vector.broadcast %cst_24 : f32 to vector<1x128xf32>
    %77 = arith.mulf %75, %76 : vector<1x128xf32>
    %78 = arith.mulf %72, %72 : vector<1x128xf32>
    %79 = arith.subf %77, %78 : vector<1x128xf32>
    %cst_25 = arith.constant 0.000000e+00 : f32
    %80 = vector.broadcast %cst_25 : f32 to vector<1x128xf32>
    %81 = arith.maximumf %79, %80 : vector<1x128xf32>
    %82 = vector.broadcast %72 : vector<1x128xf32> to vector<288x128xf32>
    %83 = arith.subf %68, %82 : vector<288x128xf32>
    %cst_26 = arith.constant 9.99999974E-6 : f32
    %84 = vector.broadcast %cst_26 : f32 to vector<1x128xf32>
    %85 = arith.addf %81, %84 : vector<1x128xf32>
    %86 = math.rsqrt %85 : vector<1x128xf32>
    %87 = vector.broadcast %86 : vector<1x128xf32> to vector<288x128xf32>
    %88 = arith.mulf %83, %87 : vector<288x128xf32>
    %89 = vector.broadcast %9 : vector<1x128xf32> to vector<288x128xf32>
    %90 = arith.mulf %88, %89 : vector<288x128xf32>
    %91 = vector.broadcast %10 : vector<1x128xf32> to vector<288x128xf32>
    %92 = arith.addf %90, %91 : vector<288x128xf32>
    %93 = vector.shape_cast %92 : vector<288x128xf32> to vector<2x12x12x128xf32>
    %c0_i32_27 = arith.constant 0 : i32
    %94 = tpu.memref_slice %arg10[%c0_i32_27] : memref<3x!tpu.dma_semaphore, #tpu.memory_space<semaphore_mem>> -> memref<1x!tpu.dma_semaphore, #tpu.memory_space<semaphore_mem>>
    %95 = tpu.memref_squeeze %94 : memref<1x!tpu.dma_semaphore, #tpu.memory_space<semaphore_mem>> -> memref<!tpu.dma_semaphore, #tpu.memory_space<semaphore_mem>>
    tpu.wait_dma2 semaphore(%95 : memref<!tpu.dma_semaphore, #tpu.memory_space<semaphore_mem>>) src(%arg3 : memref<5x640x128xbf16, #tpu.memory_space<any>>) dst(%arg7 : memref<5x640x128xbf16, #tpu.memory_space<vmem>>)
    %96 = arith.truncf %93 : vector<2x12x12x128xf32> to vector<2x12x12x128xbf16>
    %97 = vector.extract_strided_slice %6 {offsets = [3, 0], sizes = [1, 128], strides = [1, 1]} : vector<10x128xf32> to vector<1x128xf32>
    %98 = vector.extract_strided_slice %6 {offsets = [4, 0], sizes = [1, 128], strides = [1, 1]} : vector<10x128xf32> to vector<1x128xf32>
    %99 = vector.extract_strided_slice %6 {offsets = [5, 0], sizes = [1, 128], strides = [1, 1]} : vector<10x128xf32> to vector<1x128xf32>
    %100 = vector.extract_strided_slice %96 {offsets = [0, 0, 0, 0], sizes = [2, 8, 8, 128], strides = [1, 1, 1, 1]} : vector<2x12x12x128xbf16> to vector<2x8x8x128xbf16>
    %101 = vector.extract_strided_slice %96 {offsets = [0, 0, 1, 0], sizes = [2, 8, 8, 128], strides = [1, 1, 1, 1]} : vector<2x12x12x128xbf16> to vector<2x8x8x128xbf16>
    %102 = vector.extract_strided_slice %96 {offsets = [0, 0, 2, 0], sizes = [2, 8, 8, 128], strides = [1, 1, 1, 1]} : vector<2x12x12x128xbf16> to vector<2x8x8x128xbf16>
    %103 = vector.extract_strided_slice %96 {offsets = [0, 0, 3, 0], sizes = [2, 8, 8, 128], strides = [1, 1, 1, 1]} : vector<2x12x12x128xbf16> to vector<2x8x8x128xbf16>
    %104 = vector.extract_strided_slice %96 {offsets = [0, 0, 4, 0], sizes = [2, 8, 8, 128], strides = [1, 1, 1, 1]} : vector<2x12x12x128xbf16> to vector<2x8x8x128xbf16>
    %105 = tpu.concatenate %100, %101, %102, %103, %104 in 3 : vector<2x8x8x128xbf16>, vector<2x8x8x128xbf16>, vector<2x8x8x128xbf16>, vector<2x8x8x128xbf16>, vector<2x8x8x128xbf16> -> vector<2x8x8x640xbf16>
    %106 = vector.shape_cast %105 : vector<2x8x8x640xbf16> to vector<128x640xbf16>
    %c0_28 = arith.constant 0 : index
    %c0_29 = arith.constant 0 : index
    %c0_30 = arith.constant 0 : index
    %107 = vector.load %arg7[%c0_28, %c0_29, %c0_30] : memref<5x640x128xbf16, #tpu.memory_space<vmem>>, vector<1x640x128xbf16>
    %108 = vector.shape_cast %107 : vector<1x640x128xbf16> to vector<640x128xbf16>
    %cst_31 = arith.constant dense<0.000000e+00> : vector<128x128xf32>
    %109 = tpu.matmul %106, %108, %cst_31 {dimension_numbers = #tpu.dot_dimension_numbers<[1], [0], [0], [1], [0, 0, 1, 1], [], []>} : vector<128x640xbf16>, vector<640x128xbf16>, vector<128x128xf32> -> vector<128x128xf32>
    %110 = vector.extract_strided_slice %96 {offsets = [0, 1, 0, 0], sizes = [2, 8, 8, 128], strides = [1, 1, 1, 1]} : vector<2x12x12x128xbf16> to vector<2x8x8x128xbf16>
    %111 = vector.extract_strided_slice %96 {offsets = [0, 1, 1, 0], sizes = [2, 8, 8, 128], strides = [1, 1, 1, 1]} : vector<2x12x12x128xbf16> to vector<2x8x8x128xbf16>
    %112 = vector.extract_strided_slice %96 {offsets = [0, 1, 2, 0], sizes = [2, 8, 8, 128], strides = [1, 1, 1, 1]} : vector<2x12x12x128xbf16> to vector<2x8x8x128xbf16>
    %113 = vector.extract_strided_slice %96 {offsets = [0, 1, 3, 0], sizes = [2, 8, 8, 128], strides = [1, 1, 1, 1]} : vector<2x12x12x128xbf16> to vector<2x8x8x128xbf16>
    %114 = vector.extract_strided_slice %96 {offsets = [0, 1, 4, 0], sizes = [2, 8, 8, 128], strides = [1, 1, 1, 1]} : vector<2x12x12x128xbf16> to vector<2x8x8x128xbf16>
    %115 = tpu.concatenate %110, %111, %112, %113, %114 in 3 : vector<2x8x8x128xbf16>, vector<2x8x8x128xbf16>, vector<2x8x8x128xbf16>, vector<2x8x8x128xbf16>, vector<2x8x8x128xbf16> -> vector<2x8x8x640xbf16>
    %116 = vector.shape_cast %115 : vector<2x8x8x640xbf16> to vector<128x640xbf16>
    %c1_32 = arith.constant 1 : index
    %c0_33 = arith.constant 0 : index
    %c0_34 = arith.constant 0 : index
    %117 = vector.load %arg7[%c1_32, %c0_33, %c0_34] : memref<5x640x128xbf16, #tpu.memory_space<vmem>>, vector<1x640x128xbf16>
    %118 = vector.shape_cast %117 : vector<1x640x128xbf16> to vector<640x128xbf16>
    %cst_35 = arith.constant dense<0.000000e+00> : vector<128x128xf32>
    %119 = tpu.matmul %116, %118, %cst_35 {dimension_numbers = #tpu.dot_dimension_numbers<[1], [0], [0], [1], [0, 0, 1, 1], [], []>} : vector<128x640xbf16>, vector<640x128xbf16>, vector<128x128xf32> -> vector<128x128xf32>
    %120 = arith.addf %109, %119 : vector<128x128xf32>
    %121 = vector.extract_strided_slice %96 {offsets = [0, 2, 0, 0], sizes = [2, 8, 8, 128], strides = [1, 1, 1, 1]} : vector<2x12x12x128xbf16> to vector<2x8x8x128xbf16>
    %122 = vector.extract_strided_slice %96 {offsets = [0, 2, 1, 0], sizes = [2, 8, 8, 128], strides = [1, 1, 1, 1]} : vector<2x12x12x128xbf16> to vector<2x8x8x128xbf16>
    %123 = vector.extract_strided_slice %96 {offsets = [0, 2, 2, 0], sizes = [2, 8, 8, 128], strides = [1, 1, 1, 1]} : vector<2x12x12x128xbf16> to vector<2x8x8x128xbf16>
    %124 = vector.extract_strided_slice %96 {offsets = [0, 2, 3, 0], sizes = [2, 8, 8, 128], strides = [1, 1, 1, 1]} : vector<2x12x12x128xbf16> to vector<2x8x8x128xbf16>
    %125 = vector.extract_strided_slice %96 {offsets = [0, 2, 4, 0], sizes = [2, 8, 8, 128], strides = [1, 1, 1, 1]} : vector<2x12x12x128xbf16> to vector<2x8x8x128xbf16>
    %126 = tpu.concatenate %121, %122, %123, %124, %125 in 3 : vector<2x8x8x128xbf16>, vector<2x8x8x128xbf16>, vector<2x8x8x128xbf16>, vector<2x8x8x128xbf16>, vector<2x8x8x128xbf16> -> vector<2x8x8x640xbf16>
    %127 = vector.shape_cast %126 : vector<2x8x8x640xbf16> to vector<128x640xbf16>
    %c2_36 = arith.constant 2 : index
    %c0_37 = arith.constant 0 : index
    %c0_38 = arith.constant 0 : index
    %128 = vector.load %arg7[%c2_36, %c0_37, %c0_38] : memref<5x640x128xbf16, #tpu.memory_space<vmem>>, vector<1x640x128xbf16>
    %129 = vector.shape_cast %128 : vector<1x640x128xbf16> to vector<640x128xbf16>
    %cst_39 = arith.constant dense<0.000000e+00> : vector<128x128xf32>
    %130 = tpu.matmul %127, %129, %cst_39 {dimension_numbers = #tpu.dot_dimension_numbers<[1], [0], [0], [1], [0, 0, 1, 1], [], []>} : vector<128x640xbf16>, vector<640x128xbf16>, vector<128x128xf32> -> vector<128x128xf32>
    %131 = arith.addf %120, %130 : vector<128x128xf32>
    %132 = vector.extract_strided_slice %96 {offsets = [0, 3, 0, 0], sizes = [2, 8, 8, 128], strides = [1, 1, 1, 1]} : vector<2x12x12x128xbf16> to vector<2x8x8x128xbf16>
    %133 = vector.extract_strided_slice %96 {offsets = [0, 3, 1, 0], sizes = [2, 8, 8, 128], strides = [1, 1, 1, 1]} : vector<2x12x12x128xbf16> to vector<2x8x8x128xbf16>
    %134 = vector.extract_strided_slice %96 {offsets = [0, 3, 2, 0], sizes = [2, 8, 8, 128], strides = [1, 1, 1, 1]} : vector<2x12x12x128xbf16> to vector<2x8x8x128xbf16>
    %135 = vector.extract_strided_slice %96 {offsets = [0, 3, 3, 0], sizes = [2, 8, 8, 128], strides = [1, 1, 1, 1]} : vector<2x12x12x128xbf16> to vector<2x8x8x128xbf16>
    %136 = vector.extract_strided_slice %96 {offsets = [0, 3, 4, 0], sizes = [2, 8, 8, 128], strides = [1, 1, 1, 1]} : vector<2x12x12x128xbf16> to vector<2x8x8x128xbf16>
    %137 = tpu.concatenate %132, %133, %134, %135, %136 in 3 : vector<2x8x8x128xbf16>, vector<2x8x8x128xbf16>, vector<2x8x8x128xbf16>, vector<2x8x8x128xbf16>, vector<2x8x8x128xbf16> -> vector<2x8x8x640xbf16>
    %138 = vector.shape_cast %137 : vector<2x8x8x640xbf16> to vector<128x640xbf16>
    %c3_40 = arith.constant 3 : index
    %c0_41 = arith.constant 0 : index
    %c0_42 = arith.constant 0 : index
    %139 = vector.load %arg7[%c3_40, %c0_41, %c0_42] : memref<5x640x128xbf16, #tpu.memory_space<vmem>>, vector<1x640x128xbf16>
    %140 = vector.shape_cast %139 : vector<1x640x128xbf16> to vector<640x128xbf16>
    %cst_43 = arith.constant dense<0.000000e+00> : vector<128x128xf32>
    %141 = tpu.matmul %138, %140, %cst_43 {dimension_numbers = #tpu.dot_dimension_numbers<[1], [0], [0], [1], [0, 0, 1, 1], [], []>} : vector<128x640xbf16>, vector<640x128xbf16>, vector<128x128xf32> -> vector<128x128xf32>
    %142 = arith.addf %131, %141 : vector<128x128xf32>
    %143 = vector.extract_strided_slice %96 {offsets = [0, 4, 0, 0], sizes = [2, 8, 8, 128], strides = [1, 1, 1, 1]} : vector<2x12x12x128xbf16> to vector<2x8x8x128xbf16>
    %144 = vector.extract_strided_slice %96 {offsets = [0, 4, 1, 0], sizes = [2, 8, 8, 128], strides = [1, 1, 1, 1]} : vector<2x12x12x128xbf16> to vector<2x8x8x128xbf16>
    %145 = vector.extract_strided_slice %96 {offsets = [0, 4, 2, 0], sizes = [2, 8, 8, 128], strides = [1, 1, 1, 1]} : vector<2x12x12x128xbf16> to vector<2x8x8x128xbf16>
    %146 = vector.extract_strided_slice %96 {offsets = [0, 4, 3, 0], sizes = [2, 8, 8, 128], strides = [1, 1, 1, 1]} : vector<2x12x12x128xbf16> to vector<2x8x8x128xbf16>
    %147 = vector.extract_strided_slice %96 {offsets = [0, 4, 4, 0], sizes = [2, 8, 8, 128], strides = [1, 1, 1, 1]} : vector<2x12x12x128xbf16> to vector<2x8x8x128xbf16>
    %148 = tpu.concatenate %143, %144, %145, %146, %147 in 3 : vector<2x8x8x128xbf16>, vector<2x8x8x128xbf16>, vector<2x8x8x128xbf16>, vector<2x8x8x128xbf16>, vector<2x8x8x128xbf16> -> vector<2x8x8x640xbf16>
    %149 = vector.shape_cast %148 : vector<2x8x8x640xbf16> to vector<128x640xbf16>
    %c4_44 = arith.constant 4 : index
    %c0_45 = arith.constant 0 : index
    %c0_46 = arith.constant 0 : index
    %150 = vector.load %arg7[%c4_44, %c0_45, %c0_46] : memref<5x640x128xbf16, #tpu.memory_space<vmem>>, vector<1x640x128xbf16>
    %151 = vector.shape_cast %150 : vector<1x640x128xbf16> to vector<640x128xbf16>
    %cst_47 = arith.constant dense<0.000000e+00> : vector<128x128xf32>
    %152 = tpu.matmul %149, %151, %cst_47 {dimension_numbers = #tpu.dot_dimension_numbers<[1], [0], [0], [1], [0, 0, 1, 1], [], []>} : vector<128x640xbf16>, vector<640x128xbf16>, vector<128x128xf32> -> vector<128x128xf32>
    %153 = arith.addf %142, %152 : vector<128x128xf32>
    %154 = vector.broadcast %97 : vector<1x128xf32> to vector<128x128xf32>
    %155 = arith.addf %153, %154 : vector<128x128xf32>
    %cst_48 = arith.constant 0.000000e+00 : f32
    %156 = vector.broadcast %cst_48 : f32 to vector<128x128xf32>
    %157 = arith.maximumf %155, %156 : vector<128x128xf32>
    %cst_49 = arith.constant dense<0.000000e+00> : vector<128xf32>
    %158 = vector.multi_reduction <add>, %157, %cst_49 [0] : vector<128x128xf32> to vector<128xf32>
    %159 = vector.shape_cast %158 : vector<128xf32> to vector<1x128xf32>
    %cst_50 = arith.constant 7.812500e-03 : f32
    %160 = vector.broadcast %cst_50 : f32 to vector<1x128xf32>
    %161 = arith.mulf %159, %160 : vector<1x128xf32>
    %162 = arith.mulf %157, %157 : vector<128x128xf32>
    %cst_51 = arith.constant dense<0.000000e+00> : vector<128xf32>
    %163 = vector.multi_reduction <add>, %162, %cst_51 [0] : vector<128x128xf32> to vector<128xf32>
    %164 = vector.shape_cast %163 : vector<128xf32> to vector<1x128xf32>
    %cst_52 = arith.constant 7.812500e-03 : f32
    %165 = vector.broadcast %cst_52 : f32 to vector<1x128xf32>
    %166 = arith.mulf %164, %165 : vector<1x128xf32>
    %167 = arith.mulf %161, %161 : vector<1x128xf32>
    %168 = arith.subf %166, %167 : vector<1x128xf32>
    %cst_53 = arith.constant 0.000000e+00 : f32
    %169 = vector.broadcast %cst_53 : f32 to vector<1x128xf32>
    %170 = arith.maximumf %168, %169 : vector<1x128xf32>
    %171 = vector.broadcast %161 : vector<1x128xf32> to vector<128x128xf32>
    %172 = arith.subf %157, %171 : vector<128x128xf32>
    %cst_54 = arith.constant 9.99999974E-6 : f32
    %173 = vector.broadcast %cst_54 : f32 to vector<1x128xf32>
    %174 = arith.addf %170, %173 : vector<1x128xf32>
    %175 = math.rsqrt %174 : vector<1x128xf32>
    %176 = vector.broadcast %175 : vector<1x128xf32> to vector<128x128xf32>
    %177 = arith.mulf %172, %176 : vector<128x128xf32>
    %178 = vector.broadcast %98 : vector<1x128xf32> to vector<128x128xf32>
    %179 = arith.mulf %177, %178 : vector<128x128xf32>
    %180 = vector.broadcast %99 : vector<1x128xf32> to vector<128x128xf32>
    %181 = arith.addf %179, %180 : vector<128x128xf32>
    %182 = vector.shape_cast %181 : vector<128x128xf32> to vector<2x8x8x128xf32>
    %c1_i32_55 = arith.constant 1 : i32
    %183 = tpu.memref_slice %arg10[%c1_i32_55] : memref<3x!tpu.dma_semaphore, #tpu.memory_space<semaphore_mem>> -> memref<1x!tpu.dma_semaphore, #tpu.memory_space<semaphore_mem>>
    %184 = tpu.memref_squeeze %183 : memref<1x!tpu.dma_semaphore, #tpu.memory_space<semaphore_mem>> -> memref<!tpu.dma_semaphore, #tpu.memory_space<semaphore_mem>>
    tpu.wait_dma2 semaphore(%184 : memref<!tpu.dma_semaphore, #tpu.memory_space<semaphore_mem>>) src(%arg4 : memref<5x640x128xbf16, #tpu.memory_space<any>>) dst(%arg8 : memref<5x640x128xbf16, #tpu.memory_space<vmem>>)
    %185 = arith.truncf %182 : vector<2x8x8x128xf32> to vector<2x8x8x128xbf16>
    %186 = vector.extract_strided_slice %6 {offsets = [6, 0], sizes = [1, 128], strides = [1, 1]} : vector<10x128xf32> to vector<1x128xf32>
    %187 = vector.extract_strided_slice %6 {offsets = [7, 0], sizes = [1, 128], strides = [1, 1]} : vector<10x128xf32> to vector<1x128xf32>
    %188 = vector.extract_strided_slice %6 {offsets = [8, 0], sizes = [1, 128], strides = [1, 1]} : vector<10x128xf32> to vector<1x128xf32>
    %189 = vector.extract_strided_slice %185 {offsets = [0, 0, 0, 0], sizes = [2, 4, 4, 128], strides = [1, 1, 1, 1]} : vector<2x8x8x128xbf16> to vector<2x4x4x128xbf16>
    %190 = vector.extract_strided_slice %185 {offsets = [0, 0, 1, 0], sizes = [2, 4, 4, 128], strides = [1, 1, 1, 1]} : vector<2x8x8x128xbf16> to vector<2x4x4x128xbf16>
    %191 = vector.extract_strided_slice %185 {offsets = [0, 0, 2, 0], sizes = [2, 4, 4, 128], strides = [1, 1, 1, 1]} : vector<2x8x8x128xbf16> to vector<2x4x4x128xbf16>
    %192 = vector.extract_strided_slice %185 {offsets = [0, 0, 3, 0], sizes = [2, 4, 4, 128], strides = [1, 1, 1, 1]} : vector<2x8x8x128xbf16> to vector<2x4x4x128xbf16>
    %193 = vector.extract_strided_slice %185 {offsets = [0, 0, 4, 0], sizes = [2, 4, 4, 128], strides = [1, 1, 1, 1]} : vector<2x8x8x128xbf16> to vector<2x4x4x128xbf16>
    %194 = tpu.concatenate %189, %190, %191, %192, %193 in 3 : vector<2x4x4x128xbf16>, vector<2x4x4x128xbf16>, vector<2x4x4x128xbf16>, vector<2x4x4x128xbf16>, vector<2x4x4x128xbf16> -> vector<2x4x4x640xbf16>
    %195 = vector.shape_cast %194 : vector<2x4x4x640xbf16> to vector<32x640xbf16>
    %c0_56 = arith.constant 0 : index
    %c0_57 = arith.constant 0 : index
    %c0_58 = arith.constant 0 : index
    %196 = vector.load %arg8[%c0_56, %c0_57, %c0_58] : memref<5x640x128xbf16, #tpu.memory_space<vmem>>, vector<1x640x128xbf16>
    %197 = vector.shape_cast %196 : vector<1x640x128xbf16> to vector<640x128xbf16>
    %cst_59 = arith.constant dense<0.000000e+00> : vector<32x128xf32>
    %198 = tpu.matmul %195, %197, %cst_59 {dimension_numbers = #tpu.dot_dimension_numbers<[1], [0], [0], [1], [0, 0, 1, 1], [], []>} : vector<32x640xbf16>, vector<640x128xbf16>, vector<32x128xf32> -> vector<32x128xf32>
    %199 = vector.extract_strided_slice %185 {offsets = [0, 1, 0, 0], sizes = [2, 4, 4, 128], strides = [1, 1, 1, 1]} : vector<2x8x8x128xbf16> to vector<2x4x4x128xbf16>
    %200 = vector.extract_strided_slice %185 {offsets = [0, 1, 1, 0], sizes = [2, 4, 4, 128], strides = [1, 1, 1, 1]} : vector<2x8x8x128xbf16> to vector<2x4x4x128xbf16>
    %201 = vector.extract_strided_slice %185 {offsets = [0, 1, 2, 0], sizes = [2, 4, 4, 128], strides = [1, 1, 1, 1]} : vector<2x8x8x128xbf16> to vector<2x4x4x128xbf16>
    %202 = vector.extract_strided_slice %185 {offsets = [0, 1, 3, 0], sizes = [2, 4, 4, 128], strides = [1, 1, 1, 1]} : vector<2x8x8x128xbf16> to vector<2x4x4x128xbf16>
    %203 = vector.extract_strided_slice %185 {offsets = [0, 1, 4, 0], sizes = [2, 4, 4, 128], strides = [1, 1, 1, 1]} : vector<2x8x8x128xbf16> to vector<2x4x4x128xbf16>
    %204 = tpu.concatenate %199, %200, %201, %202, %203 in 3 : vector<2x4x4x128xbf16>, vector<2x4x4x128xbf16>, vector<2x4x4x128xbf16>, vector<2x4x4x128xbf16>, vector<2x4x4x128xbf16> -> vector<2x4x4x640xbf16>
    %205 = vector.shape_cast %204 : vector<2x4x4x640xbf16> to vector<32x640xbf16>
    %c1_60 = arith.constant 1 : index
    %c0_61 = arith.constant 0 : index
    %c0_62 = arith.constant 0 : index
    %206 = vector.load %arg8[%c1_60, %c0_61, %c0_62] : memref<5x640x128xbf16, #tpu.memory_space<vmem>>, vector<1x640x128xbf16>
    %207 = vector.shape_cast %206 : vector<1x640x128xbf16> to vector<640x128xbf16>
    %cst_63 = arith.constant dense<0.000000e+00> : vector<32x128xf32>
    %208 = tpu.matmul %205, %207, %cst_63 {dimension_numbers = #tpu.dot_dimension_numbers<[1], [0], [0], [1], [0, 0, 1, 1], [], []>} : vector<32x640xbf16>, vector<640x128xbf16>, vector<32x128xf32> -> vector<32x128xf32>
    %209 = arith.addf %198, %208 : vector<32x128xf32>
    %210 = vector.extract_strided_slice %185 {offsets = [0, 2, 0, 0], sizes = [2, 4, 4, 128], strides = [1, 1, 1, 1]} : vector<2x8x8x128xbf16> to vector<2x4x4x128xbf16>
    %211 = vector.extract_strided_slice %185 {offsets = [0, 2, 1, 0], sizes = [2, 4, 4, 128], strides = [1, 1, 1, 1]} : vector<2x8x8x128xbf16> to vector<2x4x4x128xbf16>
    %212 = vector.extract_strided_slice %185 {offsets = [0, 2, 2, 0], sizes = [2, 4, 4, 128], strides = [1, 1, 1, 1]} : vector<2x8x8x128xbf16> to vector<2x4x4x128xbf16>
    %213 = vector.extract_strided_slice %185 {offsets = [0, 2, 3, 0], sizes = [2, 4, 4, 128], strides = [1, 1, 1, 1]} : vector<2x8x8x128xbf16> to vector<2x4x4x128xbf16>
    %214 = vector.extract_strided_slice %185 {offsets = [0, 2, 4, 0], sizes = [2, 4, 4, 128], strides = [1, 1, 1, 1]} : vector<2x8x8x128xbf16> to vector<2x4x4x128xbf16>
    %215 = tpu.concatenate %210, %211, %212, %213, %214 in 3 : vector<2x4x4x128xbf16>, vector<2x4x4x128xbf16>, vector<2x4x4x128xbf16>, vector<2x4x4x128xbf16>, vector<2x4x4x128xbf16> -> vector<2x4x4x640xbf16>
    %216 = vector.shape_cast %215 : vector<2x4x4x640xbf16> to vector<32x640xbf16>
    %c2_64 = arith.constant 2 : index
    %c0_65 = arith.constant 0 : index
    %c0_66 = arith.constant 0 : index
    %217 = vector.load %arg8[%c2_64, %c0_65, %c0_66] : memref<5x640x128xbf16, #tpu.memory_space<vmem>>, vector<1x640x128xbf16>
    %218 = vector.shape_cast %217 : vector<1x640x128xbf16> to vector<640x128xbf16>
    %cst_67 = arith.constant dense<0.000000e+00> : vector<32x128xf32>
    %219 = tpu.matmul %216, %218, %cst_67 {dimension_numbers = #tpu.dot_dimension_numbers<[1], [0], [0], [1], [0, 0, 1, 1], [], []>} : vector<32x640xbf16>, vector<640x128xbf16>, vector<32x128xf32> -> vector<32x128xf32>
    %220 = arith.addf %209, %219 : vector<32x128xf32>
    %221 = vector.extract_strided_slice %185 {offsets = [0, 3, 0, 0], sizes = [2, 4, 4, 128], strides = [1, 1, 1, 1]} : vector<2x8x8x128xbf16> to vector<2x4x4x128xbf16>
    %222 = vector.extract_strided_slice %185 {offsets = [0, 3, 1, 0], sizes = [2, 4, 4, 128], strides = [1, 1, 1, 1]} : vector<2x8x8x128xbf16> to vector<2x4x4x128xbf16>
    %223 = vector.extract_strided_slice %185 {offsets = [0, 3, 2, 0], sizes = [2, 4, 4, 128], strides = [1, 1, 1, 1]} : vector<2x8x8x128xbf16> to vector<2x4x4x128xbf16>
    %224 = vector.extract_strided_slice %185 {offsets = [0, 3, 3, 0], sizes = [2, 4, 4, 128], strides = [1, 1, 1, 1]} : vector<2x8x8x128xbf16> to vector<2x4x4x128xbf16>
    %225 = vector.extract_strided_slice %185 {offsets = [0, 3, 4, 0], sizes = [2, 4, 4, 128], strides = [1, 1, 1, 1]} : vector<2x8x8x128xbf16> to vector<2x4x4x128xbf16>
    %226 = tpu.concatenate %221, %222, %223, %224, %225 in 3 : vector<2x4x4x128xbf16>, vector<2x4x4x128xbf16>, vector<2x4x4x128xbf16>, vector<2x4x4x128xbf16>, vector<2x4x4x128xbf16> -> vector<2x4x4x640xbf16>
    %227 = vector.shape_cast %226 : vector<2x4x4x640xbf16> to vector<32x640xbf16>
    %c3_68 = arith.constant 3 : index
    %c0_69 = arith.constant 0 : index
    %c0_70 = arith.constant 0 : index
    %228 = vector.load %arg8[%c3_68, %c0_69, %c0_70] : memref<5x640x128xbf16, #tpu.memory_space<vmem>>, vector<1x640x128xbf16>
    %229 = vector.shape_cast %228 : vector<1x640x128xbf16> to vector<640x128xbf16>
    %cst_71 = arith.constant dense<0.000000e+00> : vector<32x128xf32>
    %230 = tpu.matmul %227, %229, %cst_71 {dimension_numbers = #tpu.dot_dimension_numbers<[1], [0], [0], [1], [0, 0, 1, 1], [], []>} : vector<32x640xbf16>, vector<640x128xbf16>, vector<32x128xf32> -> vector<32x128xf32>
    %231 = arith.addf %220, %230 : vector<32x128xf32>
    %232 = vector.extract_strided_slice %185 {offsets = [0, 4, 0, 0], sizes = [2, 4, 4, 128], strides = [1, 1, 1, 1]} : vector<2x8x8x128xbf16> to vector<2x4x4x128xbf16>
    %233 = vector.extract_strided_slice %185 {offsets = [0, 4, 1, 0], sizes = [2, 4, 4, 128], strides = [1, 1, 1, 1]} : vector<2x8x8x128xbf16> to vector<2x4x4x128xbf16>
    %234 = vector.extract_strided_slice %185 {offsets = [0, 4, 2, 0], sizes = [2, 4, 4, 128], strides = [1, 1, 1, 1]} : vector<2x8x8x128xbf16> to vector<2x4x4x128xbf16>
    %235 = vector.extract_strided_slice %185 {offsets = [0, 4, 3, 0], sizes = [2, 4, 4, 128], strides = [1, 1, 1, 1]} : vector<2x8x8x128xbf16> to vector<2x4x4x128xbf16>
    %236 = vector.extract_strided_slice %185 {offsets = [0, 4, 4, 0], sizes = [2, 4, 4, 128], strides = [1, 1, 1, 1]} : vector<2x8x8x128xbf16> to vector<2x4x4x128xbf16>
    %237 = tpu.concatenate %232, %233, %234, %235, %236 in 3 : vector<2x4x4x128xbf16>, vector<2x4x4x128xbf16>, vector<2x4x4x128xbf16>, vector<2x4x4x128xbf16>, vector<2x4x4x128xbf16> -> vector<2x4x4x640xbf16>
    %238 = vector.shape_cast %237 : vector<2x4x4x640xbf16> to vector<32x640xbf16>
    %c4_72 = arith.constant 4 : index
    %c0_73 = arith.constant 0 : index
    %c0_74 = arith.constant 0 : index
    %239 = vector.load %arg8[%c4_72, %c0_73, %c0_74] : memref<5x640x128xbf16, #tpu.memory_space<vmem>>, vector<1x640x128xbf16>
    %240 = vector.shape_cast %239 : vector<1x640x128xbf16> to vector<640x128xbf16>
    %cst_75 = arith.constant dense<0.000000e+00> : vector<32x128xf32>
    %241 = tpu.matmul %238, %240, %cst_75 {dimension_numbers = #tpu.dot_dimension_numbers<[1], [0], [0], [1], [0, 0, 1, 1], [], []>} : vector<32x640xbf16>, vector<640x128xbf16>, vector<32x128xf32> -> vector<32x128xf32>
    %242 = arith.addf %231, %241 : vector<32x128xf32>
    %243 = vector.broadcast %186 : vector<1x128xf32> to vector<32x128xf32>
    %244 = arith.addf %242, %243 : vector<32x128xf32>
    %cst_76 = arith.constant 0.000000e+00 : f32
    %245 = vector.broadcast %cst_76 : f32 to vector<32x128xf32>
    %246 = arith.maximumf %244, %245 : vector<32x128xf32>
    %cst_77 = arith.constant dense<0.000000e+00> : vector<128xf32>
    %247 = vector.multi_reduction <add>, %246, %cst_77 [0] : vector<32x128xf32> to vector<128xf32>
    %248 = vector.shape_cast %247 : vector<128xf32> to vector<1x128xf32>
    %cst_78 = arith.constant 3.125000e-02 : f32
    %249 = vector.broadcast %cst_78 : f32 to vector<1x128xf32>
    %250 = arith.mulf %248, %249 : vector<1x128xf32>
    %251 = arith.mulf %246, %246 : vector<32x128xf32>
    %cst_79 = arith.constant dense<0.000000e+00> : vector<128xf32>
    %252 = vector.multi_reduction <add>, %251, %cst_79 [0] : vector<32x128xf32> to vector<128xf32>
    %253 = vector.shape_cast %252 : vector<128xf32> to vector<1x128xf32>
    %cst_80 = arith.constant 3.125000e-02 : f32
    %254 = vector.broadcast %cst_80 : f32 to vector<1x128xf32>
    %255 = arith.mulf %253, %254 : vector<1x128xf32>
    %256 = arith.mulf %250, %250 : vector<1x128xf32>
    %257 = arith.subf %255, %256 : vector<1x128xf32>
    %cst_81 = arith.constant 0.000000e+00 : f32
    %258 = vector.broadcast %cst_81 : f32 to vector<1x128xf32>
    %259 = arith.maximumf %257, %258 : vector<1x128xf32>
    %260 = vector.broadcast %250 : vector<1x128xf32> to vector<32x128xf32>
    %261 = arith.subf %246, %260 : vector<32x128xf32>
    %cst_82 = arith.constant 9.99999974E-6 : f32
    %262 = vector.broadcast %cst_82 : f32 to vector<1x128xf32>
    %263 = arith.addf %259, %262 : vector<1x128xf32>
    %264 = math.rsqrt %263 : vector<1x128xf32>
    %265 = vector.broadcast %264 : vector<1x128xf32> to vector<32x128xf32>
    %266 = arith.mulf %261, %265 : vector<32x128xf32>
    %267 = vector.broadcast %187 : vector<1x128xf32> to vector<32x128xf32>
    %268 = arith.mulf %266, %267 : vector<32x128xf32>
    %269 = vector.broadcast %188 : vector<1x128xf32> to vector<32x128xf32>
    %270 = arith.addf %268, %269 : vector<32x128xf32>
    %271 = vector.shape_cast %270 : vector<32x128xf32> to vector<2x4x4x128xf32>
    %c2_i32_83 = arith.constant 2 : i32
    %272 = tpu.memref_slice %arg10[%c2_i32_83] : memref<3x!tpu.dma_semaphore, #tpu.memory_space<semaphore_mem>> -> memref<1x!tpu.dma_semaphore, #tpu.memory_space<semaphore_mem>>
    %273 = tpu.memref_squeeze %272 : memref<1x!tpu.dma_semaphore, #tpu.memory_space<semaphore_mem>> -> memref<!tpu.dma_semaphore, #tpu.memory_space<semaphore_mem>>
    tpu.wait_dma2 semaphore(%273 : memref<!tpu.dma_semaphore, #tpu.memory_space<semaphore_mem>>) src(%arg5 : memref<2048x128xbf16, #tpu.memory_space<any>>) dst(%arg9 : memref<2048x128xbf16, #tpu.memory_space<vmem>>)
    %274 = vector.shape_cast %271 : vector<2x4x4x128xf32> to vector<2x2048xf32>
    %275 = arith.truncf %274 : vector<2x2048xf32> to vector<2x2048xbf16>
    %c0_84 = arith.constant 0 : index
    %c0_85 = arith.constant 0 : index
    %276 = vector.load %arg9[%c0_84, %c0_85] : memref<2048x128xbf16, #tpu.memory_space<vmem>>, vector<2048x128xbf16>
    %cst_86 = arith.constant dense<0.000000e+00> : vector<2x128xf32>
    %277 = tpu.matmul %275, %276, %cst_86 {dimension_numbers = #tpu.dot_dimension_numbers<[1], [0], [0], [1], [0, 0, 1, 1], [], []>} : vector<2x2048xbf16>, vector<2048x128xbf16>, vector<2x128xf32> -> vector<2x128xf32>
    %278 = vector.extract_strided_slice %6 {offsets = [9, 0], sizes = [1, 128], strides = [1, 1]} : vector<10x128xf32> to vector<1x128xf32>
    %279 = vector.broadcast %278 : vector<1x128xf32> to vector<2x128xf32>
    %280 = arith.addf %277, %279 : vector<2x128xf32>
    %c0_87 = arith.constant 0 : index
    %c0_88 = arith.constant 0 : index
    %281 = vector.load %arg6[%c0_87, %c0_88] : memref<2x128xf32, #tpu.memory_space<vmem>>, vector<2x128xf32>
    tpu.vector_store %arg6[%c0_87, %c0_88], %280 {strides = array<i32>} : memref<2x128xf32, #tpu.memory_space<vmem>>, vector<2x128xf32>,
    return
  }
}

</mosaic_0001>

<bundles_post_ra>
// kernel: _lambda_.1
= control target key start
LH: loop header
LB: loop body
LE: loop exit
PB: predicated region body
PF: predicated region fallthrough
CT: control target
= control target key end

     0   :  { %s19331_s0 = inlined_call_operand.vmem [shape: bf16[2,16,16,16], index: 0, kind: input, shape index: {}]   ;;  %s19332_s1 = inlined_call_operand.vmem [shape: bf16[5,80,128], index: 1, kind: input, shape index: {}]   ;;  %s19333_s2 = inlined_call_operand.vmem [shape: f32[10,128], index: 2, kind: input, shape index: {}]   ;;  %s19334_s3 = inlined_call_operand.hbm [shape: bf16[5,640,128], index: 3, kind: input, shape index: {}]   ;;  %s19335_s4 = inlined_call_operand.hbm [shape: bf16[5,640,128], index: 4, kind: input, shape index: {}]   ;;  %s19336_s5 = inlined_call_operand.hbm [shape: bf16[2048,128], index: 5, kind: input, shape index: {}]   ;;  %s19337_s6 = inlined_call_operand.hbm [shape: f32[2,128], index: 6, kind: output, shape index: {}]  }
   0x1   :  { %v14621_v0 = vld [vmem:[%s19331_s0 + $0x8] sm:$0xff]  ;;  %v14626_v1 = vld [vmem:[%s19331_s0 + $0x10] sm:$0xff] }
   0x2   :  { %11 = vsyncpa [#allocation7], 0  ;;  %v463_v2 = vrot.slane %v14621_v0, 1  ;;  %v464_v3 = vrot.slane %v14626_v1, 1  ;;  %v261_v4 = vshrl.u32 %v14626_v1, 16  ;;  %v263_v5 = vshll.u32 %v14626_v1, 16 }
   0x3   :  { %v256_v6 = vshll.u32 %v14621_v0, 16  ;;  %s14575_s25 = smov 32   ;;  %v254_v8 = vshrl.u32 %v14621_v0, 16  ;;  %v14639_v9 = vld [vmem:[%s19331_s0 + $0x18] sm:$0xff]  ;;  %v655_v12 = vrot.slane %v14621_v0, 2  ;;  %s14576_s28 = smov 16  }
   0x4   :  { %488 = vrot.lane.b32.xlu0 %v463_v2, %s14575_s25  ;;  %490 = vrot.lane.b32.xlu2 %v464_v3, %s14575_s25  ;;  %v265_v7 = vrot.slane %v263_v5, 1  ;;  %v270_v16 = vshll.u32 %v14639_v9, 16  ;;  %v268_v17 = vshrl.u32 %v14639_v9, 16  ;;  %v540_v18 = vrot.slane %v261_v4, 1  ;;  %s14577_s29 = smov 64   ;;  %v14650_v22 = vld [vmem:[%s19331_s0 + $0x20] sm:$0xff] }
   0x5   :  { %v258_v10 = vrot.slane %v256_v6, 1  ;;  %v537_v14 = vrot.slane %v254_v8, 1  ;;  %v538_v15 = vrot.slane %v256_v6, 2  ;;  %v541_v20 = vrot.slane %v263_v5, 2  ;;  %s14578_s8 = smov 48   ;;  %v14666_v34 = vld [vmem:[%s19331_s0 + $0x38] sm:$0xff] }
   0x6   :  { %v266_v11 = vor.u32 %v265_v7, %v261_v4  ;;  %v272_v21 = vrot.slane %v270_v16, 1  ;;  %v277_v25 = vshll.u32 %v14650_v22, 16  ;;  %v656_v26 = vrot.slane %v14626_v1, 2  ;;  %v14674_v40 = vld [vmem:[%s19331_s0 + $0x30] sm:$0xff]  ;;  %v14693_v57 = vld [vmem:[%s19331_s0 + $0x28] sm:$0xff]  ;;  %s14579_s15 = smov [#allocation2]  }
   0x7   :  { %v259_v13 = vor.u32 %v258_v10, %v254_v8  ;;  %v539_v19 = vor.u32 %v538_v15, %v537_v14  ;;  %v542_v23 = vor.u32 %v541_v20, %v540_v18  ;;  %v275_v27 = vshrl.u32 %v14650_v22, 16  ;;  %v14701_v61 = vld [vmem:[%s19331_s0 + $0x48] sm:$0xff]  ;;  %v14714_v8 = vld [vmem:[%s19331_s0 + $0x50] sm:$0xff]  ;;  %s28_s16 = sshll.u32 %s14579_s15, 4  ;;  %s40_s19 = sshll.u32 %s19335_s4, 4  ;;  %s29_s16 = int_to_ptr.vmem [resolvable:$true] %s28_s16  ;;  %s41_s19 = int_to_ptr.hbm [resolvable:$true] %s40_s19 }
   0x8   :  { %418 = vrot.lane.b32.xlu1 %v266_v11, %s14576_s28  ;;  %v273_v24 = vor.u32 %v272_v21, %v268_v17  ;;  %v279_v28 = vrot.slane %v277_v25, 1  ;;  %v466_v30 = vrot.slane %v14650_v22, 1  ;;  %v465_v31 = vrot.slane %v14639_v9, 1  ;;  %s14580_s20 = smov [#allocation3]   ;;  %s54_s24 = sshll.u32 %s19336_s5, 4  ;;  %s55_s24 = int_to_ptr.hbm [resolvable:$true] %s54_s24 }
   0x9   :  { %v543_v32 = vrot.slane %v268_v17, 1  ;;  %v544_v33 = vrot.slane %v270_v16, 2  ;;  %v657_v35 = vrot.slane %v14639_v9, 2  ;;  %v546_v37 = vrot.slane %v275_v27, 1  ;;  %s42_s21 = sshll.u32 %s14580_s20, 4  ;;  %s43_s21 = int_to_ptr.vmem [resolvable:$true] %s42_s21 }
   0xa   :  { %v280_v29 = vor.u32 %v279_v28, %v275_v27  ;;  %v547_v38 = vrot.slane %v277_v25, 2  ;;  %v298_v39 = vshll.u32 %v14666_v34, 16  ;;  %v296_v42 = vshrl.u32 %v14666_v34, 16  ;;  %v14732_v25 = vld [vmem:[%s19331_s0 + $0x40] sm:$0xff] }
   0xb   :  { %v545_v36 = vor.u32 %v544_v33, %v543_v32  ;;  %v291_v44 = vshll.u32 %v14674_v40, 16  ;;  %v658_v45 = vrot.slane %v14650_v22, 2  ;;  %v289_v47 = vshrl.u32 %v14674_v40, 16  ;;  %v14747_v33 = vld [vmem:[%s19331_s0 + $0x58] sm:$0xff] }
   0xc   :  { %416 = vrot.lane.b32.xlu0 %v259_v13, %s14576_s28  ;;  %680 = vrot.lane.b32.xlu2 %v655_v12, %s14577_s29  ;;  %v548_v41 = vor.u32 %v547_v38, %v546_v37  ;;  %v300_v43 = vrot.slane %v298_v39, 1  ;;  %v468_v52 = vrot.slane %v14674_v40, 1  ;;  %v469_v54 = vrot.slane %v14666_v34, 1 }
   0xd   :  { %v293_v48 = vrot.slane %v291_v44, 1  ;;  %v552_v50 = vrot.slane %v289_v47, 1  ;;  %v553_v51 = vrot.slane %v291_v44, 2  ;;  %v555_v55 = vrot.slane %v296_v42, 1 }
   0xe   :  { %v301_v46 = vor.u32 %v300_v43, %v296_v42  ;;  %v556_v56 = vrot.slane %v298_v39, 2  ;;  %v661_v59 = vrot.slane %v14666_v34, 2  ;;  %v284_v60 = vshll.u32 %v14693_v57, 16  ;;  %v13913_v43 = vld [vmem:[%s19332_s1 + $0x48] sm:$0xff] }
   0xf   :  { %v294_v49 = vor.u32 %v293_v48, %v289_v47  ;;  %v554_v53 = vor.u32 %v553_v51, %v552_v50  ;;  %v660_v62 = vrot.slane %v14674_v40, 2  ;;  %v282_v63 = vshrl.u32 %v14693_v57, 16  ;;  %v14764_v48 = vld [vmem:[%s19333_s2 + $0x8] sm:$0x3]  ;;  %1302 = vmatpush.bf16.msra.mxu0 %v13913_v43  ;;  %v13912_v50 = vld [vmem:[%s19332_s1 + $0x40] sm:$0xff] }
  0x10   :  { %608 = vrot.lane.b32.xlu1 %v539_v19, %s14578_s8  ;;  %v557_v58 = vor.u32 %v556_v56, %v555_v55  ;;  %v286_v2 = vrot.slane %v284_v60, 1  ;;  %v312_v3 = vshll.u32 %v14701_v61, 16  ;;  %v467_v5 = vrot.slane %v14693_v57, 1  ;;  %19622 = vst [vmem:[#allocation20_spill] sm:$0xff] %v14764_v48 }
  0x11   :  { %v310_v6 = vshrl.u32 %v14701_v61, 16  ;;  %v549_v11 = vrot.slane %v282_v63, 1  ;;  %v550_v12 = vrot.slane %v284_v60, 2  ;;  %v319_v13 = vshll.u32 %v14714_v8, 16 }
  0x12   :  { %v287_v4 = vor.u32 %v286_v2, %v282_v63  ;;  %v314_v7 = vrot.slane %v312_v3, 1  ;;  %v471_v14 = vrot.slane %v14701_v61, 1  ;;  %v317_v16 = vshrl.u32 %v14714_v8, 16 }
  0x13   :  { %v551_v15 = vor.u32 %v550_v12, %v549_v11  ;;  %v321_v17 = vrot.slane %v319_v13, 1  ;;  %v561_v19 = vrot.slane %v310_v6, 1  ;;  %v562_v20 = vrot.slane %v312_v3, 2  ;;  %1303 = vmatpush.bf16.msra.mxu0 %v13912_v50 }
  0x14   :  { %610 = vrot.lane.b32.xlu0 %v542_v23, %s14578_s8  ;;  %420 = vrot.lane.b32.xlu2 %v273_v24, %s14576_s28  ;;  %v315_v10 = vor.u32 %v314_v7, %v310_v6  ;;  %v659_v23 = vrot.slane %v14693_v57, 2  ;;  %v472_v24 = vrot.slane %v14714_v8, 1  ;;  %v564_v27 = vrot.slane %v317_v16, 1  ;;  %v13909_v6 = vld [vmem:[%s19332_s1 + $0x28] sm:$0xff] }
  0x15   :  { %v322_v18 = vor.u32 %v321_v17, %v317_v16  ;;  %v563_v21 = vor.u32 %v562_v20, %v561_v19  ;;  %v565_v28 = vrot.slane %v319_v13, 2  ;;  %v473_v55 = vrot.slane %v14747_v33, 1  ;;  %v14805_v16 = vld [vmem:[%s19331_s0 + $0x98] sm:$0xff] }
  0x16   :  { %v662_v13 = vrot.slane %v14732_v25, 2  ;;  %vm726_vm0 = vcmask 130048   ;;  %vm824_vm1 = vcmask 392192   ;;  %vm775_vm2 = vcmask 261120  }
  0x17   :  { %vm873_vm3 = vcmask 523264   ;;  %vm1262_vm4 = vcmask 654336  }
  0x18   :  { %682 = vrot.lane.b32.xlu1 %v656_v26, %s14577_s29  ;;  %v14737_v26 = vld [vmem:[%s19331_s0 + $0x60] sm:$0xff] }
  0x19   :  { %v1017_v32 = vshll.u32 %v14737_v26, 16  ;;  %v1015_v38 = vshrl.u32 %v14737_v26, 16 }
  0x1b   :  { %v1019_v39 = vrot.slane %v1017_v32, 1  ;;  %v1039_v60 = vrot.slane %v1017_v32, 2 }
  0x1c   :  { %422 = vrot.lane.b32.xlu0 %v280_v29, %s14576_s28  ;;  %494 = vrot.lane.b32.xlu2 %v466_v30, %s14575_s25  ;;  %v663_v29 = vrot.slane %v14701_v61, 2  ;;  %v664_v30 = vrot.slane %v14714_v8, 2 }
  0x20   :  { %492 = vrot.lane.b32.xlu1 %v465_v31, %s14575_s25  ;;  %v305_v31 = vshll.u32 %v14732_v25, 16 }
  0x22   :  { %v307_v37 = vrot.slane %v305_v31, 1 }
  0x24   :  { %612 = vrot.lane.b32.xlu0 %v545_v36, %s14578_s8  ;;  %684 = vrot.lane.b32.xlu2 %v657_v35, %s14577_s29  ;;  %v566_v35 = vor.u32 %v565_v28, %v564_v27  ;;  %v303_v36 = vshrl.u32 %v14732_v25, 16 }
  0x26   :  { %v308_v44 = vor.u32 %v307_v37, %v303_v36  ;;  %v558_v56 = vrot.slane %v303_v36, 1 }
  0x28   :  { %614 = vrot.lane.b32.xlu1 %v548_v41, %s14578_s8  ;;  %v326_v41 = vshll.u32 %v14747_v33, 16 }
  0x2a   :  { %v328_v47 = vrot.slane %v326_v41, 1 }
  0x2c   :  { %686 = vrot.lane.b32.xlu0 %v658_v45, %s14577_s29  ;;  %428 = vrot.lane.b32.xlu2 %v301_v46, %s14576_s28  ;;  %v1020_v45 = vor.u32 %v1019_v39, %v1015_v38  ;;  %v324_v46 = vshrl.u32 %v14747_v33, 16 }
  0x30   :  { %426 = vrot.lane.b32.xlu1 %v294_v49, %s14576_s28  ;;  %v329_v49 = vor.u32 %v328_v47, %v324_v46 }
  0x34   :  { %498 = vrot.lane.b32.xlu0 %v468_v52, %s14575_s25  ;;  %618 = vrot.lane.b32.xlu2 %v554_v53, %s14578_s8  ;;  %v470_v52 = vrot.slane %v14732_v25, 1  ;;  %v1032_v53 = vrot.slane %v14737_v26, 1 }
  0x38   :  { %500 = vrot.lane.b32.xlu1 %v469_v54, %s14575_s25  ;;  %v13911_v54 = vld [vmem:[%s19332_s1 + $0x38] sm:$0xff] }
  0x39   :  { %1304 = vmatpush.bf16.msra.mxu0 %v13911_v54 }
  0x3c   :  { %620 = vrot.lane.b32.xlu0 %v557_v58, %s14578_s8  ;;  %692 = vrot.lane.b32.xlu2 %v661_v59, %s14577_s29  ;;  %v559_v58 = vrot.slane %v305_v31, 2  ;;  %v1038_v59 = vrot.slane %v1015_v38, 1 }
  0x3e   :  { %v560_v2 = vor.u32 %v559_v58, %v558_v56  ;;  %v1040_v3 = vor.u32 %v1039_v60, %v1038_v59  ;;  %v14863_v60 = vld [vmem:[%s19331_s0 + $0xa8] sm:$0xff] }
  0x40   :  { %690 = vrot.lane.b32.xlu1 %v660_v62, %s14577_s29  ;;  %v13910_v62 = vld [vmem:[%s19332_s1 + $0x30] sm:$0xff] }
  0x41   :  { %1305 = vmatpush.bf16.msra.mxu0 %v13910_v62 }
  0x44   :  { %424 = vrot.lane.b32.xlu0 %v287_v4, %s14576_s28  ;;  %496 = vrot.lane.b32.xlu2 %v467_v5, %s14575_s25  ;;  %v567_v4 = vrot.slane %v324_v46, 1  ;;  %v568_v5 = vrot.slane %v326_v41, 2 }
  0x45   :  { %1306 = vmatpush.bf16.msra.mxu0 %v13909_v6  ;;  %v368_v6 = vshll.u32 %v14863_v60, 16 }
  0x46   :  { %v569_v7 = vor.u32 %v568_v5, %v567_v4 }
  0x48   :  { %432 = vrot.lane.b32.xlu1 %v315_v10, %s14576_s28  ;;  %v14794_v10 = vld [vmem:[%s19331_s0 + $0x90] sm:$0xff] }
  0x49   :  { %v345_v19 = vshrl.u32 %v14794_v10, 16  ;;  %v668_v5 = vrot.slane %v14794_v10, 2 }
  0x4c   :  { %504 = vrot.lane.b32.xlu0 %v471_v14, %s14575_s25  ;;  %616 = vrot.lane.b32.xlu2 %v551_v15, %s14578_s8  ;;  %v1048_v14 = vrot.slane %v14737_v26, 2  ;;  %v347_v15 = vshll.u32 %v14794_v10, 16 }
  0x4e   :  { %v349_v20 = vrot.slane %v347_v15, 1 }
  0x50   :  { %434 = vrot.lane.b32.xlu1 %v322_v18, %s14576_s28  ;;  %v665_v18 = vrot.slane %v14747_v33, 2  ;;  %v350_v28 = vor.u32 %v349_v20, %v345_v19 }
  0x54   :  { %624 = vrot.lane.b32.xlu0 %v563_v21, %s14578_s8  ;;  %688 = vrot.lane.b32.xlu2 %v659_v23, %s14577_s29  ;;  %v354_v21 = vshll.u32 %v14805_v16, 16 }
  0x56   :  { %v356_v31 = vrot.slane %v354_v21, 1  ;;  %v580_v39 = vrot.slane %v354_v21, 2 }
  0x58   :  { %506 = vrot.lane.b32.xlu1 %v472_v24, %s14575_s25 }
  0x5c   :  { %696 = vrot.lane.b32.xlu0 %v663_v29, %s14577_s29  ;;  %698 = vrot.lane.b32.xlu2 %v664_v30, %s14577_s29  ;;  %v476_v29 = vrot.slane %v14794_v10, 1  ;;  %v352_v30 = vshrl.u32 %v14805_v16, 16 }
  0x5e   :  { %v14754_v42 = vpop.permute.xlu2 %490  ;;  %v579_v38 = vrot.slane %v352_v30, 1 }
  0x60   :  { %626 = vrot.lane.b32.xlu1 %v566_v35, %s14578_s8  ;;  %v581_v50 = vor.u32 %v580_v39, %v579_v38 }
  0x64   :  { %430 = vrot.lane.b32.xlu0 %v308_v44, %s14576_s28  ;;  %1028 = vrot.lane.b32.xlu2 %v1020_v45, %s14576_s28  ;;  %v14832_v44 = vld [vmem:[%s19331_s0 + $0x88] sm:$0xff] }
  0x65   :  { %v338_v62 = vshrl.u32 %v14832_v44, 16 }
  0x66   :  { %v681_v51 = vpop.permute.xlu2 %680 }
  0x68   :  { %436 = vrot.lane.b32.xlu1 %v329_v49, %s14576_s28  ;;  %v477_v49 = vrot.slane %v14805_v16, 1 }
  0x6c   :  { %502 = vrot.lane.b32.xlu0 %v470_v52, %s14575_s25  ;;  %1034 = vrot.lane.b32.xlu2 %v1032_v53, %s14575_s25  ;;  %v577_v52 = vrot.slane %v347_v15, 2  ;;  %v669_v15 = vrot.slane %v14805_v16, 2 }
  0x6e   :  { %v14783_v63 = vpop.permute.xlu2 %420 }
  0x70   :  { %508 = vrot.lane.b32.xlu1 %v473_v55, %s14575_s25 }
  0x74   :  { %622 = vrot.lane.b32.xlu0 %v560_v2, %s14578_s8  ;;  %1044 = vrot.lane.b32.xlu2 %v1040_v3, %s14578_s8 }
  0x76   :  { %v489_v11 = vpop.permute.xlu0 %488  ;;  %v14796_v12 = vpop.permute.xlu2 %494 }
  0x78   :  { %628 = vrot.lane.b32.xlu1 %v569_v7, %s14578_s8 }
  0x7a   :  { %v419_v17 = vpop.permute.xlu1 %418 }
  0x7b   :  { %v732_v45 = vsel %vm726_vm0, %v14626_v1, %v419_v17  ;;  %v340_v1 = vshll.u32 %v14832_v44, 16  ;;  %v366_v17 = vshrl.u32 %v14863_v60, 16 }
  0x7c   :  { %694 = vrot.lane.b32.xlu0 %v662_v13, %s14577_s29  ;;  %1050 = vrot.lane.b32.xlu2 %v1048_v14, %s14577_s29  ;;  %v781_v53 = vsel %vm775_vm2, %v732_v45, %v14754_v42  ;;  %v14878_v14 = vld [vmem:[%s19331_s0 + $0xb0] sm:$0xff]  ;;  %v586_v45 = vrot.slane %v368_v6, 2 }
  0x7d   :  { %v342_v2 = vrot.slane %v340_v1, 1  ;;  %v585_v39 = vrot.slane %v366_v17, 1 }
  0x7e   :  { %v417_v23 = vpop.permute.xlu0 %416  ;;  %v14812_v24 = vpop.permute.xlu2 %684 }
  0x7f   :  { %v730_v27 = vsel %vm726_vm0, %v14621_v0, %v417_v23  ;;  %v357_v0 = vor.u32 %v356_v31, %v352_v30  ;;  %v343_v7 = vor.u32 %v342_v2, %v338_v62  ;;  %v479_v31 = vrot.slane %v14863_v60, 1 }
  0x80   :  { %700 = vrot.lane.b32.xlu1 %v665_v18, %s14577_s29  ;;  %v779_v35 = vsel %vm775_vm2, %v730_v27, %v489_v11  ;;  %v370_v18 = vrot.slane %v368_v6, 1  ;;  %v480_v6 = vrot.slane %v14878_v14, 1 }
  0x82   :  { %v609_v32 = vpop.permute.xlu1 %608  ;;  %v371_v30 = vor.u32 %v370_v18, %v366_v17  ;;  %v667_v17 = vrot.slane %v14832_v44, 2 }
  0x83   :  { %v828_v36 = vsel %vm824_vm1, %v779_v35, %v609_v32 }
  0x84   :  { %v14822_v37 = vsel %vm873_vm3, %v828_v36, %v681_v51  ;;  %442 = vrot.lane.b32.xlu0 %v350_v28, %s14576_s28  ;;  %514 = vrot.lane.b32.xlu2 %v476_v29, %s14575_s25  ;;  %v576_v51 = vrot.slane %v345_v19, 1  ;;  %v734_v19 = vsel %vm726_vm0, %v14639_v9, %v14783_v63  ;;  %v375_v28 = vshll.u32 %v14878_v14, 16 }
  0x85   :  { %v19339_v41 = vrot.slane %v14822_v37, 2  ;;  %v19338_v43 = vrot.slane %v14822_v37, 4  ;;  %1087 = vst [vmem:[#allocation1] ss:$4 sm:$0xff] %v14822_v37 }
  0x86   :  { %v611_v46 = vpop.permute.xlu0 %610  ;;  %v14836_v47 = vpop.permute.xlu2 %428  ;;  %v578_v42 = vor.u32 %v577_v52, %v576_v51  ;;  %v377_v36 = vrot.slane %v375_v28, 1 }
  0x87   :  { %1090 = vst [vmem:[#allocation1 + $0x1] ss:$4 sm:$0xff] %v19339_v41  ;;  %v830_v54 = vsel %vm824_vm1, %v781_v53, %v611_v46 }
  0x88   :  { %1093 = vst [vmem:[#allocation1 + $0x2] ss:$4 sm:$0xff] %v19338_v43  ;;  %444 = vrot.lane.b32.xlu1 %v357_v0, %s14576_s28  ;;  %v475_v0 = vrot.slane %v14832_v44, 1 }
  0x8a   :  { %v683_v55 = vpop.permute.xlu1 %682 }
  0x8b   :  { %v14849_v56 = vsel %vm873_vm3, %v830_v54, %v683_v55  ;;  %v574_v54 = vrot.slane %v340_v1, 2  ;;  %v587_v55 = vor.u32 %v586_v45, %v585_v39 }
  0x8c   :  { %v14852_v58 = vrot.slane %v14849_v56, 2  ;;  %v14855_v59 = vrot.slane %v14849_v56, 4  ;;  %1095 = vst [vmem:[#allocation1 + $0x3] ss:$4 sm:$0xff] %v14849_v56  ;;  %516 = vrot.lane.b32.xlu0 %v477_v49, %s14575_s25  ;;  %636 = vrot.lane.b32.xlu2 %v581_v50, %s14578_s8 }
  0x8e   :  { %1098 = vst [vmem:[#allocation1 + $0x20] ss:$4 sm:$0xff] %v14852_v58  ;;  %v423_v3 = vpop.permute.xlu0 %422  ;;  %v14869_v4 = vpop.permute.xlu2 %618 }
  0x8f   :  { %1101 = vst [vmem:[#allocation1 + $0x21] ss:$4 sm:$0xff] %v14855_v59  ;;  %v736_v32 = vsel %vm726_vm0, %v14650_v22, %v423_v3 }
  0x90   :  { %634 = vrot.lane.b32.xlu1 %v578_v42, %s14578_s8  ;;  %v785_v38 = vsel %vm775_vm2, %v736_v32, %v14796_v12  ;;  %v573_v12 = vrot.slane %v338_v62, 1  ;;  %v14940_v62 = vld [vmem:[%s19331_s0 + $0xa0] sm:$0xff] }
  0x92   :  { %v493_v11 = vpop.permute.xlu1 %492  ;;  %v575_v3 = vor.u32 %v574_v54, %v573_v12 }
  0x93   :  { %v1107_v13 = vld.sshfl [vmem:[#allocation1] sm:$0xff pattern:$0x73625140]  ;;  %v783_v20 = vsel %vm775_vm2, %v734_v19, %v493_v11  ;;  %v361_v11 = vshll.u32 %v14940_v62, 16  ;;  %v589_v19 = vrot.slane %v375_v28, 2 }
  0x94   :  { %706 = vrot.lane.b32.xlu0 %v668_v5, %s14577_s29  ;;  %11517 = vmatmul.msk.bf16.vlgmr.msra.gmra.mxu0 %vm1262_vm4, %v1107_v13 }
  0x95   :  { %440 = vrot.lane.b32.xlu2 %v343_v7, %s14576_s28  ;;  %v671_v7 = vrot.slane %v14863_v60, 2 }
  0x96   :  { %v613_v21 = vpop.permute.xlu0 %612  ;;  %v14889_v23 = vpop.permute.xlu2 %692 }
  0x97   :  { %v832_v27 = vsel %vm824_vm1, %v783_v20, %v613_v21  ;;  %v14953_v20 = vld [vmem:[%s19331_s0 + $0xb8] sm:$0xff]  ;;  %v742_v21 = vsel %vm726_vm0, %v14666_v34, %v14836_v47 }
  0x98   :  { %v14895_v29 = vsel %vm873_vm3, %v832_v27, %v14812_v24  ;;  %708 = vrot.lane.b32.xlu1 %v669_v15, %s14577_s29  ;;  %v373_v24 = vshrl.u32 %v14878_v14, 16  ;;  %v359_v27 = vshrl.u32 %v14940_v62, 16  ;;  %v382_v47 = vshll.u32 %v14953_v20, 16 }
  0x99   :  { %v14899_v9 = vrot.slane %v14895_v29, 2  ;;  %v14902_v63 = vrot.slane %v14895_v29, 4  ;;  %1103 = vst [vmem:[#allocation1 + $0x22] ss:$4 sm:$0xff] %v14895_v29 }
  0x9a   :  { %v615_v35 = vpop.permute.xlu1 %614  ;;  %v378_v51 = vor.u32 %v377_v36, %v373_v24  ;;  %v588_v18 = vrot.slane %v373_v24, 1 }
  0x9b   :  { %1106 = vst [vmem:[#allocation1 + $0x23] ss:$4 sm:$0xff] %v14899_v9  ;;  %v834_v22 = vsel %vm824_vm1, %v785_v38, %v615_v35 }
  0x9c   :  { %1110 = vst [vmem:[#allocation1] ss:$4 sm:$0xff] %v14902_v63  ;;  %448 = vrot.lane.b32.xlu0 %v371_v30, %s14576_s28  ;;  %v590_v34 = vor.u32 %v589_v19, %v588_v18 }
  0x9d   :  { %520 = vrot.lane.b32.xlu2 %v479_v31, %s14575_s25 }
  0x9e   :  { %v687_v46 = vpop.permute.xlu0 %686  ;;  %v14917_v49 = vpop.permute.xlu2 %496 }
  0x9f   :  { %v14920_v50 = vsel %vm873_vm3, %v834_v22, %v687_v46  ;;  %v672_v46 = vrot.slane %v14878_v14, 2 }
  0xa0   :  { %v14923_v52 = vrot.slane %v14920_v50, 2  ;;  %v14926_v53 = vrot.slane %v14920_v50, 4  ;;  %1111 = vst [vmem:[#allocation1 + $0x1] ss:$4 sm:$0xff] %v14920_v50  ;;  %512 = vrot.lane.b32.xlu1 %v475_v0, %s14575_s25  ;;  %v14972_v0 = vld [vmem:[%s19331_s0 + $0xc0] sm:$0xff] }
  0xa2   :  { %19623 = vst [vmem:[#allocation21_spill] sm:$0xff] %v14923_v52  ;;  %v1108_v42 = vld.sshfl [vmem:[#allocation1 + $0x20] sm:$0xff pattern:$0x73625140]  ;;  %v427_v2 = vpop.permute.xlu1 %426 }
  0xa3   :  { %19624 = vst [vmem:[#allocation22_spill] sm:$0xff] %v14926_v53  ;;  %v740_v15 = vsel %vm726_vm0, %v14674_v40, %v427_v2  ;;  %v363_v40 = vrot.slane %v361_v11, 1 }
  0xa4   :  { %1115 = vst [vmem:[#allocation1 + $0x3] ss:$4 sm:$0xff] %v14926_v53  ;;  %450 = vrot.lane.b32.xlu0 %v378_v51, %s14576_s28  ;;  %11518 = vmatmul.msk.bf16.gmra.mxu0 %vm1262_vm4, %v1108_v42  ;;  %v380_v51 = vshrl.u32 %v14953_v20, 16 }
  0xa5   :  { %1113 = vst [vmem:[#allocation1 + $0x2] ss:$4 sm:$0xff] %v14923_v52  ;;  %640 = vrot.lane.b32.xlu2 %v587_v55, %s14578_s8  ;;  %v364_v39 = vor.u32 %v363_v40, %v359_v27  ;;  %v389_v55 = vshll.u32 %v14972_v0, 16  ;;  %v583_v40 = vrot.slane %v361_v11, 2 }
  0xa6   :  { %v499_v1 = vpop.permute.xlu0 %498  ;;  %v617_v5 = vpop.permute.xlu2 %616 }
  0xa7   :  { %v789_v28 = vsel %vm775_vm2, %v740_v15, %v499_v1 }
  0xa8   :  { %632 = vrot.lane.b32.xlu1 %v575_v3, %s14578_s8 }
  0xaa   :  { %v501_v13 = vpop.permute.xlu1 %500 }
  0xab   :  { %v791_v30 = vsel %vm775_vm2, %v742_v21, %v501_v13  ;;  %v391_v13 = vrot.slane %v389_v55, 1 }
  0xac   :  { %522 = vrot.lane.b32.xlu0 %v480_v6, %s14575_s25  ;;  %v1122_v24 = vld.sshfl [vmem:[#allocation1] sm:$0xff pattern:$0x73625140] }
  0xad   :  { %712 = vrot.lane.b32.xlu2 %v671_v7, %s14577_s29  ;;  %v387_v7 = vshrl.u32 %v14972_v0, 16 }
  0xae   :  { %v621_v31 = vpop.permute.xlu0 %620  ;;  %v689_v32 = vpop.permute.xlu2 %688 }
  0xaf   :  { %v840_v35 = vsel %vm824_vm1, %v791_v30, %v621_v31 }
  0xb0   :  { %v14965_v36 = vsel %vm873_vm3, %v840_v35, %v14889_v23  ;;  %704 = vrot.lane.b32.xlu1 %v667_v17, %s14577_s29  ;;  %v838_v23 = vsel %vm824_vm1, %v789_v28, %v14869_v4  ;;  %v384_v4 = vrot.slane %v382_v47, 1  ;;  %v478_v17 = vrot.slane %v14940_v62, 1 }
  0xb1   :  { %v14975_v38 = vrot.slane %v14965_v36, 2  ;;  %1128 = vst [vmem:[#allocation1 + $0x2] ss:$4 sm:$0xff] %v14965_v36 }
  0xb2   :  { %v691_v45 = vpop.permute.xlu1 %690  ;;  %v385_v6 = vor.u32 %v384_v4, %v380_v51 }
  0xb3   :  { %19625 = vst [vmem:[#allocation23_spill] sm:$0xff] %v14975_v38  ;;  %v14982_v22 = vsel %vm873_vm3, %v838_v23, %v691_v45 }
  0xb4   :  { %1130 = vst [vmem:[#allocation1 + $0x3] ss:$4 sm:$0xff] %v14975_v38  ;;  %v14987_v12 = vrot.slane %v14982_v22, 2  ;;  %v14990_v54 = vrot.slane %v14982_v22, 4  ;;  %642 = vrot.lane.b32.xlu0 %v590_v34, %s14578_s8  ;;  %11519 = vmatmul.msk.bf16.gmra.mxu0 %vm1262_vm4, %v1122_v24  ;;  %v15026_v24 = vrot.slane %v14965_v36, 4  ;;  %v482_v34 = vrot.slane %v14972_v0, 1 }
  0xb5   :  { %19626 = vst [vmem:[#allocation24_spill] sm:$0xff] %v14982_v22  ;;  %446 = vrot.lane.b32.xlu2 %v364_v39, %s14576_s28  ;;  %v591_v39 = vrot.slane %v380_v51, 1  ;;  %v595_v51 = vrot.slane %v389_v55, 2 }
  0xb6   :  { %19627 = vst [vmem:[#allocation25_spill] sm:$0xff] %v14987_v12  ;;  %v425_v42 = vpop.permute.xlu0 %424  ;;  %v14998_v2 = vpop.permute.xlu2 %698 }
  0xb7   :  { %1121 = vst [vmem:[#allocation1 + $0x23] ss:$4 sm:$0xff] %v14982_v22  ;;  %v738_v3 = vsel %vm726_vm0, %v14693_v57, %v425_v42  ;;  %v594_v42 = vrot.slane %v387_v7, 1 }
  0xb8   :  { %1127 = vst [vmem:[#allocation1 + $0x1] ss:$4 sm:$0xff] %v14990_v54  ;;  %v787_v1 = vsel %vm775_vm2, %v738_v3, %v14917_v49  ;;  %714 = vrot.lane.b32.xlu1 %v672_v46, %s14577_s29  ;;  %v392_v49 = vor.u32 %v391_v13, %v387_v7  ;;  %v15036_v46 = vld [vmem:[%s19331_s0 + $0xd0] sm:$0xff] }
  0xb9   :  { %1125 = vst [vmem:[#allocation1] ss:$4 sm:$0xff] %v14987_v12  ;;  %v836_v15 = vsel %vm824_vm1, %v787_v1, %v617_v5  ;;  %v582_v5 = vrot.slane %v359_v27, 1  ;;  %v592_v27 = vrot.slane %v382_v47, 2  ;;  %v670_v47 = vrot.slane %v14940_v62, 2 }
  0xba   :  { %v15010_v18 = vsel %vm873_vm3, %v836_v15, %v689_v32  ;;  %v433_v19 = vpop.permute.xlu1 %432  ;;  %v481_v32 = vrot.slane %v14953_v20, 1  ;;  %19631 = vst [vmem:[#allocation29_spill] sm:$0xff] %v15026_v24  ;;  %v596_v13 = vor.u32 %v595_v51, %v594_v42  ;;  %v15047_v15 = vld [vmem:[%s19331_s0 + $0xd8] sm:$0xff]  ;;  %v674_v42 = vrot.slane %v14972_v0, 2 }
  0xbb   :  { %19628 = vst [vmem:[#allocation26_spill] sm:$0xff] %v15010_v18  ;;  %v15013_v21 = vrot.slane %v15010_v18, 2  ;;  %v15016_v57 = vrot.slane %v15010_v18, 4  ;;  %v584_v28 = vor.u32 %v583_v40, %v582_v5  ;;  %v593_v4 = vor.u32 %v592_v27, %v591_v39 }
  0xbc   :  { %1116 = vst [vmem:[#allocation1 + $0x20] ss:$4 sm:$0xff] %v15010_v18  ;;  %452 = vrot.lane.b32.xlu0 %v385_v6, %s14576_s28  ;;  %v746_v3 = vsel %vm726_vm0, %v14701_v61, %v433_v19  ;;  %v403_v6 = vshll.u32 %v15036_v46, 16 }
  0xbd   :  { %19629 = vst [vmem:[#allocation27_spill] sm:$0xff] %v15013_v21  ;;  %518 = vrot.lane.b32.xlu2 %v478_v17, %s14575_s25 }
  0xbe   :  { %19630 = vst [vmem:[#allocation28_spill] sm:$0xff] %v15016_v57  ;;  %v505_v30 = vpop.permute.xlu0 %504  ;;  %v1029_v31 = vpop.permute.xlu2 %1028  ;;  %v405_v55 = vrot.slane %v403_v6, 1 }
  0xbf   :  { %1118 = vst [vmem:[#allocation1 + $0x21] ss:$4 sm:$0xff] %v15013_v21  ;;  %v795_v17 = vsel %vm775_vm2, %v746_v3, %v505_v30  ;;  %v1055_v7 = vsel %vm726_vm0, %v14737_v26, %v1029_v31  ;;  %v673_v26 = vrot.slane %v14953_v20, 2  ;;  %v410_v31 = vshll.u32 %v15047_v15, 16 }
  0xc0   :  { %1120 = vst [vmem:[#allocation1 + $0x22] ss:$4 sm:$0xff] %v15016_v57  ;;  %454 = vrot.lane.b32.xlu1 %v392_v49, %s14576_s28  ;;  %v1138_v5 = vld.sshfl [vmem:[#allocation1] sm:$0xff pattern:$0x73625140] }
  0xc2   :  { %v435_v35 = vpop.permute.xlu1 %434 }
  0xc4   :  { %524 = vrot.lane.b32.xlu0 %v481_v32, %s14575_s25  ;;  %v401_v32 = vshrl.u32 %v15036_v46, 16 }
  0xc5   :  { %638 = vrot.lane.b32.xlu2 %v584_v28, %s14578_s8 }
  0xc6   :  { %v625_v45 = vpop.permute.xlu0 %624  ;;  %v1035_v23 = vpop.permute.xlu2 %1034  ;;  %v406_v27 = vor.u32 %v405_v55, %v401_v32 }
  0xc7   :  { %v1123_v11 = vld.sshfl [vmem:[#allocation1 + $0x20] sm:$0xff pattern:$0x73625140]  ;;  %v844_v61 = vsel %vm824_vm1, %v795_v17, %v625_v45  ;;  %v1059_v39 = vsel %vm775_vm2, %v1055_v7, %v1035_v23 }
  0xc8   :  { %1132 = vst [vmem:[#allocation1 + $0x20] ss:$4 sm:$0xff] %v15026_v24  ;;  %11520 = vmatmul.msk.bf16.gmra.mxu0 %vm1262_vm4, %v1123_v11  ;;  %526 = vrot.lane.b32.xlu1 %v482_v34, %s14575_s25  ;;  %v748_v34 = vsel %vm726_vm0, %v14714_v8, %v435_v35  ;;  %v408_v8 = vshrl.u32 %v15047_v15, 16  ;;  %v412_v35 = vrot.slane %v410_v31, 1 }
  0xca   :  { %v507_v1 = vpop.permute.xlu1 %506 }
  0xcb   :  { %v797_v11 = vsel %vm775_vm2, %v748_v34, %v507_v1 }
  0xcc   :  { %644 = vrot.lane.b32.xlu0 %v593_v4, %s14578_s8 }
  0xcd   :  { %710 = vrot.lane.b32.xlu2 %v670_v47, %s14577_s29 }
  0xce   :  { %v697_v19 = vpop.permute.xlu0 %696  ;;  %v1045_v49 = vpop.permute.xlu2 %1044 }
  0xcf   :  { %v15055_v40 = vsel %vm873_vm3, %v844_v61, %v697_v19  ;;  %v1063_v51 = vsel %vm824_vm1, %v1059_v39, %v1045_v49  ;;  %v484_v19 = vrot.slane %v15036_v46, 1  ;;  %v600_v49 = vrot.slane %v401_v32, 1  ;;  %v15110_v39 = vld [vmem:[%s19331_s0 + $0xc8] sm:$0xff] }
  0xd0   :  { %19632 = vst [vmem:[#allocation30_spill] sm:$0xff] %v15055_v40  ;;  %v15059_v28 = vrot.slane %v15055_v40, 2  ;;  %v15062_v30 = vrot.slane %v15055_v40, 4  ;;  %646 = vrot.lane.b32.xlu1 %v596_v13, %s14578_s8  ;;  %v485_v13 = vrot.slane %v15047_v15, 1 }
  0xd1   :  { %1140 = vst [vmem:[#allocation1] ss:$4 sm:$0xff] %v15055_v40 }
  0xd2   :  { %1144 = vst [vmem:[#allocation1 + $0x2] ss:$4 sm:$0xff] %v15062_v30  ;;  %v627_v45 = vpop.permute.xlu1 %626 }
  0xd3   :  { %1142 = vst [vmem:[#allocation1 + $0x1] ss:$4 sm:$0xff] %v15059_v28  ;;  %v846_v4 = vsel %vm824_vm1, %v797_v11, %v627_v45  ;;  %v15116_v11 = vld [vmem:[%s19331_s0] sm:$0xff]  ;;  %v676_v45 = vrot.slane %v15036_v46, 2 }
  0xd4   :  { %v15079_v47 = vsel %vm873_vm3, %v846_v4, %v14998_v2  ;;  %716 = vrot.lane.b32.xlu0 %v673_v26, %s14577_s29  ;;  %v413_v2 = vor.u32 %v412_v35, %v408_v8  ;;  %v249_v35 = vshll.u32 %v15116_v11, 16 }
  0xd5   :  { %19633 = vst [vmem:[#allocation31_spill] sm:$0xff] %v15079_v47  ;;  %458 = vrot.lane.b32.xlu2 %v406_v27, %s14576_s28  ;;  %v604_v27 = vrot.slane %v410_v31, 2 }
  0xd6   :  { %1145 = vst [vmem:[#allocation1 + $0x3] ss:$4 sm:$0xff] %v15079_v47  ;;  %v431_v23 = vpop.permute.xlu0 %430  ;;  %v1051_v3 = vpop.permute.xlu2 %1050  ;;  %v535_v41 = vrot.slane %v249_v35, 2 }
  0xd7   :  { %v15087_v1 = vsel %vm873_vm3, %v1063_v51, %v1051_v3 }
  0xd8   :  { %11521 = vmatmul.msk.bf16.gmra.mxu0 %vm1262_vm4, %v1138_v5  ;;  %19634 = vst [vmem:[#allocation32_spill] sm:$0xff] %v15087_v1  ;;  %718 = vrot.lane.b32.xlu1 %v674_v42, %s14577_s29  ;;  %v15092_v17 = vrot.slane %v15087_v1, 4  ;;  %v15095_v7 = vrot.slane %v15087_v1, 2  ;;  %v601_v5 = vrot.slane %v403_v6, 2  ;;  %v603_v6 = vrot.slane %v408_v8, 1 }
  0xd9   :  { %v396_v42 = vshll.u32 %v15110_v39, 16 }
  0xda   :  { %19635 = vst [vmem:[#allocation33_spill] sm:$0xff] %v15092_v17  ;;  %v437_v55 = vpop.permute.xlu1 %436  ;;  %v602_v32 = vor.u32 %v601_v5, %v600_v49  ;;  %v605_v51 = vor.u32 %v604_v27, %v603_v6  ;;  %v251_v49 = vrot.slane %v249_v35, 1  ;;  %v744_v6 = vsel %vm726_vm0, %v14732_v25, %v431_v23 }
  0xdb   :  { %19636 = vst [vmem:[#allocation34_spill] sm:$0xff] %v15095_v7  ;;  %v398_v3 = vrot.slane %v396_v42, 1  ;;  %v750_v25 = vsel %vm726_vm0, %v14747_v33, %v437_v55  ;;  %v462_v35 = vrot.slane %v15116_v11, 1 }
  0xdc   :  { %460 = vrot.lane.b32.xlu0 %v413_v2, %s14576_s28  ;;  %v394_v2 = vshrl.u32 %v15110_v39, 16 }
  0xdd   :  { %v15097_v61 = vld.sshfl [vmem:[#allocation1] sm:$0xff pattern:$0x73625140]  ;;  %532 = vrot.lane.b32.xlu2 %v485_v13, %s14575_s25  ;;  %v677_v13 = vrot.slane %v15047_v15, 2 }
  0xde   :  { %1157 = vst [vmem:[#allocation1 + $0x1] ss:$4 sm:$0xff] %v15087_v1  ;;  %v503_v26 = vpop.permute.xlu0 %502  ;;  %v15104_v34 = vpop.permute.xlu2 %514  ;;  %v399_v5 = vor.u32 %v398_v3, %v394_v2 }
  0xdf   :  { %1161 = vst [vmem:[#allocation1 + $0x3] ss:$4 sm:$0xff] %v15092_v17 }
  0xe0   :  { %1159 = vst [vmem:[#allocation1 + $0x2] ss:$4 sm:$0xff] %v15095_v7  ;;  %530 = vrot.lane.b32.xlu1 %v484_v19, %s14575_s25  ;;  %v247_v19 = vshrl.u32 %v15116_v11, 16 }
  0xe2   :  { %v509_v4 = vpop.permute.xlu1 %508  ;;  %v252_v27 = vor.u32 %v251_v49, %v247_v19  ;;  %v534_v43 = vrot.slane %v247_v19, 1  ;;  %v483_v49 = vrot.slane %v15110_v39, 1 }
  0xe4   :  { %650 = vrot.lane.b32.xlu0 %v602_v32, %s14578_s8 }
  0xe5   :  { %722 = vrot.lane.b32.xlu2 %v676_v45, %s14577_s29  ;;  %v793_v45 = vsel %vm775_vm2, %v744_v6, %v503_v26 }
  0xe6   :  { %v623_v8 = vpop.permute.xlu0 %622  ;;  %v15123_v31 = vpop.permute.xlu2 %636 }
  0xe8   :  { %652 = vrot.lane.b32.xlu1 %v605_v51, %s14578_s8  ;;  %v842_v51 = vsel %vm824_vm1, %v793_v45, %v623_v8  ;;  %v536_v8 = vor.u32 %v535_v41, %v534_v43  ;;  %v15166_v41 = vld [vmem:[%s19331_s0 + $0xe0] sm:$0xff]  ;;  %v15179_v45 = vrot.slane %v15079_v47, 2 }
  0xea   :  { %v629_v32 = vpop.permute.xlu1 %628  ;;  %19643 = vst [vmem:[#allocation41_spill] sm:$0xff] %v15179_v45 }
  0xec   :  { %724 = vrot.lane.b32.xlu0 %v677_v13, %s14577_s29 }
  0xed   :  { %456 = vrot.lane.b32.xlu2 %v399_v5, %s14576_s28  ;;  %v597_v5 = vrot.slane %v394_v2, 1  ;;  %v15175_v2 = vrot.slane %v15079_v47, 4 }
  0xee   :  { %v695_v48 = vpop.permute.xlu0 %694 }
  0xef   :  { %v15136_v7 = vsel %vm873_vm3, %v842_v51, %v695_v48  ;;  %v15138_v3 = vpop.permute.xlu2 %440  ;;  %v799_v48 = vsel %vm775_vm2, %v750_v25, %v509_v4  ;;  %v598_v4 = vrot.slane %v396_v42, 2  ;;  %19642 = vst [vmem:[#allocation40_spill] sm:$0xff] %v15175_v2  ;;  %v675_v42 = vrot.slane %v15110_v39, 2 }
  0xf0   :  { %19637 = vst [vmem:[#allocation35_spill] sm:$0xff] %v15136_v7  ;;  %v15143_v23 = vrot.slane %v15136_v7, 2  ;;  %v15146_v26 = vrot.slane %v15136_v7, 4  ;;  %414 = vrot.lane.b32.xlu1 %v252_v27, %s14576_s28  ;;  %v848_v13 = vsel %vm824_vm1, %v799_v48, %v629_v32  ;;  %v1024_v27 = vshll.u32 %v15166_v41, 16 }
  0xf1   :  { %1133 = vst [vmem:[#allocation1 + $0x21] ss:$4 sm:$0xff] %v15136_v7  ;;  %v599_v6 = vor.u32 %v598_v4, %v597_v5  ;;  %v654_v48 = vrot.slane %v15116_v11, 2 }
  0xf2   :  { %19638 = vst [vmem:[#allocation36_spill] sm:$0xff] %v15143_v23  ;;  %v701_v33 = vpop.permute.xlu1 %700 }
  0xf3   :  { %19639 = vst [vmem:[#allocation37_spill] sm:$0xff] %v15146_v26  ;;  %v15156_v55 = vsel %vm873_vm3, %v848_v13, %v701_v33  ;;  %v1026_v13 = vrot.slane %v1024_v27, 1 }
  0xf4   :  { %1135 = vst [vmem:[#allocation1 + $0x22] ss:$4 sm:$0xff] %v15143_v23  ;;  %v15159_v19 = vrot.slane %v15156_v55, 4  ;;  %486 = vrot.lane.b32.xlu0 %v462_v35, %s14575_s25  ;;  %v15185_v35 = vrot.slane %v15156_v55, 2 }
  0xf5   :  { %1137 = vst [vmem:[#allocation1 + $0x23] ss:$4 sm:$0xff] %v15146_v26  ;;  %606 = vrot.lane.b32.xlu2 %v536_v8, %s14578_s8  ;;  %v1022_v8 = vshrl.u32 %v15166_v41, 16 }
  0xf6   :  { %19640 = vst [vmem:[#allocation38_spill] sm:$0xff] %v15156_v55  ;;  %v443_v43 = vpop.permute.xlu0 %442 }
  0xf7   :  { %19641 = vst [vmem:[#allocation39_spill] sm:$0xff] %v15159_v19  ;;  %v15170_v32 = vpop.permute.xlu2 %520  ;;  %v1027_v5 = vor.u32 %v1026_v13, %v1022_v8  ;;  %v1041_v4 = vrot.slane %v1022_v8, 1 }
  0xf8   :  { %1156 = vst [vmem:[#allocation1] ss:$4 sm:$0xff] %v15159_v19  ;;  %528 = vrot.lane.b32.xlu1 %v483_v49, %s14575_s25 }
  0xf9   :  { %19644 = vst [vmem:[#allocation42_spill] sm:$0xff] %v15185_v35 }
  0xfa   :  { %v445_v25 = vpop.permute.xlu1 %444 }
  0xfc   :  { %v1139_v51 = vld.sshfl [vmem:[#allocation1 + $0x20] sm:$0xff pattern:$0x73625140]  ;;  %648 = vrot.lane.b32.xlu0 %v599_v6, %s14578_s8  ;;  %v756_v6 = vsel %vm726_vm0, %v14794_v10, %v443_v43 }
  0xfd   :  { %1149 = vst [vmem:[#allocation1 + $0x21] ss:$4 sm:$0xff] %v15175_v2  ;;  %11522 = vmatmul.msk.bf16.gmra.mxu0 %vm1262_vm4, %v1139_v51  ;;  %720 = vrot.lane.b32.xlu2 %v675_v42, %s14577_s29  ;;  %v1042_v51 = vrot.slane %v1024_v27, 2  ;;  %v758_v42 = vsel %vm726_vm0, %v14805_v16, %v445_v25  ;;  %v805_v27 = vsel %vm775_vm2, %v756_v6, %v15104_v34  ;;  %v1049_v25 = vrot.slane %v15166_v41, 2 }
  0xfe   :  { %1147 = vst [vmem:[#allocation1 + $0x20] ss:$4 sm:$0xff] %v15179_v45  ;;  %v517_v33 = vpop.permute.xlu0 %516  ;;  %v15199_v45 = vld [vmem:[%s19331_s0 + $0x80] sm:$0xff] }
  0xff   :  { %1150 = vst [vmem:[#allocation1 + $0x22] ss:$4 sm:$0xff] %v15156_v55  ;;  %v641_v49 = vpop.permute.xlu2 %640  ;;  %v1043_v17 = vor.u32 %v1042_v51, %v1041_v4  ;;  %v333_v10 = vshll.u32 %v15199_v45, 16  ;;  %v807_v13 = vsel %vm775_vm2, %v758_v42, %v517_v33  ;;  %v15224_v33 = vld.sshfl [vmem:[#allocation1] sm:$0xff pattern:$0x73625140] }
 0x100   :  { %1152 = vst [vmem:[#allocation1 + $0x23] ss:$4 sm:$0xff] %v15185_v35  ;;  %678 = vrot.lane.b32.xlu1 %v654_v48, %s14577_s29  ;;  %v1033_v48 = vrot.slane %v15166_v41, 1  ;;  %v856_v42 = vsel %vm824_vm1, %v807_v13, %v15123_v31 }
 0x102   :  { %v635_v1 = vpop.permute.xlu1 %634 }
 0x103   :  { %v854_v43 = vsel %vm824_vm1, %v805_v27, %v635_v1  ;;  %v331_v1 = vshrl.u32 %v15199_v45, 16 }
 0x104   :  { %1030 = vrot.lane.b32.xlu0 %v1027_v5, %s14576_s28 }
 0x105   :  { %1046 = vrot.lane.b32.xlu2 %v1043_v17, %s14578_s8  ;;  %v335_v17 = vrot.slane %v333_v10, 1 }
 0x106   :  { %v707_v8 = vpop.permute.xlu0 %706 }
 0x107   :  { %v1154_v4 = vld.sshfl [vmem:[#allocation1 + $0x20] sm:$0xff pattern:$0x73625140]  ;;  %v15212_v51 = vsel %vm873_vm3, %v854_v43, %v707_v8  ;;  %v713_v16 = vpop.permute.xlu2 %712  ;;  %v336_v43 = vor.u32 %v335_v17, %v331_v1 }
 0x108   :  { %v15216_v5 = vrot.slane %v15212_v51, 2  ;;  %v15219_v34 = vrot.slane %v15212_v51, 4  ;;  %1167 = vst [vmem:[#allocation1 + $0x23] ss:$4 sm:$0xff] %v15212_v51  ;;  %1036 = vrot.lane.b32.xlu1 %v1033_v48, %s14575_s25 }
 0x10a   :  { %19645 = vst [vmem:[#allocation43_spill] sm:$0xff] %v15216_v5  ;;  %v709_v6 = vpop.permute.xlu1 %708 }
 0x10b   :  { %19646 = vst [vmem:[#allocation44_spill] sm:$0xff] %v15219_v34  ;;  %v15231_v27 = vsel %vm873_vm3, %v856_v42, %v709_v6  ;;  %v570_v6 = vrot.slane %v331_v1, 1  ;;  %v571_v42 = vrot.slane %v333_v10, 2  ;;  %v666_v10 = vrot.slane %v15199_v45, 2 }
 0x10c   :  { %1171 = vst [vmem:[#allocation1] ss:$4 sm:$0xff] %v15216_v5  ;;  %v15236_v48 = vrot.slane %v15231_v27, 2  ;;  %1052 = vrot.lane.b32.xlu0 %v1049_v25, %s14577_s29 }
 0x10d   :  { %1173 = vst [vmem:[#allocation1 + $0x1] ss:$4 sm:$0xff] %v15219_v34  ;;  %11523 = vmatmul.msk.bf16.gmra.mxu0 %vm1262_vm4, %v15097_v61  ;;  %v572_v47 = vor.u32 %v571_v42, %v570_v6 }
 0x10e   :  { %19647 = vst [vmem:[#allocation45_spill] sm:$0xff] %v15231_v27  ;;  %v449_v8 = vpop.permute.xlu0 %448 }
 0x10f   :  { %19648 = vst [vmem:[#allocation46_spill] sm:$0xff] %v15236_v48  ;;  %v762_v31 = vsel %vm726_vm0, %v14863_v60, %v449_v8  ;;  %v447_v13 = vpop.permute.xlu2 %446  ;;  %v754_v8 = vsel %vm726_vm0, %v14832_v44, %v15138_v3 }
 0x110   :  { %1174 = vst [vmem:[#allocation1 + $0x2] ss:$4 sm:$0xff] %v15231_v27  ;;  %v811_v61 = vsel %vm775_vm2, %v762_v31, %v15170_v32  ;;  %438 = vrot.lane.b32.xlu1 %v336_v43, %s14576_s28  ;;  %v760_v31 = vsel %vm726_vm0, %v14940_v62, %v447_v13 }
 0x111   :  { %1176 = vst [vmem:[#allocation1 + $0x3] ss:$4 sm:$0xff] %v15236_v48  ;;  %v860_v34 = vsel %vm824_vm1, %v811_v61, %v641_v49 }
 0x112   :  { %v15248_v25 = vsel %vm873_vm3, %v860_v34, %v713_v16  ;;  %v513_v17 = vpop.permute.xlu1 %512 }
 0x113   :  { %19649 = vst [vmem:[#allocation47_spill] sm:$0xff] %v15248_v25  ;;  %v15251_v48 = vrot.slane %v15248_v25, 4  ;;  %v15254_v60 = vrot.slane %v15248_v25, 2  ;;  %v803_v6 = vsel %vm775_vm2, %v754_v8, %v513_v17 }
 0x114   :  { %630 = vrot.lane.b32.xlu0 %v572_v47, %s14578_s8  ;;  %v13928_v47 = vld [vmem:[%s19332_s1 + $0xc0] sm:$0xff] }
 0x115   :  { %19650 = vst [vmem:[#allocation48_spill] sm:$0xff] %v15251_v48  ;;  %2687 = vmatpush.bf16.msrb.mxu0 %v13928_v47 }
 0x116   :  { %19651 = vst [vmem:[#allocation49_spill] sm:$0xff] %v15254_v60  ;;  %v451_v49 = vpop.permute.xlu0 %450 }
 0x117   :  { %v519_v16 = vpop.permute.xlu2 %518  ;;  %v764_v13 = vsel %vm726_vm0, %v14878_v14, %v451_v49 }
 0x118   :  { %v15258_v32 = vld.sshfl [vmem:[#allocation1] sm:$0xff pattern:$0x73625140]  ;;  %702 = vrot.lane.b32.xlu1 %v666_v10, %s14577_s29  ;;  %v474_v10 = vrot.slane %v15199_v45, 1  ;;  %v809_v47 = vsel %vm775_vm2, %v760_v31, %v519_v16 }
 0x119   :  { %1186 = vst [vmem:[#allocation1] ss:$4 sm:$0xff] %v15248_v25 }
 0x11a   :  { %1190 = vst [vmem:[#allocation1 + $0x2] ss:$4 sm:$0xff] %v15251_v48  ;;  %v633_v34 = vpop.permute.xlu1 %632  ;;  %510 = vrot.lane.b32.xlu2 %v474_v10, %s14575_s25 }
 0x11b   :  { %1188 = vst [vmem:[#allocation1 + $0x1] ss:$4 sm:$0xff] %v15254_v60  ;;  %v852_v42 = vsel %vm824_vm1, %v803_v6, %v633_v34 }
 0x11d   :  { %11524 = vmatmul.msk.bf16.gmra.mxu0 %vm1262_vm4, %v1154_v4 }
 0x11e   :  { %v523_v1 = vpop.permute.xlu0 %522 }
 0x11f   :  { %v639_v43 = vpop.permute.xlu2 %638  ;;  %v813_v17 = vsel %vm775_vm2, %v764_v13, %v523_v1 }
 0x120   :  { %v858_v62 = vsel %vm824_vm1, %v809_v47, %v639_v43  ;;  %v15303_v43 = vrot.slane %v15231_v27, 4 }
 0x122   :  { %v705_v61 = vpop.permute.xlu1 %704  ;;  %19653 = vst [vmem:[#allocation51_spill] sm:$0xff] %v15303_v43 }
 0x123   :  { %v15276_v4 = vsel %vm873_vm3, %v852_v42, %v705_v61 }
 0x124   :  { %v19360_v48 = vrot.slane %v15276_v4, 2  ;;  %v19359_v60 = vrot.slane %v15276_v4, 4  ;;  %1162 = vst [vmem:[#allocation1 + $0x20] ss:$4 sm:$0xff] %v15276_v4 }
 0x126   :  { %1164 = vst [vmem:[#allocation1 + $0x21] ss:$4 sm:$0xff] %v19360_v48  ;;  %v643_v44 = vpop.permute.xlu0 %642 }
 0x127   :  { %1166 = vst [vmem:[#allocation1 + $0x22] ss:$4 sm:$0xff] %v19359_v60  ;;  %v711_v3 = vpop.permute.xlu2 %710  ;;  %v862_v16 = vsel %vm824_vm1, %v813_v17, %v643_v44  ;;  %v15329_v17 = vld [vmem:[%s19331_s0 + $0x68] sm:$0xff] }
 0x128   :  { %v15294_v34 = vsel %vm873_vm3, %v858_v62, %v711_v3  ;;  %v19371_v48 = vshrl.u32 %v15329_v17, 16 }
 0x129   :  { %v15306_v14 = vrot.slane %v15294_v34, 4  ;;  %v15309_v1 = vrot.slane %v15294_v34, 2 }
 0x12a   :  { %v715_v8 = vpop.permute.xlu1 %714  ;;  %v1698_v27 = vrot.slane %v19371_v48, 1 }
 0x12b   :  { %v15297_v31 = vsel %vm873_vm3, %v862_v16, %v715_v8  ;;  %19654 = vst [vmem:[#allocation52_spill] sm:$0xff] %v15306_v14 }
 0x12c   :  { %19652 = vst [vmem:[#allocation50_spill] sm:$0xff] %v15297_v31  ;;  %v15316_v61 = vrot.slane %v15297_v31, 4  ;;  %v15319_v10 = vrot.slane %v15297_v31, 2 }
 0x12d   :  { %11525 = vmatmul.msk.bf16.gmra.mxu0 %vm1262_vm4, %v15224_v33  ;;  %1191 = vst [vmem:[#allocation1 + $0x3] ss:$4 sm:$0xff] %v15297_v31 }
 0x12e   :  { %v1169_v49 = vld.sshfl [vmem:[#allocation1 + $0x20] sm:$0xff pattern:$0x73625140]  ;;  %v453_v6 = vpop.permute.xlu0 %452  ;;  %19655 = vst [vmem:[#allocation53_spill] sm:$0xff] %v15316_v61 }
 0x12f   :  { %1178 = vst [vmem:[#allocation1 + $0x20] ss:$4 sm:$0xff] %v15303_v43  ;;  %v459_v62 = vpop.permute.xlu2 %458  ;;  %v766_v16 = vsel %vm726_vm0, %v14953_v20, %v453_v6 }
 0x130   :  { %1179 = vst [vmem:[#allocation1 + $0x21] ss:$4 sm:$0xff] %v15294_v34 }
 0x131   :  { %1183 = vst [vmem:[#allocation1 + $0x23] ss:$4 sm:$0xff] %v15306_v14 }
 0x132   :  { %1181 = vst [vmem:[#allocation1 + $0x22] ss:$4 sm:$0xff] %v15309_v1  ;;  %v455_v33 = vpop.permute.xlu1 %454 }
 0x133   :  { %19656 = vst [vmem:[#allocation54_spill] sm:$0xff] %v15319_v10  ;;  %v768_v20 = vsel %vm726_vm0, %v14972_v0, %v455_v33 }
 0x136   :  { %v525_v42 = vpop.permute.xlu0 %524 }
 0x137   :  { %v815_v8 = vsel %vm775_vm2, %v766_v16, %v525_v42  ;;  %v533_v60 = vpop.permute.xlu2 %532  ;;  %v1199_v16 = vld.sshfl [vmem:[#allocation1] sm:$0xff pattern:$0x73625140] }
 0x139   :  { %v15321_v47 = vld.sshfl [vmem:[#allocation1 + $0x20] sm:$0xff pattern:$0x73625140] }
 0x13a   :  { %1195 = vst [vmem:[#allocation1 + $0x21] ss:$4 sm:$0xff] %v15316_v61  ;;  %v527_v44 = vpop.permute.xlu1 %526 }
 0x13b   :  { %1193 = vst [vmem:[#allocation1 + $0x20] ss:$4 sm:$0xff] %v15319_v10  ;;  %v19372_v10 = vshll.u32 %v15329_v17, 16 }
 0x13d   :  { %11526 = vmatmul.msk.bf16.gmra.mxu0 %vm1262_vm4, %v1169_v49  ;;  %v1699_v61 = vrot.slane %v19372_v10, 2 }
 0x13e   :  { %v645_v3 = vpop.permute.xlu0 %644 }
 0x13f   :  { %v864_v49 = vsel %vm824_vm1, %v815_v8, %v645_v3  ;;  %v817_v3 = vsel %vm775_vm2, %v768_v20, %v527_v44  ;;  %v1700_v8 = vor.u32 %v1699_v61, %v1698_v27  ;;  %v13908_v27 = vld [vmem:[%s19332_s1 + $0x20] sm:$0xff]  ;;  %v15376_v44 = vpop.f32.mrf.mxu0 }
 0x140   :  { %1568 = vmatpush.bf16.msra.mxu1 %v13908_v27  ;;  %19661 = vst [vmem:[#allocation59_spill] sm:$0xff] %v15376_v44 }
 0x141   :  { %1704 = vrot.lane.b32.xlu1 %v1700_v8, %s14578_s8 }
 0x142   :  { %v647_v13 = vpop.permute.xlu1 %646 }
 0x146   :  { %v717_v31 = vpop.permute.xlu0 %716 }
 0x147   :  { %v15338_v43 = vsel %vm873_vm3, %v864_v49, %v717_v31  ;;  %v1692_v31 = vrot.slane %v15329_v17, 1  ;;  %v866_v49 = vsel %vm824_vm1, %v817_v3, %v647_v13  ;;  %v13907_v13 = vld [vmem:[%s19332_s1 + $0x18] sm:$0xff]  ;;  %v15389_v44 = vpop.f32.mrf.mxu0 }
 0x148   :  { %v15347_v6 = vrot.slane %v15338_v43, 2  ;;  %v15350_v42 = vrot.slane %v15338_v43, 4  ;;  %1196 = vst [vmem:[#allocation1 + $0x22] ss:$4 sm:$0xff] %v15338_v43  ;;  %1569 = vmatpush.bf16.msra.mxu1 %v13907_v13 }
 0x149   :  { %1694 = vrot.lane.b32.xlu0 %v1692_v31, %s14575_s25  ;;  %v772_v31 = vsel %vm726_vm0, %v15036_v46, %v459_v62  ;;  %19663 = vst [vmem:[#allocation61_spill] sm:$0xff] %v15389_v44 }
 0x14a   :  { %19657 = vst [vmem:[#allocation55_spill] sm:$0xff] %v15350_v42  ;;  %v719_v48 = vpop.permute.xlu1 %718 }
 0x14b   :  { %1202 = vst [vmem:[#allocation1] ss:$4 sm:$0xff] %v15350_v42  ;;  %v15360_v0 = vsel %vm873_vm3, %v866_v49, %v719_v48 }
 0x14c   :  { %1198 = vst [vmem:[#allocation1 + $0x23] ss:$4 sm:$0xff] %v15347_v6  ;;  %v15369_v33 = vrot.slane %v15360_v0, 2  ;;  %v15372_v61 = vrot.slane %v15360_v0, 4 }
 0x14d   :  { %19658 = vst [vmem:[#allocation56_spill] sm:$0xff] %v15360_v0  ;;  %11527 = vmatmul.msk.bf16.gmra.mxu0 %vm1262_vm4, %v15258_v32  ;;  %v723_v32 = vpop.permute.xlu2 %722 }
 0x14e   :  { %19659 = vst [vmem:[#allocation57_spill] sm:$0xff] %v15369_v33  ;;  %v461_v48 = vpop.permute.xlu0 %460 }
 0x14f   :  { %19660 = vst [vmem:[#allocation58_spill] sm:$0xff] %v15372_v61  ;;  %v774_v62 = vsel %vm726_vm0, %v15047_v15, %v461_v48  ;;  %v15416_v44 = vpop.f32.mrf.mxu0 }
 0x150   :  { %1203 = vst [vmem:[#allocation1 + $0x1] ss:$4 sm:$0xff] %v15360_v0 }
 0x151   :  { %1207 = vst [vmem:[#allocation1 + $0x3] ss:$4 sm:$0xff] %v15372_v61 }
 0x152   :  { %1205 = vst [vmem:[#allocation1 + $0x2] ss:$4 sm:$0xff] %v15369_v33  ;;  %v531_v20 = vpop.permute.xlu1 %530 }
 0x153   :  { %v821_v3 = vsel %vm775_vm2, %v772_v31, %v531_v20  ;;  %v1200_v10 = vld.sshfl [vmem:[#allocation1 + $0x20] sm:$0xff pattern:$0x73625140]  ;;  %19667 = vst [vmem:[#allocation65_spill] sm:$0xff] %v15416_v44 }
 0x155   :  { %v457_v46 = vpop.permute.xlu2 %456 }
 0x156   :  { %v651_v8 = vpop.permute.xlu0 %650 }
 0x157   :  { %v870_v49 = vsel %vm824_vm1, %v821_v3, %v651_v8 }
 0x158   :  { %v15387_v27 = vsel %vm873_vm3, %v870_v49, %v723_v32  ;;  %v823_v32 = vsel %vm775_vm2, %v774_v62, %v533_v60 }
 0x159   :  { %19662 = vst [vmem:[#allocation60_spill] sm:$0xff] %v15387_v27  ;;  %v15392_v61 = vrot.slane %v15387_v27, 2  ;;  %v15395_v13 = vrot.slane %v15387_v27, 4  ;;  %v15400_v20 = vld.sshfl [vmem:[#allocation1] sm:$0xff pattern:$0x73625140] }
 0x15a   :  { %1213 = vst [vmem:[#allocation1 + $0x23] ss:$4 sm:$0xff] %v15387_v27  ;;  %v653_v31 = vpop.permute.xlu1 %652 }
 0x15b   :  { %19664 = vst [vmem:[#allocation62_spill] sm:$0xff] %v15392_v61  ;;  %v872_v3 = vsel %vm824_vm1, %v823_v32, %v653_v31  ;;  %v15424_v31 = vpop.f32.mrf.mxu0  ;;  %v770_v32 = vsel %vm726_vm0, %v15110_v39, %v457_v46 }
 0x15c   :  { %19665 = vst [vmem:[#allocation63_spill] sm:$0xff] %v15395_v13 }
 0x15d   :  { %1219 = vst [vmem:[#allocation1 + $0x1] ss:$4 sm:$0xff] %v15395_v13  ;;  %11528 = vmatmul.msk.bf16.gmra.mxu0 %vm1262_vm4, %v15321_v47  ;;  %v607_v47 = vpop.permute.xlu2 %606 }
 0x15e   :  { %1217 = vst [vmem:[#allocation1] ss:$4 sm:$0xff] %v15392_v61  ;;  %v725_v8 = vpop.permute.xlu0 %724 }
 0x15f   :  { %v15409_v49 = vsel %vm873_vm3, %v872_v3, %v725_v8  ;;  %19668 = vst [vmem:[#allocation66_spill] sm:$0xff] %v15424_v31  ;;  %v19689_v31 = vld [vmem:[#allocation41_spill] sm:$0xff] }
 0x160   :  { %v15412_v15 = vrot.slane %v15409_v49, 2  ;;  %1220 = vst [vmem:[#allocation1 + $0x2] ss:$4 sm:$0xff] %v15409_v49 }
 0x162   :  { %19666 = vst [vmem:[#allocation64_spill] sm:$0xff] %v15412_v15  ;;  %v415_v48 = vpop.permute.xlu1 %414 }
 0x163   :  { %1222 = vst [vmem:[#allocation1 + $0x3] ss:$4 sm:$0xff] %v15412_v15  ;;  %v728_v62 = vsel %vm726_vm0, %v15116_v11, %v415_v48  ;;  %v13906_v48 = vld [vmem:[%s19332_s1 + $0x10] sm:$0xff] }
 0x164   :  { %1570 = vmatpush.bf16.msra.mxu1 %v13906_v48 }
 0x165   :  { %v721_v3 = vpop.permute.xlu2 %720 }
 0x166   :  { %v487_v13 = vpop.permute.xlu0 %486 }
 0x167   :  { %v777_v15 = vsel %vm775_vm2, %v728_v62, %v487_v13  ;;  %v15453_v62 = vrot.slane %v15409_v49, 4 }
 0x168   :  { %v826_v39 = vsel %vm824_vm1, %v777_v15, %v607_v47  ;;  %v19672_v15 = vshll.u32 %v15329_v17, 16 }
 0x169   :  { %19673 = vst [vmem:[#allocation70_spill] sm:$0xff] %v15453_v62 }
 0x16a   :  { %v15418_v33 = vld.sshfl [vmem:[#allocation1] sm:$0xff pattern:$0x73625140]  ;;  %v529_v60 = vpop.permute.xlu1 %528  ;;  %v1679_v47 = vrot.slane %v19672_v15, 1 }
 0x16b   :  { %1406 = vst [vmem:[#allocation1 + $0x3] ss:$4 sm:$0xff] %v14822_v37  ;;  %v819_v8 = vsel %vm775_vm2, %v770_v32, %v529_v60  ;;  %v15448_v60 = vpop.f32.mrf.mxu0  ;;  %v13905_v32 = vld [vmem:[%s19332_s1 + $0x8] sm:$0xff] }
 0x16c   :  { %19671 = vst [vmem:[#allocation69_spill] sm:$0xff] %v15448_v60  ;;  %1571 = vmatpush.bf16.msra.mxu1 %v13905_v32  ;;  %v1708_v32 = vrot.slane %v15329_v17, 2 }
 0x16d   :  { %11529 = vmatmul.msk.bf16.gmra.mxu0 %vm1262_vm4, %v1199_v16  ;;  %v1047_v15 = vpop.permute.xlu2 %1046 }
 0x16e   :  { %v649_v44 = vpop.permute.xlu0 %648 }
 0x16f   :  { %v868_v0 = vsel %vm824_vm1, %v819_v8, %v649_v44 }
 0x170   :  { %v15432_v61 = vsel %vm873_vm3, %v868_v0, %v721_v3  ;;  %v19674_v3 = vshrl.u32 %v15329_v17, 16 }
 0x171   :  { %19669 = vst [vmem:[#allocation67_spill] sm:$0xff] %v15432_v61  ;;  %v15435_v16 = vrot.slane %v15432_v61, 2  ;;  %v15438_v11 = vrot.slane %v15432_v61, 4 }
 0x172   :  { %1208 = vst [vmem:[#allocation1 + $0x20] ss:$4 sm:$0xff] %v15432_v61  ;;  %v679_v46 = vpop.permute.xlu1 %678  ;;  %v1680_v8 = vor.u32 %v1679_v47, %v19674_v3 }
 0x173   :  { %19670 = vst [vmem:[#allocation68_spill] sm:$0xff] %v15435_v16  ;;  %v875_v13 = vsel %vm873_vm3, %v826_v39, %v679_v46  ;;  %v15471_v47 = vpop.f32.mrf.mxu0 }
 0x174   :  { %1210 = vst [vmem:[#allocation1 + $0x21] ss:$4 sm:$0xff] %v15435_v16  ;;  %v946_v44 = vrot.slane %v875_v13, 2  ;;  %v947_v0 = vrot.slane %v875_v13, 4  ;;  %1688 = vrot.lane.b32.xlu2 %v1680_v8, %s14576_s28 }
 0x175   :  { %1212 = vst [vmem:[#allocation1 + $0x22] ss:$4 sm:$0xff] %v15438_v11  ;;  %v511_v60 = vpop.permute.xlu2 %510 }
 0x176   :  { %1398 = vst [vmem:[#allocation1] ss:$4 sm:$0xff] %v875_v13  ;;  %v1031_v46 = vpop.permute.xlu0 %1030 }
 0x177   :  { %1401 = vst [vmem:[#allocation1 + $0x1] ss:$4 sm:$0xff] %v946_v44  ;;  %v13904_v44 = vld [vmem:[%s19332_s1] sm:$0xff] }
 0x178   :  { %1404 = vst [vmem:[#allocation1 + $0x2] ss:$4 sm:$0xff] %v947_v0  ;;  %v1057_v0 = vsel %vm726_vm0, %v15166_v41, %v1031_v46  ;;  %1572 = vmatpush.bf16.msra.mxu1 %v13904_v44 }
 0x179   :  { %19675 = vst [vmem:[#allocation71_spill] sm:$0xff] %v15471_v47 }
 0x17a   :  { %v1037_v48 = vpop.permute.xlu1 %1036 }
 0x17c   :  { %v1215_v39 = vld.sshfl [vmem:[#allocation1 + $0x20] sm:$0xff pattern:$0x73625140]  ;;  %1710 = vrot.lane.b32.xlu2 %v1708_v32, %s14577_s29  ;;  %v19680_v32 = vrot.slane %v14822_v37, 2 }
 0x17d   :  { %11530 = vmatmul.msk.bf16.gmra.mxu0 %vm1262_vm4, %v1200_v10  ;;  %1224 = vst [vmem:[#allocation1 + $0x20] ss:$4 sm:$0xff] %v15453_v62  ;;  %v1061_v10 = vsel %vm775_vm2, %v1057_v0, %v1037_v48  ;;  %v15501_v48 = vld [vmem:[%s19331_s0 + $0xe8] sm:$0xff] }
 0x17e   :  { %v1065_v3 = vsel %vm824_vm1, %v1061_v10, %v1047_v15  ;;  %v1053_v8 = vpop.permute.xlu0 %1052  ;;  %v19385_v10 = vshll.u32 %v15501_v48, 16 }
 0x17f   :  { %v1415_v13 = vld.sshfl [vmem:[#allocation1] sm:$0xff pattern:$0x73625140]  ;;  %v15479_v41 = vsel %vm873_vm3, %v1065_v3, %v1053_v8  ;;  %v19386_v3 = vshrl.u32 %v15501_v48, 16  ;;  %v19681_v8 = vrot.slane %v14822_v37, 4  ;;  %v1693_v37 = vrot.slane %v15501_v48, 1 }
 0x180   :  { %1417 = vst [vmem:[#allocation1] ss:$4 sm:$0xff] %v14855_v59  ;;  %11555 = vmatmul.msk.bf16.vlgmr.msra.gmra.mxu1 %vm1262_vm4, %v1415_v13  ;;  %v15483_v46 = vrot.slane %v15479_v41, 2  ;;  %v15486_v44 = vrot.slane %v15479_v41, 4  ;;  %v15492_v13 = vpop.f32.mrf.mxu0 }
 0x181   :  { %1418 = vst [vmem:[#allocation1 + $0x1] ss:$4 sm:$0xff] %v14895_v29  ;;  %1696 = vrot.lane.b32.xlu1 %v1693_v37, %s14575_s25 }
 0x182   :  { %1419 = vst [vmem:[#allocation1 + $0x2] ss:$4 sm:$0xff] %v14899_v9 }
 0x183   :  { %1420 = vst [vmem:[#allocation1 + $0x3] ss:$4 sm:$0xff] %v14902_v63 }
 0x184   :  { %19676 = vst [vmem:[#allocation72_spill] sm:$0xff] %v15479_v41 }
 0x185   :  { %19677 = vst [vmem:[#allocation73_spill] sm:$0xff] %v15483_v46 }
 0x186   :  { %19678 = vst [vmem:[#allocation74_spill] sm:$0xff] %v15486_v44 }
 0x187   :  { %1225 = vst [vmem:[#allocation1 + $0x21] ss:$4 sm:$0xff] %v15479_v41 }
 0x188   :  { %1227 = vst [vmem:[#allocation1 + $0x22] ss:$4 sm:$0xff] %v15483_v46 }
 0x189   :  { %1229 = vst [vmem:[#allocation1 + $0x23] ss:$4 sm:$0xff] %v15486_v44 }
 0x18a   :  { %v1425_v0 = vld.sshfl [vmem:[#allocation1] sm:$0xff pattern:$0x73625140]  ;;  %19679 = vst [vmem:[#allocation75_spill] sm:$0xff] %v15492_v13 }
 0x18b   :  { %1427 = vst [vmem:[#allocation1] ss:$4 sm:$0xff] %v15013_v21 }
 0x18c   :  { %1428 = vst [vmem:[#allocation1 + $0x1] ss:$4 sm:$0xff] %v15016_v57 }
 0x18d   :  { %11531 = vmatmul.msk.bf16.gmra.mxu0 %vm1262_vm4, %v15400_v20  ;;  %1429 = vst [vmem:[#allocation1 + $0x2] ss:$4 sm:$0xff] %v14982_v22  ;;  %v1686_v20 = vrot.slane %v19385_v10, 1 }
 0x18e   :  { %1430 = vst [vmem:[#allocation1 + $0x3] ss:$4 sm:$0xff] %v14987_v12 }
 0x18f   :  { %v1687_v13 = vor.u32 %v1686_v20, %v19386_v3  ;;  %v1709_v20 = vrot.slane %v15501_v48, 2  ;;  %v19686_v3 = vrot.slane %v15276_v4, 4 }
 0x190   :  { %v15505_v15 = vld.sshfl [vmem:[#allocation1 + $0x20] sm:$0xff pattern:$0x73625140] }
 0x191   :  { %1408 = vst [vmem:[#allocation1 + $0x20] ss:$4 sm:$0xff] %v19680_v32  ;;  %1690 = vrot.lane.b32.xlu0 %v1687_v13, %s14576_s28  ;;  %v15521_v32 = vpop.f32.mrf.mxu0 }
 0x192   :  { %1410 = vst [vmem:[#allocation1 + $0x21] ss:$4 sm:$0xff] %v19681_v8 }
 0x193   :  { %1412 = vst [vmem:[#allocation1 + $0x22] ss:$4 sm:$0xff] %v14849_v56 }
 0x194   :  { %1414 = vst [vmem:[#allocation1 + $0x23] ss:$4 sm:$0xff] %v14852_v58 }
 0x195   :  { %v15518_v47 = vld.sshfl [vmem:[#allocation1] sm:$0xff pattern:$0x73625140]  ;;  %19682 = vst [vmem:[#allocation76_spill] sm:$0xff] %v15521_v32 }
 0x196   :  { %1437 = vst [vmem:[#allocation1] ss:$4 sm:$0xff] %v15136_v7 }
 0x197   :  { %1438 = vst [vmem:[#allocation1 + $0x1] ss:$4 sm:$0xff] %v15143_v23 }
 0x198   :  { %1439 = vst [vmem:[#allocation1 + $0x2] ss:$4 sm:$0xff] %v15146_v26 }
 0x199   :  { %1440 = vst [vmem:[#allocation1 + $0x3] ss:$4 sm:$0xff] %v15055_v40  ;;  %1712 = vrot.lane.b32.xlu0 %v1709_v20, %s14577_s29  ;;  %v15537_v13 = vpop.f32.mrf.mxu0  ;;  %v19685_v20 = vrot.slane %v15276_v4, 2 }
 0x19a   :  { %19683 = vst [vmem:[#allocation77_spill] sm:$0xff] %v15537_v13  ;;  %v439_v13 = vpop.permute.xlu1 %438 }
 0x19b   :  { %v1416_v8 = vld.sshfl [vmem:[#allocation1 + $0x20] sm:$0xff pattern:$0x73625140]  ;;  %v752_v32 = vsel %vm726_vm0, %v15199_v45, %v439_v13 }
 0x19c   :  { %1421 = vst [vmem:[#allocation1 + $0x20] ss:$4 sm:$0xff] %v14920_v50  ;;  %11556 = vmatmul.msk.bf16.gmra.mxu1 %vm1262_vm4, %v1416_v8 }
 0x19d   :  { %11532 = vmatmul.msk.bf16.gmra.mxu0 %vm1262_vm4, %v1215_v39  ;;  %1422 = vst [vmem:[#allocation1 + $0x21] ss:$4 sm:$0xff] %v14923_v52 }
 0x19e   :  { %1423 = vst [vmem:[#allocation1 + $0x22] ss:$4 sm:$0xff] %v14926_v53 }
 0x19f   :  { %1424 = vst [vmem:[#allocation1 + $0x23] ss:$4 sm:$0xff] %v15010_v18 }
 0x1a0   :  { %v15539_v10 = vld.sshfl [vmem:[#allocation1] sm:$0xff pattern:$0x73625140] }
 0x1a1   :  { %1447 = vst [vmem:[#allocation1] ss:$4 sm:$0xff] %v15175_v2  ;;  %v15548_v37 = vpop.f32.mrf.mxu0 }
 0x1a2   :  { %1448 = vst [vmem:[#allocation1 + $0x1] ss:$4 sm:$0xff] %v15156_v55  ;;  %v703_v13 = vpop.permute.xlu1 %702 }
 0x1a3   :  { %1449 = vst [vmem:[#allocation1 + $0x2] ss:$4 sm:$0xff] %v15185_v35 }
 0x1a4   :  { %1450 = vst [vmem:[#allocation1 + $0x3] ss:$4 sm:$0xff] %v15159_v19 }
 0x1a5   :  { %19684 = vst [vmem:[#allocation78_spill] sm:$0xff] %v15548_v37 }
 0x1a6   :  { %v1426_v39 = vld.sshfl [vmem:[#allocation1 + $0x20] sm:$0xff pattern:$0x73625140] }
 0x1a7   :  { %1431 = vst [vmem:[#allocation1 + $0x20] ss:$4 sm:$0xff] %v14990_v54 }
 0x1a8   :  { %1432 = vst [vmem:[#allocation1 + $0x21] ss:$4 sm:$0xff] %v14965_v36 }
 0x1a9   :  { %1433 = vst [vmem:[#allocation1 + $0x22] ss:$4 sm:$0xff] %v14975_v38 }
 0x1aa   :  { %1434 = vst [vmem:[#allocation1 + $0x23] ss:$4 sm:$0xff] %v15026_v24 }
 0x1ab   :  { %v15551_v8 = vld.sshfl [vmem:[#allocation1] sm:$0xff pattern:$0x73625140] }
 0x1ac   :  { %1459 = vst [vmem:[#allocation1] ss:$4 sm:$0xff] %v19685_v20  ;;  %11557 = vmatmul.msk.bf16.gmra.mxu1 %vm1262_vm4, %v1425_v0  ;;  %v15566_v20 = vpop.f32.mrf.mxu0  ;;  %v801_v0 = vsel %vm775_vm2, %v752_v32, %v511_v60 }
 0x1ad   :  { %11533 = vmatmul.msk.bf16.gmra.mxu0 %vm1262_vm4, %v15418_v33  ;;  %1460 = vst [vmem:[#allocation1 + $0x1] ss:$4 sm:$0xff] %v19686_v3  ;;  %v19688_v33 = vld [vmem:[#allocation31_spill] sm:$0xff]  ;;  %v631_v3 = vpop.permute.xlu0 %630 }
 0x1ae   :  { %1461 = vst [vmem:[#allocation1 + $0x2] ss:$4 sm:$0xff] %v15212_v51  ;;  %v850_v45 = vsel %vm824_vm1, %v801_v0, %v631_v3 }
 0x1af   :  { %1462 = vst [vmem:[#allocation1 + $0x3] ss:$4 sm:$0xff] %v15216_v5  ;;  %v899_v60 = vsel %vm873_vm3, %v850_v45, %v703_v13  ;;  %v19697_v5 = vld [vmem:[#allocation44_spill] sm:$0xff] }
 0x1b0   :  { %19687 = vst [vmem:[#allocation79_spill] sm:$0xff] %v15566_v20  ;;  %v15582_v20 = vld [vmem:[%s19331_s0 + $0x70] sm:$0xff]  ;;  %v970_v0 = vrot.slane %v899_v60, 2 }
 0x1b1   :  { %v15562_v37 = vld.sshfl [vmem:[#allocation1 + $0x20] sm:$0xff pattern:$0x73625140]  ;;  %19691 = vst [vmem:[#allocation80_spill] sm:$0xff] %v15582_v20  ;;  %v2062_v32 = vshll.u32 %v15582_v20, 16  ;;  %v2060_v3 = vshrl.u32 %v15582_v20, 16 }
 0x1b2   :  { %1441 = vst [vmem:[#allocation1 + $0x20] ss:$4 sm:$0xff] %v15059_v28 }
 0x1b3   :  { %1442 = vst [vmem:[#allocation1 + $0x21] ss:$4 sm:$0xff] %v15062_v30 }
 0x1b4   :  { %1443 = vst [vmem:[#allocation1 + $0x22] ss:$4 sm:$0xff] %v19688_v33  ;;  %v15589_v41 = vpop.f32.mrf.mxu0 }
 0x1b5   :  { %1444 = vst [vmem:[#allocation1 + $0x23] ss:$4 sm:$0xff] %v19689_v31 }
 0x1b6   :  { %v15573_v44 = vld.sshfl [vmem:[#allocation1] sm:$0xff pattern:$0x73625140]  ;;  %19692 = vst [vmem:[#allocation81_spill] sm:$0xff] %v15589_v41  ;;  %v19694_v41 = vld [vmem:[#allocation53_spill] sm:$0xff] }
 0x1b7   :  { %19690 = vst [vmem:[#allocation41_spill] sm:$0xff] %v15573_v44  ;;  %v2064_v44 = vrot.slane %v2062_v32, 1 }
 0x1b8   :  { %1469 = vst [vmem:[#allocation1] ss:$4 sm:$0xff] %v15294_v34 }
 0x1b9   :  { %1470 = vst [vmem:[#allocation1 + $0x1] ss:$4 sm:$0xff] %v15309_v1  ;;  %v2065_v45 = vor.u32 %v2064_v44, %v2060_v3 }
 0x1ba   :  { %1471 = vst [vmem:[#allocation1 + $0x2] ss:$4 sm:$0xff] %v15306_v14 }
 0x1bb   :  { %1472 = vst [vmem:[#allocation1 + $0x3] ss:$4 sm:$0xff] %v15248_v25  ;;  %v971_v25 = vrot.slane %v899_v60, 4  ;;  %2073 = vrot.lane.b32.xlu1 %v2065_v45, %s14576_s28  ;;  %v2093_v45 = vrot.slane %v15582_v20, 2 }
 0x1bc   :  { %v15587_v46 = vld.sshfl [vmem:[#allocation1 + $0x20] sm:$0xff pattern:$0x73625140]  ;;  %11558 = vmatmul.msk.bf16.gmra.mxu1 %vm1262_vm4, %v1426_v39  ;;  %v19695_v39 = vshrl.u32 %v15501_v48, 16 }
 0x1bd   :  { %11534 = vmatmul.msk.bf16.gmra.mxu0 %vm1262_vm4, %v15505_v15  ;;  %1456 = vst [vmem:[#allocation1 + $0x23] ss:$4 sm:$0xff] %v15276_v4  ;;  %v2083_v4 = vrot.slane %v2060_v3, 1  ;;  %v2084_v15 = vrot.slane %v2062_v32, 2  ;;  %v19698_v32 = vld [vmem:[#allocation45_spill] sm:$0xff]  ;;  %v19699_v3 = vld [vmem:[#allocation46_spill] sm:$0xff] }
 0x1be   :  { %1451 = vst [vmem:[#allocation1 + $0x20] ss:$4 sm:$0xff] %v899_v60  ;;  %v1701_v14 = vrot.slane %v19695_v39, 1  ;;  %v19696_v60 = vshll.u32 %v15501_v48, 16  ;;  %v19700_v39 = vld [vmem:[#allocation51_spill] sm:$0xff] }
 0x1bf   :  { %1453 = vst [vmem:[#allocation1 + $0x21] ss:$4 sm:$0xff] %v970_v0 }
 0x1c0   :  { %1455 = vst [vmem:[#allocation1 + $0x22] ss:$4 sm:$0xff] %v971_v25  ;;  %v1702_v0 = vrot.slane %v19696_v60, 2  ;;  %v2085_v25 = vor.u32 %v2084_v15, %v2083_v4  ;;  %v13917_v15 = vld [vmem:[%s19332_s1 + $0x68] sm:$0xff]  ;;  %v19702_v60 = vld [vmem:[#allocation62_spill] sm:$0xff] }
 0x1c2   :  { %v15596_v13 = vld.sshfl [vmem:[#allocation1] sm:$0xff pattern:$0x73625140]  ;;  %v1703_v44 = vor.u32 %v1702_v0, %v1701_v14  ;;  %2089 = vrot.lane.b32.xlu0 %v2085_v25, %s14578_s8  ;;  %v13918_v14 = vld [vmem:[%s19332_s1 + $0x70] sm:$0xff] }
 0x1c3   :  { %19693 = vst [vmem:[#allocation82_spill] sm:$0xff] %v15596_v13  ;;  %2095 = vrot.lane.b32.xlu1 %v2093_v45, %s14577_s29  ;;  %1917 = vmatpush.bf16.msra.mxu2 %v13918_v14  ;;  %v19703_v25 = vld [vmem:[#allocation49_spill] sm:$0xff]  ;;  %v19705_v45 = vld [vmem:[#allocation50_spill] sm:$0xff] }
 0x1c4   :  { %1479 = vst [vmem:[#allocation1] ss:$4 sm:$0xff] %v19694_v41  ;;  %1706 = vrot.lane.b32.xlu2 %v1703_v44, %s14578_s8  ;;  %v19704_v44 = vld [vmem:[#allocation48_spill] sm:$0xff]  ;;  %v19706_v14 = vld [vmem:[#allocation54_spill] sm:$0xff] }
 0x1c5   :  { %1480 = vst [vmem:[#allocation1 + $0x1] ss:$4 sm:$0xff] %v15338_v43 }
 0x1c6   :  { %1481 = vst [vmem:[#allocation1 + $0x2] ss:$4 sm:$0xff] %v15347_v6 }
 0x1c7   :  { %1482 = vst [vmem:[#allocation1 + $0x3] ss:$4 sm:$0xff] %v15350_v42  ;;  %v15607_v13 = vld.sshfl [vmem:[#allocation1 + $0x20] sm:$0xff pattern:$0x73625140]  ;;  %1918 = vmatpush.bf16.msra.mxu2 %v13917_v15  ;;  %v13915_v15 = vld [vmem:[%s19332_s1 + $0x58] sm:$0xff] }
 0x1c8   :  { %1463 = vst [vmem:[#allocation1 + $0x20] ss:$4 sm:$0xff] %v19697_v5 }
 0x1c9   :  { %1464 = vst [vmem:[#allocation1 + $0x21] ss:$4 sm:$0xff] %v19698_v32 }
 0x1ca   :  { %1465 = vst [vmem:[#allocation1 + $0x22] ss:$4 sm:$0xff] %v19699_v3 }
 0x1cb   :  { %1466 = vst [vmem:[#allocation1 + $0x23] ss:$4 sm:$0xff] %v19700_v39 }
 0x1cc   :  { %11559 = vmatmul.msk.bf16.gmra.mxu1 %vm1262_vm4, %v15518_v47  ;;  %v13916_v47 = vld [vmem:[%s19332_s1 + $0x60] sm:$0xff] }
 0x1cd   :  { %1919 = vmatpush.bf16.msra.mxu2 %v13916_v47  ;;  %v13914_v47 = vld [vmem:[%s19332_s1 + $0x50] sm:$0xff] }
 0x1ce   :  { %v15620_v4 = vld.sshfl [vmem:[#allocation1] sm:$0xff pattern:$0x73625140] }
 0x1cf   :  { %19701 = vst [vmem:[#allocation53_spill] sm:$0xff] %v15620_v4 }
 0x1d0   :  { %1489 = vst [vmem:[#allocation1] ss:$4 sm:$0xff] %v15435_v16 }
 0x1d1   :  { %1490 = vst [vmem:[#allocation1 + $0x1] ss:$4 sm:$0xff] %v15438_v11  ;;  %1920 = vmatpush.bf16.msra.mxu2 %v13915_v15 }
 0x1d2   :  { %1491 = vst [vmem:[#allocation1 + $0x2] ss:$4 sm:$0xff] %v15387_v27  ;;  %v15631_v0 = vld.sshfl [vmem:[#allocation1 + $0x20] sm:$0xff pattern:$0x73625140] }
 0x1d3   :  { %1492 = vst [vmem:[#allocation1 + $0x3] ss:$4 sm:$0xff] %v19702_v60  ;;  %v2077_v60 = vrot.slane %v15582_v20, 1 }
 0x1d4   :  { %1473 = vst [vmem:[#allocation1 + $0x20] ss:$4 sm:$0xff] %v19703_v25 }
 0x1d5   :  { %1474 = vst [vmem:[#allocation1 + $0x21] ss:$4 sm:$0xff] %v19704_v44  ;;  %1921 = vmatpush.bf16.msra.mxu2 %v13914_v47  ;;  %2079 = vrot.lane.b32.xlu2 %v2077_v60, %s14575_s25  ;;  %v19713_v47 = vld [vmem:[#allocation63_spill] sm:$0xff] }
 0x1d6   :  { %1475 = vst [vmem:[#allocation1 + $0x22] ss:$4 sm:$0xff] %v19705_v45 }
 0x1d7   :  { %1476 = vst [vmem:[#allocation1 + $0x23] ss:$4 sm:$0xff] %v19706_v14 }
 0x1da   :  { %v15640_v4 = vld.sshfl [vmem:[#allocation1] sm:$0xff pattern:$0x73625140] }
 0x1db   :  { %19707 = vst [vmem:[#allocation44_spill] sm:$0xff] %v15640_v4 }
 0x1dc   :  { %1747 = vst [vmem:[#allocation1] ss:$4 sm:$0xff] %v14849_v56  ;;  %11560 = vmatmul.msk.bf16.gmra.mxu1 %vm1262_vm4, %v15562_v37  ;;  %v19709_v56 = vld [vmem:[#allocation56_spill] sm:$0xff]  ;;  %v13927_v37 = vld [vmem:[%s19332_s1 + $0xb8] sm:$0xff] }
 0x1dd   :  { %1749 = vst [vmem:[#allocation1 + $0x1] ss:$4 sm:$0xff] %v14852_v58  ;;  %v19710_v58 = vld [vmem:[#allocation57_spill] sm:$0xff]  ;;  %2688 = vmatpush.bf16.msrb.mxu0 %v13927_v37  ;;  %v1689_v37 = vpop.permute.xlu2 %1688 }
 0x1de   :  { %1751 = vst [vmem:[#allocation1 + $0x2] ss:$4 sm:$0xff] %v14855_v59  ;;  %v15654_v4 = vld.sshfl [vmem:[#allocation1 + $0x20] sm:$0xff pattern:$0x73625140] }
 0x1df   :  { %1753 = vst [vmem:[#allocation1 + $0x3] ss:$4 sm:$0xff] %v14895_v29  ;;  %v19711_v59 = vld [vmem:[#allocation58_spill] sm:$0xff] }
 0x1e0   :  { %19708 = vst [vmem:[#allocation45_spill] sm:$0xff] %v15654_v4  ;;  %v19714_v4 = vld [vmem:[#allocation64_spill] sm:$0xff] }
 0x1e1   :  { %1483 = vst [vmem:[#allocation1 + $0x20] ss:$4 sm:$0xff] %v19709_v56 }
 0x1e2   :  { %1484 = vst [vmem:[#allocation1 + $0x21] ss:$4 sm:$0xff] %v19710_v58 }
 0x1e3   :  { %1485 = vst [vmem:[#allocation1 + $0x22] ss:$4 sm:$0xff] %v19711_v59 }
 0x1e4   :  { %1486 = vst [vmem:[#allocation1 + $0x23] ss:$4 sm:$0xff] %v15432_v61 }
 0x1e6   :  { %v1762_v15 = vld.sshfl [vmem:[#allocation1] sm:$0xff pattern:$0x73625140] }
 0x1e7   :  { %1764 = vst [vmem:[#allocation1] ss:$4 sm:$0xff] %v14926_v53  ;;  %11611 = vmatmul.msk.bf16.vlgmr.msra.gmra.mxu2 %vm1262_vm4, %v1762_v15 }
 0x1e8   :  { %1765 = vst [vmem:[#allocation1 + $0x1] ss:$4 sm:$0xff] %v15010_v18 }
 0x1e9   :  { %1766 = vst [vmem:[#allocation1 + $0x2] ss:$4 sm:$0xff] %v15013_v21  ;;  %v1695_v21 = vpop.permute.xlu0 %1694 }
 0x1ea   :  { %1767 = vst [vmem:[#allocation1 + $0x3] ss:$4 sm:$0xff] %v15016_v57 }
 0x1eb   :  { %v15670_v60 = vld.sshfl [vmem:[#allocation1 + $0x20] sm:$0xff pattern:$0x73625140] }
 0x1ec   :  { %19712 = vst [vmem:[#allocation46_spill] sm:$0xff] %v15670_v60  ;;  %11561 = vmatmul.msk.bf16.gmra.mxu1 %vm1262_vm4, %v15539_v10  ;;  %v1715_v10 = vsel %vm726_vm0, %v15329_v17, %v1689_v37 }
 0x1ed   :  { %1493 = vst [vmem:[#allocation1 + $0x20] ss:$4 sm:$0xff] %v19713_v47 }
 0x1ee   :  { %1494 = vst [vmem:[#allocation1 + $0x21] ss:$4 sm:$0xff] %v15409_v49 }
 0x1ef   :  { %1495 = vst [vmem:[#allocation1 + $0x22] ss:$4 sm:$0xff] %v19714_v4 }
 0x1f0   :  { %1496 = vst [vmem:[#allocation1 + $0x23] ss:$4 sm:$0xff] %v15453_v62 }
 0x1f1   :  { %v1772_v15 = vld.sshfl [vmem:[#allocation1] sm:$0xff pattern:$0x73625140] }
 0x1f2   :  { %1774 = vst [vmem:[#allocation1] ss:$4 sm:$0xff] %v14975_v38  ;;  %v1705_v38 = vpop.permute.xlu1 %1704 }
 0x1f3   :  { %1775 = vst [vmem:[#allocation1 + $0x1] ss:$4 sm:$0xff] %v15026_v24 }
 0x1f4   :  { %1776 = vst [vmem:[#allocation1 + $0x2] ss:$4 sm:$0xff] %v15136_v7  ;;  %v15693_v7 = vld [vmem:[%s19331_s0 + $0xf0] sm:$0xff] }
 0x1f5   :  { %1777 = vst [vmem:[#allocation1 + $0x3] ss:$4 sm:$0xff] %v15143_v23  ;;  %v2067_v20 = vshrl.u32 %v15693_v7, 16  ;;  %v2069_v18 = vshll.u32 %v15693_v7, 16 }
 0x1f6   :  { %19716 = vst [vmem:[#allocation49_spill] sm:$0xff] %v15693_v7 }
 0x1f7   :  { %v15682_v60 = vld.sshfl [vmem:[#allocation1 + $0x20] sm:$0xff pattern:$0x73625140]  ;;  %v2086_v17 = vrot.slane %v2067_v20, 1  ;;  %v2087_v37 = vrot.slane %v2069_v18, 2 }
 0x1f8   :  { %19715 = vst [vmem:[#allocation51_spill] sm:$0xff] %v15682_v60  ;;  %v1719_v60 = vsel %vm775_vm2, %v1715_v10, %v1695_v21 }
 0x1f9   :  { %1755 = vst [vmem:[#allocation1 + $0x20] ss:$4 sm:$0xff] %v14899_v9  ;;  %v1723_v53 = vsel %vm824_vm1, %v1719_v60, %v1705_v38  ;;  %v2088_v21 = vor.u32 %v2087_v37, %v2086_v17  ;;  %v15733_v60 = vld [vmem:[%s19331_s0 + $0x78] sm:$0xff]  ;;  %v2071_v37 = vrot.slane %v2069_v18, 1 }
 0x1fa   :  { %1757 = vst [vmem:[#allocation1 + $0x21] ss:$4 sm:$0xff] %v14902_v63  ;;  %v19420_v17 = vshll.u32 %v15733_v60, 16 }
 0x1fb   :  { %1759 = vst [vmem:[#allocation1 + $0x22] ss:$4 sm:$0xff] %v14920_v50  ;;  %2091 = vrot.lane.b32.xlu1 %v2088_v21, %s14578_s8  ;;  %v19421_v21 = vshrl.u32 %v15733_v60, 16 }
 0x1fc   :  { %1761 = vst [vmem:[#allocation1 + $0x23] ss:$4 sm:$0xff] %v14923_v52  ;;  %v15695_v24 = vld.sshfl [vmem:[#allocation1] sm:$0xff pattern:$0x73625140]  ;;  %v1711_v52 = vpop.permute.xlu2 %1710  ;;  %11562 = vmatmul.msk.bf16.gmra.mxu1 %vm1262_vm4, %v15587_v46 }
 0x1fd   :  { %1784 = vst [vmem:[#allocation1] ss:$4 sm:$0xff] %v19688_v33  ;;  %v2078_v33 = vrot.slane %v15693_v7, 1 }
 0x1fe   :  { %1785 = vst [vmem:[#allocation1 + $0x1] ss:$4 sm:$0xff] %v19689_v31 }
 0x1ff   :  { %1786 = vst [vmem:[#allocation1 + $0x2] ss:$4 sm:$0xff] %v15175_v2  ;;  %2081 = vrot.lane.b32.xlu0 %v2078_v33, %s14575_s25  ;;  %v15711_v2 = vsel %vm873_vm3, %v1723_v53, %v1711_v52  ;;  %v19719_v52 = vld [vmem:[#allocation33_spill] sm:$0xff] }
 0x200   :  { %1787 = vst [vmem:[#allocation1 + $0x3] ss:$4 sm:$0xff] %v15156_v55  ;;  %v15719_v38 = vrot.slane %v15711_v2, 2  ;;  %v15724_v33 = vrot.slane %v15711_v2, 4 }
 0x201   :  { %19717 = vst [vmem:[#allocation48_spill] sm:$0xff] %v15711_v2 }
 0x202   :  { %19718 = vst [vmem:[#allocation50_spill] sm:$0xff] %v15719_v38 }
 0x203   :  { %v1763_v10 = vld.sshfl [vmem:[#allocation1 + $0x20] sm:$0xff pattern:$0x73625140]  ;;  %19720 = vst [vmem:[#allocation54_spill] sm:$0xff] %v15733_v60 }
 0x204   :  { %1768 = vst [vmem:[#allocation1 + $0x20] ss:$4 sm:$0xff] %v14982_v22  ;;  %11612 = vmatmul.msk.bf16.gmra.mxu2 %vm1262_vm4, %v1763_v10  ;;  %v2449_v10 = vrot.slane %v19420_v17, 1  ;;  %v13923_v17 = vld [vmem:[%s19332_s1 + $0x98] sm:$0xff] }
 0x205   :  { %1769 = vst [vmem:[#allocation1 + $0x21] ss:$4 sm:$0xff] %v14987_v12  ;;  %2302 = vmatpush.bf16.msra.mxu3 %v13923_v17  ;;  %v13926_v17 = vld [vmem:[%s19332_s1 + $0xb0] sm:$0xff] }
 0x206   :  { %1770 = vst [vmem:[#allocation1 + $0x22] ss:$4 sm:$0xff] %v14990_v54  ;;  %v2450_v18 = vor.u32 %v2449_v10, %v19421_v21  ;;  %v19722_v10 = vld [vmem:[#allocation34_spill] sm:$0xff]  ;;  %2689 = vmatpush.bf16.msrb.mxu0 %v13926_v17  ;;  %v15817_v17 = vpop.f32.mrf.mxu1 }
 0x207   :  { %1771 = vst [vmem:[#allocation1 + $0x23] ss:$4 sm:$0xff] %v14965_v36  ;;  %v15721_v46 = vld.sshfl [vmem:[#allocation1] sm:$0xff pattern:$0x73625140] }
 0x208   :  { %1794 = vst [vmem:[#allocation1] ss:$4 sm:$0xff] %v19719_v52  ;;  %2458 = vrot.lane.b32.xlu0 %v2450_v18, %s14576_s28 }
 0x209   :  { %1795 = vst [vmem:[#allocation1 + $0x1] ss:$4 sm:$0xff] %v15711_v2  ;;  %v2072_v2 = vor.u32 %v2071_v37, %v2067_v20  ;;  %v2462_v20 = vrot.slane %v15733_v60, 1  ;;  %v19721_v37 = vld [vmem:[#allocation32_spill] sm:$0xff] }
 0x20a   :  { %1797 = vst [vmem:[#allocation1 + $0x2] ss:$4 sm:$0xff] %v15719_v38 }
 0x20b   :  { %1799 = vst [vmem:[#allocation1 + $0x3] ss:$4 sm:$0xff] %v15724_v33  ;;  %2075 = vrot.lane.b32.xlu2 %v2072_v2, %s14576_s28  ;;  %2464 = vrot.lane.b32.xlu1 %v2462_v20, %s14575_s25  ;;  %v2478_v2 = vrot.slane %v15733_v60, 2  ;;  %v13922_v20 = vld [vmem:[%s19332_s1 + $0x90] sm:$0xff] }
 0x20c   :  { %11563 = vmatmul.msk.bf16.gmra.mxu1 %vm1262_vm4, %v15551_v8  ;;  %2303 = vmatpush.bf16.msra.mxu3 %v13922_v20  ;;  %v19726_v20 = vld [vmem:[#allocation47_spill] sm:$0xff] }
 0x20e   :  { %v1773_v53 = vld.sshfl [vmem:[#allocation1 + $0x20] sm:$0xff pattern:$0x73625140] }
 0x20f   :  { %1778 = vst [vmem:[#allocation1 + $0x20] ss:$4 sm:$0xff] %v15146_v26 }
 0x210   :  { %1779 = vst [vmem:[#allocation1 + $0x21] ss:$4 sm:$0xff] %v15055_v40  ;;  %2480 = vrot.lane.b32.xlu0 %v2478_v2, %s14577_s29  ;;  %v19723_v2 = vld [vmem:[#allocation43_spill] sm:$0xff] }
 0x211   :  { %1780 = vst [vmem:[#allocation1 + $0x22] ss:$4 sm:$0xff] %v15059_v28 }
 0x212   :  { %1781 = vst [vmem:[#allocation1 + $0x23] ss:$4 sm:$0xff] %v15062_v30  ;;  %v15745_v38 = vld.sshfl [vmem:[#allocation1] sm:$0xff pattern:$0x73625140] }
 0x213   :  { %1806 = vst [vmem:[#allocation1] ss:$4 sm:$0xff] %v19699_v3 }
 0x214   :  { %11613 = vmatmul.msk.bf16.gmra.mxu2 %vm1262_vm4, %v1772_v15  ;;  %1807 = vst [vmem:[#allocation1 + $0x1] ss:$4 sm:$0xff] %v19700_v39  ;;  %v2094_v15 = vrot.slane %v15693_v7, 2  ;;  %v13919_v7 = vld [vmem:[%s19332_s1 + $0x78] sm:$0xff] }
 0x215   :  { %1808 = vst [vmem:[#allocation1 + $0x2] ss:$4 sm:$0xff] %v15294_v34 }
 0x216   :  { %1809 = vst [vmem:[#allocation1 + $0x3] ss:$4 sm:$0xff] %v15309_v1  ;;  %2097 = vrot.lane.b32.xlu2 %v2094_v15, %s14577_s29 }
 0x219   :  { %v15756_v8 = vld.sshfl [vmem:[#allocation1 + $0x20] sm:$0xff pattern:$0x73625140] }
 0x21a   :  { %1788 = vst [vmem:[#allocation1 + $0x20] ss:$4 sm:$0xff] %v15185_v35 }
 0x21b   :  { %1789 = vst [vmem:[#allocation1 + $0x21] ss:$4 sm:$0xff] %v15159_v19 }
 0x21c   :  { %1790 = vst [vmem:[#allocation1 + $0x22] ss:$4 sm:$0xff] %v19721_v37  ;;  %11564 = vmatmul.msk.bf16.gmra.mxu1 %vm1262_vm4, %v15607_v13  ;;  %v13921_v13 = vld [vmem:[%s19332_s1 + $0x88] sm:$0xff] }
 0x21d   :  { %1791 = vst [vmem:[#allocation1 + $0x23] ss:$4 sm:$0xff] %v19722_v10  ;;  %v15767_v18 = vld.sshfl [vmem:[#allocation1] sm:$0xff pattern:$0x73625140]  ;;  %2304 = vmatpush.bf16.msra.mxu3 %v13921_v13 }
 0x21e   :  { %1816 = vst [vmem:[#allocation1] ss:$4 sm:$0xff] %v19705_v45 }
 0x21f   :  { %1817 = vst [vmem:[#allocation1 + $0x1] ss:$4 sm:$0xff] %v19706_v14 }
 0x220   :  { %1818 = vst [vmem:[#allocation1 + $0x2] ss:$4 sm:$0xff] %v19694_v41 }
 0x221   :  { %1819 = vst [vmem:[#allocation1 + $0x3] ss:$4 sm:$0xff] %v15338_v43 }
 0x224   :  { %v15782_v15 = vld.sshfl [vmem:[#allocation1 + $0x20] sm:$0xff pattern:$0x73625140]  ;;  %11614 = vmatmul.msk.bf16.gmra.mxu2 %vm1262_vm4, %v1773_v53  ;;  %v19725_v53 = vld [vmem:[#allocation52_spill] sm:$0xff] }
 0x225   :  { %1800 = vst [vmem:[#allocation1 + $0x20] ss:$4 sm:$0xff] %v15212_v51  ;;  %v13920_v51 = vld [vmem:[%s19332_s1 + $0x80] sm:$0xff] }
 0x226   :  { %1801 = vst [vmem:[#allocation1 + $0x21] ss:$4 sm:$0xff] %v19723_v2  ;;  %2305 = vmatpush.bf16.msra.mxu3 %v13920_v51  ;;  %v19727_v2 = vld [vmem:[#allocation41_spill] sm:$0xff]  ;;  %v19729_v51 = vld [vmem:[#allocation72_spill] sm:$0xff] }
 0x227   :  { %1802 = vst [vmem:[#allocation1 + $0x22] ss:$4 sm:$0xff] %v19697_v5 }
 0x228   :  { %1803 = vst [vmem:[#allocation1 + $0x23] ss:$4 sm:$0xff] %v19698_v32  ;;  %v15795_v21 = vld.sshfl [vmem:[#allocation1] sm:$0xff pattern:$0x73625140] }
 0x229   :  { %19724 = vst [vmem:[#allocation56_spill] sm:$0xff] %v15795_v21  ;;  %v19730_v21 = vld [vmem:[#allocation73_spill] sm:$0xff] }
 0x22a   :  { %1826 = vst [vmem:[#allocation1] ss:$4 sm:$0xff] %v19711_v59  ;;  %2306 = vmatpush.bf16.msra.mxu3 %v13919_v7  ;;  %v1691_v7 = vpop.permute.xlu0 %1690 }
 0x22b   :  { %1827 = vst [vmem:[#allocation1 + $0x1] ss:$4 sm:$0xff] %v15432_v61  ;;  %v15839_v61 = vpop.f32.mrf.mxu1 }
 0x22c   :  { %1828 = vst [vmem:[#allocation1 + $0x2] ss:$4 sm:$0xff] %v15435_v16  ;;  %11565 = vmatmul.msk.bf16.gmra.mxu1 %vm1262_vm4, %v19727_v2 }
 0x22d   :  { %1829 = vst [vmem:[#allocation1 + $0x3] ss:$4 sm:$0xff] %v15438_v11 }
 0x22f   :  { %v15804_v5 = vld.sshfl [vmem:[#allocation1 + $0x20] sm:$0xff pattern:$0x73625140] }
 0x230   :  { %1810 = vst [vmem:[#allocation1 + $0x20] ss:$4 sm:$0xff] %v19725_v53 }
 0x231   :  { %1811 = vst [vmem:[#allocation1 + $0x21] ss:$4 sm:$0xff] %v19726_v20 }
 0x232   :  { %1812 = vst [vmem:[#allocation1 + $0x22] ss:$4 sm:$0xff] %v19703_v25 }
 0x233   :  { %1813 = vst [vmem:[#allocation1 + $0x23] ss:$4 sm:$0xff] %v19704_v44 }
 0x234   :  { %v15812_v13 = vld.sshfl [vmem:[#allocation1] sm:$0xff pattern:$0x73625140]  ;;  %11615 = vmatmul.msk.bf16.gmra.mxu2 %vm1262_vm4, %v15695_v24  ;;  %v19733_v24 = vshrl.u32 %v15733_v60, 16 }
 0x235   :  { %19728 = vst [vmem:[#allocation57_spill] sm:$0xff] %v15812_v13  ;;  %v15828_v13 = vpop.f32.mrf.mxu0 }
 0x236   :  { %1836 = vst [vmem:[#allocation1] ss:$4 sm:$0xff] %v19714_v4 }
 0x237   :  { %1837 = vst [vmem:[#allocation1 + $0x1] ss:$4 sm:$0xff] %v15453_v62  ;;  %v2468_v62 = vrot.slane %v19733_v24, 1  ;;  %v1713_v24 = vpop.permute.xlu0 %1712 }
 0x238   :  { %1838 = vst [vmem:[#allocation1 + $0x2] ss:$4 sm:$0xff] %v19729_v51  ;;  %v19734_v51 = vshll.u32 %v15733_v60, 16 }
 0x239   :  { %1839 = vst [vmem:[#allocation1 + $0x3] ss:$4 sm:$0xff] %v19730_v21 }
 0x23a   :  { %v15822_v2 = vld.sshfl [vmem:[#allocation1 + $0x20] sm:$0xff pattern:$0x73625140]  ;;  %19732 = vst [vmem:[#allocation63_spill] sm:$0xff] %v15828_v13  ;;  %v2469_v4 = vrot.slane %v19734_v51, 2 }
 0x23b   :  { %19731 = vst [vmem:[#allocation58_spill] sm:$0xff] %v15822_v2 }
 0x23c   :  { %1820 = vst [vmem:[#allocation1 + $0x20] ss:$4 sm:$0xff] %v15347_v6  ;;  %v2470_v2 = vor.u32 %v2469_v4, %v2468_v62  ;;  %11566 = vmatmul.msk.bf16.gmra.mxu1 %vm1262_vm4, %v15631_v0  ;;  %v1697_v4 = vpop.permute.xlu1 %1696  ;;  %v15858_v0 = vpop.f32.mrf.mxu1 }
 0x23d   :  { %1821 = vst [vmem:[#allocation1 + $0x21] ss:$4 sm:$0xff] %v15350_v42  ;;  %v15854_v51 = vpop.f32.mrf.mxu0 }
 0x23e   :  { %1822 = vst [vmem:[#allocation1 + $0x22] ss:$4 sm:$0xff] %v19709_v56  ;;  %2474 = vrot.lane.b32.xlu2 %v2470_v2, %s14578_s8  ;;  %v1707_v2 = vpop.permute.xlu2 %1706 }
 0x23f   :  { %1823 = vst [vmem:[#allocation1 + $0x23] ss:$4 sm:$0xff] %v19710_v58 }
 0x240   :  { %v15837_v16 = vld.sshfl [vmem:[#allocation1] sm:$0xff pattern:$0x73625140]  ;;  %19737 = vst [vmem:[#allocation43_spill] sm:$0xff] %v15854_v51 }
 0x241   :  { %19735 = vst [vmem:[#allocation33_spill] sm:$0xff] %v15837_v16  ;;  %v19743_v51 = vld [vmem:[#allocation74_spill] sm:$0xff] }
 0x242   :  { %2132 = vst [vmem:[#allocation1] ss:$4 sm:$0xff] %v14895_v29  ;;  %v1717_v29 = vsel %vm726_vm0, %v15501_v48, %v1691_v7  ;;  %v13925_v7 = vld [vmem:[%s19332_s1 + $0xa8] sm:$0xff] }
 0x243   :  { %2134 = vst [vmem:[#allocation1 + $0x1] ss:$4 sm:$0xff] %v14899_v9  ;;  %v19738_v9 = vld [vmem:[#allocation62_spill] sm:$0xff]  ;;  %2690 = vmatpush.bf16.msrb.mxu0 %v13925_v7 }
 0x244   :  { %2136 = vst [vmem:[#allocation1 + $0x2] ss:$4 sm:$0xff] %v14902_v63  ;;  %11616 = vmatmul.msk.bf16.gmra.mxu2 %vm1262_vm4, %v15756_v8  ;;  %v1721_v63 = vsel %vm775_vm2, %v1717_v29, %v1697_v4  ;;  %v15874_v29 = vld [vmem:[%s19331_s0 + $0xf8] sm:$0xff]  ;;  %v15889_v13 = vpop.f32.mrf.mxu1  ;;  %v2074_v60 = vpop.permute.xlu1 %2073 }
 0x245   :  { %2138 = vst [vmem:[#allocation1 + $0x3] ss:$4 sm:$0xff] %v14920_v50  ;;  %v1725_v48 = vsel %vm824_vm1, %v1721_v63, %v1707_v2  ;;  %v2454_v63 = vshll.u32 %v15874_v29, 16  ;;  %v15881_v2 = vpop.f32.mrf.mxu0  ;;  %v19744_v7 = vld [vmem:[#allocation82_spill] sm:$0xff] }
 0x246   :  { %v15850_v62 = vld.sshfl [vmem:[#allocation1 + $0x20] sm:$0xff pattern:$0x73625140]  ;;  %19739 = vst [vmem:[#allocation41_spill] sm:$0xff] %v15874_v29  ;;  %v15878_v4 = vsel %vm873_vm3, %v1725_v48, %v1713_v24 }
 0x247   :  { %19736 = vst [vmem:[#allocation34_spill] sm:$0xff] %v15850_v62  ;;  %v15886_v16 = vrot.slane %v15878_v4, 2  ;;  %v2452_v62 = vshrl.u32 %v15874_v29, 16  ;;  %v15895_v48 = vrot.slane %v15878_v4, 4 }
 0x248   :  { %1830 = vst [vmem:[#allocation1 + $0x20] ss:$4 sm:$0xff] %v15387_v27 }
 0x249   :  { %1831 = vst [vmem:[#allocation1 + $0x21] ss:$4 sm:$0xff] %v19738_v9 }
 0x24a   :  { %1832 = vst [vmem:[#allocation1 + $0x22] ss:$4 sm:$0xff] %v19713_v47 }
 0x24b   :  { %1833 = vst [vmem:[#allocation1 + $0x23] ss:$4 sm:$0xff] %v15409_v49 }
 0x24c   :  { %v2147_v8 = vld.sshfl [vmem:[#allocation1] sm:$0xff pattern:$0x73625140]  ;;  %19740 = vst [vmem:[#allocation83_spill] sm:$0xff] %v15878_v4  ;;  %11567 = vmatmul.msk.bf16.gmra.mxu1 %vm1262_vm4, %v19744_v7  ;;  %v2471_v7 = vrot.slane %v2452_v62, 1 }
 0x24d   :  { %2149 = vst [vmem:[#allocation1] ss:$4 sm:$0xff] %v15016_v57  ;;  %11667 = vmatmul.msk.bf16.vlgmr.msra.gmra.mxu3 %vm1262_vm4, %v2147_v8 }
 0x24e   :  { %2150 = vst [vmem:[#allocation1 + $0x1] ss:$4 sm:$0xff] %v14982_v22 }
 0x24f   :  { %2151 = vst [vmem:[#allocation1 + $0x2] ss:$4 sm:$0xff] %v14987_v12  ;;  %v2456_v12 = vrot.slane %v2454_v63, 1 }
 0x250   :  { %2152 = vst [vmem:[#allocation1 + $0x3] ss:$4 sm:$0xff] %v14990_v54 }
 0x251   :  { %19741 = vst [vmem:[#allocation84_spill] sm:$0xff] %v15881_v2  ;;  %v2457_v24 = vor.u32 %v2456_v12, %v2452_v62  ;;  %v15909_v12 = vpop.f32.mrf.mxu0  ;;  %v19750_v62 = vld [vmem:[#allocation26_spill] sm:$0xff] }
 0x252   :  { %v15883_v8 = vld.sshfl [vmem:[#allocation1 + $0x20] sm:$0xff pattern:$0x73625140]  ;;  %19745 = vst [vmem:[#allocation82_spill] sm:$0xff] %v15895_v48 }
 0x253   :  { %19742 = vst [vmem:[#allocation85_spill] sm:$0xff] %v15883_v8  ;;  %2460 = vrot.lane.b32.xlu1 %v2457_v24, %s14576_s28  ;;  %v2472_v8 = vrot.slane %v2454_v63, 2  ;;  %v2479_v24 = vrot.slane %v15874_v29, 2  ;;  %v19751_v63 = vld [vmem:[#allocation80_spill] sm:$0xff] }
 0x254   :  { %1840 = vst [vmem:[#allocation1 + $0x20] ss:$4 sm:$0xff] %v19743_v51  ;;  %11617 = vmatmul.msk.bf16.gmra.mxu2 %vm1262_vm4, %v15721_v46  ;;  %v15913_v46 = vpop.f32.mrf.mxu1 }
 0x255   :  { %1841 = vst [vmem:[#allocation1 + $0x21] ss:$4 sm:$0xff] %v15878_v4  ;;  %v2473_v22 = vor.u32 %v2472_v8, %v2471_v7  ;;  %v2080_v8 = vpop.permute.xlu2 %2079  ;;  %v19752_v7 = vld [vmem:[#allocation27_spill] sm:$0xff] }
 0x256   :  { %1843 = vst [vmem:[#allocation1 + $0x22] ss:$4 sm:$0xff] %v15886_v16 }
 0x257   :  { %1845 = vst [vmem:[#allocation1 + $0x23] ss:$4 sm:$0xff] %v15895_v48  ;;  %v15902_v2 = vld.sshfl [vmem:[#allocation1] sm:$0xff pattern:$0x73625140]  ;;  %v19748_v48 = vld [vmem:[#allocation21_spill] sm:$0xff]  ;;  %2476 = vrot.lane.b32.xlu0 %v2473_v22, %s14578_s8 }
 0x258   :  { %2159 = vst [vmem:[#allocation1] ss:$4 sm:$0xff] %v15143_v23  ;;  %v2090_v23 = vpop.permute.xlu0 %2089  ;;  %v19753_v22 = vld [vmem:[#allocation45_spill] sm:$0xff]  ;;  %s26_s8 = sshll.u32 %s19334_s3, 4  ;;  %s14581_s3 = smov [#allocation4]   ;;  %s27_s8 = int_to_ptr.hbm [resolvable:$true] %s26_s8 }
 0x259   :  { %2160 = vst [vmem:[#allocation1 + $0x1] ss:$4 sm:$0xff] %v15146_v26  ;;  %v19749_v26 = vld [vmem:[#allocation22_spill] sm:$0xff]  ;;  %31 = dma.hbm_to_vmem [thread:$0]  %s27_s8, 25600, %s29_s16, [#allocation5] }
 0x25a   :  { %2161 = vst [vmem:[#allocation1 + $0x2] ss:$4 sm:$0xff] %v15055_v40  ;;  %45 = dma.hbm_to_vmem [thread:$0]  %s41_s19, 25600, %s43_s21, [#allocation5 + $0x1] }
 0x25b   :  { %2162 = vst [vmem:[#allocation1 + $0x3] ss:$4 sm:$0xff] %v15059_v28  ;;  %2482 = vrot.lane.b32.xlu1 %v2479_v24, %s14577_s29  ;;  %v15932_v24 = vpop.f32.mrf.mxu0  ;;  %s56_s26 = sshll.u32 %s14581_s3, 4  ;;  %s57_s26 = int_to_ptr.vmem [resolvable:$true] %s56_s26 }
 0x25c   :  { %19746 = vst [vmem:[#allocation86_spill] sm:$0xff] %v15909_v12  ;;  %v2100_v12 = vsel %vm726_vm0, %v19751_v63, %v2074_v60  ;;  %11568 = vmatmul.msk.bf16.gmra.mxu1 %vm1262_vm4, %v19753_v22  ;;  %v2096_v63 = vpop.permute.xlu1 %2095  ;;  %v19755_v22 = vld [vmem:[#allocation23_spill] sm:$0xff]  ;;  %59 = dma.hbm_to_vmem [thread:$0]  %s55_s24, 16384, %s57_s26, [#allocation5 + $0x2] }
 0x25d   :  { %v2104_v40 = vsel %vm775_vm2, %v2100_v12, %v2080_v8  ;;  %19754 = vst [vmem:[#allocation21_spill] sm:$0xff] %v15932_v24  ;;  %v19756_v24 = vld [vmem:[#allocation29_spill] sm:$0xff] }
 0x25e   :  { %v15911_v57 = vld.sshfl [vmem:[#allocation1 + $0x20] sm:$0xff pattern:$0x73625140]  ;;  %v2108_v60 = vsel %vm824_vm1, %v2104_v40, %v2090_v23 }
 0x25f   :  { %19747 = vst [vmem:[#allocation87_spill] sm:$0xff] %v15911_v57  ;;  %v15942_v8 = vsel %vm873_vm3, %v2108_v60, %v2096_v63  ;;  %v19758_v23 = vld [vmem:[#allocation35_spill] sm:$0xff] }
 0x260   :  { %2140 = vst [vmem:[#allocation1 + $0x20] ss:$4 sm:$0xff] %v19748_v48  ;;  %v13924_v60 = vld [vmem:[%s19332_s1 + $0xa0] sm:$0xff]  ;;  %v19445_v63 = vrot.slane %v15942_v8, 4 }
 0x261   :  { %2142 = vst [vmem:[#allocation1 + $0x21] ss:$4 sm:$0xff] %v19749_v26  ;;  %2691 = vmatpush.bf16.msrb.mxu0 %v13924_v60 }
 0x262   :  { %2144 = vst [vmem:[#allocation1 + $0x22] ss:$4 sm:$0xff] %v19750_v62  ;;  %v15924_v57 = vld.sshfl [vmem:[#allocation1] sm:$0xff pattern:$0x73625140] }
 0x263   :  { %2146 = vst [vmem:[#allocation1 + $0x23] ss:$4 sm:$0xff] %v19752_v7 }
 0x264   :  { %2169 = vst [vmem:[#allocation1] ss:$4 sm:$0xff] %v15156_v55  ;;  %11618 = vmatmul.msk.bf16.gmra.mxu2 %vm1262_vm4, %v15782_v15  ;;  %v15938_v55 = vpop.f32.mrf.mxu1  ;;  %v19444_v15 = vrot.slane %v15942_v8, 2 }
 0x265   :  { %2170 = vst [vmem:[#allocation1 + $0x1] ss:$4 sm:$0xff] %v15185_v35 }
 0x266   :  { %2171 = vst [vmem:[#allocation1 + $0x2] ss:$4 sm:$0xff] %v15159_v19  ;;  %v19757_v19 = vld [vmem:[#allocation59_spill] sm:$0xff] }
 0x267   :  { %2172 = vst [vmem:[#allocation1 + $0x3] ss:$4 sm:$0xff] %v19721_v37  ;;  %v1575_v40 = vadd.f32 %v15817_v17, %v19757_v19  ;;  %v15963_v19 = vpop.f32.mrf.mxu0 }
 0x268   :  { %19759 = vst [vmem:[#allocation22_spill] sm:$0xff] %v15963_v19 }
 0x26a   :  { %v2148_v12 = vld.sshfl [vmem:[#allocation1 + $0x20] sm:$0xff pattern:$0x73625140]  ;;  %v1923_v37 = vpop.f32.mrf.mxu2 }
 0x26b   :  { %2153 = vst [vmem:[#allocation1 + $0x20] ss:$4 sm:$0xff] %v14965_v36  ;;  %11668 = vmatmul.msk.bf16.gmra.mxu3 %vm1262_vm4, %v2148_v12  ;;  %v2463_v12 = vrot.slane %v15874_v29, 1  ;;  %v15959_v7 = vadd.f32 %v1923_v37, %v1575_v40  ;;  %v19761_v37 = vld [vmem:[#allocation31_spill] sm:$0xff]  ;;  %v19762_v40 = vld [vmem:[#allocation40_spill] sm:$0xff] }
 0x26c   :  { %2154 = vst [vmem:[#allocation1 + $0x21] ss:$4 sm:$0xff] %v19755_v22  ;;  %v15969_v17 = vpop.f32.mrf.mxu1 }
 0x26d   :  { %2155 = vst [vmem:[#allocation1 + $0x22] ss:$4 sm:$0xff] %v19756_v24  ;;  %2466 = vrot.lane.b32.xlu2 %v2463_v12, %s14575_s25 }
 0x26e   :  { %2156 = vst [vmem:[#allocation1 + $0x23] ss:$4 sm:$0xff] %v19758_v23  ;;  %v15951_v35 = vld.sshfl [vmem:[#allocation1] sm:$0xff pattern:$0x73625140]  ;;  %v19760_v23 = vld [vmem:[#allocation53_spill] sm:$0xff] }
 0x26f   :  { %2179 = vst [vmem:[#allocation1] ss:$4 sm:$0xff] %v15724_v33  ;;  %11569 = vmatmul.msk.bf16.gmra.mxu1 %vm1262_vm4, %v19760_v23  ;;  %v15984_v12 = vpop.f32.mrf.mxu0 }
 0x270   :  { %2180 = vst [vmem:[#allocation1 + $0x1] ss:$4 sm:$0xff] %v15942_v8 }
 0x271   :  { %2182 = vst [vmem:[#allocation1 + $0x2] ss:$4 sm:$0xff] %v19444_v15  ;;  %v19764_v15 = vld [vmem:[#allocation48_spill] sm:$0xff] }
 0x272   :  { %2184 = vst [vmem:[#allocation1 + $0x3] ss:$4 sm:$0xff] %v19445_v63  ;;  %v19765_v63 = vld [vmem:[#allocation50_spill] sm:$0xff] }
 0x273   :  { %19763 = vst [vmem:[#allocation26_spill] sm:$0xff] %v15984_v12  ;;  %v19766_v12 = vld [vmem:[#allocation46_spill] sm:$0xff] }
 0x274   :  { %11619 = vmatmul.msk.bf16.gmra.mxu2 %vm1262_vm4, %v15745_v38  ;;  %v15988_v23 = vpop.f32.mrf.mxu1 }
 0x275   :  { %v2158_v29 = vld.sshfl [vmem:[#allocation1 + $0x20] sm:$0xff pattern:$0x73625140] }
 0x276   :  { %2163 = vst [vmem:[#allocation1 + $0x20] ss:$4 sm:$0xff] %v15062_v30 }
 0x277   :  { %2164 = vst [vmem:[#allocation1 + $0x21] ss:$4 sm:$0xff] %v19761_v37  ;;  %v16001_v19 = vpop.f32.mrf.mxu0 }
 0x278   :  { %2165 = vst [vmem:[#allocation1 + $0x22] ss:$4 sm:$0xff] %v19689_v31 }
 0x279   :  { %2166 = vst [vmem:[#allocation1 + $0x23] ss:$4 sm:$0xff] %v19762_v40  ;;  %v15979_v60 = vld.sshfl [vmem:[#allocation1] sm:$0xff pattern:$0x73625140] }
 0x27a   :  { %2191 = vst [vmem:[#allocation1] ss:$4 sm:$0xff] %v15309_v1 }
 0x27b   :  { %11669 = vmatmul.msk.bf16.gmra.mxu3 %vm1262_vm4, %v15902_v2  ;;  %2192 = vst [vmem:[#allocation1 + $0x1] ss:$4 sm:$0xff] %v19725_v53 }
 0x27c   :  { %2193 = vst [vmem:[#allocation1 + $0x2] ss:$4 sm:$0xff] %v19726_v20  ;;  %v16005_v20 = vpop.f32.mrf.mxu1 }
 0x27d   :  { %2194 = vst [vmem:[#allocation1 + $0x3] ss:$4 sm:$0xff] %v19703_v25 }
 0x27e   :  { %19767 = vst [vmem:[#allocation80_spill] sm:$0xff] %v16001_v19 }
 0x27f   :  { %11570 = vmatmul.msk.bf16.gmra.mxu1 %vm1262_vm4, %v19766_v12  ;;  %v16018_v12 = vpop.f32.mrf.mxu0 }
 0x280   :  { %v15991_v38 = vld.sshfl [vmem:[#allocation1 + $0x20] sm:$0xff pattern:$0x73625140]  ;;  %19768 = vst [vmem:[#allocation45_spill] sm:$0xff] %v16018_v12 }
 0x281   :  { %2173 = vst [vmem:[#allocation1 + $0x20] ss:$4 sm:$0xff] %v19722_v10 }
 0x282   :  { %2174 = vst [vmem:[#allocation1 + $0x21] ss:$4 sm:$0xff] %v19719_v52 }
 0x283   :  { %2175 = vst [vmem:[#allocation1 + $0x22] ss:$4 sm:$0xff] %v19764_v15 }
 0x284   :  { %2176 = vst [vmem:[#allocation1 + $0x23] ss:$4 sm:$0xff] %v19765_v63  ;;  %v15997_v2 = vld.sshfl [vmem:[#allocation1] sm:$0xff pattern:$0x73625140]  ;;  %11620 = vmatmul.msk.bf16.gmra.mxu2 %vm1262_vm4, %v15804_v5  ;;  %v19770_v5 = vld [vmem:[#allocation61_spill] sm:$0xff] }
 0x285   :  { %2201 = vst [vmem:[#allocation1] ss:$4 sm:$0xff] %v15338_v43 }
 0x286   :  { %2202 = vst [vmem:[#allocation1 + $0x1] ss:$4 sm:$0xff] %v15347_v6 }
 0x287   :  { %2203 = vst [vmem:[#allocation1 + $0x2] ss:$4 sm:$0xff] %v15350_v42  ;;  %v16022_v42 = vpop.f32.mrf.mxu1 }
 0x288   :  { %2204 = vst [vmem:[#allocation1 + $0x3] ss:$4 sm:$0xff] %v19709_v56 }
 0x28b   :  { %v16011_v53 = vld.sshfl [vmem:[#allocation1 + $0x20] sm:$0xff pattern:$0x73625140]  ;;  %11670 = vmatmul.msk.bf16.gmra.mxu3 %vm1262_vm4, %v2158_v29 }
 0x28c   :  { %2186 = vst [vmem:[#allocation1 + $0x21] ss:$4 sm:$0xff] %v19699_v3  ;;  %v1577_v3 = vadd.f32 %v15839_v61, %v19770_v5  ;;  %v16041_v61 = vpop.f32.mrf.mxu0 }
 0x28d   :  { %2185 = vst [vmem:[#allocation1 + $0x20] ss:$4 sm:$0xff] %v19698_v32  ;;  %v1925_v32 = vpop.f32.mrf.mxu2 }
 0x28e   :  { %2187 = vst [vmem:[#allocation1 + $0x22] ss:$4 sm:$0xff] %v19700_v39  ;;  %v19771_v39 = vld [vmem:[#allocation44_spill] sm:$0xff]  ;;  %v16034_v12 = vadd.f32 %v1925_v32, %v1577_v3 }
 0x28f   :  { %2188 = vst [vmem:[#allocation1 + $0x23] ss:$4 sm:$0xff] %v15294_v34  ;;  %v16020_v19 = vld.sshfl [vmem:[#allocation1] sm:$0xff pattern:$0x73625140]  ;;  %11571 = vmatmul.msk.bf16.gmra.mxu1 %vm1262_vm4, %v19771_v39  ;;  %v16044_v5 = vpop.f32.mrf.mxu1 }
 0x290   :  { %19769 = vst [vmem:[#allocation23_spill] sm:$0xff] %v16020_v19 }
 0x291   :  { %2211 = vst [vmem:[#allocation1] ss:$4 sm:$0xff] %v15438_v11 }
 0x292   :  { %2212 = vst [vmem:[#allocation1 + $0x1] ss:$4 sm:$0xff] %v15387_v27 }
 0x293   :  { %2213 = vst [vmem:[#allocation1 + $0x2] ss:$4 sm:$0xff] %v19738_v9 }
 0x294   :  { %2214 = vst [vmem:[#allocation1 + $0x3] ss:$4 sm:$0xff] %v19713_v47  ;;  %11621 = vmatmul.msk.bf16.gmra.mxu2 %vm1262_vm4, %v15767_v18  ;;  %v19774_v18 = vld [vmem:[#allocation65_spill] sm:$0xff] }
 0x295   :  { %19772 = vst [vmem:[#allocation29_spill] sm:$0xff] %v16041_v61  ;;  %v1580_v32 = vadd.f32 %v15858_v0, %v19774_v18  ;;  %v1928_v61 = vpop.f32.mrf.mxu2  ;;  %v19781_v18 = vld [vmem:[#allocation66_spill] sm:$0xff] }
 0x296   :  { %v16032_v29 = vld.sshfl [vmem:[#allocation1 + $0x20] sm:$0xff pattern:$0x73625140] }
 0x297   :  { %2195 = vst [vmem:[#allocation1 + $0x20] ss:$4 sm:$0xff] %v19704_v44  ;;  %v16059_v19 = vadd.f32 %v1928_v61, %v1580_v32  ;;  %v1582_v61 = vadd.f32 %v15889_v13, %v19781_v18  ;;  %v2076_v32 = vpop.permute.xlu2 %2075  ;;  %v2082_v13 = vpop.permute.xlu0 %2081 }
 0x298   :  { %2196 = vst [vmem:[#allocation1 + $0x21] ss:$4 sm:$0xff] %v19705_v45 }
 0x299   :  { %2197 = vst [vmem:[#allocation1 + $0x22] ss:$4 sm:$0xff] %v19706_v14 }
 0x29a   :  { %2198 = vst [vmem:[#allocation1 + $0x23] ss:$4 sm:$0xff] %v19694_v41 }
 0x29b   :  { %11671 = vmatmul.msk.bf16.gmra.mxu3 %vm1262_vm4, %v15924_v57  ;;  %v16048_v3 = vld.sshfl [vmem:[#allocation1] sm:$0xff pattern:$0x73625140]  ;;  %v16062_v57 = vpop.f32.mrf.mxu0 }
 0x29c   :  { %19773 = vst [vmem:[#allocation59_spill] sm:$0xff] %v16048_v3  ;;  %v19777_v3 = vld [vmem:[#allocation67_spill] sm:$0xff] }
 0x29d   :  { %2221 = vst [vmem:[#allocation1] ss:$4 sm:$0xff] %v19730_v21  ;;  %v19779_v21 = vld [vmem:[#allocation51_spill] sm:$0xff] }
 0x29e   :  { %2222 = vst [vmem:[#allocation1 + $0x1] ss:$4 sm:$0xff] %v19743_v51  ;;  %v19778_v51 = vld [vmem:[#allocation68_spill] sm:$0xff] }
 0x29f   :  { %2223 = vst [vmem:[#allocation1 + $0x2] ss:$4 sm:$0xff] %v15878_v4  ;;  %v16066_v4 = vpop.f32.mrf.mxu1  ;;  %11572 = vmatmul.msk.bf16.gmra.mxu1 %vm1262_vm4, %v19779_v21  ;;  %v2098_v27 = vpop.permute.xlu2 %2097 }
 0x2a0   :  { %2224 = vst [vmem:[#allocation1 + $0x3] ss:$4 sm:$0xff] %v15886_v16 }
 0x2a1   :  { %v16056_v39 = vld.sshfl [vmem:[#allocation1 + $0x20] sm:$0xff pattern:$0x73625140]  ;;  %19776 = vst [vmem:[#allocation31_spill] sm:$0xff] %v16062_v57 }
 0x2a2   :  { %19775 = vst [vmem:[#allocation53_spill] sm:$0xff] %v16056_v39  ;;  %v19782_v57 = vld [vmem:[#allocation58_spill] sm:$0xff]  ;;  %v1930_v39 = vpop.f32.mrf.mxu2 }
 0x2a3   :  { %2205 = vst [vmem:[#allocation1 + $0x20] ss:$4 sm:$0xff] %v19710_v58  ;;  %v16080_v9 = vadd.f32 %v1930_v39, %v1582_v61  ;;  %v19787_v39 = vld [vmem:[#allocation70_spill] sm:$0xff]  ;;  %v19788_v61 = vld [vmem:[#allocation69_spill] sm:$0xff] }
 0x2a4   :  { %2206 = vst [vmem:[#allocation1 + $0x21] ss:$4 sm:$0xff] %v19711_v59  ;;  %11622 = vmatmul.msk.bf16.gmra.mxu2 %vm1262_vm4, %v19782_v57  ;;  %v19786_v57 = vld [vmem:[#allocation64_spill] sm:$0xff] }
 0x2a5   :  { %2207 = vst [vmem:[#allocation1 + $0x22] ss:$4 sm:$0xff] %v19777_v3 }
 0x2a6   :  { %2208 = vst [vmem:[#allocation1 + $0x23] ss:$4 sm:$0xff] %v19778_v51 }
 0x2a7   :  { %v16070_v0 = vld.sshfl [vmem:[#allocation1] sm:$0xff pattern:$0x73625140] }
 0x2a8   :  { %19780 = vst [vmem:[#allocation40_spill] sm:$0xff] %v16070_v0  ;;  %v19789_v0 = vld [vmem:[#allocation72_spill] sm:$0xff] }
 0x2a9   :  { %2517 = vst [vmem:[#allocation1] ss:$4 sm:$0xff] %v14920_v50  ;;  %v19783_v50 = vld [vmem:[#allocation49_spill] sm:$0xff] }
 0x2aa   :  { %2519 = vst [vmem:[#allocation1 + $0x1] ss:$4 sm:$0xff] %v19748_v48  ;;  %v2102_v21 = vsel %vm726_vm0, %v19783_v50, %v2076_v32  ;;  %v16089_v48 = vpop.f32.mrf.mxu0  ;;  %v1933_v50 = vpop.f32.mrf.mxu2 }
 0x2ab   :  { %2521 = vst [vmem:[#allocation1 + $0x2] ss:$4 sm:$0xff] %v19749_v26  ;;  %11672 = vmatmul.msk.bf16.gmra.mxu3 %vm1262_vm4, %v15991_v38  ;;  %v2106_v26 = vsel %vm775_vm2, %v2102_v21, %v2082_v13  ;;  %v1585_v38 = vadd.f32 %v15913_v46, %v19788_v61  ;;  %v19791_v61 = vld [vmem:[#allocation82_spill] sm:$0xff] }
 0x2ac   :  { %2523 = vst [vmem:[#allocation1 + $0x3] ss:$4 sm:$0xff] %v19750_v62  ;;  %v2092_v62 = vpop.permute.xlu1 %2091 }
 0x2ad   :  { %v16086_v18 = vld.sshfl [vmem:[#allocation1 + $0x20] sm:$0xff pattern:$0x73625140]  ;;  %19785 = vst [vmem:[#allocation50_spill] sm:$0xff] %v16089_v48  ;;  %v16100_v48 = vadd.f32 %v1933_v50, %v1585_v38  ;;  %v19792_v38 = vld [vmem:[#allocation56_spill] sm:$0xff] }
 0x2ae   :  { %19784 = vst [vmem:[#allocation48_spill] sm:$0xff] %v16086_v18  ;;  %v2110_v18 = vsel %vm824_vm1, %v2106_v26, %v2092_v62  ;;  %v19790_v26 = vld [vmem:[#allocation71_spill] sm:$0xff] }
 0x2af   :  { %2215 = vst [vmem:[#allocation1 + $0x20] ss:$4 sm:$0xff] %v15409_v49  ;;  %v16105_v21 = vsel %vm873_vm3, %v2110_v18, %v2098_v27  ;;  %v1587_v62 = vadd.f32 %v15938_v55, %v19790_v26 }
 0x2b0   :  { %2216 = vst [vmem:[#allocation1 + $0x21] ss:$4 sm:$0xff] %v19786_v57 }
 0x2b1   :  { %2217 = vst [vmem:[#allocation1 + $0x22] ss:$4 sm:$0xff] %v19787_v39 }
 0x2b2   :  { %2218 = vst [vmem:[#allocation1 + $0x23] ss:$4 sm:$0xff] %v19789_v0  ;;  %v16110_v13 = vpop.f32.mrf.mxu0  ;;  %v1935_v27 = vpop.f32.mrf.mxu2 }
 0x2b3   :  { %v2532_v32 = vld.sshfl [vmem:[#allocation1] sm:$0xff pattern:$0x73625140] }
 0x2b4   :  { %11723 = vmatmul.msk.bf16.vlgmr.msrb.gmra.mxu0 %vm1262_vm4, %v2532_v32  ;;  %2534 = vst [vmem:[#allocation1] ss:$4 sm:$0xff] %v14990_v54  ;;  %v19455_v54 = vrot.slane %v16105_v21, 2  ;;  %11623 = vmatmul.msk.bf16.gmra.mxu2 %vm1262_vm4, %v19792_v38  ;;  %v2459_v32 = vpop.permute.xlu0 %2458  ;;  %v19795_v38 = vld [vmem:[#allocation27_spill] sm:$0xff] }
 0x2b5   :  { %2535 = vst [vmem:[#allocation1 + $0x1] ss:$4 sm:$0xff] %v14965_v36  ;;  %v19454_v36 = vrot.slane %v16105_v21, 4 }
 0x2b6   :  { %2536 = vst [vmem:[#allocation1 + $0x2] ss:$4 sm:$0xff] %v19755_v22  ;;  %v19793_v22 = vld [vmem:[#allocation75_spill] sm:$0xff] }
 0x2b7   :  { %2537 = vst [vmem:[#allocation1 + $0x3] ss:$4 sm:$0xff] %v19756_v24  ;;  %v16122_v24 = vadd.f32 %v1935_v27, %v1587_v62  ;;  %v1590_v18 = vadd.f32 %v15969_v17, %v19793_v22  ;;  %v2465_v17 = vpop.permute.xlu1 %2464  ;;  %v19799_v22 = vld [vmem:[#allocation25_spill] sm:$0xff] }
 0x2b9   :  { %v16108_v46 = vld.sshfl [vmem:[#allocation1 + $0x20] sm:$0xff pattern:$0x73625140] }
 0x2ba   :  { %2225 = vst [vmem:[#allocation1 + $0x20] ss:$4 sm:$0xff] %v19791_v61  ;;  %v1938_v50 = vpop.f32.mrf.mxu2  ;;  %v16136_v26 = vpop.f32.mrf.mxu0 }
 0x2bb   :  { %2226 = vst [vmem:[#allocation1 + $0x21] ss:$4 sm:$0xff] %v16105_v21  ;;  %11673 = vmatmul.msk.bf16.gmra.mxu3 %vm1262_vm4, %v15951_v35  ;;  %v16140_v35 = vadd.f32 %v1938_v50, %v1590_v18  ;;  %v2475_v50 = vpop.permute.xlu2 %2474 }
 0x2bc   :  { %2228 = vst [vmem:[#allocation1 + $0x22] ss:$4 sm:$0xff] %v19455_v54 }
 0x2bd   :  { %2230 = vst [vmem:[#allocation1 + $0x23] ss:$4 sm:$0xff] %v19454_v36  ;;  %v19800_v36 = vld [vmem:[#allocation76_spill] sm:$0xff] }
 0x2be   :  { %v16128_v55 = vld.sshfl [vmem:[#allocation1] sm:$0xff pattern:$0x73625140]  ;;  %19794 = vst [vmem:[#allocation46_spill] sm:$0xff] %v16136_v26  ;;  %v1592_v54 = vadd.f32 %v15988_v23, %v19800_v36 }
 0x2bf   :  { %2544 = vst [vmem:[#allocation1] ss:$4 sm:$0xff] %v15059_v28  ;;  %v19796_v28 = vld [vmem:[#allocation28_spill] sm:$0xff]  ;;  %v19801_v26 = vld [vmem:[#allocation34_spill] sm:$0xff] }
 0x2c0   :  { %2545 = vst [vmem:[#allocation1 + $0x1] ss:$4 sm:$0xff] %v15062_v30  ;;  %v19797_v30 = vld [vmem:[#allocation24_spill] sm:$0xff] }
 0x2c1   :  { %2546 = vst [vmem:[#allocation1 + $0x2] ss:$4 sm:$0xff] %v19761_v37  ;;  %v19798_v37 = vld [vmem:[#allocation54_spill] sm:$0xff] }
 0x2c2   :  { %2547 = vst [vmem:[#allocation1 + $0x3] ss:$4 sm:$0xff] %v19689_v31  ;;  %v2485_v27 = vsel %vm726_vm0, %v19798_v37, %v2459_v32  ;;  %v2481_v37 = vpop.permute.xlu0 %2480  ;;  %v16164_v23 = vpop.f32.mrf.mxu0 }
 0x2c3   :  { %v2489_v18 = vsel %vm775_vm2, %v2485_v27, %v2465_v17  ;;  %v19806_v17 = vld [vmem:[#allocation37_spill] sm:$0xff] }
 0x2c4   :  { %v16138_v62 = vld.sshfl [vmem:[#allocation1 + $0x20] sm:$0xff pattern:$0x73625140]  ;;  %11624 = vmatmul.msk.bf16.gmra.mxu2 %vm1262_vm4, %v19801_v26 }
 0x2c5   :  { %2525 = vst [vmem:[#allocation1 + $0x20] ss:$4 sm:$0xff] %v19795_v38  ;;  %v19802_v38 = vld [vmem:[#allocation32_spill] sm:$0xff] }
 0x2c6   :  { %2527 = vst [vmem:[#allocation1 + $0x21] ss:$4 sm:$0xff] %v19796_v28  ;;  %v1940_v28 = vpop.f32.mrf.mxu2 }
 0x2c7   :  { %2529 = vst [vmem:[#allocation1 + $0x22] ss:$4 sm:$0xff] %v19797_v30  ;;  %v16157_v32 = vadd.f32 %v1940_v28, %v1592_v54  ;;  %v2493_v30 = vsel %vm824_vm1, %v2489_v18, %v2475_v50  ;;  %v19804_v54 = vld [vmem:[#allocation36_spill] sm:$0xff] }
 0x2c8   :  { %2531 = vst [vmem:[#allocation1 + $0x23] ss:$4 sm:$0xff] %v19799_v22  ;;  %v2497_v26 = vsel %vm873_vm3, %v2493_v30, %v2481_v37  ;;  %v19808_v37 = vrot.slane %v15942_v8, 4 }
 0x2c9   :  { %v16148_v31 = vld.sshfl [vmem:[#allocation1] sm:$0xff pattern:$0x73625140]  ;;  %v2502_v22 = vrot.slane %v2497_v26, 2  ;;  %v2503_v18 = vrot.slane %v2497_v26, 4 }
 0x2ca   :  { %2554 = vst [vmem:[#allocation1] ss:$4 sm:$0xff] %v19802_v38 }
 0x2cb   :  { %2555 = vst [vmem:[#allocation1 + $0x1] ss:$4 sm:$0xff] %v19722_v10  ;;  %11674 = vmatmul.msk.bf16.gmra.mxu3 %vm1262_vm4, %v16011_v53  ;;  %v19803_v10 = vld [vmem:[#allocation35_spill] sm:$0xff]  ;;  %v19807_v53 = vld [vmem:[#allocation30_spill] sm:$0xff] }
 0x2cc   :  { %2556 = vst [vmem:[#allocation1 + $0x2] ss:$4 sm:$0xff] %v19719_v52  ;;  %v19805_v52 = vld [vmem:[#allocation77_spill] sm:$0xff] }
 0x2cd   :  { %2557 = vst [vmem:[#allocation1 + $0x3] ss:$4 sm:$0xff] %v19764_v15  ;;  %v1595_v27 = vadd.f32 %v16005_v20, %v19805_v52  ;;  %v16183_v20 = vpop.f32.mrf.mxu0 }
 0x2ce   :  { %v1943_v15 = vpop.f32.mrf.mxu2 }
 0x2cf   :  { %v2533_v36 = vld.sshfl [vmem:[#allocation1 + $0x20] sm:$0xff pattern:$0x73625140]  ;;  %v16174_v50 = vadd.f32 %v1943_v15, %v1595_v27  ;;  %v19810_v27 = vld [vmem:[#allocation57_spill] sm:$0xff] }
 0x2d0   :  { %11724 = vmatmul.msk.bf16.gmra.mxu0 %vm1262_vm4, %v2533_v36  ;;  %2538 = vst [vmem:[#allocation1 + $0x20] ss:$4 sm:$0xff] %v19803_v10  ;;  %v2308_v38 = vpop.f32.mrf.mxu3  ;;  %v19809_v36 = vld [vmem:[#allocation78_spill] sm:$0xff]  ;;  %v19813_v15 = vld [vmem:[#allocation39_spill] sm:$0xff] }
 0x2d1   :  { %2539 = vst [vmem:[#allocation1 + $0x21] ss:$4 sm:$0xff] %v19804_v54  ;;  %v16179_v30 = vadd.f32 %v2308_v38, %v15959_v7  ;;  %v1597_v10 = vadd.f32 %v16022_v42, %v19809_v36  ;;  %v1604_v54 = vpop.f32.mrf.mxu1  ;;  %v19814_v38 = vld [vmem:[#allocation79_spill] sm:$0xff] }
 0x2d2   :  { %2540 = vst [vmem:[#allocation1 + $0x22] ss:$4 sm:$0xff] %v19806_v17  ;;  %v19811_v17 = vld [vmem:[#allocation38_spill] sm:$0xff] }
 0x2d3   :  { %2541 = vst [vmem:[#allocation1 + $0x23] ss:$4 sm:$0xff] %v19807_v53 }
 0x2d4   :  { %v16176_v28 = vld.sshfl [vmem:[#allocation1] sm:$0xff pattern:$0x73625140]  ;;  %11625 = vmatmul.msk.bf16.gmra.mxu2 %vm1262_vm4, %v19810_v27 }
 0x2d5   :  { %2564 = vst [vmem:[#allocation1] ss:$4 sm:$0xff] %v19808_v37  ;;  %v1600_v37 = vadd.f32 %v16044_v5, %v19814_v38  ;;  %v19817_v5 = vld [vmem:[#allocation85_spill] sm:$0xff] }
 0x2d6   :  { %2565 = vst [vmem:[#allocation1 + $0x1] ss:$4 sm:$0xff] %v2497_v26  ;;  %v1945_v7 = vpop.f32.mrf.mxu2 }
 0x2d7   :  { %2567 = vst [vmem:[#allocation1 + $0x2] ss:$4 sm:$0xff] %v2502_v22  ;;  %v16191_v53 = vadd.f32 %v1945_v7, %v1597_v10  ;;  %v19812_v22 = vld [vmem:[#allocation42_spill] sm:$0xff]  ;;  %v19818_v7 = vld [vmem:[#allocation63_spill] sm:$0xff] }
 0x2d8   :  { %2569 = vst [vmem:[#allocation1 + $0x3] ss:$4 sm:$0xff] %v2503_v18  ;;  %v2310_v26 = vpop.f32.mrf.mxu3 }
 0x2d9   :  { %v16197_v42 = vadd.f32 %v2310_v26, %v16034_v12  ;;  %v1606_v12 = vpop.f32.mrf.mxu1 }
 0x2da   :  { %v2543_v52 = vld.sshfl [vmem:[#allocation1 + $0x20] sm:$0xff pattern:$0x73625140] }
 0x2db   :  { %2548 = vst [vmem:[#allocation1 + $0x20] ss:$4 sm:$0xff] %v19762_v40  ;;  %11675 = vmatmul.msk.bf16.gmra.mxu3 %vm1262_vm4, %v15979_v60  ;;  %v16206_v40 = vpop.f32.mrf.mxu0 }
 0x2dc   :  { %2549 = vst [vmem:[#allocation1 + $0x21] ss:$4 sm:$0xff] %v19811_v17  ;;  %v19819_v17 = vld [vmem:[#allocation52_spill] sm:$0xff] }
 0x2dd   :  { %2550 = vst [vmem:[#allocation1 + $0x22] ss:$4 sm:$0xff] %v19812_v22 }
 0x2de   :  { %2551 = vst [vmem:[#allocation1 + $0x23] ss:$4 sm:$0xff] %v19813_v15  ;;  %v1948_v60 = vpop.f32.mrf.mxu2  ;;  %v19822_v15 = vld [vmem:[#allocation33_spill] sm:$0xff] }
 0x2df   :  { %v16200_v18 = vld.sshfl [vmem:[#allocation1] sm:$0xff pattern:$0x73625140]  ;;  %v16212_v36 = vadd.f32 %v1948_v60, %v1600_v37 }
 0x2e0   :  { %11725 = vmatmul.msk.bf16.gmra.mxu0 %vm1262_vm4, %v16128_v55  ;;  %2576 = vst [vmem:[#allocation1] ss:$4 sm:$0xff] %v19703_v25  ;;  %v19815_v25 = vrot.slane %v15942_v8, 2 }
 0x2e1   :  { %2577 = vst [vmem:[#allocation1 + $0x1] ss:$4 sm:$0xff] %v19704_v44  ;;  %v19816_v44 = vld [vmem:[#allocation81_spill] sm:$0xff] }
 0x2e2   :  { %2578 = vst [vmem:[#allocation1 + $0x2] ss:$4 sm:$0xff] %v19705_v45  ;;  %v1602_v45 = vadd.f32 %v16066_v4, %v19816_v44  ;;  %v19826_v44 = vld [vmem:[#allocation60_spill] sm:$0xff] }
 0x2e3   :  { %2579 = vst [vmem:[#allocation1 + $0x3] ss:$4 sm:$0xff] %v19706_v14  ;;  %v16228_v27 = vpop.f32.mrf.mxu0 }
 0x2e4   :  { %11626 = vmatmul.msk.bf16.gmra.mxu2 %vm1262_vm4, %v19817_v5 }
 0x2e5   :  { %v16214_v10 = vld.sshfl [vmem:[#allocation1 + $0x20] sm:$0xff pattern:$0x73625140] }
 0x2e6   :  { %2558 = vst [vmem:[#allocation1 + $0x20] ss:$4 sm:$0xff] %v19765_v63  ;;  %v1950_v55 = vpop.f32.mrf.mxu2 }
 0x2e7   :  { %2559 = vst [vmem:[#allocation1 + $0x21] ss:$4 sm:$0xff] %v15724_v33  ;;  %v16230_v63 = vadd.f32 %v1950_v55, %v1602_v45  ;;  %v1609_v33 = vpop.f32.mrf.mxu1  ;;  %v19827_v45 = vld [vmem:[#allocation86_spill] sm:$0xff]  ;;  %v19828_v55 = vld [vmem:[#allocation87_spill] sm:$0xff] }
 0x2e8   :  { %2560 = vst [vmem:[#allocation1 + $0x22] ss:$4 sm:$0xff] %v15942_v8 }
 0x2e9   :  { %2561 = vst [vmem:[#allocation1 + $0x23] ss:$4 sm:$0xff] %v19815_v25 }
 0x2ea   :  { %v16225_v14 = vld.sshfl [vmem:[#allocation1] sm:$0xff pattern:$0x73625140] }
 0x2eb   :  { %2586 = vst [vmem:[#allocation1] ss:$4 sm:$0xff] %v19709_v56  ;;  %11676 = vmatmul.msk.bf16.gmra.mxu3 %vm1262_vm4, %v16032_v29  ;;  %v16252_v26 = vpop.f32.mrf.mxu0 }
 0x2ec   :  { %2587 = vst [vmem:[#allocation1 + $0x1] ss:$4 sm:$0xff] %v19710_v58  ;;  %v1605_v58 = vadd.f32 %v1604_v54, %v19818_v7  ;;  %v19821_v54 = vld [vmem:[#allocation43_spill] sm:$0xff] }
 0x2ed   :  { %2588 = vst [vmem:[#allocation1 + $0x2] ss:$4 sm:$0xff] %v19711_v59  ;;  %v1607_v22 = vadd.f32 %v1606_v12, %v19821_v54  ;;  %v19832_v54 = vld [vmem:[#allocation21_spill] sm:$0xff] }
 0x2ee   :  { %2589 = vst [vmem:[#allocation1 + $0x3] ss:$4 sm:$0xff] %v19777_v3  ;;  %v2313_v4 = vpop.f32.mrf.mxu3  ;;  %v1953_v29 = vpop.f32.mrf.mxu2  ;;  %v19820_v3 = vld [vmem:[#allocation47_spill] sm:$0xff] }
 0x2ef   :  { %v16241_v56 = vadd.f32 %v2313_v4, %v16059_v19  ;;  %v16247_v59 = vadd.f32 %v1953_v29, %v1605_v58  ;;  %v2461_v4 = vpop.permute.xlu1 %2460 }
 0x2f0   :  { %11726 = vmatmul.msk.bf16.gmra.mxu0 %vm1262_vm4, %v2543_v52  ;;  %v16238_v8 = vld.sshfl [vmem:[#allocation1 + $0x20] sm:$0xff pattern:$0x73625140] }
 0x2f1   :  { %2570 = vst [vmem:[#allocation1 + $0x20] ss:$4 sm:$0xff] %v15294_v34  ;;  %v1611_v34 = vpop.f32.mrf.mxu1 }
 0x2f2   :  { %2571 = vst [vmem:[#allocation1 + $0x21] ss:$4 sm:$0xff] %v15309_v1  ;;  %v1612_v5 = vadd.f32 %v1611_v34, %v19827_v45  ;;  %v19836_v45 = vld [vmem:[#allocation22_spill] sm:$0xff] }
 0x2f3   :  { %2572 = vst [vmem:[#allocation1 + $0x22] ss:$4 sm:$0xff] %v19819_v17  ;;  %v2467_v17 = vpop.permute.xlu2 %2466 }
 0x2f4   :  { %2573 = vst [vmem:[#allocation1 + $0x23] ss:$4 sm:$0xff] %v19820_v3  ;;  %11627 = vmatmul.msk.bf16.gmra.mxu2 %vm1262_vm4, %v19822_v15 }
 0x2f5   :  { %v16250_v52 = vld.sshfl [vmem:[#allocation1] sm:$0xff pattern:$0x73625140] }
 0x2f6   :  { %2596 = vst [vmem:[#allocation1] ss:$4 sm:$0xff] %v19713_v47  ;;  %v2315_v19 = vpop.f32.mrf.mxu3  ;;  %v1955_v38 = vpop.f32.mrf.mxu2 }
 0x2f7   :  { %2597 = vst [vmem:[#allocation1 + $0x1] ss:$4 sm:$0xff] %v15409_v49  ;;  %v16258_v1 = vadd.f32 %v2315_v19, %v16080_v9  ;;  %v16266_v47 = vadd.f32 %v1955_v38, %v1607_v22  ;;  %v19823_v49 = vld [vmem:[#allocation55_spill] sm:$0xff]  ;;  %v16274_v9 = vpop.f32.mrf.mxu0  ;;  %v2477_v38 = vpop.permute.xlu0 %2476 }
 0x2f8   :  { %2598 = vst [vmem:[#allocation1 + $0x2] ss:$4 sm:$0xff] %v19786_v57 }
 0x2f9   :  { %2599 = vst [vmem:[#allocation1 + $0x3] ss:$4 sm:$0xff] %v19787_v39 }
 0x2fb   :  { %v16264_v37 = vld.sshfl [vmem:[#allocation1 + $0x20] sm:$0xff pattern:$0x73625140]  ;;  %11677 = vmatmul.msk.bf16.gmra.mxu3 %vm1262_vm4, %v15997_v2 }
 0x2fc   :  { %2580 = vst [vmem:[#allocation1 + $0x20] ss:$4 sm:$0xff] %v19694_v41  ;;  %v19824_v41 = vld [vmem:[#allocation84_spill] sm:$0xff] }
 0x2fd   :  { %2581 = vst [vmem:[#allocation1 + $0x21] ss:$4 sm:$0xff] %v15338_v43  ;;  %v1610_v2 = vadd.f32 %v1609_v33, %v19824_v41  ;;  %v1614_v43 = vpop.f32.mrf.mxu1  ;;  %v19829_v33 = vld [vmem:[#allocation62_spill] sm:$0xff] }
 0x2fe   :  { %2582 = vst [vmem:[#allocation1 + $0x22] ss:$4 sm:$0xff] %v15347_v6  ;;  %v2318_v57 = vpop.f32.mrf.mxu3  ;;  %v1958_v6 = vpop.f32.mrf.mxu2  ;;  %v1615_v22 = vadd.f32 %v1614_v43, %v19832_v54  ;;  %v19839_v54 = vld [vmem:[#allocation26_spill] sm:$0xff] }
 0x2ff   :  { %2583 = vst [vmem:[#allocation1 + $0x23] ss:$4 sm:$0xff] %v19823_v49  ;;  %v16281_v60 = vadd.f32 %v2318_v57, %v16100_v48  ;;  %v16287_v12 = vadd.f32 %v1958_v6, %v1610_v2  ;;  %v19833_v57 = vld [vmem:[#allocation73_spill] sm:$0xff]  ;;  %v19834_v2 = vld [vmem:[#allocation74_spill] sm:$0xff]  ;;  %v2483_v6 = vpop.permute.xlu1 %2482 }
 0x300   :  { %11727 = vmatmul.msk.bf16.gmra.mxu0 %vm1262_vm4, %v16148_v31  ;;  %v16278_v39 = vld.sshfl [vmem:[#allocation1] sm:$0xff pattern:$0x73625140]  ;;  %v19825_v31 = vrot.slane %v16105_v21, 2 }
 0x301   :  { %2606 = vst [vmem:[#allocation1] ss:$4 sm:$0xff] %v15886_v16 }
 0x302   :  { %2607 = vst [vmem:[#allocation1 + $0x1] ss:$4 sm:$0xff] %v19791_v61  ;;  %v16299_v61 = vpop.f32.mrf.mxu0 }
 0x303   :  { %2608 = vst [vmem:[#allocation1 + $0x2] ss:$4 sm:$0xff] %v16105_v21 }
 0x304   :  { %2609 = vst [vmem:[#allocation1 + $0x3] ss:$4 sm:$0xff] %v19825_v31  ;;  %11628 = vmatmul.msk.bf16.gmra.mxu2 %vm1262_vm4, %v19828_v55  ;;  %v19835_v31 = vld [vmem:[#allocation83_spill] sm:$0xff] }
 0x306   :  { %v16291_v25 = vld.sshfl [vmem:[#allocation1 + $0x20] sm:$0xff pattern:$0x73625140]  ;;  %v2320_v48 = vpop.f32.mrf.mxu3  ;;  %v1960_v7 = vpop.f32.mrf.mxu2 }
 0x307   :  { %2590 = vst [vmem:[#allocation1 + $0x20] ss:$4 sm:$0xff] %v19778_v51  ;;  %v16296_v16 = vadd.f32 %v2320_v48, %v16122_v24  ;;  %v1616_v51 = vpop.f32.mrf.mxu1  ;;  %v16305_v58 = vadd.f32 %v1960_v7, %v1612_v5  ;;  %v19831_v24 = vld [vmem:[#allocation41_spill] sm:$0xff] }
 0x308   :  { %2591 = vst [vmem:[#allocation1 + $0x21] ss:$4 sm:$0xff] %v15438_v11  ;;  %v19830_v11 = vld [vmem:[#allocation53_spill] sm:$0xff]  ;;  %v2487_v29 = vsel %vm726_vm0, %v19831_v24, %v2461_v4  ;;  %v1617_v5 = vadd.f32 %v1616_v51, %v19836_v45  ;;  %v19837_v24 = vld [vmem:[#allocation23_spill] sm:$0xff] }
 0x309   :  { %2592 = vst [vmem:[#allocation1 + $0x22] ss:$4 sm:$0xff] %v19826_v44  ;;  %v2491_v15 = vsel %vm775_vm2, %v2487_v29, %v2467_v17  ;;  %v19838_v29 = vrot.slane %v16105_v21, 4 }
 0x30a   :  { %2593 = vst [vmem:[#allocation1 + $0x23] ss:$4 sm:$0xff] %v19829_v33 }
 0x30b   :  { %11678 = vmatmul.msk.bf16.gmra.mxu3 %vm1262_vm4, %v19830_v11 }
 0x30e   :  { %v2323_v3 = vpop.f32.mrf.mxu3  ;;  %v1963_v49 = vpop.f32.mrf.mxu2 }
 0x30f   :  { %v16314_v34 = vadd.f32 %v2323_v3, %v16140_v35  ;;  %v16322_v41 = vadd.f32 %v1963_v49, %v1615_v22  ;;  %v2495_v35 = vsel %vm824_vm1, %v2491_v15, %v2477_v38  ;;  %v1619_v43 = vpop.f32.mrf.mxu1 }
 0x310   :  { %11728 = vmatmul.msk.bf16.gmra.mxu0 %vm1262_vm4, %v16214_v10  ;;  %v16325_v10 = vpop.f32.mrf.mxu0  ;;  %v2499_v48 = vsel %vm873_vm3, %v2495_v35, %v2483_v6  ;;  %v1620_v22 = vadd.f32 %v1619_v43, %v19839_v54 }
 0x311   :  { %v16316_v19 = vld.sshfl [vmem:[#allocation1 + $0x20] sm:$0xff pattern:$0x73625140]  ;;  %v2504_v55 = vrot.slane %v2499_v48, 2  ;;  %v2505_v4 = vrot.slane %v2499_v48, 4 }
 0x312   :  { %2600 = vst [vmem:[#allocation1 + $0x20] ss:$4 sm:$0xff] %v19789_v0 }
 0x313   :  { %2601 = vst [vmem:[#allocation1 + $0x21] ss:$4 sm:$0xff] %v19833_v57 }
 0x314   :  { %2602 = vst [vmem:[#allocation1 + $0x22] ss:$4 sm:$0xff] %v19834_v2  ;;  %v19840_v2 = vld [vmem:[#allocation80_spill] sm:$0xff] }
 0x315   :  { %2603 = vst [vmem:[#allocation1 + $0x23] ss:$4 sm:$0xff] %v19835_v31 }
 0x316   :  { %v2325_v44 = vpop.f32.mrf.mxu3  ;;  %v1965_v33 = vpop.f32.mrf.mxu2 }
 0x317   :  { %v16331_v0 = vadd.f32 %v2325_v44, %v16157_v32  ;;  %v16334_v7 = vadd.f32 %v1965_v33, %v1617_v5  ;;  %v1621_v32 = vpop.f32.mrf.mxu1  ;;  %v19842_v5 = vld [vmem:[#allocation45_spill] sm:$0xff] }
 0x318   :  { %v16342_v17 = vpop.f32.mrf.mxu0  ;;  %v1622_v35 = vadd.f32 %v1621_v32, %v19840_v2  ;;  %v19843_v32 = vld [vmem:[#allocation29_spill] sm:$0xff] }
 0x31b   :  { %11679 = vmatmul.msk.bf16.gmra.mxu3 %vm1262_vm4, %v19837_v24 }
 0x31c   :  { %v16336_v11 = vld.sshfl [vmem:[#allocation1 + $0x20] sm:$0xff pattern:$0x73625140] }
 0x31d   :  { %2610 = vst [vmem:[#allocation1 + $0x20] ss:$4 sm:$0xff] %v19838_v29 }
 0x31e   :  { %2611 = vst [vmem:[#allocation1 + $0x21] ss:$4 sm:$0xff] %v2499_v48  ;;  %v2328_v51 = vpop.f32.mrf.mxu3  ;;  %v1968_v15 = vpop.f32.mrf.mxu2  ;;  %v19841_v48 = vld [vmem:[#allocation48_spill] sm:$0xff] }
 0x31f   :  { %2613 = vst [vmem:[#allocation1 + $0x22] ss:$4 sm:$0xff] %v2504_v55  ;;  %v16347_v3 = vadd.f32 %v2328_v51, %v16174_v50  ;;  %v16350_v38 = vadd.f32 %v1968_v15, %v1620_v22  ;;  %v1624_v6 = vpop.f32.mrf.mxu1 }
 0x320   :  { %11729 = vmatmul.msk.bf16.gmra.mxu0 %vm1262_vm4, %v16176_v28  ;;  %2615 = vst [vmem:[#allocation1 + $0x23] ss:$4 sm:$0xff] %v2505_v4  ;;  %v16352_v49 = vpop.f32.mrf.mxu0  ;;  %v1625_v55 = vadd.f32 %v1624_v6, %v19842_v5 }
 0x326   :  { %v2330_v21 = vpop.f32.mrf.mxu3  ;;  %v1970_v28 = vpop.f32.mrf.mxu2 }
 0x327   :  { %v16355_v57 = vadd.f32 %v2330_v21, %v16191_v53  ;;  %v16358_v31 = vadd.f32 %v1970_v28, %v1622_v35  ;;  %v1626_v45 = vpop.f32.mrf.mxu1  ;;  %v19845_v21 = vld [vmem:[#allocation31_spill] sm:$0xff] }
 0x328   :  { %v1627_v51 = vadd.f32 %v1626_v45, %v19843_v32 }
 0x32b   :  { %11680 = vmatmul.msk.bf16.gmra.mxu3 %vm1262_vm4, %v19841_v48 }
 0x32e   :  { %v2333_v50 = vpop.f32.mrf.mxu3  ;;  %v1973_v33 = vpop.f32.mrf.mxu2 }
 0x32f   :  { %v16365_v44 = vadd.f32 %v2333_v50, %v16212_v36  ;;  %v2033_v4 = vadd.f32 %v1973_v33, %v1625_v55  ;;  %v1629_v54 = vpop.f32.mrf.mxu1 }
 0x330   :  { %11730 = vmatmul.msk.bf16.gmra.mxu0 %vm1262_vm4, %v16238_v8  ;;  %v19844_v8 = vld [vmem:[#allocation59_spill] sm:$0xff]  ;;  %v1630_v2 = vadd.f32 %v1629_v54, %v19845_v21  ;;  %v19847_v21 = vld [vmem:[#allocation40_spill] sm:$0xff] }
 0x331   :  { %v2693_v43 = vpop.f32.mrf.mxu0 }
 0x332   :  { %v16368_v53 = vadd.f32 %v2693_v43, %v16179_v30  ;;  %v19846_v43 = vld [vmem:[#allocation50_spill] sm:$0xff] }
 0x336   :  { %v2335_v24 = vpop.f32.mrf.mxu3  ;;  %v1975_v36 = vpop.f32.mrf.mxu2 }
 0x337   :  { %v16372_v29 = vadd.f32 %v2335_v24, %v16230_v63  ;;  %v2034_v22 = vadd.f32 %v1975_v36, %v1627_v51  ;;  %v1631_v28 = vpop.f32.mrf.mxu1 }
 0x338   :  { %v1632_v45 = vadd.f32 %v1631_v28, %v19846_v43 }
 0x339   :  { %v16383_v35 = vpop.f32.mrf.mxu0 }
 0x33b   :  { %11681 = vmatmul.msk.bf16.gmra.mxu3 %vm1262_vm4, %v19844_v8 }
 0x33e   :  { %v2338_v30 = vpop.f32.mrf.mxu3  ;;  %v1978_v63 = vpop.f32.mrf.mxu2 }
 0x33f   :  { %v16380_v15 = vadd.f32 %v2338_v30, %v16247_v59  ;;  %v2035_v6 = vadd.f32 %v1978_v63, %v1630_v2  ;;  %v1634_v32 = vpop.f32.mrf.mxu1 }
 0x340   :  { %11731 = vmatmul.msk.bf16.gmra.mxu0 %vm1262_vm4, %v16200_v18 }
 0x346   :  { %v2340_v48 = vpop.f32.mrf.mxu3  ;;  %v1980_v59 = vpop.f32.mrf.mxu2 }
 0x347   :  { %v2411_v50 = vadd.f32 %v2340_v48, %v16266_v47  ;;  %v2036_v55 = vadd.f32 %v1980_v59, %v1632_v45  ;;  %v1635_v47 = vadd.f32 %v1634_v32, %v16110_v13 }
 0x34b   :  { %11682 = vmatmul.msk.bf16.gmra.mxu3 %vm1262_vm4, %v16108_v46 }
 0x34d   :  { %v2698_v5 = vpop.f32.mrf.mxu0 }
 0x34e   :  { %v16390_v18 = vadd.f32 %v2698_v5, %v16241_v56  ;;  %v2343_v33 = vpop.f32.mrf.mxu3  ;;  %v1983_v54 = vpop.f32.mrf.mxu2 }
 0x34f   :  { %v2412_v24 = vadd.f32 %v2343_v33, %v16287_v12  ;;  %v2037_v46 = vadd.f32 %v1983_v54, %v1635_v47 }
 0x350   :  { %11732 = vmatmul.msk.bf16.gmra.mxu0 %vm1262_vm4, %v16264_v37 }
 0x355   :  { %v2700_v51 = vpop.f32.mrf.mxu0 }
 0x356   :  { %v16397_v8 = vadd.f32 %v2700_v51, %v16258_v1  ;;  %v2345_v36 = vpop.f32.mrf.mxu3 }
 0x357   :  { %v2413_v56 = vadd.f32 %v2345_v36, %v16305_v58 }
 0x35b   :  { %11683 = vmatmul.msk.bf16.gmra.mxu3 %vm1262_vm4, %v19847_v21 }
 0x35d   :  { %v2703_v30 = vpop.f32.mrf.mxu0 }
 0x35e   :  { %v16403_v37 = vadd.f32 %v2703_v30, %v16281_v60  ;;  %v2348_v13 = vpop.f32.mrf.mxu3 }
 0x35f   :  { %v2414_v12 = vadd.f32 %v2348_v13, %v16322_v41  ;;  %v2616_v13 = vld.sshfl [vmem:[#allocation1] sm:$0xff pattern:$0x73625140] }
 0x360   :  { %11733 = vmatmul.msk.bf16.gmra.mxu0 %vm1262_vm4, %v16225_v14 }
 0x365   :  { %v2705_v1 = vpop.f32.mrf.mxu0 }
 0x366   :  { %v16409_v2 = vadd.f32 %v2705_v1, %v16296_v16  ;;  %v2350_v63 = vpop.f32.mrf.mxu3 }
 0x367   :  { %v2415_v58 = vadd.f32 %v2350_v63, %v16334_v7 }
 0x36b   :  { %11684 = vmatmul.msk.bf16.gmra.mxu3 %vm1262_vm4, %v16138_v62 }
 0x36d   :  { %v2708_v28 = vpop.f32.mrf.mxu0 }
 0x36e   :  { %v16415_v60 = vadd.f32 %v2708_v28, %v16314_v34  ;;  %v2353_v14 = vpop.f32.mrf.mxu3 }
 0x36f   :  { %v2416_v41 = vadd.f32 %v2353_v14, %v16350_v38 }
 0x370   :  { %11734 = vmatmul.msk.bf16.gmra.mxu0 %vm1262_vm4, %v16291_v25 }
 0x375   :  { %v2710_v48 = vpop.f32.mrf.mxu0 }
 0x376   :  { %v16421_v16 = vadd.f32 %v2710_v48, %v16331_v0  ;;  %v2355_v43 = vpop.f32.mrf.mxu3 }
 0x377   :  { %v16424_v7 = vadd.f32 %v2355_v43, %v16358_v31  ;;  %v2617_v43 = vld.sshfl [vmem:[#allocation1 + $0x20] sm:$0xff pattern:$0x73625140] }
 0x37d   :  { %v2713_v45 = vpop.f32.mrf.mxu0 }
 0x37e   :  { %v16427_v62 = vadd.f32 %v2713_v45, %v16347_v3  ;;  %v2358_v34 = vpop.f32.mrf.mxu3 }
 0x37f   :  { %v16431_v25 = vadd.f32 %v2358_v34, %v2033_v4 }
 0x380   :  { %11735 = vmatmul.msk.bf16.gmra.mxu0 %vm1262_vm4, %v16250_v52 }
 0x385   :  { %v2715_v5 = vpop.f32.mrf.mxu0 }
 0x386   :  { %v16434_v38 = vadd.f32 %v2715_v5, %v16355_v57  ;;  %v2360_v0 = vpop.f32.mrf.mxu3 }
 0x387   :  { %v16436_v59 = vadd.f32 %v2360_v0, %v2034_v22 }
 0x38d   :  { %v2718_v33 = vpop.f32.mrf.mxu0 }
 0x38e   :  { %v16439_v31 = vadd.f32 %v2718_v33, %v16365_v44  ;;  %v2363_v3 = vpop.f32.mrf.mxu3 }
 0x38f   :  { %v16443_v32 = vadd.f32 %v2363_v3, %v2035_v6 }
 0x390   :  { %11736 = vmatmul.msk.bf16.gmra.mxu0 %vm1262_vm4, %v16316_v19 }
 0x395   :  { %v2720_v52 = vpop.f32.mrf.mxu0 }
 0x396   :  { %v16446_v4 = vadd.f32 %v2720_v52, %v16372_v29  ;;  %v2365_v47 = vpop.f32.mrf.mxu3 }
 0x397   :  { %v16448_v57 = vadd.f32 %v2365_v47, %v2036_v55 }
 0x39d   :  { %v2723_v51 = vpop.f32.mrf.mxu0 }
 0x39e   :  { %v16451_v22 = vadd.f32 %v2723_v51, %v16380_v15  ;;  %v2368_v44 = vpop.f32.mrf.mxu3 }
 0x39f   :  { %v16455_v54 = vadd.f32 %v2368_v44, %v2037_v46 }
 0x3a0   :  { %11737 = vmatmul.msk.bf16.gmra.mxu0 %vm1262_vm4, %v16278_v39  ;;  %v16471_v39 = vld [vmem:[%s19333_s2] sm:$0xff] }
 0x3a1   :  { %19848 = vst [vmem:[#allocation61_spill] sm:$0xff] %v16471_v39 }
 0x3a5   :  { %v2725_v19 = vpop.f32.mrf.mxu0 }
 0x3a6   :  { %v16457_v6 = vadd.f32 %v2725_v19, %v2411_v50  ;;  %v2784_v50 = vadd.f32 %v16383_v35, %v16197_v42 }
 0x3ad   :  { %v2728_v36 = vpop.f32.mrf.mxu0 }
 0x3ae   :  { %v16459_v30 = vadd.f32 %v2728_v36, %v2412_v24 }
 0x3b0   :  { %11738 = vmatmul.msk.bf16.gmra.mxu0 %vm1262_vm4, %v16336_v11  ;;  %v16478_v11 = vperm.slane %v16471_v39, 0 }
 0x3b2   :  { %v2822_v1 = vadd.f32 %v16478_v11, %v16390_v18  ;;  %v2823_v28 = vadd.f32 %v16478_v11, %v16397_v8  ;;  %v2824_v48 = vadd.f32 %v16478_v11, %v16403_v37  ;;  %v2825_v8 = vadd.f32 %v16478_v11, %v16409_v2 }
 0x3b3   :  { %v2826_v37 = vadd.f32 %v16478_v11, %v16415_v60  ;;  %v2827_v52 = vadd.f32 %v16478_v11, %v16421_v16  ;;  %v2828_v36 = vadd.f32 %v16478_v11, %v16427_v62  ;;  %v2830_v62 = vadd.f32 %v16478_v11, %v16439_v31 }
 0x3b4   :  { %v16493_v14 = vmax.f32 %v2822_v1, 0.0  ;;  %v16500_v18 = vmax.f32 %v2823_v28, 0.0  ;;  %v16508_v34 = vmax.f32 %v2824_v48, 0.0  ;;  %v16516_v3 = vmax.f32 %v2825_v8, 0.0 }
 0x3b5   :  { %v2730_v29 = vpop.f32.mrf.mxu0  ;;  %v16526_v19 = vmax.f32 %v2826_v37, 0.0 }
 0x3b6   :  { %v16463_v55 = vadd.f32 %v2730_v29, %v2413_v56  ;;  %v2821_v56 = vadd.f32 %v16478_v11, %v2784_v50  ;;  %v2936_v45 = vmul.f32 %v16493_v14, %v16493_v14  ;;  %v2937_v33 = vmul.f32 %v16500_v18, %v16500_v18 }
 0x3b7   :  { %v2938_v60 = vmul.f32 %v16508_v34, %v16508_v34  ;;  %v2939_v16 = vmul.f32 %v16516_v3, %v16516_v3 }
 0x3b8   :  { %v16485_v63 = vmax.f32 %v2821_v56, 0.0  ;;  %v2940_v56 = vmul.f32 %v16526_v19, %v16526_v19 }
 0x3bd   :  { %v2733_v15 = vpop.f32.mrf.mxu0 }
 0x3be   :  { %v16465_v21 = vadd.f32 %v2733_v15, %v2414_v12  ;;  %v2820_v12 = vadd.f32 %v16478_v11, %v16368_v53  ;;  %v2935_v53 = vmul.f32 %v16485_v63, %v16485_v63 }
 0x3c0   :  { %11739 = vmatmul.msk.bf16.gmra.mxu0 %vm1262_vm4, %v2616_v13  ;;  %v16533_v13 = vmax.f32 %v2827_v52, 0.0 }
 0x3c2   :  { %19849 = vst [vmem:[#allocation44_spill] sm:$0xff] %v16533_v13  ;;  %v2941_v48 = vmul.f32 %v16533_v13, %v16533_v13 }
 0x3c5   :  { %v2735_v24 = vpop.f32.mrf.mxu0 }
 0x3c6   :  { %v16475_v46 = vadd.f32 %v2735_v24, %v2415_v58  ;;  %v16491_v58 = vmax.f32 %v2820_v12, 0.0  ;;  %v16540_v12 = vmax.f32 %v2828_v36, 0.0 }
 0x3c8   :  { %v2892_v5 = vadd.f32 %v16485_v63, %v16491_v58  ;;  %19850 = vst [vmem:[#allocation65_spill] sm:$0xff] %v16540_v12  ;;  %v2942_v31 = vmul.f32 %v16540_v12, %v16540_v12 }
 0x3ca   :  { %v2893_v51 = vadd.f32 %v2892_v5, %v16493_v14  ;;  %v2832_v5 = vadd.f32 %v16478_v11, %v16451_v22  ;;  %v2834_v22 = vadd.f32 %v16478_v11, %v16459_v30 }
 0x3cc   :  { %v2894_v29 = vadd.f32 %v2893_v51, %v16500_v18 }
 0x3cd   :  { %v2738_v42 = vpop.f32.mrf.mxu0 }
 0x3ce   :  { %v16489_v35 = vadd.f32 %v2738_v42, %v2416_v41  ;;  %v2934_v41 = vmul.f32 %v16491_v58, %v16491_v58  ;;  %v2895_v50 = vadd.f32 %v2894_v29, %v16508_v34 }
 0x3d0   :  { %11740 = vmatmul.msk.bf16.gmra.mxu0 %vm1262_vm4, %v2617_v43  ;;  %v2970_v0 = vadd.f32 %v2935_v53, %v2934_v41  ;;  %v2896_v1 = vadd.f32 %v2895_v50, %v16516_v3  ;;  %v2835_v50 = vadd.f32 %v16478_v11, %v16463_v55 }
 0x3d2   :  { %v2971_v44 = vadd.f32 %v2970_v0, %v2936_v45  ;;  %v2897_v8 = vadd.f32 %v2896_v1, %v16526_v19  ;;  %v16555_v45 = vmax.f32 %v2830_v62, 0.0  ;;  %v16587_v1 = vmax.f32 %v2834_v22, 0.0 }
 0x3d4   :  { %v2972_v15 = vadd.f32 %v2971_v44, %v2937_v33  ;;  %19852 = vst [vmem:[#allocation68_spill] sm:$0xff] %v16555_v45  ;;  %v2898_v37 = vadd.f32 %v2897_v8, %v16533_v13  ;;  %v2944_v51 = vmul.f32 %v16555_v45, %v16555_v45  ;;  %v2837_v8 = vadd.f32 %v16478_v11, %v16475_v46 }
 0x3d5   :  { %v2740_v2 = vpop.f32.mrf.mxu0  ;;  %19856 = vst [vmem:[#allocation49_spill] sm:$0xff] %v16587_v1 }
 0x3d6   :  { %v16521_v47 = vadd.f32 %v2740_v2, %v16424_v7  ;;  %v2829_v7 = vadd.f32 %v16478_v11, %v16434_v38  ;;  %v2973_v24 = vadd.f32 %v2972_v15, %v2938_v60  ;;  %v2831_v38 = vadd.f32 %v16478_v11, %v16446_v4 }
 0x3d7   :  { %v2833_v2 = vadd.f32 %v16478_v11, %v16457_v6  ;;  %v16570_v60 = vmax.f32 %v2832_v5, 0.0 }
 0x3d8   :  { %v2974_v28 = vadd.f32 %v2973_v24, %v2939_v16  ;;  %v16547_v43 = vmax.f32 %v2829_v7, 0.0  ;;  %v16562_v4 = vmax.f32 %v2831_v38, 0.0  ;;  %v16582_v24 = vpop.f32.mrf.mxu1  ;;  %v16596_v38 = vmax.f32 %v2835_v50, 0.0 }
 0x3d9   :  { %19854 = vst [vmem:[#allocation66_spill] sm:$0xff] %v16570_v60  ;;  %v16578_v7 = vmax.f32 %v2833_v2, 0.0  ;;  %v2946_v30 = vmul.f32 %v16570_v60, %v16570_v60 }
 0x3da   :  { %19851 = vst [vmem:[#allocation67_spill] sm:$0xff] %v16547_v43  ;;  %v2975_v41 = vadd.f32 %v2974_v28, %v2940_v56  ;;  %v2943_v33 = vmul.f32 %v16547_v43, %v16547_v43  ;;  %v2945_v15 = vmul.f32 %v16562_v4, %v16562_v4  ;;  %v16591_v28 = vpop.f32.mrf.mxu2  ;;  %v2949_v46 = vmul.f32 %v16596_v38, %v16596_v38 }
 0x3db   :  { %19853 = vst [vmem:[#allocation51_spill] sm:$0xff] %v16562_v4  ;;  %v2947_v55 = vmul.f32 %v16578_v7, %v16578_v7 }
 0x3dc   :  { %v2976_v0 = vadd.f32 %v2975_v41, %v2941_v48  ;;  %19855 = vst [vmem:[#allocation58_spill] sm:$0xff] %v16578_v7  ;;  %v16600_v41 = vpop.f32.mrf.mxu3 }
 0x3dd   :  { %v2743_v42 = vpop.f32.mrf.mxu0  ;;  %19857 = vst [vmem:[#allocation64_spill] sm:$0xff] %v16596_v38 }
 0x3de   :  { %v2803_v53 = vadd.f32 %v2743_v42, %v16431_v25  ;;  %v2899_v25 = vadd.f32 %v2898_v37, %v16540_v12  ;;  %v2977_v52 = vadd.f32 %v2976_v0, %v2942_v31 }
 0x3e0   :  { %v2900_v44 = vadd.f32 %v2899_v25, %v16547_v43  ;;  %v2978_v29 = vadd.f32 %v2977_v52, %v2943_v33  ;;  %v2838_v33 = vadd.f32 %v16478_v11, %v16489_v35  ;;  %v16620_v35 = vpop.f32.mrf.mxu1 }
 0x3e2   :  { %v2901_v6 = vadd.f32 %v2900_v44, %v16555_v45  ;;  %v2979_v56 = vadd.f32 %v2978_v29, %v2944_v51  ;;  %v16613_v51 = vmax.f32 %v2837_v8, 0.0  ;;  %v2839_v44 = vadd.f32 %v16478_v11, %v16521_v47 }
 0x3e4   :  { %v2902_v62 = vadd.f32 %v2901_v6, %v16562_v4  ;;  %v2980_v42 = vadd.f32 %v2979_v56, %v2945_v15  ;;  %19859 = vst [vmem:[#allocation69_spill] sm:$0xff] %v16613_v51  ;;  %v2840_v15 = vadd.f32 %v16478_v11, %v2803_v53  ;;  %v2951_v56 = vmul.f32 %v16613_v51, %v16613_v51 }
 0x3e5   :  { %v2745_v36 = vpop.f32.mrf.mxu0  ;;  %v16630_v47 = vmax.f32 %v2839_v44, 0.0 }
 0x3e6   :  { %v2804_v16 = vadd.f32 %v2745_v36, %v16436_v59  ;;  %v2836_v59 = vadd.f32 %v16478_v11, %v16465_v21  ;;  %v2903_v48 = vadd.f32 %v2902_v62, %v16570_v60  ;;  %v2981_v31 = vadd.f32 %v2980_v42, %v2946_v30  ;;  %v16628_v62 = vpop.f32.mrf.mxu2 }
 0x3e7   :  { %v2948_v21 = vmul.f32 %v16587_v1, %v16587_v1  ;;  %19861 = vst [vmem:[#allocation71_spill] sm:$0xff] %v16630_v47  ;;  %v16638_v8 = vmax.f32 %v2840_v15, 0.0 }
 0x3e8   :  { %v2904_v37 = vadd.f32 %v2903_v48, %v16578_v7  ;;  %v16605_v5 = vmax.f32 %v2836_v59, 0.0  ;;  %v2982_v2 = vadd.f32 %v2981_v31, %v2947_v55  ;;  %v2841_v30 = vadd.f32 %v16478_v11, %v2804_v16  ;;  %v16634_v55 = vpop.f32.mrf.mxu3 }
 0x3e9   :  { %19862 = vst [vmem:[#allocation82_spill] sm:$0xff] %v16638_v8  ;;  %v2953_v16 = vmul.f32 %v16630_v47, %v16630_v47  ;;  %v2954_v44 = vmul.f32 %v16638_v8, %v16638_v8 }
 0x3ea   :  { %19858 = vst [vmem:[#allocation70_spill] sm:$0xff] %v16605_v5  ;;  %v2905_v52 = vadd.f32 %v2904_v37, %v16587_v1  ;;  %v2983_v22 = vadd.f32 %v2982_v2, %v2948_v21  ;;  %v2950_v29 = vmul.f32 %v16605_v5, %v16605_v5 }
 0x3ec   :  { %v2906_v36 = vadd.f32 %v2905_v52, %v16596_v38  ;;  %v2984_v6 = vadd.f32 %v2983_v22, %v2949_v46 }
 0x3ed   :  { %v2748_v0 = vpop.f32.mrf.mxu0 }
 0x3ee   :  { %v2805_v25 = vadd.f32 %v2748_v0, %v16443_v32  ;;  %v16622_v32 = vmax.f32 %v2838_v33, 0.0  ;;  %v2907_v50 = vadd.f32 %v2906_v36, %v16605_v5  ;;  %v2985_v59 = vadd.f32 %v2984_v6, %v2950_v29 }
 0x3ef   :  { %v16645_v33 = vmax.f32 %v2841_v30, 0.0  ;;  %v1640_v5 = vadd.f32 %v16620_v35, %v16164_v23 }
 0x3f0   :  { %19860 = vst [vmem:[#allocation72_spill] sm:$0xff] %v16622_v32  ;;  %v2908_v42 = vadd.f32 %v2907_v50, %v16613_v51  ;;  %v2952_v53 = vmul.f32 %v16622_v32, %v16622_v32  ;;  %v2842_v31 = vadd.f32 %v16478_v11, %v2805_v25  ;;  %v2986_v21 = vadd.f32 %v2985_v59, %v2951_v56  ;;  %v16653_v25 = vpop.f32.mrf.mxu1  ;;  %v16660_v50 = vpop.f32.mrf.mxu2 }
 0x3f1   :  { %19863 = vst [vmem:[#allocation56_spill] sm:$0xff] %v16645_v33  ;;  %v2955_v29 = vmul.f32 %v16645_v33, %v16645_v33  ;;  %v1642_v7 = vadd.f32 %v16653_v25, %v16183_v20  ;;  %v2039_v60 = vadd.f32 %v16628_v62, %v1640_v5 }
 0x3f2   :  { %v2909_v0 = vadd.f32 %v2908_v42, %v16622_v32  ;;  %v2987_v52 = vadd.f32 %v2986_v21, %v2952_v53  ;;  %v16651_v22 = vmax.f32 %v2842_v31, 0.0  ;;  %v19865_v32 = vld [vmem:[#allocation46_spill] sm:$0xff] }
 0x3f3   :  { %v1637_v51 = vadd.f32 %v16582_v24, %v19865_v32  ;;  %v2040_v12 = vadd.f32 %v16660_v50, %v1642_v7  ;;  %v2424_v24 = vadd.f32 %v16634_v55, %v2039_v60 }
 0x3f4   :  { %v2910_v46 = vadd.f32 %v2909_v0, %v16630_v47  ;;  %19864 = vst [vmem:[#allocation75_spill] sm:$0xff] %v16651_v22  ;;  %v2956_v59 = vmul.f32 %v16651_v22, %v16651_v22 }
 0x3f5   :  { %v2750_v48 = vpop.f32.mrf.mxu0  ;;  %v2038_v38 = vadd.f32 %v16591_v28, %v1637_v51 }
 0x3f6   :  { %v2806_v37 = vadd.f32 %v2750_v48, %v16448_v57  ;;  %v2988_v57 = vadd.f32 %v2987_v52, %v2953_v16  ;;  %v2911_v36 = vadd.f32 %v2910_v46, %v16638_v8  ;;  %v16666_v48 = vpop.f32.mrf.mxu3 }
 0x3f7   :  { %v2423_v4 = vadd.f32 %v16600_v41, %v2038_v38  ;;  %v2425_v28 = vadd.f32 %v16666_v48, %v2040_v12 }
 0x3f8   :  { %v2843_v2 = vadd.f32 %v16478_v11, %v2806_v37  ;;  %v2989_v56 = vadd.f32 %v2988_v57, %v2954_v44  ;;  %v2912_v30 = vadd.f32 %v2911_v36, %v16645_v33  ;;  %v1644_v57 = vpop.f32.mrf.mxu1 }
 0x3f9   :  { %v1645_v43 = vadd.f32 %v1644_v57, %v16206_v40 }
 0x3fa   :  { %v16658_v15 = vmax.f32 %v2843_v2, 0.0  ;;  %v2990_v53 = vadd.f32 %v2989_v56, %v2955_v29  ;;  %v2913_v31 = vadd.f32 %v2912_v30, %v16651_v22  ;;  %v1993_v29 = vpop.f32.mrf.mxu2 }
 0x3fb   :  { %v2041_v23 = vadd.f32 %v1993_v29, %v1645_v43 }
 0x3fc   :  { %v2957_v37 = vmul.f32 %v16658_v15, %v16658_v15  ;;  %v2991_v0 = vadd.f32 %v2990_v53, %v2956_v59  ;;  %v2914_v16 = vadd.f32 %v2913_v31, %v16658_v15 }
 0x3fd   :  { %v2753_v6 = vpop.f32.mrf.mxu0 }
 0x3fe   :  { %v2807_v42 = vadd.f32 %v2753_v6, %v16455_v54  ;;  %v2992_v52 = vadd.f32 %v2991_v0, %v2957_v37  ;;  %v2378_v6 = vpop.f32.mrf.mxu3 }
 0x3ff   :  { %v2426_v25 = vadd.f32 %v2378_v6, %v2041_v23 }
 0x400   :  { %v2844_v21 = vadd.f32 %v16478_v11, %v2807_v42  ;;  %v1646_v30 = vpop.f32.mrf.mxu1 }
 0x401   :  { %v1647_v35 = vadd.f32 %v1646_v30, %v16228_v27 }
 0x402   :  { %v16673_v2 = vmax.f32 %v2844_v21, 0.0  ;;  %v1995_v59 = vpop.f32.mrf.mxu2 }
 0x403   :  { %v2042_v62 = vadd.f32 %v1995_v59, %v1647_v35 }
 0x404   :  { %v16676_v46 = vadd.f32 %v2914_v16, %v16673_v2  ;;  %v2958_v54 = vmul.f32 %v16673_v2, %v16673_v2 }
 0x405   :  { %v2755_v44 = vpop.f32.mrf.mxu0 }
 0x406   :  { %v16680_v36 = vadd.f32 %v2992_v52, %v2958_v54  ;;  %v2380_v42 = vpop.f32.mrf.mxu3  ;;  %v2808_v32 = vadd.f32 %v2755_v44, %v2423_v4 }
 0x407   :  { %v2427_v55 = vadd.f32 %v2380_v42, %v2042_v62 }
 0x408   :  { %v1649_v31 = vpop.f32.mrf.mxu1  ;;  %v2845_v5 = vadd.f32 %v16478_v11, %v2808_v32 }
 0x409   :  { %v1650_v40 = vadd.f32 %v1649_v31, %v16252_v26 }
 0x40a   :  { %v1998_v21 = vpop.f32.mrf.mxu2  ;;  %v16711_v12 = vmax.f32 %v2845_v5, 0.0 }
 0x40b   :  { %v2043_v43 = vadd.f32 %v1998_v21, %v1650_v40 }
 0x40d   :  { %v2758_v56 = vpop.f32.mrf.mxu0 }
 0x40e   :  { %v2383_v0 = vpop.f32.mrf.mxu3  ;;  %v2809_v51 = vadd.f32 %v2758_v56, %v2424_v24 }
 0x40f   :  { %v2428_v57 = vadd.f32 %v2383_v0, %v2043_v43 }
 0x410   :  { %v1651_v16 = vpop.f32.mrf.mxu1  ;;  %v2846_v7 = vadd.f32 %v16478_v11, %v2809_v51 }
 0x411   :  { %v1652_v4 = vadd.f32 %v1651_v16, %v16274_v9 }
 0x412   :  { %v2000_v22 = vpop.f32.mrf.mxu2  ;;  %v16715_v6 = vmax.f32 %v2846_v7, 0.0 }
 0x413   :  { %v2044_v44 = vadd.f32 %v2000_v22, %v1652_v4 }
 0x415   :  { %v2760_v53 = vpop.f32.mrf.mxu0 }
 0x416   :  { %v16682_v33 = vpop.f32.mrf.mxu3  ;;  %v2810_v38 = vadd.f32 %v2760_v53, %v2425_v28  ;;  %v2959_v53 = vmul.f32 %v16711_v12, %v16711_v12 }
 0x417   :  { %v2429_v59 = vadd.f32 %v16682_v33, %v2044_v44 }
 0x418   :  { %v1654_v54 = vpop.f32.mrf.mxu1  ;;  %v2847_v27 = vadd.f32 %v16478_v11, %v2810_v38 }
 0x419   :  { %v1655_v50 = vadd.f32 %v1654_v54, %v16299_v61 }
 0x41a   :  { %v2003_v8 = vpop.f32.mrf.mxu2  ;;  %v16722_v31 = vmax.f32 %v2847_v27, 0.0 }
 0x41b   :  { %v2045_v30 = vadd.f32 %v2003_v8, %v1655_v50 }
 0x41d   :  { %v2763_v37 = vpop.f32.mrf.mxu0 }
 0x41e   :  { %v2388_v47 = vpop.f32.mrf.mxu3  ;;  %v2811_v60 = vadd.f32 %v2763_v37, %v2426_v25 }
 0x41f   :  { %v2430_v21 = vadd.f32 %v2388_v47, %v2045_v30 }
 0x420   :  { %v1656_v45 = vpop.f32.mrf.mxu1  ;;  %v2848_v26 = vadd.f32 %v16478_v11, %v2811_v60 }
 0x421   :  { %v1657_v56 = vadd.f32 %v1656_v45, %v16325_v10  ;;  %v2916_v10 = vadd.f32 %v16676_v46, %v16711_v12  ;;  %v2960_v45 = vmul.f32 %v16715_v6, %v16715_v6 }
 0x422   :  { %v2005_v13 = vpop.f32.mrf.mxu2  ;;  %v16729_v8 = vmax.f32 %v2848_v26, 0.0 }
 0x423   :  { %v2046_v22 = vadd.f32 %v2005_v13, %v1657_v56  ;;  %v2994_v13 = vadd.f32 %v16680_v36, %v2959_v53  ;;  %v2917_v47 = vadd.f32 %v2916_v10, %v16715_v6 }
 0x424   :  { %v2962_v51 = vmul.f32 %v16729_v8, %v16729_v8 }
 0x425   :  { %v2765_v39 = vpop.f32.mrf.mxu0  ;;  %v2995_v28 = vadd.f32 %v2994_v13, %v2960_v45 }
 0x426   :  { %v2390_v20 = vpop.f32.mrf.mxu3  ;;  %v2812_v29 = vadd.f32 %v2765_v39, %v2427_v55 }
 0x427   :  { %v2431_v16 = vadd.f32 %v2390_v20, %v2046_v22 }
 0x428   :  { %v1659_v48 = vpop.f32.mrf.mxu1  ;;  %v2849_v37 = vadd.f32 %v16478_v11, %v2812_v29 }
 0x429   :  { %v1660_v33 = vadd.f32 %v1659_v48, %v16342_v17  ;;  %v2918_v17 = vadd.f32 %v2917_v47, %v16722_v31 }
 0x42a   :  { %v2008_v9 = vpop.f32.mrf.mxu2  ;;  %v16737_v46 = vmax.f32 %v2849_v37, 0.0 }
 0x42b   :  { %v2047_v24 = vadd.f32 %v2008_v9, %v1660_v33  ;;  %v2919_v38 = vadd.f32 %v2918_v17, %v16729_v8 }
 0x42c   :  { %v2963_v62 = vmul.f32 %v16737_v46, %v16737_v46 }
 0x42d   :  { %v2768_v52 = vpop.f32.mrf.mxu0  ;;  %v2920_v50 = vadd.f32 %v2919_v38, %v16737_v46 }
 0x42e   :  { %v2813_v42 = vadd.f32 %v2768_v52, %v2428_v57  ;;  %v2393_v39 = vpop.f32.mrf.mxu3 }
 0x42f   :  { %v2432_v20 = vadd.f32 %v2393_v39, %v2047_v24 }
 0x430   :  { %v2850_v52 = vadd.f32 %v16478_v11, %v2813_v42  ;;  %v1661_v35 = vpop.f32.mrf.mxu1 }
 0x431   :  { %v1662_v43 = vadd.f32 %v1661_v35, %v16352_v49 }
 0x432   :  { %v16743_v36 = vmax.f32 %v2850_v52, 0.0  ;;  %v2010_v40 = vpop.f32.mrf.mxu2 }
 0x433   :  { %v2048_v29 = vadd.f32 %v2010_v40, %v1662_v43 }
 0x434   :  { %v2964_v48 = vmul.f32 %v16743_v36, %v16743_v36  ;;  %v2921_v56 = vadd.f32 %v2920_v50, %v16743_v36 }
 0x435   :  { %v2770_v1 = vpop.f32.mrf.mxu0 }
 0x436   :  { %v2814_v0 = vadd.f32 %v2770_v1, %v2429_v59  ;;  %v2961_v1 = vmul.f32 %v16722_v31, %v16722_v31  ;;  %v2395_v27 = vpop.f32.mrf.mxu3 }
 0x437   :  { %v2433_v49 = vadd.f32 %v2395_v27, %v2048_v29 }
 0x438   :  { %v2851_v32 = vadd.f32 %v16478_v11, %v2814_v0  ;;  %v2996_v5 = vadd.f32 %v2995_v28, %v2961_v1 }
 0x43a   :  { %v16749_v7 = vmax.f32 %v2851_v32, 0.0  ;;  %v2997_v55 = vadd.f32 %v2996_v5, %v2962_v51 }
 0x43c   :  { %v2998_v26 = vadd.f32 %v2997_v55, %v2963_v62  ;;  %v2965_v30 = vmul.f32 %v16749_v7, %v16749_v7  ;;  %v2922_v42 = vadd.f32 %v2921_v56, %v16749_v7 }
 0x43d   :  { %v2773_v41 = vpop.f32.mrf.mxu0 }
 0x43e   :  { %v2815_v54 = vadd.f32 %v2773_v41, %v2430_v21  ;;  %v2999_v59 = vadd.f32 %v2998_v26, %v2964_v48 }
 0x440   :  { %v2852_v25 = vadd.f32 %v16478_v11, %v2815_v54  ;;  %v3000_v21 = vadd.f32 %v2999_v59, %v2965_v30 }
 0x442   :  { %v16756_v44 = vmax.f32 %v2852_v25, 0.0 }
 0x444   :  { %v2966_v53 = vmul.f32 %v16756_v44, %v16756_v44  ;;  %v2923_v39 = vadd.f32 %v2922_v42, %v16756_v44 }
 0x445   :  { %v2775_v61 = vpop.f32.mrf.mxu0 }
 0x446   :  { %v2816_v23 = vadd.f32 %v2775_v61, %v2431_v16  ;;  %v3001_v10 = vadd.f32 %v3000_v21, %v2966_v53 }
 0x448   :  { %v2853_v60 = vadd.f32 %v16478_v11, %v2816_v23 }
 0x44a   :  { %v16762_v9 = vmax.f32 %v2853_v60, 0.0 }
 0x44c   :  { %v2967_v37 = vmul.f32 %v16762_v9, %v16762_v9  ;;  %v2924_v45 = vadd.f32 %v2923_v39, %v16762_v9 }
 0x44d   :  { %v2778_v41 = vpop.f32.mrf.mxu0 }
 0x44e   :  { %v2817_v4 = vadd.f32 %v2778_v41, %v2432_v20  ;;  %v3002_v52 = vadd.f32 %v3001_v10, %v2967_v37 }
 0x450   :  { %v2854_v57 = vadd.f32 %v16478_v11, %v2817_v4 }
 0x452   :  { %v16767_v61 = vmax.f32 %v2854_v57, 0.0 }
 0x454   :  { %v2968_v33 = vmul.f32 %v16767_v61, %v16767_v61  ;;  %v2925_v54 = vadd.f32 %v2924_v45, %v16767_v61 }
 0x455   :  { %v2780_v22 = vpop.f32.mrf.mxu0 }
 0x456   :  { %v2818_v0 = vadd.f32 %v2780_v22, %v2433_v49  ;;  %v3003_v47 = vadd.f32 %v3002_v52, %v2968_v33  ;;  %v19873_v52 = vld [vmem:[#allocation49_spill] sm:$0xff] }
 0x458   :  { %v2855_v16 = vadd.f32 %v16478_v11, %v2818_v0 }
 0x45a   :  { %v16777_v13 = vmax.f32 %v2855_v16, 0.0 }
 0x45c   :  { %v2926_v1 = vadd.f32 %v2925_v54, %v16777_v13  ;;  %v2969_v24 = vmul.f32 %v16777_v13, %v16777_v13 }
 0x45e   :  { %v2927_v32 = vrot.slane %v2926_v1, 4  ;;  %v3004_v23 = vadd.f32 %v3003_v47, %v2969_v24  ;;  %v19874_v47 = vld [vmem:[#allocation64_spill] sm:$0xff] }
 0x460   :  { %v2928_v28 = vadd.f32 %v2927_v32, %v2926_v1  ;;  %v3005_v17 = vrot.slane %v3004_v23, 4  ;;  %v19875_v32 = vld [vmem:[#allocation70_spill] sm:$0xff] }
 0x462   :  { %v2929_v51 = vrot.slane %v2928_v28, 2  ;;  %v3006_v35 = vadd.f32 %v3005_v17, %v3004_v23 }
 0x464   :  { %v2930_v20 = vadd.f32 %v2929_v51, %v2928_v28  ;;  %v3007_v25 = vrot.slane %v3006_v35, 2  ;;  %v19876_v28 = vld [vmem:[#allocation69_spill] sm:$0xff]  ;;  %v19877_v51 = vld [vmem:[#allocation72_spill] sm:$0xff] }
 0x466   :  { %v2931_v11 = vrot.slane %v2930_v20, 1  ;;  %v3008_v5 = vadd.f32 %v3007_v25, %v3006_v35 }
 0x468   :  { %v2932_v38 = vadd.f32 %v2931_v11, %v2930_v20  ;;  %v3009_v41 = vrot.slane %v3008_v5, 1  ;;  %v19878_v20 = vld [vmem:[#allocation71_spill] sm:$0xff]  ;;  %v19879_v11 = vld [vmem:[#allocation82_spill] sm:$0xff] }
 0x46a   :  { %v16782_v40 = vmul.f32 0.0034722222, %v2932_v38  ;;  %v3010_v62 = vadd.f32 %v3009_v41, %v3008_v5  ;;  %v19880_v38 = vld [vmem:[#allocation56_spill] sm:$0xff] }
 0x46c   :  { %v3011_v60 = vmul.f32 0.0034722222, %v3010_v62  ;;  %v3012_v4 = vmul.f32 %v16782_v40, %v16782_v40  ;;  %v3038_v27 = vsub.f32 %v16658_v15, %v16782_v40  ;;  %v3039_v50 = vsub.f32 %v16673_v2, %v16782_v40 }
 0x46d   :  { %v3050_v48 = vsub.f32 %v16777_v13, %v16782_v40  ;;  %v3015_v26 = vsub.f32 %v16491_v58, %v16782_v40  ;;  %v3016_v56 = vsub.f32 %v16485_v63, %v16782_v40  ;;  %v3017_v49 = vsub.f32 %v16493_v14, %v16782_v40  ;;  %v19866_v58 = vld [vmem:[#allocation44_spill] sm:$0xff]  ;;  %v19867_v63 = vld [vmem:[#allocation65_spill] sm:$0xff]  ;;  %v19868_v14 = vld [vmem:[#allocation67_spill] sm:$0xff] }
 0x46e   :  { %v3013_v43 = vsub.f32 %v3011_v60, %v3012_v4  ;;  %v3018_v59 = vsub.f32 %v16500_v18, %v16782_v40  ;;  %v3019_v42 = vsub.f32 %v16508_v34, %v16782_v40  ;;  %v3020_v53 = vsub.f32 %v16516_v3, %v16782_v40  ;;  %v19869_v18 = vld [vmem:[#allocation68_spill] sm:$0xff]  ;;  %v19870_v34 = vld [vmem:[#allocation51_spill] sm:$0xff]  ;;  %v19871_v3 = vld [vmem:[#allocation66_spill] sm:$0xff] }
 0x46f   :  { %v3021_v22 = vsub.f32 %v16526_v19, %v16782_v40  ;;  %v3022_v21 = vsub.f32 %v19866_v58, %v16782_v40  ;;  %v3023_v39 = vsub.f32 %v19867_v63, %v16782_v40  ;;  %v3024_v0 = vsub.f32 %v19868_v14, %v16782_v40  ;;  %v19872_v19 = vld [vmem:[#allocation58_spill] sm:$0xff]  ;;  %v19881_v60 = vld [vmem:[#allocation75_spill] sm:$0xff] }
 0x470   :  { %v3014_v55 = vmax.f32 %v3013_v43, 0.0  ;;  %v3025_v10 = vsub.f32 %v19869_v18, %v16782_v40  ;;  %v3026_v45 = vsub.f32 %v19870_v34, %v16782_v40  ;;  %v3027_v33 = vsub.f32 %v19871_v3, %v16782_v40 }
 0x471   :  { %v3028_v16 = vsub.f32 %v19872_v19, %v16782_v40  ;;  %v3029_v54 = vsub.f32 %v19873_v52, %v16782_v40  ;;  %v3030_v1 = vsub.f32 %v19874_v47, %v16782_v40  ;;  %v3031_v23 = vsub.f32 %v19875_v32, %v16782_v40 }
 0x472   :  { %v3051_v57 = vadd.f32 1e-05, %v3014_v55  ;;  %v3032_v17 = vsub.f32 %v19876_v28, %v16782_v40  ;;  %v3033_v35 = vsub.f32 %v19877_v51, %v16782_v40  ;;  %v3034_v25 = vsub.f32 %v19878_v20, %v16782_v40 }
 0x473   :  { %v3035_v5 = vsub.f32 %v19879_v11, %v16782_v40  ;;  %v3036_v41 = vsub.f32 %v19880_v38, %v16782_v40  ;;  %v3037_v4 = vsub.f32 %v19881_v60, %v16782_v40  ;;  %v3040_v43 = vsub.f32 %v16711_v12, %v16782_v40 }
 0x474   :  { %14465 = vrsqrt.f32 %v3051_v57  ;;  %v3041_v55 = vsub.f32 %v16715_v6, %v16782_v40  ;;  %v3043_v58 = vsub.f32 %v16729_v8, %v16782_v40  ;;  %v3044_v63 = vsub.f32 %v16737_v46, %v16782_v40  ;;  %v19882_v46 = vld [vmem:[#allocation61_spill] sm:$0xff] }
 0x475   :  { %vm3058_vm6 = vweird.f32 %v3051_v57  ;;  %v3045_v14 = vsub.f32 %v16743_v36, %v16782_v40  ;;  %v3046_v12 = vsub.f32 %v16749_v7, %v16782_v40  ;;  %v3047_v6 = vsub.f32 %v16756_v44, %v16782_v40 }
 0x476   :  { %v3049_v8 = vsub.f32 %v16767_v61, %v16782_v40  ;;  %v16859_v34 = vperm.slane %v19882_v46, 1 }
 0x47a   :  { %v14466_v29 = vpop.eup %14465 }
 0x47b   :  { %v3053_v30 = vmul.f32 %v14466_v29, %v3051_v57  ;;  %vm3059_vm5 = vweird.f32 %v14466_v29  ;;  %v16862_v57 = vperm.slane %v19882_v46, 2 }
 0x47c   :  { %vm3060_vm7 = vmor %vm3058_vm6, %vm3059_vm5 }
 0x47d   :  { %v3054_v37 = vmul.f32 %v14466_v29, %v3053_v30  ;;  %v3042_v30 = vsub.f32 %v16722_v31, %v16782_v40  ;;  %v3048_v31 = vsub.f32 %v16762_v9, %v16782_v40 }
 0x47f   :  { %v3055_v24 = vmul.f32 0.5, %v3054_v37 }
 0x481   :  { %v3056_v62 = vsub.f32 1.5, %v3055_v24 }
 0x483   :  { %v3057_v37 = vmul.f32 %v14466_v29, %v3056_v62 }
 0x485   :  { %v3061_v18 = vsel %vm3060_vm7, %v14466_v29, %v3057_v37 }
 0x486   :  { %v3062_v36 = vmul.f32 %v3061_v18, %v3015_v26  ;;  %v3063_v3 = vmul.f32 %v3061_v18, %v3016_v56  ;;  %v3064_v7 = vmul.f32 %v3061_v18, %v3017_v49  ;;  %v3065_v19 = vmul.f32 %v3061_v18, %v3018_v59 }
 0x487   :  { %v3066_v52 = vmul.f32 %v3061_v18, %v3019_v42  ;;  %v3067_v44 = vmul.f32 %v3061_v18, %v3020_v53  ;;  %v3068_v47 = vmul.f32 %v3061_v18, %v3021_v22  ;;  %v3069_v24 = vmul.f32 %v3061_v18, %v3022_v21 }
 0x488   :  { %v3070_v9 = vmul.f32 %v3061_v18, %v3023_v39  ;;  %v3071_v32 = vmul.f32 %v3061_v18, %v3024_v0  ;;  %v3072_v28 = vmul.f32 %v3061_v18, %v3025_v10  ;;  %v3073_v51 = vmul.f32 %v3061_v18, %v3026_v45 }
 0x489   :  { %v3074_v61 = vmul.f32 %v3061_v18, %v3027_v33  ;;  %v3075_v29 = vmul.f32 %v3061_v18, %v3028_v16  ;;  %v3076_v20 = vmul.f32 %v3061_v18, %v3029_v54  ;;  %v3077_v11 = vmul.f32 %v3061_v18, %v3030_v1 }
 0x48a   :  { %v3078_v38 = vmul.f32 %v3061_v18, %v3031_v23  ;;  %v3079_v62 = vmul.f32 %v3061_v18, %v3032_v17  ;;  %v3080_v60 = vmul.f32 %v3061_v18, %v3033_v35  ;;  %v3081_v37 = vmul.f32 %v3061_v18, %v3034_v25 }
 0x48b   :  { %v3082_v26 = vmul.f32 %v3061_v18, %v3035_v5  ;;  %v3083_v56 = vmul.f32 %v3061_v18, %v3036_v41  ;;  %v3084_v49 = vmul.f32 %v3061_v18, %v3037_v4  ;;  %v3085_v59 = vmul.f32 %v3061_v18, %v3038_v27 }
 0x48c   :  { %v3086_v42 = vmul.f32 %v3061_v18, %v3039_v50  ;;  %v3087_v53 = vmul.f32 %v3061_v18, %v3040_v43  ;;  %v3088_v22 = vmul.f32 %v3061_v18, %v3041_v55  ;;  %v3089_v21 = vmul.f32 %v3061_v18, %v3042_v30 }
 0x48d   :  { %v3090_v39 = vmul.f32 %v3061_v18, %v3043_v58  ;;  %v3091_v0 = vmul.f32 %v3061_v18, %v3044_v63  ;;  %v3092_v10 = vmul.f32 %v3061_v18, %v3045_v14  ;;  %v3093_v45 = vmul.f32 %v3061_v18, %v3046_v12 }
 0x48e   :  { %v3094_v33 = vmul.f32 %v3061_v18, %v3047_v6  ;;  %v3095_v16 = vmul.f32 %v3061_v18, %v3048_v31  ;;  %v3096_v54 = vmul.f32 %v3061_v18, %v3049_v8  ;;  %v3097_v1 = vmul.f32 %v3061_v18, %v3050_v48 }
 0x48f   :  { %v3099_v15 = vmul.f32 %v16859_v34, %v3062_v36  ;;  %v3100_v27 = vmul.f32 %v16859_v34, %v3063_v3  ;;  %v3101_v2 = vmul.f32 %v16859_v34, %v3064_v7  ;;  %v3102_v50 = vmul.f32 %v16859_v34, %v3065_v19 }
 0x490   :  { %v3103_v23 = vmul.f32 %v16859_v34, %v3066_v52  ;;  %v3104_v17 = vmul.f32 %v16859_v34, %v3067_v44  ;;  %v3105_v35 = vmul.f32 %v16859_v34, %v3068_v47  ;;  %v3106_v25 = vmul.f32 %v16859_v34, %v3069_v24 }
 0x491   :  { %v3107_v5 = vmul.f32 %v16859_v34, %v3070_v9  ;;  %v3108_v13 = vmul.f32 %v16859_v34, %v3071_v32  ;;  %v3109_v40 = vmul.f32 %v16859_v34, %v3072_v28  ;;  %v3110_v48 = vmul.f32 %v16859_v34, %v3073_v51 }
 0x492   :  { %v3111_v41 = vmul.f32 %v16859_v34, %v3074_v61  ;;  %v3112_v4 = vmul.f32 %v16859_v34, %v3075_v29  ;;  %v3113_v43 = vmul.f32 %v16859_v34, %v3076_v20  ;;  %v3114_v55 = vmul.f32 %v16859_v34, %v3077_v11 }
 0x493   :  { %v3115_v30 = vmul.f32 %v16859_v34, %v3078_v38  ;;  %v3116_v58 = vmul.f32 %v16859_v34, %v3079_v62  ;;  %v3117_v63 = vmul.f32 %v16859_v34, %v3080_v60  ;;  %v3118_v14 = vmul.f32 %v16859_v34, %v3081_v37 }
 0x494   :  { %v3119_v12 = vmul.f32 %v16859_v34, %v3082_v26  ;;  %v3120_v6 = vmul.f32 %v16859_v34, %v3083_v56  ;;  %v3121_v31 = vmul.f32 %v16859_v34, %v3084_v49  ;;  %v3122_v8 = vmul.f32 %v16859_v34, %v3085_v59 }
 0x495   :  { %v3123_v18 = vmul.f32 %v16859_v34, %v3086_v42  ;;  %v3124_v36 = vmul.f32 %v16859_v34, %v3087_v53  ;;  %v3125_v3 = vmul.f32 %v16859_v34, %v3088_v22  ;;  %v3126_v7 = vmul.f32 %v16859_v34, %v3089_v21 }
 0x496   :  { %v3127_v19 = vmul.f32 %v16859_v34, %v3090_v39  ;;  %v3128_v52 = vmul.f32 %v16859_v34, %v3091_v0  ;;  %v3129_v44 = vmul.f32 %v16859_v34, %v3092_v10  ;;  %v3130_v47 = vmul.f32 %v16859_v34, %v3093_v45 }
 0x497   :  { %v3131_v24 = vmul.f32 %v16859_v34, %v3094_v33  ;;  %v3132_v9 = vmul.f32 %v16859_v34, %v3095_v16  ;;  %v3133_v32 = vmul.f32 %v16859_v34, %v3096_v54  ;;  %v3134_v28 = vmul.f32 %v16859_v34, %v3097_v1 }
 0x498   :  { %v16910_v51 = vadd.f32 %v16862_v57, %v3099_v15  ;;  %v16913_v61 = vadd.f32 %v16862_v57, %v3100_v27  ;;  %v16916_v29 = vadd.f32 %v16862_v57, %v3101_v2  ;;  %v16919_v20 = vadd.f32 %v16862_v57, %v3102_v50 }
 0x499   :  { %v16922_v11 = vadd.f32 %v16862_v57, %v3103_v23  ;;  %v16925_v38 = vadd.f32 %v16862_v57, %v3104_v17  ;;  %v16928_v34 = vadd.f32 %v16862_v57, %v3105_v35  ;;  %v16931_v62 = vadd.f32 %v16862_v57, %v3106_v25 }
 0x49a   :  { %v16934_v60 = vadd.f32 %v16862_v57, %v3107_v5  ;;  %v16937_v37 = vadd.f32 %v16862_v57, %v3108_v13  ;;  %v16940_v26 = vadd.f32 %v16862_v57, %v3109_v40  ;;  %v16943_v56 = vadd.f32 %v16862_v57, %v3110_v48 }
 0x49b   :  { %v16946_v49 = vadd.f32 %v16862_v57, %v3111_v41  ;;  %v16949_v59 = vadd.f32 %v16862_v57, %v3112_v4  ;;  %v16952_v42 = vadd.f32 %v16862_v57, %v3113_v43  ;;  %v16955_v53 = vadd.f32 %v16862_v57, %v3114_v55 }
 0x49c   :  { %v16958_v22 = vadd.f32 %v16862_v57, %v3115_v30  ;;  %v16961_v21 = vadd.f32 %v16862_v57, %v3116_v58  ;;  %v16964_v39 = vadd.f32 %v16862_v57, %v3117_v63  ;;  %v16967_v0 = vadd.f32 %v16862_v57, %v3118_v14 }
 0x49d   :  { %v16970_v10 = vadd.f32 %v16862_v57, %v3119_v12  ;;  %v16973_v45 = vadd.f32 %v16862_v57, %v3120_v6  ;;  %v16976_v33 = vadd.f32 %v16862_v57, %v3121_v31  ;;  %v16979_v16 = vadd.f32 %v16862_v57, %v3122_v8 }
 0x49e   :  { %v16982_v54 = vadd.f32 %v16862_v57, %v3123_v18  ;;  %v16985_v1 = vadd.f32 %v16862_v57, %v3124_v36  ;;  %v16988_v15 = vadd.f32 %v16862_v57, %v3125_v3  ;;  %v16991_v27 = vadd.f32 %v16862_v57, %v3126_v7 }
 0x49f   :  { %v16994_v2 = vadd.f32 %v16862_v57, %v3127_v19  ;;  %v16997_v50 = vadd.f32 %v16862_v57, %v3128_v52  ;;  %v17000_v23 = vadd.f32 %v16862_v57, %v3129_v44  ;;  %v17003_v17 = vadd.f32 %v16862_v57, %v3130_v47 }
 0x4a0   :  { %v17006_v35 = vadd.f32 %v16862_v57, %v3131_v24  ;;  %v17009_v25 = vadd.f32 %v16862_v57, %v3132_v9  ;;  %v17012_v5 = vadd.f32 %v16862_v57, %v3133_v32  ;;  %v17015_v13 = vadd.f32 %v16862_v57, %v3134_v28 }
 0x4a1   :  { %v3208_v40 = vrot.slane %v16910_v51, 4  ;;  %v3209_v48 = vrot.slane %v16913_v61, 4  ;;  %v3210_v41 = vrot.slane %v16916_v29, 4  ;;  %v3211_v4 = vrot.slane %v16919_v20, 4 }
 0x4a2   :  { %19883 = vst [vmem:[#allocation27_spill] sm:$0xff] %v17012_v5  ;;  %v3212_v43 = vrot.slane %v16922_v11, 4  ;;  %v3213_v55 = vrot.slane %v16925_v38, 4  ;;  %v3214_v30 = vrot.slane %v16928_v34, 4  ;;  %v3215_v58 = vrot.slane %v16931_v62, 4 }
 0x4a3   :  { %19884 = vst [vmem:[#allocation28_spill] sm:$0xff] %v17015_v13  ;;  %v3216_v63 = vrot.slane %v16934_v60, 4  ;;  %v3217_v57 = vrot.slane %v16937_v37, 4  ;;  %v3218_v14 = vrot.slane %v16940_v26, 4  ;;  %v3219_v12 = vrot.slane %v16943_v56, 4 }
 0x4a4   :  { %v3220_v6 = vrot.slane %v16946_v49, 4  ;;  %v3221_v31 = vrot.slane %v16949_v59, 4  ;;  %v3222_v8 = vrot.slane %v16952_v42, 4  ;;  %v3223_v18 = vrot.slane %v16955_v53, 4 }
 0x4a5   :  { %14567 = dma.done.wait [#allocation5], 25600 }
 0x4a6   :  { %14568 = vsyncadd [#allocation5], 4294941696  ;;  %3249 = vst [vmem:[#allocation1] ss:$2 sm:$0xff] %v16910_v51  ;;  %v13976_v44 = vld [vmem:[#allocation2 + $0x178] sm:$0xff]  ;;  %v13975_v24 = vld [vmem:[#allocation2 + $0x170] sm:$0xff] }
 0x4a7   :  { %3251 = vst [vmem:[#allocation1 + $0x1] ss:$2 sm:$0xff] %v3208_v40  ;;  %v13984_v52 = vld [vmem:[#allocation2 + $0x1b8] sm:$0xff]  ;;  %4329 = vmatpush.bf16.msrb.mxu1 %v13976_v44  ;;  %v13983_v9 = vld [vmem:[#allocation2 + $0x1b0] sm:$0xff]  ;;  %v13974_v19 = vld [vmem:[#allocation2 + $0x168] sm:$0xff] }
 0x4a8   :  { %3253 = vst [vmem:[#allocation1 + $0x10] ss:$2 sm:$0xff] %v16913_v61  ;;  %v13992_v47 = vld [vmem:[#allocation2 + $0x1f8] sm:$0xff]  ;;  %4378 = vmatpush.bf16.msrb.mxu2 %v13984_v52  ;;  %v13991_v32 = vld [vmem:[#allocation2 + $0x1f0] sm:$0xff]  ;;  %v13982_v51 = vld [vmem:[#allocation2 + $0x1a8] sm:$0xff] }
 0x4a9   :  { %3257 = vst [vmem:[#allocation1 + $0x20] ss:$2 sm:$0xff] %v3209_v48  ;;  %4427 = vmatpush.bf16.msrb.mxu3 %v13992_v47  ;;  %v13990_v40 = vld [vmem:[#allocation2 + $0x1e8] sm:$0xff]  ;;  %v13973_v44 = vld [vmem:[#allocation2 + $0x160] sm:$0xff]  ;;  %v13935_v3 = vld [vmem:[#allocation2 + $0x30] sm:$0xff] }
 0x4aa   :  { %3259 = vst [vmem:[#allocation1 + $0x21] ss:$2 sm:$0xff] %v16916_v29  ;;  %v13981_v52 = vld [vmem:[#allocation2 + $0x1a0] sm:$0xff] }
 0x4ab   :  { %3261 = vst [vmem:[#allocation1 + $0x30] ss:$2 sm:$0xff] %v3210_v41  ;;  %4330 = vmatpush.bf16.msrb.mxu1 %v13975_v24  ;;  %v13989_v24 = vld [vmem:[#allocation2 + $0x1e0] sm:$0xff] }
 0x4ac   :  { %4379 = vmatpush.bf16.msrb.mxu2 %v13983_v9  ;;  %v13997_v46 = vld [vmem:[#allocation2 + $0x220] sm:$0xff] }
 0x4ad   :  { %4428 = vmatpush.bf16.msrb.mxu3 %v13991_v32 }
 0x4ae   :  { %v17056_v61 = vld.sshfl [vmem:[#allocation1] sm:$0xff pattern:$0x75316420] }
 0x4af   :  { %v17058_v48 = vld.sshfl [vmem:[#allocation1 + $0x10] sm:$0xff pattern:$0x75316420]  ;;  %4331 = vmatpush.bf16.msrb.mxu1 %v13974_v19  ;;  %3264 = vst [vmem:[#allocation1] ss:$2 sm:$0xff] %v16919_v20  ;;  %v13972_v19 = vld [vmem:[#allocation2 + $0x158] sm:$0xff] }
 0x4b0   :  { %4380 = vmatpush.bf16.msrb.mxu2 %v13982_v51  ;;  %3265 = vst [vmem:[#allocation1 + $0x1] ss:$2 sm:$0xff] %v3211_v4  ;;  %v13980_v51 = vld [vmem:[#allocation2 + $0x198] sm:$0xff]  ;;  %v13971_v4 = vld [vmem:[#allocation2 + $0x150] sm:$0xff] }
 0x4b1   :  { %v3262_v29 = vld.sshfl [vmem:[#allocation1 + $0x20] sm:$0xff pattern:$0x75316420]  ;;  %4429 = vmatpush.bf16.msrb.mxu3 %v13990_v40  ;;  %3266 = vst [vmem:[#allocation1 + $0x10] ss:$2 sm:$0xff] %v16922_v11  ;;  %v13987_v40 = vld [vmem:[#allocation2 + $0x1d0] sm:$0xff] }
 0x4b2   :  { %v3263_v41 = vld.sshfl [vmem:[#allocation1 + $0x30] sm:$0xff pattern:$0x75316420]  ;;  %v3424_v47 = vpack.c.bf16 %v3262_v29, %v3262_v29  ;;  %3269 = vst [vmem:[#allocation1 + $0x20] ss:$2 sm:$0xff] %v3212_v43  ;;  %v13988_v20 = vld [vmem:[#allocation2 + $0x1d8] sm:$0xff] }
 0x4b3   :  { %v3425_v7 = vpack.c.bf16 %v3263_v41, %v3263_v41  ;;  %4332 = vmatpush.bf16.msrb.mxu1 %v13973_v44  ;;  %3270 = vst [vmem:[#allocation1 + $0x21] ss:$2 sm:$0xff] %v16925_v38 }
 0x4b4   :  { %v17064_v9 = vunpack.c.l.b16 %v3424_v47  ;;  %4381 = vmatpush.bf16.msrb.mxu2 %v13981_v52  ;;  %3271 = vst [vmem:[#allocation1 + $0x30] ss:$2 sm:$0xff] %v3213_v55  ;;  %v13970_v52 = vld [vmem:[#allocation2 + $0x148] sm:$0xff] }
 0x4b5   :  { %v3505_v32 = vunpack.c.l.b16 %v3425_v7  ;;  %4430 = vmatpush.bf16.msrb.mxu3 %v13989_v24  ;;  %v13979_v7 = vld [vmem:[#allocation2 + $0x190] sm:$0xff]  ;;  %v13978_v47 = vld [vmem:[#allocation2 + $0x188] sm:$0xff] }
 0x4b7   :  { %v17069_v29 = vpack.c.b16 %v3505_v32, %v17064_v9  ;;  %4333 = vmatpush.bf16.msrb.mxu1 %v13972_v19  ;;  %v3267_v11 = vld.sshfl [vmem:[#allocation1] sm:$0xff pattern:$0x75316420] }
 0x4b8   :  { %4382 = vmatpush.bf16.msrb.mxu2 %v13980_v51  ;;  %v3268_v41 = vld.sshfl [vmem:[#allocation1 + $0x10] sm:$0xff pattern:$0x75316420]  ;;  %v3426_v44 = vpack.c.bf16 %v3267_v11, %v3267_v11  ;;  %3274 = vst [vmem:[#allocation1] ss:$2 sm:$0xff] %v16928_v34 }
 0x4b9   :  { %v19474_v43 = vshll.u32 %v17069_v29, 16  ;;  %4431 = vmatpush.bf16.msrb.mxu3 %v13988_v20  ;;  %v3427_v24 = vpack.c.bf16 %v3268_v41, %v3268_v41  ;;  %3275 = vst [vmem:[#allocation1 + $0x1] ss:$2 sm:$0xff] %v3214_v30  ;;  %v19475_v38 = vshrl.u32 %v17069_v29, 16  ;;  %v3663_v32 = vrot.slane %v17069_v29, 1  ;;  %v13986_v34 = vld [vmem:[#allocation2 + $0x1c8] sm:$0xff] }
 0x4ba   :  { %v17079_v55 = vunpack.c.l.b16 %v3426_v44  ;;  %3276 = vst [vmem:[#allocation1 + $0x10] ss:$2 sm:$0xff] %v16931_v62  ;;  %v3272_v19 = vld.sshfl [vmem:[#allocation1 + $0x20] sm:$0xff pattern:$0x75316420]  ;;  %v13969_v62 = vld [vmem:[#allocation2 + $0x140] sm:$0xff] }
 0x4bb   :  { %4334 = vmatpush.bf16.msrb.mxu1 %v13971_v4  ;;  %v3507_v51 = vunpack.c.l.b16 %v3427_v24  ;;  %v3562_v20 = vrot.slane %v19474_v43, 1  ;;  %v3273_v11 = vld.sshfl [vmem:[#allocation1 + $0x30] sm:$0xff pattern:$0x75316420]  ;;  %v3428_v41 = vpack.c.bf16 %v3272_v19, %v3272_v19  ;;  %3279 = vst [vmem:[#allocation1 + $0x20] ss:$2 sm:$0xff] %v3215_v58  ;;  %v17095_v4 = vunpack.c.l.b16 %v3663_v32 }
 0x4bc   :  { %4383 = vmatpush.bf16.msrb.mxu2 %v13979_v7  ;;  %v3429_v30 = vpack.c.bf16 %v3273_v11, %v3273_v11  ;;  %3280 = vst [vmem:[#allocation1 + $0x21] ss:$2 sm:$0xff] %v16934_v60  ;;  %v13977_v58 = vld [vmem:[#allocation2 + $0x180] sm:$0xff]  ;;  %v13936_v11 = vld [vmem:[#allocation2 + $0x38] sm:$0xff] }
 0x4bd   :  { %4432 = vmatpush.bf16.msrb.mxu3 %v13987_v40  ;;  %v17089_v44 = vpack.c.b16 %v3507_v51, %v17079_v55  ;;  %v17091_v36 = vunpack.c.l.b16 %v3428_v41  ;;  %3281 = vst [vmem:[#allocation1 + $0x30] ss:$2 sm:$0xff] %v3216_v63  ;;  %v17099_v40 = vor.u32 %v3562_v20, %v19475_v38  ;;  %v13985_v60 = vld [vmem:[#allocation2 + $0x1c0] sm:$0xff]  ;;  %v14008_v63 = vld [vmem:[#allocation2 + $0x278] sm:$0xff]  ;;  %v4009_v38 = vpack.c.b16 %v17079_v55, %v17064_v9 }
 0x4be   :  { %v3509_v7 = vunpack.c.l.b16 %v3429_v30  ;;  %v14000_v41 = vld [vmem:[#allocation2 + $0x238] sm:$0xff] }
 0x4bf   :  { %4335 = vmatpush.bf16.msrb.mxu1 %v13970_v52  ;;  %v19477_v24 = vshrl.u32 %v17089_v44, 16  ;;  %v19476_v19 = vshll.u32 %v17089_v44, 16  ;;  %v3664_v51 = vrot.slane %v17089_v44, 1 }
 0x4c0   :  { %4384 = vmatpush.bf16.msrb.mxu2 %v13978_v47  ;;  %v3277_v32 = vld.sshfl [vmem:[#allocation1] sm:$0xff pattern:$0x75316420]  ;;  %v17109_v43 = vpack.c.b16 %v3509_v7, %v17091_v36 }
 0x4c1   :  { %4433 = vmatpush.bf16.msrb.mxu3 %v13986_v34  ;;  %v3569_v52 = vrot.slane %v19476_v19, 1  ;;  %v17106_v47 = vunpack.c.l.b16 %v3664_v51  ;;  %v3278_v30 = vld.sshfl [vmem:[#allocation1 + $0x10] sm:$0xff pattern:$0x75316420]  ;;  %v3430_v20 = vpack.c.bf16 %v3277_v32, %v3277_v32  ;;  %3284 = vst [vmem:[#allocation1] ss:$2 sm:$0xff] %v16937_v37  ;;  %v19479_v51 = vunpack.c.l.b16 %v17099_v40 }
 0x4c2   :  { %v3431_v28 = vpack.c.bf16 %v3278_v30, %v3278_v30  ;;  %3285 = vst [vmem:[#allocation1 + $0x1] ss:$2 sm:$0xff] %v3217_v57  ;;  %v13999_v57 = vld [vmem:[#allocation2 + $0x230] sm:$0xff] }
 0x4c3   :  { %4336 = vmatpush.bf16.msrb.mxu1 %v13969_v62  ;;  %v17116_v34 = vor.u32 %v3569_v52, %v19477_v24  ;;  %v4011_v32 = vpack.c.b16 %v17106_v47, %v17095_v4  ;;  %v17121_v19 = vunpack.c.l.b16 %v3430_v20  ;;  %v3282_v7 = vld.sshfl [vmem:[#allocation1 + $0x20] sm:$0xff pattern:$0x75316420]  ;;  %3286 = vst [vmem:[#allocation1 + $0x10] ss:$2 sm:$0xff] %v16940_v26  ;;  %v14007_v62 = vld [vmem:[#allocation2 + $0x270] sm:$0xff] }
 0x4c4   :  { %4385 = vmatpush.bf16.msrb.mxu2 %v13977_v58  ;;  %v3511_v30 = vunpack.c.l.b16 %v3431_v28  ;;  %v3283_v58 = vld.sshfl [vmem:[#allocation1 + $0x30] sm:$0xff pattern:$0x75316420]  ;;  %v19484_v24 = vshll.u32 %v17109_v43, 16  ;;  %3289 = vst [vmem:[#allocation1 + $0x20] ss:$2 sm:$0xff] %v3218_v14 }
 0x4c5   :  { %4434 = vmatpush.bf16.msrb.mxu3 %v13985_v60  ;;  %v19478_v52 = vunpack.c.l.b16 %v17116_v34  ;;  %3290 = vst [vmem:[#allocation1 + $0x21] ss:$2 sm:$0xff] %v16943_v56  ;;  %v3432_v60 = vpack.c.bf16 %v3282_v7, %v3282_v7  ;;  %v19485_v14 = vshrl.u32 %v17109_v43, 16  ;;  %v13934_v20 = vld [vmem:[#allocation2 + $0x28] sm:$0xff]  ;;  %v3665_v56 = vrot.slane %v17109_v43, 1 }
 0x4c6   :  { %4337 = vmatmul.bf16.vlgmr.msrb.gmra.mxu1 %v4009_v38  ;;  %v17131_v37 = vpack.c.b16 %v3511_v30, %v17121_v19  ;;  %3291 = vst [vmem:[#allocation1 + $0x30] ss:$2 sm:$0xff] %v3219_v12  ;;  %v3576_v38 = vrot.slane %v19484_v24, 1  ;;  %v13998_v7 = vld [vmem:[#allocation2 + $0x228] sm:$0xff] }
 0x4c7   :  { %4476 = vmatpush.bf16.msra.mxu1 %v14000_v41  ;;  %v4010_v28 = vpack.c.b16 %v19478_v52, %v19479_v51  ;;  %v14006_v41 = vld [vmem:[#allocation2 + $0x268] sm:$0xff] }
 0x4c8   :  { %4525 = vmatpush.bf16.msra.mxu2 %v14008_v63  ;;  %4435 = vmatmul.bf16.vlgmr.msrb.gmra.mxu3 %v4011_v32  ;;  %v3433_v63 = vpack.c.bf16 %v3283_v58, %v3283_v58  ;;  %v19480_v26 = vshll.u32 %v17131_v37, 16  ;;  %v3666_v30 = vrot.slane %v17131_v37, 1  ;;  %v17155_v51 = vor.u32 %v3576_v38, %v19485_v14 }
 0x4c9   :  { %4894 = vmatpush.bf16.msra.mxu3 %v13936_v11  ;;  %4386 = vmatmul.bf16.vlgmr.msrb.gmra.mxu2 %v4010_v28  ;;  %v19483_v11 = vshrl.u32 %v17131_v37, 16  ;;  %v3287_v12 = vld.sshfl [vmem:[#allocation1] sm:$0xff pattern:$0x75316420]  ;;  %v17149_v28 = vunpack.c.l.b16 %v3432_v60 }
 0x4ca   :  { %v3583_v32 = vrot.slane %v19480_v26, 1  ;;  %v3434_v58 = vpack.c.bf16 %v3287_v12, %v3287_v12  ;;  %v3513_v52 = vunpack.c.l.b16 %v3433_v63  ;;  %3294 = vst [vmem:[#allocation1] ss:$2 sm:$0xff] %v16946_v49  ;;  %v17169_v38 = vunpack.c.l.b16 %v3666_v30 }
 0x4cb   :  { %4477 = vmatpush.bf16.msra.mxu1 %v13999_v57  ;;  %3295 = vst [vmem:[#allocation1 + $0x1] ss:$2 sm:$0xff] %v3220_v6  ;;  %v19482_v49 = vunpack.c.l.b16 %v17155_v51  ;;  %v19892_v30 = vrot.slane %v16958_v22, 4 }
 0x4cc   :  { %4526 = vmatpush.bf16.msra.mxu2 %v14007_v62  ;;  %v3288_v62 = vld.sshfl [vmem:[#allocation1 + $0x10] sm:$0xff pattern:$0x75316420]  ;;  %v17159_v57 = vor.u32 %v3583_v32, %v19483_v11  ;;  %v17161_v26 = vunpack.c.l.b16 %v3434_v58  ;;  %v3292_v60 = vld.sshfl [vmem:[#allocation1 + $0x20] sm:$0xff pattern:$0x75316420]  ;;  %v17172_v32 = vpack.c.b16 %v3513_v52, %v17149_v28 }
 0x4cd   :  { %4895 = vmatpush.bf16.msra.mxu3 %v13935_v3  ;;  %3296 = vst [vmem:[#allocation1 + $0x10] ss:$2 sm:$0xff] %v16949_v59  ;;  %v3435_v3 = vpack.c.bf16 %v3288_v62, %v3288_v62  ;;  %v3293_v12 = vld.sshfl [vmem:[#allocation1 + $0x30] sm:$0xff pattern:$0x75316420]  ;;  %v17184_v59 = vpack.c.b16 %v17121_v19, %v17091_v36 }
 0x4ce   :  { %3299 = vst [vmem:[#allocation1 + $0x20] ss:$2 sm:$0xff] %v3221_v31  ;;  %v19481_v6 = vunpack.c.l.b16 %v17159_v57  ;;  %v19486_v52 = vshll.u32 %v17172_v32, 16  ;;  %v3437_v11 = vpack.c.bf16 %v3293_v12, %v3293_v12 }
 0x4cf   :  { %v3515_v63 = vunpack.c.l.b16 %v3435_v3  ;;  %4478 = vmatpush.bf16.msra.mxu1 %v13998_v7  ;;  %19885 = vst [vmem:[#allocation24_spill] sm:$0xff] %v17169_v38  ;;  %v19890_v3 = vrot.slane %v16961_v21, 4 }
 0x4d0   :  { %4527 = vmatpush.bf16.msra.mxu2 %v14006_v41  ;;  %v17167_v41 = vunpack.c.l.b16 %v3665_v56  ;;  %3301 = vst [vmem:[#allocation1 + $0x30] ss:$2 sm:$0xff] %v3222_v8  ;;  %v3590_v58 = vrot.slane %v19486_v52, 1  ;;  %v13933_v52 = vld [vmem:[#allocation2 + $0x20] sm:$0xff] }
 0x4d1   :  { %4896 = vmatpush.bf16.msra.mxu3 %v13934_v20  ;;  %3300 = vst [vmem:[#allocation1 + $0x21] ss:$2 sm:$0xff] %v16952_v42  ;;  %v17180_v20 = vpack.c.b16 %v3515_v63, %v17161_v26  ;;  %v17196_v42 = vpack.c.b16 %v19481_v6, %v19482_v49  ;;  %v3436_v63 = vpack.c.bf16 %v3292_v60, %v3292_v60  ;;  %v3667_v60 = vrot.slane %v17172_v32, 1 }
 0x4d2   :  { %19886 = vst [vmem:[#allocation54_spill] sm:$0xff] %v17184_v59  ;;  %v17188_v31 = vpack.c.b16 %v17169_v38, %v17167_v41  ;;  %v3297_v56 = vld.sshfl [vmem:[#allocation1] sm:$0xff pattern:$0x75316420] }
 0x4d3   :  { %19888 = vst [vmem:[#allocation76_spill] sm:$0xff] %v17196_v42  ;;  %v19488_v7 = vshll.u32 %v17180_v20, 16  ;;  %v19490_v49 = vshrl.u32 %v17180_v20, 16  ;;  %v3438_v24 = vpack.c.bf16 %v3297_v56, %v3297_v56  ;;  %4479 = vmatpush.bf16.msra.mxu1 %v13997_v46  ;;  %v19901_v46 = vrot.slane %v16970_v10, 4 }
 0x4d4   :  { %19887 = vst [vmem:[#allocation25_spill] sm:$0xff] %v17188_v31  ;;  %v3298_v8 = vld.sshfl [vmem:[#allocation1 + $0x10] sm:$0xff pattern:$0x75316420] }
 0x4d5   :  { %3306 = vst [vmem:[#allocation1 + $0x10] ss:$2 sm:$0xff] %v16958_v22  ;;  %v3439_v14 = vpack.c.bf16 %v3298_v8, %v3298_v8  ;;  %4897 = vmatpush.bf16.msra.mxu3 %v13933_v52  ;;  %v17225_v22 = vunpack.c.l.b16 %v3436_v63  ;;  %v3517_v8 = vunpack.c.l.b16 %v3437_v11  ;;  %v17227_v56 = vunpack.c.l.b16 %v3438_v24 }
 0x4d6   :  { %3304 = vst [vmem:[#allocation1] ss:$2 sm:$0xff] %v16955_v53  ;;  %4342 = vmatmul.bf16.gmra.mxu1 %v17184_v59  ;;  %v3597_v53 = vrot.slane %v19488_v7, 1  ;;  %v19895_v7 = vshrl.u32 %v17172_v32, 16  ;;  %v17242_v63 = vunpack.c.l.b16 %v3667_v60  ;;  %v19904_v60 = vrot.slane %v16967_v0, 4 }
 0x4d7   :  { %v17202_v62 = vld.sshfl [vmem:[#allocation1 + $0x30] sm:$0xff pattern:$0x75316420]  ;;  %3305 = vst [vmem:[#allocation1 + $0x1] ss:$2 sm:$0xff] %v3223_v18  ;;  %v14005_v18 = vld [vmem:[#allocation2 + $0x260] sm:$0xff] }
 0x4d8   :  { %19889 = vst [vmem:[#allocation34_spill] sm:$0xff] %v17202_v62  ;;  %4440 = vmatmul.bf16.gmra.mxu3 %v17188_v31  ;;  %v17211_v6 = vld.sshfl [vmem:[#allocation1 + $0x20] sm:$0xff pattern:$0x75316420]  ;;  %4528 = vmatpush.bf16.msra.mxu2 %v14005_v18  ;;  %v17235_v59 = vor.u32 %v3597_v53, %v19490_v49  ;;  %v19908_v49 = vrot.slane %v16979_v16, 4 }
 0x4d9   :  { %3311 = vst [vmem:[#allocation1 + $0x30] ss:$2 sm:$0xff] %v19890_v3  ;;  %4391 = vmatmul.bf16.gmra.mxu2 %v17196_v42  ;;  %v3668_v3 = vrot.slane %v17180_v20, 1 }
 0x4da   :  { %19891 = vst [vmem:[#allocation32_spill] sm:$0xff] %v17211_v6  ;;  %v19491_v18 = vunpack.c.l.b16 %v17235_v59 }
 0x4db   :  { %3309 = vst [vmem:[#allocation1 + $0x20] ss:$2 sm:$0xff] %v19892_v30  ;;  %v3891_v30 = vunpack.c.l.b16 %v3439_v14  ;;  %v17244_v24 = vunpack.c.l.b16 %v3668_v3  ;;  %v17249_v14 = vpack.c.b16 %v3517_v8, %v17225_v22  ;;  %v17264_v3 = vpack.c.b16 %v17161_v26, %v17149_v28 }
 0x4dc   :  { %3310 = vst [vmem:[#allocation1 + $0x21] ss:$2 sm:$0xff] %v16961_v21  ;;  %v17222_v12 = vld.sshfl [vmem:[#allocation1 + $0x10] sm:$0xff pattern:$0x75316420]  ;;  %v17231_v21 = vor.u32 %v3590_v58, %v19895_v7  ;;  %v19903_v58 = vrot.slane %v16964_v39, 4 }
 0x4dd   :  { %19893 = vst [vmem:[#allocation35_spill] sm:$0xff] %v17222_v12  ;;  %v17252_v11 = vpack.c.b16 %v3891_v30, %v17227_v56  ;;  %v17269_v8 = vpack.c.b16 %v17244_v24, %v17242_v63 }
 0x4de   :  { %3316 = vst [vmem:[#allocation1 + $0x10] ss:$2 sm:$0xff] %v16967_v0  ;;  %v17237_v12 = vld.sshfl [vmem:[#allocation1] sm:$0xff pattern:$0x75316420]  ;;  %v19492_v53 = vunpack.c.l.b16 %v17231_v21 }
 0x4df   :  { %19894 = vst [vmem:[#allocation36_spill] sm:$0xff] %v17227_v56 }
 0x4e0   :  { %19896 = vst [vmem:[#allocation77_spill] sm:$0xff] %v17235_v59  ;;  %v17239_v52 = vld.sshfl [vmem:[#allocation1 + $0x30] sm:$0xff pattern:$0x75316420]  ;;  %v17280_v0 = vpack.c.b16 %v19491_v18, %v19492_v53  ;;  %v19909_v18 = vshll.u32 %v17252_v11, 16  ;;  %v3730_v59 = vrot.slane %v17131_v37, 2 }
 0x4e1   :  { %19897 = vst [vmem:[#allocation37_spill] sm:$0xff] %v17237_v12  ;;  %v14004_v12 = vld [vmem:[#allocation2 + $0x258] sm:$0xff] }
 0x4e2   :  { %19898 = vst [vmem:[#allocation30_spill] sm:$0xff] %v17239_v52  ;;  %v3901_v53 = vrot.slane %v19909_v18, 1  ;;  %v13932_v52 = vld [vmem:[#allocation2 + $0x18] sm:$0xff]  ;;  %v3910_v18 = vrot.slane %v17252_v11, 1  ;;  %4529 = vmatpush.bf16.msra.mxu2 %v14004_v12 }
 0x4e3   :  { %3314 = vst [vmem:[#allocation1] ss:$2 sm:$0xff] %v16964_v39  ;;  %v17254_v7 = vld.sshfl [vmem:[#allocation1 + $0x20] sm:$0xff pattern:$0x75316420]  ;;  %v19495_v39 = vshll.u32 %v17249_v14, 16  ;;  %4898 = vmatpush.bf16.msra.mxu3 %v13932_v52 }
 0x4e4   :  { %19899 = vst [vmem:[#allocation78_spill] sm:$0xff] %v17242_v63 }
 0x4e5   :  { %19900 = vst [vmem:[#allocation57_spill] sm:$0xff] %v17244_v24  ;;  %v17271_v30 = vld.sshfl [vmem:[#allocation1 + $0x10] sm:$0xff pattern:$0x75316420] }
 0x4e6   :  { %3321 = vst [vmem:[#allocation1 + $0x30] ss:$2 sm:$0xff] %v19901_v46  ;;  %4347 = vmatmul.bf16.gmra.mxu1 %v17264_v3  ;;  %v3604_v46 = vrot.slane %v19495_v39, 1  ;;  %v19911_v39 = vrot.slane %v16976_v33, 4 }
 0x4e7   :  { %19902 = vst [vmem:[#allocation38_spill] sm:$0xff] %v17254_v7 }
 0x4e8   :  { %3315 = vst [vmem:[#allocation1 + $0x1] ss:$2 sm:$0xff] %v19903_v58  ;;  %4445 = vmatmul.bf16.gmra.mxu3 %v17269_v8  ;;  %v19910_v58 = vrot.slane %v16973_v45, 4 }
 0x4e9   :  { %3319 = vst [vmem:[#allocation1 + $0x20] ss:$2 sm:$0xff] %v19904_v60  ;;  %4396 = vmatmul.bf16.gmra.mxu2 %v17280_v0 }
 0x4ea   :  { %19905 = vst [vmem:[#allocation42_spill] sm:$0xff] %v17264_v3 }
 0x4eb   :  { %3320 = vst [vmem:[#allocation1 + $0x21] ss:$2 sm:$0xff] %v16970_v10 }
 0x4ec   :  { %19906 = vst [vmem:[#allocation39_spill] sm:$0xff] %v17269_v8  ;;  %v13996_v8 = vld [vmem:[#allocation2 + $0x218] sm:$0xff] }
 0x4ed   :  { %3326 = vst [vmem:[#allocation1 + $0x10] ss:$2 sm:$0xff] %v16976_v33  ;;  %v3323_v10 = vld.sshfl [vmem:[#allocation1 + $0x30] sm:$0xff pattern:$0x75316420]  ;;  %4480 = vmatpush.bf16.msra.mxu1 %v13996_v8  ;;  %v19914_v33 = vshrl.u32 %v17252_v11, 16 }
 0x4ee   :  { %19907 = vst [vmem:[#allocation79_spill] sm:$0xff] %v17280_v0  ;;  %v3449_v7 = vpack.c.bf16 %v3323_v10, %v3323_v10 }
 0x4ef   :  { %v17285_v60 = vld.sshfl [vmem:[#allocation1] sm:$0xff pattern:$0x75316420]  ;;  %3331 = vst [vmem:[#allocation1 + $0x30] ss:$2 sm:$0xff] %v19908_v49  ;;  %v3669_v49 = vrot.slane %v17249_v14, 1 }
 0x4f0   :  { %3324 = vst [vmem:[#allocation1] ss:$2 sm:$0xff] %v16973_v45  ;;  %v3521_v45 = vunpack.c.l.b16 %v3449_v7 }
 0x4f1   :  { %3325 = vst [vmem:[#allocation1 + $0x1] ss:$2 sm:$0xff] %v19910_v58  ;;  %v17314_v62 = vunpack.c.l.b16 %v3669_v49  ;;  %v19920_v49 = vrot.slane %v16982_v54, 4 }
 0x4f2   :  { %v3322_v3 = vld.sshfl [vmem:[#allocation1 + $0x20] sm:$0xff pattern:$0x75316420] }
 0x4f3   :  { %v3448_v42 = vpack.c.bf16 %v3322_v3, %v3322_v3  ;;  %3329 = vst [vmem:[#allocation1 + $0x20] ss:$2 sm:$0xff] %v19911_v39  ;;  %v19912_v3 = vshrl.u32 %v17249_v14, 16  ;;  %v17312_v39 = vor.u32 %v3901_v53, %v19914_v33 }
 0x4f4   :  { %v3328_v31 = vld.sshfl [vmem:[#allocation1 + $0x10] sm:$0xff pattern:$0x75316420]  ;;  %3330 = vst [vmem:[#allocation1 + $0x21] ss:$2 sm:$0xff] %v16979_v16  ;;  %v17316_v16 = vunpack.c.l.b16 %v3910_v18 }
 0x4f5   :  { %3336 = vst [vmem:[#allocation1 + $0x10] ss:$2 sm:$0xff] %v16985_v1  ;;  %v17304_v10 = vunpack.c.l.b16 %v3448_v42  ;;  %v17308_v58 = vor.u32 %v3604_v46, %v19912_v3  ;;  %v3451_v0 = vpack.c.bf16 %v3328_v31, %v3328_v31  ;;  %v19918_v42 = vrot.slane %v16988_v15, 4 }
 0x4f6   :  { %19915 = vst [vmem:[#allocation85_spill] sm:$0xff] %v17312_v39  ;;  %v3333_v13 = vld.sshfl [vmem:[#allocation1 + $0x30] sm:$0xff pattern:$0x75316420]  ;;  %v19501_v8 = vunpack.c.l.b16 %v17312_v39  ;;  %v17328_v31 = vpack.c.b16 %v17227_v56, %v17225_v22  ;;  %v17334_v18 = vpack.c.b16 %v17316_v16, %v17314_v62  ;;  %v14003_v39 = vld [vmem:[#allocation2 + $0x250] sm:$0xff] }
 0x4f7   :  { %19913 = vst [vmem:[#allocation81_spill] sm:$0xff] %v17308_v58  ;;  %v17321_v52 = vpack.c.b16 %v3521_v45, %v17304_v10  ;;  %v19502_v7 = vunpack.c.l.b16 %v17308_v58  ;;  %v3523_v53 = vunpack.c.l.b16 %v3451_v0  ;;  %v19922_v0 = vrot.slane %v16985_v1, 4  ;;  %4530 = vmatpush.bf16.msra.mxu2 %v14003_v39 }
 0x4f8   :  { %19916 = vst [vmem:[#allocation63_spill] sm:$0xff] %v17314_v62  ;;  %v3327_v12 = vld.sshfl [vmem:[#allocation1] sm:$0xff pattern:$0x75316420]  ;;  %4352 = vmatmul.bf16.gmra.mxu1 %v17328_v31  ;;  %4450 = vmatmul.bf16.gmra.mxu3 %v17334_v18 }
 0x4f9   :  { %19917 = vst [vmem:[#allocation52_spill] sm:$0xff] %v17316_v16  ;;  %v3450_v46 = vpack.c.bf16 %v3327_v12, %v3327_v12  ;;  %v19507_v33 = vshll.u32 %v17321_v52, 16  ;;  %v13931_v16 = vld [vmem:[#allocation2 + $0x10] sm:$0xff] }
 0x4fa   :  { %3341 = vst [vmem:[#allocation1 + $0x30] ss:$2 sm:$0xff] %v19918_v42  ;;  %v17345_v42 = vpack.c.b16 %v19501_v8, %v19502_v7  ;;  %v3453_v8 = vpack.c.bf16 %v3333_v13, %v3333_v13  ;;  %v19924_v13 = vrot.slane %v16991_v27, 4  ;;  %4899 = vmatpush.bf16.msra.mxu3 %v13931_v16 }
 0x4fb   :  { %3334 = vst [vmem:[#allocation1] ss:$2 sm:$0xff] %v16982_v54  ;;  %v17336_v45 = vunpack.c.l.b16 %v3450_v46  ;;  %v3332_v3 = vld.sshfl [vmem:[#allocation1 + $0x20] sm:$0xff pattern:$0x75316420]  ;;  %v3671_v46 = vrot.slane %v17321_v52, 1 }
 0x4fc   :  { %19919 = vst [vmem:[#allocation47_spill] sm:$0xff] %v17328_v31  ;;  %v3338_v12 = vld.sshfl [vmem:[#allocation1 + $0x10] sm:$0xff pattern:$0x75316420]  ;;  %4401 = vmatmul.bf16.gmra.mxu2 %v17345_v42 }
 0x4fd   :  { %3335 = vst [vmem:[#allocation1 + $0x1] ss:$2 sm:$0xff] %v19920_v49  ;;  %v17348_v54 = vpack.c.b16 %v3523_v53, %v17336_v45  ;;  %v3618_v49 = vrot.slane %v19507_v33, 1  ;;  %v3455_v31 = vpack.c.bf16 %v3338_v12, %v3338_v12  ;;  %v19925_v12 = vshrl.u32 %v17321_v52, 16 }
 0x4fe   :  { %19921 = vst [vmem:[#allocation43_spill] sm:$0xff] %v17334_v18  ;;  %v17382_v16 = vunpack.c.l.b16 %v3671_v46 }
 0x4ff   :  { %3339 = vst [vmem:[#allocation1 + $0x20] ss:$2 sm:$0xff] %v19922_v0  ;;  %v19509_v1 = vshll.u32 %v17348_v54, 16  ;;  %v3452_v0 = vpack.c.bf16 %v3332_v3, %v3332_v3  ;;  %v3672_v33 = vrot.slane %v17348_v54, 1  ;;  %v13995_v3 = vld [vmem:[#allocation2 + $0x210] sm:$0xff]  ;;  %v19927_v56 = vshrl.u32 %v17348_v54, 16 }
 0x500   :  { %19923 = vst [vmem:[#allocation33_spill] sm:$0xff] %v17345_v42  ;;  %v3525_v42 = vunpack.c.l.b16 %v3453_v8  ;;  %v3527_v24 = vunpack.c.l.b16 %v3455_v31  ;;  %4481 = vmatpush.bf16.msra.mxu1 %v13995_v3 }
 0x501   :  { %3340 = vst [vmem:[#allocation1 + $0x21] ss:$2 sm:$0xff] %v16988_v15  ;;  %v3625_v15 = vrot.slane %v19509_v1, 1  ;;  %v17367_v53 = vunpack.c.l.b16 %v3452_v0  ;;  %v3343_v39 = vld.sshfl [vmem:[#allocation1 + $0x30] sm:$0xff pattern:$0x75316420]  ;;  %v17384_v8 = vunpack.c.l.b16 %v3672_v33  ;;  %v4029_v33 = vpack.c.b16 %v17336_v45, %v17304_v10 }
 0x502   :  { %3346 = vst [vmem:[#allocation1 + $0x10] ss:$2 sm:$0xff] %v16994_v2  ;;  %v19932_v0 = vrot.slane %v16997_v50, 4 }
 0x503   :  { %v17375_v6 = vor.u32 %v3625_v15, %v19927_v56  ;;  %19930 = vst [vmem:[#allocation60_spill] sm:$0xff] %v17382_v16  ;;  %v17389_v56 = vpack.c.b16 %v3525_v42, %v17367_v53  ;;  %v19933_v15 = vrot.slane %v17000_v23, 4 }
 0x504   :  { %v3337_v7 = vld.sshfl [vmem:[#allocation1] sm:$0xff pattern:$0x75316420]  ;;  %19931 = vst [vmem:[#allocation86_spill] sm:$0xff] %v17384_v8 }
 0x505   :  { %v3454_v18 = vpack.c.bf16 %v3337_v7, %v3337_v7  ;;  %3344 = vst [vmem:[#allocation1] ss:$2 sm:$0xff] %v16991_v27  ;;  %v17371_v7 = vor.u32 %v3618_v49, %v19925_v12  ;;  %v19929_v27 = vrot.slane %v16994_v2, 4  ;;  %v19515_v2 = vunpack.c.l.b16 %v17375_v6 }
 0x506   :  { %3345 = vst [vmem:[#allocation1 + $0x1] ss:$2 sm:$0xff] %v19924_v13  ;;  %v19518_v42 = vshll.u32 %v17389_v56, 16  ;;  %v3673_v3 = vrot.slane %v17389_v56, 1 }
 0x507   :  { %19926 = vst [vmem:[#allocation55_spill] sm:$0xff] %v17371_v7  ;;  %v17377_v62 = vunpack.c.l.b16 %v3454_v18  ;;  %v19516_v31 = vunpack.c.l.b16 %v17371_v7 }
 0x508   :  { %v3342_v1 = vld.sshfl [vmem:[#allocation1 + $0x20] sm:$0xff pattern:$0x75316420]  ;;  %19928 = vst [vmem:[#allocation84_spill] sm:$0xff] %v17375_v6  ;;  %4357 = vmatmul.bf16.gmra.mxu1 %v4029_v33  ;;  %v3632_v12 = vrot.slane %v19518_v42, 1  ;;  %v13994_v33 = vld [vmem:[#allocation2 + $0x208] sm:$0xff] }
 0x509   :  { %3349 = vst [vmem:[#allocation1 + $0x20] ss:$2 sm:$0xff] %v19929_v27  ;;  %v3348_v49 = vld.sshfl [vmem:[#allocation1 + $0x10] sm:$0xff pattern:$0x75316420]  ;;  %v17395_v18 = vpack.c.b16 %v3527_v24, %v17377_v62  ;;  %v4030_v24 = vpack.c.b16 %v19515_v2, %v19516_v31  ;;  %v3456_v27 = vpack.c.bf16 %v3342_v1, %v3342_v1  ;;  %4482 = vmatpush.bf16.msra.mxu1 %v13994_v33 }
 0x50a   :  { %3350 = vst [vmem:[#allocation1 + $0x21] ss:$2 sm:$0xff] %v16997_v50  ;;  %v4031_v50 = vpack.c.b16 %v17384_v8, %v17382_v16  ;;  %v3459_v2 = vpack.c.bf16 %v3348_v49, %v3348_v49  ;;  %v14002_v31 = vld [vmem:[#allocation2 + $0x248] sm:$0xff]  ;;  %v19935_v49 = vshrl.u32 %v17389_v56, 16 }
 0x50b   :  { %3351 = vst [vmem:[#allocation1 + $0x30] ss:$2 sm:$0xff] %v19932_v0  ;;  %v19519_v13 = vshll.u32 %v17395_v18, 16  ;;  %v3457_v0 = vpack.c.bf16 %v3343_v39, %v3343_v39  ;;  %v13930_v16 = vld [vmem:[#allocation2 + $0x8] sm:$0xff]  ;;  %v3674_v1 = vrot.slane %v17395_v18, 1  ;;  %4531 = vmatpush.bf16.msra.mxu2 %v14002_v31  ;;  %v17420_v39 = vunpack.c.l.b16 %v3456_v27 }
 0x50c   :  { %3356 = vst [vmem:[#allocation1 + $0x10] ss:$2 sm:$0xff] %v17003_v17  ;;  %4455 = vmatmul.bf16.gmra.mxu3 %v4031_v50  ;;  %4406 = vmatmul.bf16.gmra.mxu2 %v4030_v24  ;;  %v19934_v50 = vrot.slane %v17003_v17, 4  ;;  %v17436_v27 = vunpack.c.l.b16 %v3673_v3  ;;  %v17453_v3 = vpack.c.b16 %v17377_v62, %v17367_v53 }
 0x50d   :  { %v3347_v46 = vld.sshfl [vmem:[#allocation1] sm:$0xff pattern:$0x75316420]  ;;  %4900 = vmatpush.bf16.msra.mxu3 %v13930_v16  ;;  %v3529_v24 = vunpack.c.l.b16 %v3457_v0  ;;  %v19938_v16 = vrot.slane %v17006_v35, 4  ;;  %v17438_v0 = vunpack.c.l.b16 %v3674_v1 }
 0x50e   :  { %3354 = vst [vmem:[#allocation1] ss:$2 sm:$0xff] %v17000_v23  ;;  %v19520_v23 = vshrl.u32 %v17395_v18, 16  ;;  %v3458_v6 = vpack.c.bf16 %v3347_v46, %v3347_v46  ;;  %v17425_v46 = vor.u32 %v3632_v12, %v19935_v49  ;;  %v19941_v12 = vrot.slane %v17009_v25, 4 }
 0x50f   :  { %3355 = vst [vmem:[#allocation1 + $0x1] ss:$2 sm:$0xff] %v19933_v15  ;;  %v3639_v15 = vrot.slane %v19519_v13, 1  ;;  %v3531_v13 = vunpack.c.l.b16 %v3459_v2 }
 0x510   :  { %19936 = vst [vmem:[#allocation87_spill] sm:$0xff] %v17425_v46 }
 0x511   :  { %v3352_v8 = vld.sshfl [vmem:[#allocation1 + $0x20] sm:$0xff pattern:$0x75316420]  ;;  %v17429_v17 = vor.u32 %v3639_v15, %v19520_v23  ;;  %19939 = vst [vmem:[#allocation53_spill] sm:$0xff] %v17436_v27  ;;  %v17443_v15 = vpack.c.b16 %v3529_v24, %v17420_v39 }
 0x512   :  { %3359 = vst [vmem:[#allocation1 + $0x20] ss:$2 sm:$0xff] %v19934_v50  ;;  %v3353_v42 = vld.sshfl [vmem:[#allocation1 + $0x30] sm:$0xff pattern:$0x75316420]  ;;  %v17431_v50 = vunpack.c.l.b16 %v3458_v6  ;;  %v19522_v6 = vunpack.c.l.b16 %v17425_v46  ;;  %v3460_v23 = vpack.c.bf16 %v3352_v8, %v3352_v8 }
 0x513   :  { %3360 = vst [vmem:[#allocation1 + $0x21] ss:$2 sm:$0xff] %v17006_v35  ;;  %v3358_v33 = vld.sshfl [vmem:[#allocation1 + $0x10] sm:$0xff pattern:$0x75316420]  ;;  %v19521_v35 = vunpack.c.l.b16 %v17429_v17  ;;  %v19529_v1 = vshll.u32 %v17443_v15, 16 }
 0x514   :  { %19937 = vst [vmem:[#allocation62_spill] sm:$0xff] %v17429_v17  ;;  %v17449_v2 = vpack.c.b16 %v3531_v13, %v17431_v50  ;;  %v14001_v17 = vld [vmem:[#allocation2 + $0x240] sm:$0xff] }
 0x515   :  { %3361 = vst [vmem:[#allocation1 + $0x30] ss:$2 sm:$0xff] %v19938_v16  ;;  %v17464_v24 = vpack.c.b16 %v19521_v35, %v19522_v6  ;;  %v3646_v16 = vrot.slane %v19529_v1, 1  ;;  %v3461_v6 = vpack.c.bf16 %v3353_v42, %v3353_v42  ;;  %4532 = vmatpush.bf16.msra.mxu2 %v14001_v17  ;;  %v19945_v1 = vshrl.u32 %v17443_v15, 16 }
 0x516   :  { %v3357_v31 = vld.sshfl [vmem:[#allocation1] sm:$0xff pattern:$0x75316420]  ;;  %19940 = vst [vmem:[#allocation41_spill] sm:$0xff] %v17438_v0  ;;  %v19530_v49 = vshll.u32 %v17449_v2, 16  ;;  %v3676_v13 = vrot.slane %v17449_v2, 1 }
 0x517   :  { %3364 = vst [vmem:[#allocation1] ss:$2 sm:$0xff] %v17009_v25  ;;  %v17457_v25 = vpack.c.b16 %v17438_v0, %v17436_v27  ;;  %v3463_v0 = vpack.c.bf16 %v3358_v33, %v3358_v33  ;;  %v13993_v27 = vld [vmem:[#allocation2 + $0x200] sm:$0xff]  ;;  %v17480_v8 = vor.u32 %v3646_v16, %v19945_v1  ;;  %v19947_v42 = vshrl.u32 %v17449_v2, 16 }
 0x518   :  { %3365 = vst [vmem:[#allocation1 + $0x1] ss:$2 sm:$0xff] %v19941_v12  ;;  %4362 = vmatmul.bf16.gmra.mxu1 %v17453_v3  ;;  %v3653_v35 = vrot.slane %v19530_v49, 1  ;;  %v17482_v12 = vunpack.c.l.b16 %v3460_v23  ;;  %v3533_v33 = vunpack.c.l.b16 %v3461_v6  ;;  %v17492_v7 = vunpack.c.l.b16 %v3676_v13 }
 0x519   :  { %3366 = vst [vmem:[#allocation1 + $0x10] ss:$2 sm:$0xff] %v17012_v5  ;;  %v3462_v5 = vpack.c.bf16 %v3357_v31, %v3357_v31  ;;  %4483 = vmatpush.bf16.msra.mxu1 %v13993_v27  ;;  %v19535_v17 = vunpack.c.l.b16 %v17480_v8  ;;  %v17504_v6 = vpack.c.b16 %v17431_v50, %v17420_v39 }
 0x51a   :  { %19942 = vst [vmem:[#allocation21_spill] sm:$0xff] %v17453_v3  ;;  %v13929_v3 = vld [vmem:[#allocation2] sm:$0xff]  ;;  %v17486_v31 = vor.u32 %v3653_v35, %v19947_v42  ;;  %v17497_v23 = vpack.c.b16 %v3533_v33, %v17482_v12  ;;  %v13952_v42 = vld [vmem:[#allocation2 + $0xb8] sm:$0xff] }
 0x51b   :  { %19943 = vst [vmem:[#allocation73_spill] sm:$0xff] %v17457_v25  ;;  %4901 = vmatpush.bf16.msra.mxu3 %v13929_v3  ;;  %v17488_v49 = vunpack.c.l.b16 %v3462_v5  ;;  %v13960_v33 = vld [vmem:[#allocation2 + $0xf8] sm:$0xff]  ;;  %4992 = vmatpush.bf16.msrb.mxu2 %v13952_v42 }
 0x51c   :  { %19944 = vst [vmem:[#allocation74_spill] sm:$0xff] %v17464_v24  ;;  %4460 = vmatmul.bf16.gmra.mxu3 %v17457_v25  ;;  %4411 = vmatmul.bf16.gmra.mxu2 %v17464_v24  ;;  %v3675_v25 = vrot.slane %v17443_v15, 1  ;;  %v3893_v24 = vunpack.c.l.b16 %v3463_v0  ;;  %v19534_v3 = vunpack.c.l.b16 %v17486_v31  ;;  %v19537_v35 = vshll.u32 %v17497_v23, 16 }
 0x51d   :  { %19946 = vst [vmem:[#allocation83_spill] sm:$0xff] %v17480_v8  ;;  %v19544_v1 = vshrl.u32 %v17497_v23, 16  ;;  %v17545_v42 = vpack.c.b16 %v17488_v49, %v17482_v12 }
 0x51e   :  { %19948 = vst [vmem:[#allocation22_spill] sm:$0xff] %v17486_v31  ;;  %v17490_v46 = vunpack.c.l.b16 %v3675_v25  ;;  %v17500_v27 = vpack.c.b16 %v3893_v24, %v17488_v49  ;;  %v17514_v0 = vpack.c.b16 %v19534_v3, %v19535_v17  ;;  %v3660_v24 = vrot.slane %v19537_v35, 1 }
 0x51f   :  { %19949 = vst [vmem:[#allocation23_spill] sm:$0xff] %v17488_v49  ;;  %v3677_v3 = vrot.slane %v17497_v23, 1  ;;  %5041 = vmatpush.bf16.msrb.mxu3 %v13960_v33  ;;  %v19963_v33 = vshrl.u32 %v17089_v44, 16 }
 0x520   :  { %19950 = vst [vmem:[#allocation26_spill] sm:$0xff] %v17490_v46  ;;  %v17508_v5 = vpack.c.b16 %v17492_v7, %v17490_v46  ;;  %v19540_v25 = vshll.u32 %v17500_v27, 16  ;;  %v19543_v13 = vshrl.u32 %v17500_v27, 16  ;;  %v3911_v17 = vrot.slane %v17500_v27, 1 }
 0x521   :  { %19951 = vst [vmem:[#allocation80_spill] sm:$0xff] %v17492_v7 }
 0x522   :  { %19952 = vst [vmem:[#allocation48_spill] sm:$0xff] %v17504_v6  ;;  %v3908_v16 = vrot.slane %v19540_v25, 1  ;;  %v13944_v25 = vld [vmem:[#allocation2 + $0x78] sm:$0xff] }
 0x523   :  { %19953 = vst [vmem:[#allocation45_spill] sm:$0xff] %v17508_v5  ;;  %4943 = vmatpush.bf16.msrb.mxu1 %v13944_v25  ;;  %v3684_v25 = vrot.slane %v19963_v33, 1  ;;  %v3727_v33 = vrot.slane %v17069_v29, 2 }
 0x524   :  { %19954 = vst [vmem:[#allocation29_spill] sm:$0xff] %v17514_v0  ;;  %v17535_v35 = vor.u32 %v3908_v16, %v19543_v13  ;;  %v19964_v13 = vshll.u32 %v17069_v29, 16 }
 0x525   :  { %19959 = vst [vmem:[#allocation46_spill] sm:$0xff] %v17545_v42 }
 0x526   :  { %19956 = vst [vmem:[#allocation31_spill] sm:$0xff] %v17535_v35  ;;  %v19547_v31 = vunpack.c.l.b16 %v17535_v35 }
 0x528   :  { %4367 = vmatmul.bf16.gmra.mxu1 %v17504_v6  ;;  %v17531_v6 = vor.u32 %v3660_v24, %v19544_v1  ;;  %v3682_v1 = vrot.slane %v19964_v13, 2  ;;  %v3728_v13 = vrot.slane %v17089_v44, 2 }
 0x52a   :  { %19955 = vst [vmem:[#allocation59_spill] sm:$0xff] %v17531_v6  ;;  %v19548_v7 = vunpack.c.l.b16 %v17531_v6  ;;  %v17578_v6 = vunpack.c.l.b16 %v3727_v33  ;;  %v13950_v33 = vld [vmem:[#allocation2 + $0xa8] sm:$0xff] }
 0x52c   :  { %4465 = vmatmul.bf16.gmra.mxu3 %v17508_v5  ;;  %4416 = vmatmul.bf16.gmra.mxu2 %v17514_v0  ;;  %v17537_v0 = vunpack.c.l.b16 %v3677_v3  ;;  %v17539_v5 = vunpack.c.l.b16 %v3911_v17  ;;  %v17555_v17 = vpack.c.b16 %v19547_v31, %v19548_v7  ;;  %v19962_v3 = vshrl.u32 %v17069_v29, 16  ;;  %v13951_v31 = vld [vmem:[#allocation2 + $0xb0] sm:$0xff] }
 0x52d   :  { %v13959_v7 = vld [vmem:[#allocation2 + $0xf0] sm:$0xff]  ;;  %4993 = vmatpush.bf16.msrb.mxu2 %v13951_v31 }
 0x52e   :  { %19957 = vst [vmem:[#allocation50_spill] sm:$0xff] %v17537_v0  ;;  %v17549_v24 = vpack.c.b16 %v17539_v5, %v17537_v0  ;;  %v3681_v16 = vrot.slane %v19962_v3, 1  ;;  %v3422_v3 = vpack.c.bf16 %v17056_v61, %v17056_v61  ;;  %5042 = vmatpush.bf16.msrb.mxu3 %v13959_v7 }
 0x52f   :  { %19958 = vst [vmem:[#allocation40_spill] sm:$0xff] %v17539_v5  ;;  %v19965_v5 = vshll.u32 %v17089_v44, 16 }
 0x530   :  { %19960 = vst [vmem:[#allocation44_spill] sm:$0xff] %v17549_v24  ;;  %v3683_v35 = vor.u32 %v3682_v1, %v3681_v16  ;;  %v17580_v1 = vunpack.c.l.b16 %v3728_v13  ;;  %v19968_v16 = vshrl.u32 %v17131_v37, 16 }
 0x531   :  { %19961 = vst [vmem:[#allocation65_spill] sm:$0xff] %v17555_v17  ;;  %v3685_v49 = vrot.slane %v19965_v5, 2  ;;  %4994 = vmatpush.bf16.msrb.mxu2 %v13950_v33 }
 0x532   :  { %v4013_v44 = vpack.c.b16 %v17580_v1, %v17578_v6 }
 0x533   :  { %v3686_v0 = vor.u32 %v3685_v49, %v3684_v25  ;;  %v19966_v49 = vshrl.u32 %v17109_v43, 16  ;;  %v19969_v25 = vshll.u32 %v17131_v37, 16  ;;  %v17614_v37 = vpack.c.b16 %v17091_v36, %v17079_v55 }
 0x534   :  { %v19977_v36 = vshll.u32 %v17180_v20, 16 }
 0x535   :  { %v17574_v5 = vunpack.c.l.b16 %v3686_v0  ;;  %v3687_v31 = vrot.slane %v19966_v49, 1  ;;  %v19967_v0 = vshll.u32 %v17109_v43, 16  ;;  %19972 = vst [vmem:[#allocation51_spill] sm:$0xff] %v17614_v37 }
 0x536   :  { %v3697_v55 = vrot.slane %v19977_v36, 2  ;;  %v3732_v36 = vrot.slane %v17180_v20, 2 }
 0x538   :  { %4372 = vmatmul.bf16.gmra.mxu1 %v17545_v42  ;;  %v17572_v42 = vunpack.c.l.b16 %v3683_v35  ;;  %v3688_v35 = vrot.slane %v19967_v0, 2  ;;  %v3729_v0 = vrot.slane %v17109_v43, 2 }
 0x53a   :  { %v4012_v61 = vpack.c.b16 %v17574_v5, %v17572_v42  ;;  %v3689_v46 = vor.u32 %v3688_v35, %v3687_v31  ;;  %v17606_v31 = vunpack.c.l.b16 %v3730_v59  ;;  %v19974_v59 = vshrl.u32 %v17172_v32, 16 }
 0x53c   :  { %4470 = vmatmul.bf16.gmra.mxu3 %v17549_v24  ;;  %4421 = vmatmul.bf16.gmra.mxu2 %v17555_v17  ;;  %v17576_v24 = vunpack.c.l.b16 %v3422_v3  ;;  %v13943_v17 = vld [vmem:[#allocation2 + $0x70] sm:$0xff]  ;;  %v3691_v3 = vrot.slane %v19969_v25, 2  ;;  %v17604_v25 = vunpack.c.l.b16 %v3729_v0  ;;  %v13957_v0 = vld [vmem:[#allocation2 + $0xe0] sm:$0xff] }
 0x53d   :  { %4944 = vmatpush.bf16.msrb.mxu1 %v13943_v17  ;;  %v3690_v17 = vrot.slane %v19968_v16, 1  ;;  %v17598_v16 = vunpack.c.l.b16 %v3689_v46 }
 0x53e   :  { %v4574_v29 = vpack.c.b16 %v17064_v9, %v17576_v24  ;;  %v13958_v9 = vld [vmem:[#allocation2 + $0xe8] sm:$0xff] }
 0x53f   :  { %v3692_v8 = vor.u32 %v3691_v3, %v3690_v17  ;;  %5043 = vmatpush.bf16.msrb.mxu3 %v13958_v9  ;;  %v3693_v17 = vrot.slane %v19974_v59, 1  ;;  %v19975_v3 = vshll.u32 %v17172_v32, 16  ;;  %v19976_v9 = vshrl.u32 %v17180_v20, 16 }
 0x540   :  { %v17651_v20 = vpack.c.b16 %v17149_v28, %v17121_v19  ;;  %v19986_v19 = vshll.u32 %v17252_v11, 16 }
 0x541   :  { %v17600_v63 = vunpack.c.l.b16 %v3692_v8  ;;  %v3694_v33 = vrot.slane %v19975_v3, 2 }
 0x542   :  { %19981 = vst [vmem:[#allocation70_spill] sm:$0xff] %v17651_v20  ;;  %v3913_v28 = vrot.slane %v19986_v19, 2  ;;  %v3918_v19 = vrot.slane %v17252_v11, 2 }
 0x543   :  { %v4338_v7 = vpop.f32.mrf.mxu1  ;;  %19970 = vst [vmem:[#allocation67_spill] sm:$0xff] %v17600_v63  ;;  %5044 = vmatpush.bf16.msrb.mxu3 %v13957_v0  ;;  %v19984_v0 = vshll.u32 %v17249_v14, 16 }
 0x548   :  { %4484 = vmatmul.bf16.vlgmr.msra.gmra.mxu1 %v4012_v61 }
 0x54b   :  { %v4436_v13 = vpop.f32.mrf.mxu3  ;;  %v4340_v61 = vpop.f32.mrf.mxu1 }
 0x54c   :  { %4902 = vmatmul.bf16.vlgmr.msra.gmra.mxu3 %v4574_v29  ;;  %4533 = vmatmul.bf16.vlgmr.msra.gmra.mxu2 %v4013_v44  ;;  %v4387_v49 = vpop.f32.mrf.mxu2  ;;  %v13942_v44 = vld [vmem:[#allocation2 + $0x68] sm:$0xff] }
 0x54d   :  { %v4388_v58 = vadd.f32 %v4387_v49, %v4338_v7  ;;  %4945 = vmatpush.bf16.msrb.mxu1 %v13942_v44  ;;  %v17610_v7 = vpack.c.b16 %v17600_v63, %v17598_v16 }
 0x54f   :  { %v17602_v29 = vadd.f32 %v4436_v13, %v4388_v58  ;;  %19971 = vst [vmem:[#allocation68_spill] sm:$0xff] %v17610_v7  ;;  %v17618_v58 = vpack.c.b16 %v17606_v31, %v17604_v25  ;;  %v3696_v13 = vrot.slane %v19976_v9, 1  ;;  %v3731_v9 = vrot.slane %v17172_v32, 2 }
 0x551   :  { %19973 = vst [vmem:[#allocation66_spill] sm:$0xff] %v17618_v58  ;;  %v3698_v59 = vor.u32 %v3697_v55, %v3696_v13  ;;  %v17641_v63 = vunpack.c.l.b16 %v3731_v9  ;;  %v13956_v9 = vld [vmem:[#allocation2 + $0xd8] sm:$0xff] }
 0x552   :  { %5045 = vmatpush.bf16.msrb.mxu3 %v13956_v9 }
 0x553   :  { %v4438_v35 = vpop.f32.mrf.mxu3  ;;  %v4343_v43 = vpop.f32.mrf.mxu1 }
 0x554   :  { %v4389_v46 = vpop.f32.mrf.mxu2 }
 0x555   :  { %v4390_v8 = vadd.f32 %v4389_v46, %v4340_v61  ;;  %v13949_v61 = vld [vmem:[#allocation2 + $0xa0] sm:$0xff]  ;;  %v3695_v46 = vor.u32 %v3694_v33, %v3693_v17  ;;  %v17643_v17 = vunpack.c.l.b16 %v3732_v36 }
 0x556   :  { %4995 = vmatpush.bf16.msrb.mxu2 %v13949_v61 }
 0x557   :  { %v17629_v49 = vadd.f32 %v4438_v35, %v4390_v8  ;;  %v17635_v35 = vunpack.c.l.b16 %v3695_v46  ;;  %v17637_v8 = vunpack.c.l.b16 %v3698_v59  ;;  %v19985_v46 = vshrl.u32 %v17252_v11, 16 }
 0x558   :  { %4489 = vmatmul.bf16.gmra.mxu1 %v17610_v7  ;;  %v17688_v11 = vpack.c.b16 %v17225_v22, %v17161_v26  ;;  %v19995_v26 = vshll.u32 %v17348_v54, 16 }
 0x559   :  { %19978 = vst [vmem:[#allocation58_spill] sm:$0xff] %v17635_v35  ;;  %v3912_v59 = vrot.slane %v19985_v46, 1  ;;  %v3733_v46 = vrot.slane %v17249_v14, 2 }
 0x55a   :  { %19979 = vst [vmem:[#allocation49_spill] sm:$0xff] %v17637_v8  ;;  %v3709_v22 = vrot.slane %v19995_v26, 2 }
 0x55b   :  { %v4441_v44 = vpop.f32.mrf.mxu3  ;;  %v4345_v7 = vpop.f32.mrf.mxu1  ;;  %19990 = vst [vmem:[#allocation56_spill] sm:$0xff] %v17688_v11 }
 0x55c   :  { %4907 = vmatmul.bf16.gmra.mxu3 %v17614_v37  ;;  %4538 = vmatmul.bf16.gmra.mxu2 %v17618_v58  ;;  %v4392_v3 = vpop.f32.mrf.mxu2  ;;  %v13941_v58 = vld [vmem:[#allocation2 + $0x60] sm:$0xff] }
 0x55d   :  { %v4393_v38 = vadd.f32 %v4392_v3, %v4343_v43  ;;  %4946 = vmatpush.bf16.msrb.mxu1 %v13941_v58  ;;  %v17647_v43 = vpack.c.b16 %v17637_v8, %v17635_v35  ;;  %v19983_v58 = vshrl.u32 %v17249_v14, 16  ;;  %v17678_v35 = vunpack.c.l.b16 %v3733_v46  ;;  %v13955_v46 = vld [vmem:[#allocation2 + $0xd0] sm:$0xff] }
 0x55e   :  { %5046 = vmatpush.bf16.msrb.mxu3 %v13955_v46 }
 0x55f   :  { %v17639_v37 = vadd.f32 %v4441_v44, %v4393_v38  ;;  %19980 = vst [vmem:[#allocation64_spill] sm:$0xff] %v17647_v43  ;;  %v17655_v38 = vpack.c.b16 %v17643_v17, %v17641_v63  ;;  %v3699_v61 = vrot.slane %v19983_v58, 1  ;;  %v3700_v44 = vrot.slane %v19984_v0, 2 }
 0x560   :  { %v3914_v58 = vor.u32 %v3913_v28, %v3912_v59 }
 0x561   :  { %19982 = vst [vmem:[#allocation69_spill] sm:$0xff] %v17655_v38 }
 0x563   :  { %v4443_v33 = vpop.f32.mrf.mxu3  ;;  %v4348_v32 = vpop.f32.mrf.mxu1 }
 0x564   :  { %v4394_v13 = vpop.f32.mrf.mxu2 }
 0x565   :  { %v4395_v55 = vadd.f32 %v4394_v13, %v4345_v7  ;;  %v13948_v7 = vld [vmem:[#allocation2 + $0x98] sm:$0xff]  ;;  %v3701_v13 = vor.u32 %v3700_v44, %v3699_v61  ;;  %v17680_v61 = vunpack.c.l.b16 %v3918_v19 }
 0x566   :  { %4996 = vmatpush.bf16.msrb.mxu2 %v13948_v7  ;;  %v19992_v7 = vshrl.u32 %v17321_v52, 16 }
 0x567   :  { %v17666_v3 = vadd.f32 %v4443_v33, %v4395_v55  ;;  %v17672_v33 = vunpack.c.l.b16 %v3701_v13  ;;  %v17674_v55 = vunpack.c.l.b16 %v3914_v58  ;;  %19988 = vst [vmem:[#allocation71_spill] sm:$0xff] %v17680_v61  ;;  %v19994_v13 = vshll.u32 %v17321_v52, 16 }
 0x568   :  { %4494 = vmatmul.bf16.gmra.mxu1 %v17647_v43  ;;  %v3705_v9 = vrot.slane %v19992_v7, 1 }
 0x569   :  { %19987 = vst [vmem:[#allocation72_spill] sm:$0xff] %v17674_v55  ;;  %v3706_v58 = vrot.slane %v19994_v13, 2 }
 0x56b   :  { %v4446_v36 = vpop.f32.mrf.mxu3  ;;  %v4350_v43 = vpop.f32.mrf.mxu1 }
 0x56c   :  { %4912 = vmatmul.bf16.gmra.mxu3 %v17651_v20  ;;  %4543 = vmatmul.bf16.gmra.mxu2 %v17655_v38  ;;  %v4397_v0 = vpop.f32.mrf.mxu2  ;;  %v13940_v38 = vld [vmem:[#allocation2 + $0x58] sm:$0xff] }
 0x56d   :  { %v4398_v8 = vadd.f32 %v4397_v0, %v4348_v32  ;;  %4947 = vmatpush.bf16.msrb.mxu1 %v13940_v38  ;;  %v17684_v32 = vpack.c.b16 %v17674_v55, %v17672_v33  ;;  %v19993_v38 = vshrl.u32 %v17348_v54, 16 }
 0x56f   :  { %v17676_v20 = vadd.f32 %v4446_v36, %v4398_v8  ;;  %19989 = vst [vmem:[#allocation82_spill] sm:$0xff] %v17684_v32  ;;  %v17692_v8 = vpack.c.b16 %v17680_v61, %v17678_v35  ;;  %v3708_v36 = vrot.slane %v19993_v38, 1 }
 0x571   :  { %19991 = vst [vmem:[#allocation75_spill] sm:$0xff] %v17692_v8  ;;  %v3710_v7 = vor.u32 %v3709_v22, %v3708_v36  ;;  %v13939_v36 = vld [vmem:[#allocation2 + $0x50] sm:$0xff] }
 0x572   :  { %4948 = vmatpush.bf16.msrb.mxu1 %v13939_v36 }
 0x573   :  { %v4448_v44 = vpop.f32.mrf.mxu3 }
 0x574   :  { %v4399_v59 = vpop.f32.mrf.mxu2 }
 0x575   :  { %v4353_v14 = vpop.f32.mrf.mxu1  ;;  %v4400_v28 = vadd.f32 %v4399_v59, %v4350_v43  ;;  %v13947_v43 = vld [vmem:[#allocation2 + $0x90] sm:$0xff]  ;;  %v3707_v59 = vor.u32 %v3706_v58, %v3705_v9 }
 0x576   :  { %4997 = vmatpush.bf16.msrb.mxu2 %v13947_v43 }
 0x577   :  { %v17703_v0 = vadd.f32 %v4448_v44, %v4400_v28  ;;  %v3735_v44 = vrot.slane %v17321_v52, 2  ;;  %v3736_v28 = vrot.slane %v17348_v54, 2  ;;  %v17711_v26 = vunpack.c.l.b16 %v3707_v59 }
 0x578   :  { %4499 = vmatmul.bf16.gmra.mxu1 %v17684_v32  ;;  %v3446_v32 = vpack.c.bf16 %v17285_v60, %v17285_v60  ;;  %v20001_v59 = vshrl.u32 %v17395_v18, 16 }
 0x579   :  { %19996 = vst [vmem:[#allocation88_spill] sm:$0xff] %v17711_v26  ;;  %v17719_v58 = vunpack.c.l.b16 %v3735_v44  ;;  %v17721_v60 = vunpack.c.l.b16 %v3736_v28  ;;  %v20003_v28 = vshll.u32 %v17395_v18, 16 }
 0x57a   :  { %v17717_v9 = vunpack.c.l.b16 %v3446_v32  ;;  %v20000_v32 = vshrl.u32 %v17389_v56, 16 }
 0x57b   :  { %v4451_v19 = vpop.f32.mrf.mxu3  ;;  %19999 = vst [vmem:[#allocation91_spill] sm:$0xff] %v17721_v60  ;;  %v3715_v36 = vrot.slane %v20003_v28, 2 }
 0x57c   :  { %4917 = vmatmul.bf16.gmra.mxu3 %v17688_v11  ;;  %4548 = vmatmul.bf16.gmra.mxu2 %v17692_v8  ;;  %v17713_v8 = vunpack.c.l.b16 %v3710_v7  ;;  %v4594_v54 = vpack.c.b16 %v17304_v10, %v17717_v9  ;;  %v3714_v7 = vrot.slane %v20001_v59, 1  ;;  %v13946_v10 = vld [vmem:[#allocation2 + $0x88] sm:$0xff] }
 0x57d   :  { %v4355_v38 = vpop.f32.mrf.mxu1  ;;  %4998 = vmatpush.bf16.msrb.mxu2 %v13946_v10 }
 0x57e   :  { %19997 = vst [vmem:[#allocation89_spill] sm:$0xff] %v17713_v8  ;;  %v4032_v52 = vpack.c.b16 %v17713_v8, %v17711_v26  ;;  %v3716_v26 = vor.u32 %v3715_v36, %v3714_v7  ;;  %v20008_v36 = vshrl.u32 %v17443_v15, 16 }
 0x57f   :  { %v4402_v13 = vpop.f32.mrf.mxu2 }
 0x580   :  { %v4403_v61 = vadd.f32 %v4402_v13, %v4353_v14  ;;  %v20002_v13 = vshll.u32 %v17389_v56, 16  ;;  %v3717_v10 = vrot.slane %v20008_v36, 1 }
 0x582   :  { %v17715_v11 = vadd.f32 %v4451_v19, %v4403_v61  ;;  %v4033_v61 = vpack.c.b16 %v17721_v60, %v17719_v58  ;;  %v3711_v19 = vrot.slane %v20000_v32, 1  ;;  %v3712_v44 = vrot.slane %v20002_v13, 2 }
 0x583   :  { %v4453_v22 = vpop.f32.mrf.mxu3  ;;  %v3737_v60 = vrot.slane %v17389_v56, 2  ;;  %v3738_v13 = vrot.slane %v17395_v18, 2  ;;  %v13967_v18 = vld [vmem:[#allocation2 + $0x130] sm:$0xff] }
 0x584   :  { %19998 = vst [vmem:[#allocation90_spill] sm:$0xff] %v17715_v11  ;;  %v3713_v8 = vor.u32 %v3712_v44, %v3711_v19 }
 0x585   :  { %v4358_v14 = vpop.f32.mrf.mxu1  ;;  %v17747_v19 = vunpack.c.l.b16 %v3737_v60  ;;  %v17749_v7 = vunpack.c.l.b16 %v3738_v13  ;;  %v13966_v13 = vld [vmem:[#allocation2 + $0x128] sm:$0xff] }
 0x586   :  { %v17741_v11 = vunpack.c.l.b16 %v3713_v8 }
 0x587   :  { %v4404_v43 = vpop.f32.mrf.mxu2  ;;  %v17761_v60 = vpack.c.b16 %v17749_v7, %v17747_v19 }
 0x588   :  { %v4405_v46 = vadd.f32 %v4404_v43, %v4355_v38  ;;  %4504 = vmatmul.bf16.gmra.mxu1 %v4032_v52  ;;  %v13954_v38 = vld [vmem:[#allocation2 + $0xc8] sm:$0xff] }
 0x589   :  { %5047 = vmatpush.bf16.msrb.mxu3 %v13954_v38  ;;  %20007 = vst [vmem:[#allocation95_spill] sm:$0xff] %v17761_v60  ;;  %v20009_v38 = vshrl.u32 %v17449_v2, 16 }
 0x58a   :  { %v17737_v55 = vadd.f32 %v4453_v22, %v4405_v46  ;;  %v17743_v22 = vunpack.c.l.b16 %v3716_v26  ;;  %v17757_v26 = vpack.c.b16 %v17367_v53, %v17336_v45  ;;  %v20011_v45 = vshll.u32 %v17449_v2, 16 }
 0x58c   :  { %4922 = vmatmul.bf16.gmra.mxu3 %v4594_v54  ;;  %4553 = vmatmul.bf16.gmra.mxu2 %v4033_v61  ;;  %20004 = vst [vmem:[#allocation92_spill] sm:$0xff] %v17743_v22  ;;  %v13968_v54 = vld [vmem:[#allocation2 + $0x138] sm:$0xff]  ;;  %v13938_v61 = vld [vmem:[#allocation2 + $0x48] sm:$0xff]  ;;  %v17753_v56 = vpack.c.b16 %v17743_v22, %v17741_v11  ;;  %v3721_v53 = vrot.slane %v20011_v45, 2 }
 0x58d   :  { %v4360_v32 = vpop.f32.mrf.mxu1  ;;  %5090 = vmatpush.bf16.msra.mxu0 %v13968_v54  ;;  %4949 = vmatpush.bf16.msrb.mxu1 %v13938_v61  ;;  %20006 = vst [vmem:[#allocation94_spill] sm:$0xff] %v17757_v26  ;;  %v13945_v54 = vld [vmem:[#allocation2 + $0x80] sm:$0xff] }
 0x58e   :  { %20005 = vst [vmem:[#allocation93_spill] sm:$0xff] %v17753_v56  ;;  %v13953_v61 = vld [vmem:[#allocation2 + $0xc0] sm:$0xff]  ;;  %4999 = vmatpush.bf16.msrb.mxu2 %v13945_v54 }
 0x58f   :  { %v4456_v43 = vpop.f32.mrf.mxu3  ;;  %v4407_v59 = vpop.f32.mrf.mxu2  ;;  %5048 = vmatpush.bf16.msrb.mxu3 %v13953_v61 }
 0x590   :  { %v4408_v52 = vadd.f32 %v4407_v59, %v4358_v14  ;;  %v20010_v59 = vshll.u32 %v17443_v15, 16 }
 0x591   :  { %5091 = vmatpush.bf16.msra.mxu0 %v13967_v18 }
 0x592   :  { %v17745_v46 = vadd.f32 %v4456_v43, %v4408_v52  ;;  %v3720_v43 = vrot.slane %v20009_v38, 1  ;;  %v3718_v52 = vrot.slane %v20010_v59, 2  ;;  %v13965_v38 = vld [vmem:[#allocation2 + $0x120] sm:$0xff] }
 0x594   :  { %v3722_v36 = vor.u32 %v3721_v53, %v3720_v43 }
 0x595   :  { %v4363_v8 = vpop.f32.mrf.mxu1  ;;  %5092 = vmatpush.bf16.msra.mxu0 %v13966_v13 }
 0x596   :  { %v17780_v13 = vunpack.c.l.b16 %v3722_v36 }
 0x597   :  { %v4458_v44 = vpop.f32.mrf.mxu3  ;;  %v4409_v14 = vpop.f32.mrf.mxu2 }
 0x598   :  { %v4410_v28 = vadd.f32 %v4409_v14, %v4360_v32  ;;  %4509 = vmatmul.bf16.gmra.mxu1 %v17753_v56  ;;  %v3719_v14 = vor.u32 %v3718_v52, %v3717_v10  ;;  %20013 = vst [vmem:[#allocation97_spill] sm:$0xff] %v17780_v13  ;;  %v3423_v10 = vpack.c.bf16 %v17058_v48, %v17058_v48  ;;  %v13937_v52 = vld [vmem:[#allocation2 + $0x40] sm:$0xff] }
 0x599   :  { %5093 = vmatpush.bf16.msra.mxu0 %v13965_v38  ;;  %4950 = vmatpush.bf16.msrb.mxu1 %v13937_v52  ;;  %v17796_v48 = vpack.c.b16 %v17420_v39, %v17377_v62  ;;  %v20017_v38 = vshrl.u32 %v17497_v23, 16  ;;  %v20020_v62 = vshll.u32 %v17500_v27, 16  ;;  %v13962_v52 = vld [vmem:[#allocation2 + $0x108] sm:$0xff] }
 0x59a   :  { %v17772_v32 = vadd.f32 %v4458_v44, %v4410_v28  ;;  %v3739_v44 = vrot.slane %v17443_v15, 2  ;;  %v3740_v28 = vrot.slane %v17449_v2, 2  ;;  %v3503_v61 = vunpack.c.l.b16 %v3423_v10 }
 0x59b   :  { %20015 = vst [vmem:[#allocation99_spill] sm:$0xff] %v17796_v48  ;;  %v3916_v39 = vrot.slane %v20020_v62, 2 }
 0x59c   :  { %4927 = vmatmul.bf16.gmra.mxu3 %v17757_v26  ;;  %4558 = vmatmul.bf16.gmra.mxu2 %v17761_v60  ;;  %v17778_v26 = vunpack.c.l.b16 %v3719_v14  ;;  %v13964_v60 = vld [vmem:[#allocation2 + $0x118] sm:$0xff]  ;;  %v17786_v53 = vunpack.c.l.b16 %v3739_v44  ;;  %v17788_v54 = vunpack.c.l.b16 %v3740_v28  ;;  %v20019_v28 = vshll.u32 %v17497_v23, 16 }
 0x59d   :  { %v4365_v56 = vpop.f32.mrf.mxu1  ;;  %5094 = vmatpush.bf16.msra.mxu0 %v13964_v60 }
 0x59e   :  { %20012 = vst [vmem:[#allocation96_spill] sm:$0xff] %v17778_v26  ;;  %v17792_v2 = vpack.c.b16 %v17780_v13, %v17778_v26  ;;  %v17800_v36 = vpack.c.b16 %v17788_v54, %v17786_v53  ;;  %v3724_v10 = vrot.slane %v20019_v28, 2  ;;  %v13961_v26 = vld [vmem:[#allocation2 + $0x100] sm:$0xff] }
 0x59f   :  { %v4461_v18 = vpop.f32.mrf.mxu3  ;;  %v4412_v59 = vpop.f32.mrf.mxu2 }
 0x5a0   :  { %v4413_v45 = vadd.f32 %v4412_v59, %v4363_v8  ;;  %20014 = vst [vmem:[#allocation98_spill] sm:$0xff] %v17792_v2  ;;  %v13963_v8 = vld [vmem:[#allocation2 + $0x110] sm:$0xff]  ;;  %v3723_v59 = vrot.slane %v20017_v38, 1  ;;  %v14032_v38 = vld [vmem:[#allocation2 + $0x338] sm:$0xff] }
 0x5a1   :  { %5095 = vmatpush.bf16.msra.mxu0 %v13963_v8  ;;  %20016 = vst [vmem:[#allocation100_spill] sm:$0xff] %v17800_v36  ;;  %5620 = vmatpush.bf16.msra.mxu3 %v14032_v38 }
 0x5a2   :  { %v17784_v43 = vadd.f32 %v4461_v18, %v4413_v45  ;;  %v20018_v45 = vshrl.u32 %v17500_v27, 16  ;;  %v3725_v28 = vor.u32 %v3724_v10, %v3723_v59 }
 0x5a4   :  { %v3915_v44 = vrot.slane %v20018_v45, 1 }
 0x5a5   :  { %v4368_v14 = vpop.f32.mrf.mxu1  ;;  %5096 = vmatpush.bf16.msra.mxu0 %v13962_v52  ;;  %v3919_v52 = vrot.slane %v17500_v27, 2 }
 0x5a6   :  { %v3917_v13 = vor.u32 %v3916_v39, %v3915_v44  ;;  %v14016_v44 = vld [vmem:[#allocation2 + $0x2b8] sm:$0xff] }
 0x5a7   :  { %v4463_v15 = vpop.f32.mrf.mxu3  ;;  %v4414_v18 = vpop.f32.mrf.mxu2  ;;  %v17830_v39 = vunpack.c.l.b16 %v3919_v52  ;;  %5522 = vmatpush.bf16.msra.mxu1 %v14016_v44 }
 0x5a8   :  { %v4415_v60 = vadd.f32 %v4414_v18, %v4365_v56  ;;  %4514 = vmatmul.bf16.gmra.mxu1 %v17792_v2  ;;  %v17812_v56 = vpack.c.b16 %v3503_v61, %v17576_v24  ;;  %v14024_v18 = vld [vmem:[#allocation2 + $0x2f8] sm:$0xff]  ;;  %v17824_v22 = vunpack.c.l.b16 %v3917_v13 }
 0x5a9   :  { %5571 = vmatpush.bf16.msra.mxu2 %v14024_v18  ;;  %5097 = vmatpush.bf16.msra.mxu0 %v13961_v26 }
 0x5aa   :  { %v17814_v8 = vadd.f32 %v4463_v15, %v4415_v60  ;;  %v3726_v45 = vrot.slane %v17812_v56, 2  ;;  %v3741_v60 = vrot.slane %v17497_v23, 2  ;;  %v3553_v26 = vshll.u32 %v17812_v56, 16 }
 0x5ab   :  { %v3662_v44 = vrot.slane %v17812_v56, 1 }
 0x5ac   :  { %4932 = vmatmul.bf16.gmra.mxu3 %v17796_v48  ;;  %4563 = vmatmul.bf16.gmra.mxu2 %v17800_v36  ;;  %v3745_v24 = vunpack.c.l.b16 %v3726_v45  ;;  %v17822_v48 = vunpack.c.l.b16 %v3725_v28  ;;  %v17828_v10 = vunpack.c.l.b16 %v3741_v60  ;;  %v3555_v38 = vrot.slane %v3553_v26, 1 }
 0x5ad   :  { %v4370_v62 = vpop.f32.mrf.mxu1  ;;  %v3679_v28 = vrot.slane %v3553_v26, 2  ;;  %v17854_v26 = vpack.c.b16 %v17604_v25, %v17580_v1 }
 0x5ae   :  { %v4578_v36 = vpack.c.b16 %v17578_v6, %v3745_v24  ;;  %v17835_v27 = vpack.c.b16 %v17824_v22, %v17822_v48  ;;  %v3551_v6 = vshrl.u32 %v17812_v56, 16  ;;  %v17844_v18 = vpack.c.b16 %v17830_v39, %v17828_v10 }
 0x5af   :  { %v4466_v2 = vpop.f32.mrf.mxu3  ;;  %v4417_v61 = vpop.f32.mrf.mxu2 }
 0x5b0   :  { %v4418_v15 = vadd.f32 %v4417_v61, %v4368_v14  ;;  %5098 = vmatmul.bf16.vlgmr.msra.gmra.mxu0 %v4578_v36  ;;  %20021 = vst [vmem:[#allocation101_spill] sm:$0xff] %v17835_v27  ;;  %v3678_v45 = vrot.slane %v3551_v6, 1  ;;  %v14023_v61 = vld [vmem:[#allocation2 + $0x2f0] sm:$0xff] }
 0x5b1   :  { %20023 = vst [vmem:[#allocation103_spill] sm:$0xff] %v17844_v18  ;;  %5572 = vmatpush.bf16.msra.mxu2 %v14023_v61 }
 0x5b2   :  { %v17826_v59 = vadd.f32 %v4466_v2, %v4418_v15  ;;  %v17840_v2 = vpack.c.b16 %v17482_v12, %v17431_v50  ;;  %v14031_v50 = vld [vmem:[#allocation2 + $0x330] sm:$0xff]  ;;  %v3556_v12 = vor.u32 %v3555_v38, %v3551_v6  ;;  %v3743_v6 = vunpack.c.l.b16 %v3662_v44 }
 0x5b3   :  { %5621 = vmatpush.bf16.msra.mxu3 %v14031_v50  ;;  %v20024_v38 = vunpack.c.l.b16 %v17099_v40 }
 0x5b4   :  { %20022 = vst [vmem:[#allocation102_spill] sm:$0xff] %v17840_v2  ;;  %v4576_v25 = vpack.c.b16 %v17095_v4, %v3743_v6 }
 0x5b5   :  { %v4373_v13 = vpop.f32.mrf.mxu1 }
 0x5b7   :  { %v4468_v23 = vpop.f32.mrf.mxu3  ;;  %v4419_v14 = vpop.f32.mrf.mxu2 }
 0x5b8   :  { %v4420_v36 = vadd.f32 %v4419_v14, %v4370_v62  ;;  %4519 = vmatmul.bf16.gmra.mxu1 %v17835_v27  ;;  %v3680_v62 = vor.u32 %v3679_v28, %v3678_v45 }
 0x5ba   :  { %v17847_v24 = vadd.f32 %v4468_v23, %v4420_v36  ;;  %v3742_v23 = vunpack.c.l.b16 %v3556_v12  ;;  %v3744_v36 = vunpack.c.l.b16 %v3680_v62 }
 0x5bc   :  { %4937 = vmatmul.bf16.gmra.mxu3 %v17840_v2  ;;  %4568 = vmatmul.bf16.gmra.mxu2 %v17844_v18  ;;  %v14015_v18 = vld [vmem:[#allocation2 + $0x2b0] sm:$0xff]  ;;  %v4575_v45 = vpack.c.b16 %v20024_v38, %v3742_v23  ;;  %v4577_v56 = vpack.c.b16 %v17572_v42, %v3744_v36  ;;  %v20026_v23 = vunpack.c.l.b16 %v17116_v34  ;;  %v20027_v36 = vunpack.c.l.b16 %v17155_v51  ;;  %v14021_v51 = vld [vmem:[#allocation2 + $0x2e0] sm:$0xff] }
 0x5bd   :  { %v4375_v60 = vpop.f32.mrf.mxu1  ;;  %5523 = vmatpush.bf16.msra.mxu1 %v14015_v18  ;;  %v14030_v18 = vld [vmem:[#allocation2 + $0x328] sm:$0xff] }
 0x5be   :  { %5622 = vmatpush.bf16.msra.mxu3 %v14030_v18  ;;  %v17878_v6 = vpack.c.b16 %v20027_v36, %v20026_v23  ;;  %v20030_v18 = vunpack.c.l.b16 %v17231_v21  ;;  %v14020_v36 = vld [vmem:[#allocation2 + $0x2d8] sm:$0xff] }
 0x5bf   :  { %v4471_v15 = vpop.f32.mrf.mxu3  ;;  %v4422_v52 = vpop.f32.mrf.mxu2 }
 0x5c0   :  { %v4423_v14 = vadd.f32 %v4422_v52, %v4373_v13  ;;  %5103 = vmatmul.bf16.gmra.mxu0 %v17854_v26 }
 0x5c2   :  { %v17856_v27 = vadd.f32 %v4471_v15, %v4423_v14  ;;  %v14022_v15 = vld [vmem:[#allocation2 + $0x2e8] sm:$0xff] }
 0x5c3   :  { %5573 = vmatpush.bf16.msra.mxu2 %v14022_v15  ;;  %v20029_v15 = vunpack.c.l.b16 %v17159_v57 }
 0x5c5   :  { %v4485_v13 = vpop.f32.mrf.mxu1 }
 0x5c6   :  { %v4486_v1 = vadd.f32 %v4485_v13, %v17602_v29  ;;  %v17869_v29 = vpack.c.b16 %v17641_v63, %v17606_v31 }
 0x5c7   :  { %v4473_v28 = vpop.f32.mrf.mxu3  ;;  %v4424_v61 = vpop.f32.mrf.mxu2  ;;  %5574 = vmatpush.bf16.msra.mxu2 %v14021_v51 }
 0x5c8   :  { %v4425_v50 = vadd.f32 %v4424_v61, %v4375_v60  ;;  %4951 = vmatmul.bf16.vlgmr.msrb.gmra.mxu1 %v4575_v45  ;;  %20025 = vst [vmem:[#allocation104_spill] sm:$0xff] %v17869_v29  ;;  %v14014_v60 = vld [vmem:[#allocation2 + $0x2a8] sm:$0xff] }
 0x5c9   :  { %5524 = vmatpush.bf16.msra.mxu1 %v14014_v60  ;;  %v20034_v60 = vld [vmem:[#allocation24_spill] sm:$0xff] }
 0x5ca   :  { %v17864_v12 = vadd.f32 %v4473_v28, %v4425_v50  ;;  %v17887_v28 = vpack.c.b16 %v17167_v41, %v17106_v47  ;;  %v17897_v47 = vpack.c.b16 %v17678_v35, %v17643_v17  ;;  %v3447_v41 = vpack.c.bf16 %v17271_v30, %v17271_v30  ;;  %v20031_v35 = vld [vmem:[#allocation67_spill] sm:$0xff]  ;;  %v20032_v17 = vld [vmem:[#allocation58_spill] sm:$0xff] }
 0x5cb   :  { %5575 = vmatpush.bf16.msra.mxu2 %v14020_v36 }
 0x5cc   :  { %5049 = vmatmul.bf16.vlgmr.msrb.gmra.mxu3 %v4577_v56  ;;  %5000 = vmatmul.bf16.vlgmr.msrb.gmra.mxu2 %v4576_v25  ;;  %v14029_v56 = vld [vmem:[#allocation2 + $0x320] sm:$0xff]  ;;  %20028 = vst [vmem:[#allocation105_spill] sm:$0xff] %v17897_v47 }
 0x5cd   :  { %v4487_v40 = vpop.f32.mrf.mxu1  ;;  %5623 = vmatpush.bf16.msra.mxu3 %v14029_v56  ;;  %v14013_v25 = vld [vmem:[#allocation2 + $0x2a0] sm:$0xff] }
 0x5ce   :  { %v4488_v42 = vadd.f32 %v4487_v40, %v17629_v49  ;;  %v17882_v49 = vpack.c.b16 %v17598_v16, %v17574_v5  ;;  %5525 = vmatpush.bf16.msra.mxu1 %v14013_v25  ;;  %v20039_v25 = vld [vmem:[#allocation81_spill] sm:$0xff] }
 0x5cf   :  { %v4903_v62 = vpop.f32.mrf.mxu3  ;;  %v4534_v52 = vpop.f32.mrf.mxu2 }
 0x5d0   :  { %v4535_v44 = vadd.f32 %v4534_v52, %v4486_v1  ;;  %5108 = vmatmul.bf16.gmra.mxu0 %v17869_v29  ;;  %v17912_v52 = vpack.c.b16 %v20032_v17, %v20031_v35  ;;  %v20043_v17 = vld [vmem:[#allocation90_spill] sm:$0xff] }
 0x5d2   :  { %v17871_v4 = vadd.f32 %v4903_v62, %v4535_v44  ;;  %v3519_v62 = vunpack.c.l.b16 %v3447_v41  ;;  %20033 = vst [vmem:[#allocation67_spill] sm:$0xff] %v17912_v52 }
 0x5d4   :  { %v3542_v57 = vpack.c.b16 %v3519_v62, %v17717_v9 }
 0x5d5   :  { %v4490_v38 = vpop.f32.mrf.mxu1 }
 0x5d6   :  { %v4491_v31 = vadd.f32 %v4490_v38, %v17639_v37  ;;  %v14028_v38 = vld [vmem:[#allocation2 + $0x318] sm:$0xff]  ;;  %v3607_v35 = vshrl.u32 %v3542_v57, 16 }
 0x5d7   :  { %v4905_v14 = vpop.f32.mrf.mxu3  ;;  %v4536_v63 = vpop.f32.mrf.mxu2  ;;  %5624 = vmatpush.bf16.msra.mxu3 %v14028_v38 }
 0x5d8   :  { %v4537_v45 = vadd.f32 %v4536_v63, %v4488_v42  ;;  %4956 = vmatmul.bf16.gmra.mxu1 %v17878_v6  ;;  %v3734_v63 = vrot.slane %v3542_v57, 2 }
 0x5da   :  { %v17890_v34 = vadd.f32 %v4905_v14, %v4537_v45  ;;  %v20035_v14 = vld [vmem:[#allocation78_spill] sm:$0xff]  ;;  %v3777_v45 = vunpack.c.l.b16 %v3734_v63  ;;  %v3702_v63 = vrot.slane %v3607_v35, 1 }
 0x5db   :  { %v17917_v23 = vpack.c.b16 %v20035_v14, %v20034_v60  ;;  %v20045_v60 = vld [vmem:[#allocation63_spill] sm:$0xff] }
 0x5dc   :  { %5054 = vmatmul.bf16.gmra.mxu3 %v17882_v49  ;;  %5005 = vmatmul.bf16.gmra.mxu2 %v17887_v28  ;;  %v4598_v9 = vpack.c.b16 %v17719_v58, %v3777_v45 }
 0x5dd   :  { %v4492_v16 = vpop.f32.mrf.mxu1  ;;  %20036 = vst [vmem:[#allocation58_spill] sm:$0xff] %v17917_v23 }
 0x5de   :  { %v4493_v13 = vadd.f32 %v4492_v16, %v17666_v3  ;;  %v17908_v3 = vpack.c.b16 %v20030_v18, %v20029_v15  ;;  %v3609_v18 = vshll.u32 %v3542_v57, 16 }
 0x5df   :  { %v4908_v5 = vpop.f32.mrf.mxu3  ;;  %v4539_v37 = vpop.f32.mrf.mxu2 }
 0x5e0   :  { %v4540_v61 = vadd.f32 %v4539_v37, %v4491_v31  ;;  %5113 = vmatmul.bf16.gmra.mxu0 %v17897_v47  ;;  %v14012_v37 = vld [vmem:[#allocation2 + $0x298] sm:$0xff]  ;;  %v3611_v36 = vrot.slane %v3609_v18, 1 }
 0x5e1   :  { %5526 = vmatpush.bf16.msra.mxu1 %v14012_v37 }
 0x5e2   :  { %v17901_v1 = vadd.f32 %v4908_v5, %v4540_v61  ;;  %v20037_v61 = vld [vmem:[#allocation77_spill] sm:$0xff] }
 0x5e3   :  { %v20038_v41 = vunpack.c.l.b16 %v20037_v61 }
 0x5e5   :  { %v4495_v40 = vpop.f32.mrf.mxu1 }
 0x5e6   :  { %v4496_v42 = vadd.f32 %v4495_v40, %v17676_v20  ;;  %v20041_v40 = vld [vmem:[#allocation49_spill] sm:$0xff] }
 0x5e7   :  { %v4910_v50 = vpop.f32.mrf.mxu3  ;;  %v4541_v30 = vpop.f32.mrf.mxu2 }
 0x5e8   :  { %v4542_v44 = vadd.f32 %v4541_v30, %v4493_v13  ;;  %4961 = vmatmul.bf16.gmra.mxu1 %v17908_v3 }
 0x5ea   :  { %v17921_v21 = vadd.f32 %v4910_v50, %v4542_v44  ;;  %v20040_v50 = vunpack.c.l.b16 %v20039_v25  ;;  %v20044_v44 = vld [vmem:[#allocation57_spill] sm:$0xff] }
 0x5eb   :  { %v17942_v14 = vpack.c.b16 %v20045_v60, %v20044_v44 }
 0x5ec   :  { %5059 = vmatmul.bf16.gmra.mxu3 %v17912_v52  ;;  %5010 = vmatmul.bf16.gmra.mxu2 %v17917_v23  ;;  %v17933_v15 = vpack.c.b16 %v20040_v50, %v20038_v41  ;;  %v20047_v41 = vld [vmem:[#allocation91_spill] sm:$0xff] }
 0x5ed   :  { %v4497_v20 = vpop.f32.mrf.mxu1  ;;  %20046 = vst [vmem:[#allocation78_spill] sm:$0xff] %v17942_v14  ;;  %v17952_v25 = vpack.c.b16 %v17747_v19, %v20047_v41  ;;  %v14010_v41 = vld [vmem:[#allocation2 + $0x288] sm:$0xff] }
 0x5ee   :  { %v4498_v56 = vadd.f32 %v4497_v20, %v17703_v0  ;;  %v17937_v0 = vpack.c.b16 %v17672_v33, %v20041_v40  ;;  %v14019_v33 = vld [vmem:[#allocation2 + $0x2d0] sm:$0xff] }
 0x5ef   :  { %v4913_v31 = vpop.f32.mrf.mxu3  ;;  %v4544_v51 = vpop.f32.mrf.mxu2  ;;  %v14027_v20 = vld [vmem:[#allocation2 + $0x310] sm:$0xff]  ;;  %5576 = vmatpush.bf16.msra.mxu2 %v14019_v33 }
 0x5f0   :  { %v4545_v5 = vadd.f32 %v4544_v51, %v4496_v42  ;;  %5118 = vmatmul.bf16.gmra.mxu0 %v4598_v9  ;;  %20042 = vst [vmem:[#allocation24_spill] sm:$0xff] %v17937_v0  ;;  %v3612_v51 = vor.u32 %v3611_v36, %v3607_v35  ;;  %5625 = vmatpush.bf16.msra.mxu3 %v14027_v20  ;;  %v14011_v40 = vld [vmem:[#allocation2 + $0x290] sm:$0xff]  ;;  %v14018_v20 = vld [vmem:[#allocation2 + $0x2c8] sm:$0xff] }
 0x5f1   :  { %5527 = vmatpush.bf16.msra.mxu1 %v14011_v40 }
 0x5f2   :  { %v17927_v16 = vadd.f32 %v4913_v31, %v4545_v5  ;;  %v3703_v31 = vrot.slane %v3609_v18, 2  ;;  %v3774_v50 = vunpack.c.l.b16 %v3612_v51 }
 0x5f3   :  { %5577 = vmatpush.bf16.msra.mxu2 %v14018_v20 }
 0x5f4   :  { %v3704_v5 = vor.u32 %v3703_v31, %v3702_v63  ;;  %v20051_v63 = vld [vmem:[#allocation60_spill] sm:$0xff] }
 0x5f5   :  { %v4500_v62 = vpop.f32.mrf.mxu1  ;;  %5528 = vmatpush.bf16.msra.mxu1 %v14010_v41  ;;  %v14009_v41 = vld [vmem:[#allocation2 + $0x280] sm:$0xff] }
 0x5f6   :  { %v4501_v30 = vadd.f32 %v4500_v62, %v20043_v17  ;;  %v3776_v62 = vunpack.c.l.b16 %v3704_v5  ;;  %v20048_v17 = vld [vmem:[#allocation55_spill] sm:$0xff] }
 0x5f7   :  { %v4915_v13 = vpop.f32.mrf.mxu3  ;;  %v4546_v58 = vpop.f32.mrf.mxu2 }
 0x5f8   :  { %v4547_v42 = vadd.f32 %v4546_v58, %v4498_v56  ;;  %4966 = vmatmul.bf16.gmra.mxu1 %v17933_v15 }
 0x5f9   :  { %5529 = vmatpush.bf16.msra.mxu1 %v14009_v41 }
 0x5fa   :  { %v17945_v38 = vadd.f32 %v4915_v13, %v4547_v42  ;;  %v3670_v13 = vrot.slane %v3542_v57, 1  ;;  %v20049_v42 = vunpack.c.l.b16 %v20048_v17 }
 0x5fc   :  { %5064 = vmatmul.bf16.gmra.mxu3 %v17937_v0  ;;  %5015 = vmatmul.bf16.gmra.mxu2 %v17942_v14  ;;  %v3775_v35 = vunpack.c.l.b16 %v3670_v13  ;;  %v4595_v44 = vpack.c.b16 %v20049_v42, %v3774_v50 }
 0x5fd   :  { %v4502_v56 = vpop.f32.mrf.mxu1 }
 0x5fe   :  { %v4503_v37 = vadd.f32 %v4502_v56, %v17737_v55  ;;  %v4596_v31 = vpack.c.b16 %v20051_v63, %v3775_v35  ;;  %v20054_v35 = vld [vmem:[#allocation87_spill] sm:$0xff] }
 0x5ff   :  { %v4918_v45 = vpop.f32.mrf.mxu3  ;;  %v4549_v9 = vpop.f32.mrf.mxu2 }
 0x600   :  { %v4550_v61 = vadd.f32 %v4549_v9, %v4501_v30  ;;  %5123 = vmatmul.bf16.gmra.mxu0 %v17952_v25  ;;  %v20050_v30 = vld [vmem:[#allocation88_spill] sm:$0xff] }
 0x601   :  { %v4597_v57 = vpack.c.b16 %v20050_v30, %v3776_v62  ;;  %v20052_v62 = vld [vmem:[#allocation84_spill] sm:$0xff] }
 0x602   :  { %v17954_v18 = vadd.f32 %v4918_v45, %v4550_v61  ;;  %v14026_v45 = vld [vmem:[#allocation2 + $0x308] sm:$0xff]  ;;  %v20053_v40 = vunpack.c.l.b16 %v20052_v62  ;;  %v20060_v62 = vld [vmem:[#allocation62_spill] sm:$0xff] }
 0x603   :  { %5626 = vmatpush.bf16.msra.mxu3 %v14026_v45 }
 0x605   :  { %v4505_v55 = vpop.f32.mrf.mxu1 }
 0x606   :  { %v4506_v19 = vadd.f32 %v4505_v55, %v17745_v46  ;;  %v17967_v46 = vpack.c.b16 %v17786_v53, %v17749_v7 }
 0x607   :  { %v4920_v58 = vpop.f32.mrf.mxu3  ;;  %v4551_v60 = vpop.f32.mrf.mxu2 }
 0x608   :  { %v4552_v36 = vadd.f32 %v4551_v60, %v4503_v37  ;;  %4971 = vmatmul.bf16.gmra.mxu1 %v4595_v44  ;;  %v14040_v37 = vld [vmem:[#allocation2 + $0x378] sm:$0xff]  ;;  %v20056_v44 = vld [vmem:[#allocation89_spill] sm:$0xff] }
 0x609   :  { %5669 = vmatpush.bf16.msrb.mxu0 %v14040_v37  ;;  %v17980_v7 = vpack.c.b16 %v17741_v11, %v20056_v44  ;;  %v20058_v60 = vld [vmem:[#allocation53_spill] sm:$0xff]  ;;  %v14017_v11 = vld [vmem:[#allocation2 + $0x2c0] sm:$0xff] }
 0x60a   :  { %v17962_v33 = vadd.f32 %v4920_v58, %v4552_v36  ;;  %v20055_v58 = vunpack.c.l.b16 %v20054_v35  ;;  %v14038_v36 = vld [vmem:[#allocation2 + $0x368] sm:$0xff]  ;;  %5578 = vmatpush.bf16.msra.mxu2 %v14017_v11  ;;  %v20062_v35 = vld [vmem:[#allocation83_spill] sm:$0xff] }
 0x60b   :  { %v20064_v44 = vld [vmem:[#allocation92_spill] sm:$0xff] }
 0x60c   :  { %5069 = vmatmul.bf16.gmra.mxu3 %v4597_v57  ;;  %5020 = vmatmul.bf16.gmra.mxu2 %v4596_v31  ;;  %v17976_v17 = vpack.c.b16 %v20055_v58, %v20053_v40  ;;  %v20057_v57 = vld [vmem:[#allocation86_spill] sm:$0xff]  ;;  %v14025_v31 = vld [vmem:[#allocation2 + $0x300] sm:$0xff]  ;;  %v20061_v40 = vunpack.c.l.b16 %v20060_v62  ;;  %v20063_v58 = vunpack.c.l.b16 %v20062_v35  ;;  %v14034_v11 = vld [vmem:[#allocation2 + $0x348] sm:$0xff] }
 0x60d   :  { %v4507_v56 = vpop.f32.mrf.mxu1  ;;  %5627 = vmatpush.bf16.msra.mxu3 %v14025_v31  ;;  %v14048_v62 = vld [vmem:[#allocation2 + $0x3b8] sm:$0xff] }
 0x60e   :  { %v4508_v9 = vadd.f32 %v4507_v56, %v17772_v32  ;;  %v14039_v32 = vld [vmem:[#allocation2 + $0x370] sm:$0xff]  ;;  %5718 = vmatpush.bf16.msrb.mxu1 %v14048_v62 }
 0x60f   :  { %v4923_v51 = vpop.f32.mrf.mxu3  ;;  %v4554_v5 = vpop.f32.mrf.mxu2  ;;  %5670 = vmatpush.bf16.msrb.mxu0 %v14039_v32  ;;  %v14035_v32 = vld [vmem:[#allocation2 + $0x350] sm:$0xff] }
 0x610   :  { %v4555_v61 = vadd.f32 %v4554_v5, %v4506_v19  ;;  %5128 = vmatmul.bf16.gmra.mxu0 %v17967_v46  ;;  %v17985_v19 = vpack.c.b16 %v20058_v60, %v20057_v57  ;;  %v20067_v57 = vld [vmem:[#allocation41_spill] sm:$0xff]  ;;  %v20068_v60 = vld [vmem:[#allocation26_spill] sm:$0xff] }
 0x611   :  { %v20070_v35 = vld [vmem:[#allocation22_spill] sm:$0xff] }
 0x612   :  { %v17969_v13 = vadd.f32 %v4923_v51, %v4555_v61  ;;  %v14036_v61 = vld [vmem:[#allocation2 + $0x358] sm:$0xff] }
 0x613   :  { %5671 = vmatpush.bf16.msrb.mxu0 %v14038_v36  ;;  %v18013_v36 = vpack.c.b16 %v20068_v60, %v20067_v57  ;;  %v20076_v60 = vld [vmem:[#allocation80_spill] sm:$0xff] }
 0x615   :  { %v4510_v42 = vpop.f32.mrf.mxu1  ;;  %20069 = vst [vmem:[#allocation49_spill] sm:$0xff] %v18013_v36 }
 0x616   :  { %v4511_v55 = vadd.f32 %v4510_v42, %v17784_v43  ;;  %v14037_v43 = vld [vmem:[#allocation2 + $0x360] sm:$0xff] }
 0x617   :  { %v4925_v50 = vpop.f32.mrf.mxu3  ;;  %v4556_v53 = vpop.f32.mrf.mxu2  ;;  %5672 = vmatpush.bf16.msrb.mxu0 %v14037_v43  ;;  %v14064_v43 = vld [vmem:[#allocation2 + $0x438] sm:$0xff] }
 0x618   :  { %v4557_v30 = vadd.f32 %v4556_v53, %v4508_v9  ;;  %4976 = vmatmul.bf16.gmra.mxu1 %v17976_v17  ;;  %v17995_v9 = vpack.c.b16 %v17828_v10, %v17788_v54  ;;  %v20065_v54 = vld [vmem:[#allocation96_spill] sm:$0xff]  ;;  %6215 = vmatpush.bf16.msrb.mxu3 %v14064_v43 }
 0x619   :  { %v18008_v10 = vpack.c.b16 %v20065_v54, %v20064_v44 }
 0x61a   :  { %v17988_v63 = vadd.f32 %v4925_v50, %v4557_v30  ;;  %20059 = vst [vmem:[#allocation77_spill] sm:$0xff] %v17995_v9 }
 0x61b   :  { %5673 = vmatpush.bf16.msrb.mxu0 %v14036_v61  ;;  %20066 = vst [vmem:[#allocation81_spill] sm:$0xff] %v18008_v10 }
 0x61c   :  { %5074 = vmatmul.bf16.gmra.mxu3 %v17980_v7  ;;  %5025 = vmatmul.bf16.gmra.mxu2 %v17985_v19 }
 0x61d   :  { %v4512_v45 = vpop.f32.mrf.mxu1 }
 0x61e   :  { %v4513_v56 = vadd.f32 %v4512_v45, %v17814_v8  ;;  %v18004_v8 = vpack.c.b16 %v20063_v58, %v20061_v40  ;;  %v20071_v58 = vunpack.c.l.b16 %v20070_v35 }
 0x61f   :  { %v4928_v20 = vpop.f32.mrf.mxu3  ;;  %v4559_v51 = vpop.f32.mrf.mxu2  ;;  %5674 = vmatpush.bf16.msrb.mxu0 %v14035_v32  ;;  %v20072_v32 = vld [vmem:[#allocation59_spill] sm:$0xff] }
 0x620   :  { %v4560_v5 = vadd.f32 %v4559_v51, %v4511_v55  ;;  %5133 = vmatmul.bf16.gmra.mxu0 %v17995_v9 }
 0x622   :  { %v17997_v37 = vadd.f32 %v4928_v20, %v4560_v5  ;;  %v14056_v20 = vld [vmem:[#allocation2 + $0x3f8] sm:$0xff] }
 0x623   :  { %5675 = vmatpush.bf16.msrb.mxu0 %v14034_v11  ;;  %6166 = vmatpush.bf16.msrb.mxu2 %v14056_v20  ;;  %v20077_v11 = vld [vmem:[#allocation50_spill] sm:$0xff] }
 0x624   :  { %v18039_v20 = vpack.c.b16 %v20077_v11, %v20076_v60  ;;  %v20080_v11 = vld [vmem:[#allocation32_spill] sm:$0xff] }
 0x625   :  { %v4515_v42 = vpop.f32.mrf.mxu1 }
 0x626   :  { %v4516_v55 = vadd.f32 %v4515_v42, %v17826_v59  ;;  %v14033_v59 = vld [vmem:[#allocation2 + $0x340] sm:$0xff]  ;;  %v20073_v42 = vunpack.c.l.b16 %v20072_v32  ;;  %20078 = vst [vmem:[#allocation57_spill] sm:$0xff] %v18039_v20 }
 0x627   :  { %v4930_v50 = vpop.f32.mrf.mxu3  ;;  %v4561_v53 = vpop.f32.mrf.mxu2  ;;  %5676 = vmatpush.bf16.msrb.mxu0 %v14033_v59 }
 0x628   :  { %v4562_v30 = vadd.f32 %v4561_v53, %v4513_v56  ;;  %4981 = vmatmul.bf16.gmra.mxu1 %v18004_v8  ;;  %v18028_v44 = vpack.c.b16 %v20073_v42, %v20071_v58  ;;  %v20074_v53 = vld [vmem:[#allocation97_spill] sm:$0xff] }
 0x62a   :  { %v18016_v31 = vadd.f32 %v4930_v50, %v4562_v30  ;;  %v18032_v30 = vpack.c.b16 %v17822_v48, %v20074_v53  ;;  %v14055_v48 = vld [vmem:[#allocation2 + $0x3f0] sm:$0xff] }
 0x62b   :  { %6167 = vmatpush.bf16.msrb.mxu2 %v14055_v48  ;;  %v3440_v48 = vpack.c.bf16 %v20080_v11, %v20080_v11  ;;  %v20082_v11 = vld [vmem:[#allocation70_spill] sm:$0xff] }
 0x62c   :  { %5079 = vmatmul.bf16.gmra.mxu3 %v18008_v10  ;;  %5030 = vmatmul.bf16.gmra.mxu2 %v18013_v36  ;;  %20075 = vst [vmem:[#allocation90_spill] sm:$0xff] %v18032_v30 }
 0x62d   :  { %v4517_v51 = vpop.f32.mrf.mxu1  ;;  %v5099_v61 = vpop.f32.mrf.mxu0 }
 0x62e   :  { %v4518_v5 = vadd.f32 %v4517_v51, %v17847_v24 }
 0x62f   :  { %v4933_v45 = vpop.f32.mrf.mxu3  ;;  %v4564_v56 = vpop.f32.mrf.mxu2 }
 0x630   :  { %v4565_v41 = vadd.f32 %v4564_v56, %v4516_v55  ;;  %5677 = vmatmul.bf16.vlgmr.msrb.gmra.mxu0 %v17882_v49 }
 0x632   :  { %v18021_v50 = vadd.f32 %v4933_v45, %v4565_v41  ;;  %v14063_v45 = vld [vmem:[#allocation2 + $0x430] sm:$0xff] }
 0x633   :  { %6216 = vmatpush.bf16.msrb.mxu3 %v14063_v45  ;;  %v20081_v45 = vld [vmem:[#allocation34_spill] sm:$0xff] }
 0x635   :  { %v4520_v54 = vpop.f32.mrf.mxu1  ;;  %v18035_v57 = vpop.f32.mrf.mxu0 }
 0x636   :  { %v4521_v55 = vadd.f32 %v4520_v54, %v17856_v27 }
 0x637   :  { %v4935_v40 = vpop.f32.mrf.mxu3  ;;  %v4566_v24 = vpop.f32.mrf.mxu2 }
 0x638   :  { %v4567_v49 = vadd.f32 %v4566_v24, %v4518_v5  ;;  %4986 = vmatmul.bf16.gmra.mxu1 %v18028_v44  ;;  %v20079_v24 = vld [vmem:[#allocation51_spill] sm:$0xff] }
 0x63a   :  { %v18042_v43 = vadd.f32 %v4935_v40, %v4567_v49  ;;  %v14047_v40 = vld [vmem:[#allocation2 + $0x3b0] sm:$0xff]  ;;  %v14062_v49 = vld [vmem:[#allocation2 + $0x428] sm:$0xff] }
 0x63b   :  { %5719 = vmatpush.bf16.msrb.mxu1 %v14047_v40  ;;  %6217 = vmatpush.bf16.msrb.mxu3 %v14062_v49 }
 0x63c   :  { %5084 = vmatmul.bf16.gmra.mxu3 %v18032_v30  ;;  %5035 = vmatmul.bf16.gmra.mxu2 %v18039_v20 }
 0x63d   :  { %v4522_v51 = vpop.f32.mrf.mxu1  ;;  %v18047_v5 = vpop.f32.mrf.mxu0 }
 0x63e   :  { %v4523_v56 = vadd.f32 %v4522_v51, %v17864_v12 }
 0x63f   :  { %v4938_v59 = vpop.f32.mrf.mxu3  ;;  %v4569_v27 = vpop.f32.mrf.mxu2 }
 0x640   :  { %v4570_v41 = vadd.f32 %v4569_v27, %v4521_v55  ;;  %5682 = vmatmul.bf16.gmra.mxu0 %v17912_v52  ;;  %v14054_v55 = vld [vmem:[#allocation2 + $0x3e8] sm:$0xff] }
 0x641   :  { %6168 = vmatpush.bf16.msrb.mxu2 %v14054_v55 }
 0x642   :  { %v18049_v62 = vadd.f32 %v4938_v59, %v4570_v41  ;;  %v18067_v41 = vunpack.c.l.b16 %v3440_v48 }
 0x645   :  { %v4952_v58 = vpop.f32.mrf.mxu1  ;;  %v18053_v54 = vpop.f32.mrf.mxu0 }
 0x646   :  { %v4953_v42 = vadd.f32 %v4952_v58, %v17871_v4  ;;  %v3441_v4 = vpack.c.bf16 %v20081_v45, %v20081_v45  ;;  %v14046_v58 = vld [vmem:[#allocation2 + $0x3a8] sm:$0xff] }
 0x647   :  { %v4940_v35 = vpop.f32.mrf.mxu3  ;;  %v4571_v32 = vpop.f32.mrf.mxu2  ;;  %5720 = vmatpush.bf16.msrb.mxu1 %v14046_v58 }
 0x648   :  { %v4572_v53 = vadd.f32 %v4571_v32, %v4523_v56  ;;  %5530 = vmatmul.bf16.vlgmr.msra.gmra.mxu1 %v20079_v24 }
 0x64a   :  { %v18056_v12 = vadd.f32 %v4940_v35, %v4572_v53 }
 0x64c   :  { %5628 = vmatmul.bf16.vlgmr.msra.gmra.mxu3 %v17887_v28  ;;  %5579 = vmatmul.bf16.vlgmr.msra.gmra.mxu2 %v17878_v6  ;;  %v5144_v6 = vunpack.c.l.b16 %v3441_v4 }
 0x64d   :  { %v4954_v59 = vpop.f32.mrf.mxu1  ;;  %v18065_v56 = vpop.f32.mrf.mxu0 }
 0x64e   :  { %v4955_v27 = vadd.f32 %v4954_v59, %v17890_v34  ;;  %v18073_v53 = vpack.c.b16 %v5144_v6, %v18067_v41 }
 0x64f   :  { %v5050_v60 = vpop.f32.mrf.mxu3  ;;  %v5001_v51 = vpop.f32.mrf.mxu2 }
 0x650   :  { %v5002_v28 = vadd.f32 %v5001_v51, %v4953_v42  ;;  %5687 = vmatmul.bf16.gmra.mxu0 %v17937_v0  ;;  %v14061_v51 = vld [vmem:[#allocation2 + $0x420] sm:$0xff] }
 0x651   :  { %6218 = vmatpush.bf16.msrb.mxu3 %v14061_v51 }
 0x652   :  { %v5051_v40 = vadd.f32 %v5050_v60, %v5002_v28  ;;  %v5150_v60 = vshrl.u32 %v18073_v53, 16 }
 0x654   :  { %v18070_v35 = vadd.f32 %v5099_v61, %v5051_v40  ;;  %v5152_v61 = vshll.u32 %v18073_v53, 16  ;;  %v5165_v45 = vrot.slane %v5150_v60, 1 }
 0x655   :  { %v4957_v24 = vpop.f32.mrf.mxu1  ;;  %v18076_v49 = vpop.f32.mrf.mxu0 }
 0x656   :  { %v4958_v34 = vadd.f32 %v4957_v24, %v17901_v1  ;;  %v5166_v4 = vrot.slane %v5152_v61, 2  ;;  %v14053_v1 = vld [vmem:[#allocation2 + $0x3e0] sm:$0xff] }
 0x657   :  { %v5052_v32 = vpop.f32.mrf.mxu3  ;;  %v5003_v55 = vpop.f32.mrf.mxu2  ;;  %6169 = vmatpush.bf16.msrb.mxu2 %v14053_v1 }
 0x658   :  { %v5004_v42 = vadd.f32 %v5003_v55, %v4955_v27  ;;  %5535 = vmatmul.bf16.gmra.mxu1 %v20082_v11  ;;  %v5167_v27 = vor.u32 %v5166_v4, %v5165_v45  ;;  %v14045_v4 = vld [vmem:[#allocation2 + $0x3a0] sm:$0xff] }
 0x659   :  { %5721 = vmatpush.bf16.msrb.mxu1 %v14045_v4 }
 0x65a   :  { %v5053_v48 = vadd.f32 %v5052_v32, %v5004_v42  ;;  %v18089_v24 = vunpack.c.l.b16 %v5167_v27  ;;  %v20083_v42 = vld [vmem:[#allocation72_spill] sm:$0xff] }
 0x65c   :  { %5633 = vmatmul.bf16.gmra.mxu3 %v17917_v23  ;;  %v18083_v59 = vadd.f32 %v18035_v57, %v5053_v48  ;;  %5584 = vmatmul.bf16.gmra.mxu2 %v17908_v3  ;;  %v18093_v57 = vpack.c.b16 %v18089_v24, %v20083_v42 }
 0x65d   :  { %v4959_v6 = vpop.f32.mrf.mxu1  ;;  %v18087_v32 = vpop.f32.mrf.mxu0 }
 0x65e   :  { %v4960_v58 = vadd.f32 %v4959_v6, %v17921_v21  ;;  %20084 = vst [vmem:[#allocation63_spill] sm:$0xff] %v18093_v57 }
 0x65f   :  { %v5055_v28 = vpop.f32.mrf.mxu3  ;;  %v5006_v40 = vpop.f32.mrf.mxu2 }
 0x660   :  { %v5007_v55 = vadd.f32 %v5006_v40, %v4958_v34  ;;  %5692 = vmatmul.bf16.gmra.mxu0 %v18093_v57  ;;  %v20085_v40 = vld [vmem:[#allocation56_spill] sm:$0xff] }
 0x662   :  { %v5056_v48 = vadd.f32 %v5055_v28, %v5007_v55  ;;  %v14052_v55 = vld [vmem:[#allocation2 + $0x3d8] sm:$0xff] }
 0x663   :  { %6170 = vmatpush.bf16.msrb.mxu2 %v14052_v55  ;;  %v14044_v55 = vld [vmem:[#allocation2 + $0x398] sm:$0xff] }
 0x664   :  { %v18097_v45 = vadd.f32 %v18047_v5, %v5056_v48  ;;  %v5154_v5 = vrot.slane %v5152_v61, 1  ;;  %v14060_v48 = vld [vmem:[#allocation2 + $0x418] sm:$0xff]  ;;  %5722 = vmatpush.bf16.msrb.mxu1 %v14044_v55  ;;  %v14059_v55 = vld [vmem:[#allocation2 + $0x410] sm:$0xff] }
 0x665   :  { %v4962_v51 = vpop.f32.mrf.mxu1  ;;  %v18100_v27 = vpop.f32.mrf.mxu0  ;;  %6219 = vmatpush.bf16.msrb.mxu3 %v14060_v48 }
 0x666   :  { %v4963_v6 = vadd.f32 %v4962_v51, %v17927_v16  ;;  %v5163_v16 = vrot.slane %v18073_v53, 1 }
 0x667   :  { %v5057_v1 = vpop.f32.mrf.mxu3  ;;  %v5008_v21 = vpop.f32.mrf.mxu2 }
 0x668   :  { %v5009_v34 = vadd.f32 %v5008_v21, %v4960_v58  ;;  %5540 = vmatmul.bf16.gmra.mxu1 %v20085_v40 }
 0x669   :  { %6220 = vmatpush.bf16.msrb.mxu3 %v14059_v55 }
 0x66a   :  { %v5058_v42 = vadd.f32 %v5057_v1, %v5009_v34  ;;  %v18112_v34 = vor.u32 %v5154_v5, %v5150_v60 }
 0x66c   :  { %5638 = vmatmul.bf16.gmra.mxu3 %v17942_v14  ;;  %v18105_v28 = vadd.f32 %v18053_v54, %v5058_v42  ;;  %5589 = vmatmul.bf16.gmra.mxu2 %v17933_v15  ;;  %v18114_v42 = vunpack.c.l.b16 %v5163_v16  ;;  %v19595_v0 = vunpack.c.l.b16 %v18112_v34  ;;  %v20086_v14 = vld [vmem:[#allocation36_spill] sm:$0xff]  ;;  %v20089_v16 = vld [vmem:[#allocation85_spill] sm:$0xff] }
 0x66d   :  { %v4964_v57 = vpop.f32.mrf.mxu1  ;;  %v18110_v1 = vpop.f32.mrf.mxu0 }
 0x66e   :  { %v4965_v51 = vadd.f32 %v4964_v57, %v17945_v38  ;;  %v18123_v38 = vpack.c.b16 %v18067_v41, %v20086_v14 }
 0x66f   :  { %v5060_v4 = vpop.f32.mrf.mxu3  ;;  %v5011_v58 = vpop.f32.mrf.mxu2 }
 0x670   :  { %v5012_v21 = vadd.f32 %v5011_v58, %v4963_v6  ;;  %5697 = vmatmul.bf16.gmra.mxu0 %v17980_v7  ;;  %v20087_v6 = vld [vmem:[#allocation52_spill] sm:$0xff]  ;;  %v20090_v58 = vunpack.c.l.b16 %v20089_v16 }
 0x671   :  { %v18127_v60 = vpack.c.b16 %v18114_v42, %v20087_v6 }
 0x672   :  { %v5061_v54 = vadd.f32 %v5060_v4, %v5012_v21  ;;  %v18136_v21 = vpack.c.b16 %v19595_v0, %v20090_v58 }
 0x673   :  { %20088 = vst [vmem:[#allocation91_spill] sm:$0xff] %v18127_v60 }
 0x674   :  { %v18118_v61 = vadd.f32 %v18065_v56, %v5061_v54 }
 0x675   :  { %v4967_v57 = vpop.f32.mrf.mxu1  ;;  %v18130_v4 = vpop.f32.mrf.mxu0 }
 0x676   :  { %v4968_v7 = vadd.f32 %v4967_v57, %v17954_v18  ;;  %v14051_v18 = vld [vmem:[#allocation2 + $0x3d0] sm:$0xff] }
 0x677   :  { %v5062_v48 = vpop.f32.mrf.mxu3  ;;  %v5013_v5 = vpop.f32.mrf.mxu2  ;;  %6171 = vmatpush.bf16.msrb.mxu2 %v14051_v18 }
 0x678   :  { %v5014_v56 = vadd.f32 %v5013_v5, %v4965_v51  ;;  %5545 = vmatmul.bf16.gmra.mxu1 %v18123_v38 }
 0x67a   :  { %v5063_v14 = vadd.f32 %v5062_v48, %v5014_v56  ;;  %v14043_v56 = vld [vmem:[#allocation2 + $0x390] sm:$0xff] }
 0x67b   :  { %5723 = vmatpush.bf16.msrb.mxu1 %v14043_v56 }
 0x67c   :  { %5643 = vmatmul.bf16.gmra.mxu3 %v18127_v60  ;;  %v18141_v54 = vadd.f32 %v18076_v49, %v5063_v14  ;;  %5594 = vmatmul.bf16.gmra.mxu2 %v18136_v21 }
 0x67d   :  { %v4969_v51 = vpop.f32.mrf.mxu1  ;;  %v18145_v16 = vpop.f32.mrf.mxu0 }
 0x67e   :  { %v4970_v5 = vadd.f32 %v4969_v51, %v17962_v33  ;;  %v20091_v33 = vld [vmem:[#allocation94_spill] sm:$0xff] }
 0x67f   :  { %v5065_v57 = vpop.f32.mrf.mxu3  ;;  %v5016_v6 = vpop.f32.mrf.mxu2 }
 0x680   :  { %v5017_v58 = vadd.f32 %v5016_v6, %v4968_v7  ;;  %5702 = vmatmul.bf16.gmra.mxu0 %v18008_v10  ;;  %v3362_v7 = vld.sshfl [vmem:[#allocation1 + $0x20] sm:$0xff pattern:$0x75316420]  ;;  %v14050_v6 = vld [vmem:[#allocation2 + $0x3c8] sm:$0xff] }
 0x681   :  { %6172 = vmatpush.bf16.msrb.mxu2 %v14050_v6  ;;  %v14042_v6 = vld [vmem:[#allocation2 + $0x388] sm:$0xff] }
 0x682   :  { %v5066_v48 = vadd.f32 %v5065_v57, %v5017_v58  ;;  %v3363_v57 = vld.sshfl [vmem:[#allocation1 + $0x30] sm:$0xff pattern:$0x75316420]  ;;  %5724 = vmatpush.bf16.msrb.mxu1 %v14042_v6 }
 0x683   :  { %v14058_v58 = vld [vmem:[#allocation2 + $0x408] sm:$0xff] }
 0x684   :  { %v18149_v49 = vadd.f32 %v18087_v32, %v5066_v48  ;;  %v20092_v48 = vld [vmem:[#allocation27_spill] sm:$0xff]  ;;  %6221 = vmatpush.bf16.msrb.mxu3 %v14058_v58 }
 0x685   :  { %v4972_v0 = vpop.f32.mrf.mxu1  ;;  %v18152_v55 = vpop.f32.mrf.mxu0  ;;  %v20093_v56 = vrot.slane %v20092_v48, 4 }
 0x686   :  { %v4973_v18 = vadd.f32 %v4972_v0, %v17969_v13  ;;  %v3464_v13 = vpack.c.bf16 %v3362_v7, %v3362_v7 }
 0x687   :  { %v5067_v14 = vpop.f32.mrf.mxu3  ;;  %v5018_v60 = vpop.f32.mrf.mxu2  ;;  %3369 = vst [vmem:[#allocation1 + $0x20] ss:$2 sm:$0xff] %v20093_v56 }
 0x688   :  { %v5019_v52 = vadd.f32 %v5018_v60, %v4970_v5  ;;  %5550 = vmatmul.bf16.gmra.mxu1 %v20091_v33  ;;  %v3465_v60 = vpack.c.bf16 %v3363_v57, %v3363_v57  ;;  %v20094_v5 = vld [vmem:[#allocation28_spill] sm:$0xff]  ;;  %v18168_v48 = vunpack.c.l.b16 %v3464_v13 }
 0x689   :  { %3370 = vst [vmem:[#allocation1 + $0x21] ss:$2 sm:$0xff] %v20094_v5 }
 0x68a   :  { %v5068_v51 = vadd.f32 %v5067_v14, %v5019_v52  ;;  %v5146_v56 = vunpack.c.l.b16 %v3465_v60  ;;  %v20096_v60 = vld [vmem:[#allocation99_spill] sm:$0xff] }
 0x68c   :  { %5648 = vmatmul.bf16.gmra.mxu3 %v17985_v19  ;;  %v18157_v32 = vadd.f32 %v18100_v27, %v5068_v51  ;;  %5599 = vmatmul.bf16.gmra.mxu2 %v17976_v17  ;;  %v20095_v19 = vrot.slane %v20094_v5, 4  ;;  %v14072_v51 = vld [vmem:[#allocation2 + $0x478] sm:$0xff]  ;;  %v14071_v5 = vld [vmem:[#allocation2 + $0x470] sm:$0xff] }
 0x68d   :  { %v4974_v52 = vpop.f32.mrf.mxu1  ;;  %v18166_v17 = vpop.f32.mrf.mxu0  ;;  %6264 = vmatpush.bf16.msra.mxu0 %v14072_v51 }
 0x68e   :  { %3371 = vst [vmem:[#allocation1 + $0x30] ss:$2 sm:$0xff] %v20095_v19  ;;  %v4975_v14 = vadd.f32 %v4974_v52, %v17988_v63  ;;  %v18175_v19 = vpack.c.b16 %v5146_v56, %v18168_v48 }
 0x68f   :  { %v5070_v0 = vpop.f32.mrf.mxu3  ;;  %v5021_v27 = vpop.f32.mrf.mxu2 }
 0x690   :  { %v5022_v33 = vadd.f32 %v5021_v27, %v4973_v18  ;;  %5707 = vmatmul.bf16.gmra.mxu0 %v18032_v30  ;;  %v5157_v27 = vshrl.u32 %v18175_v19, 16 }
 0x691   :  { %6265 = vmatpush.bf16.msra.mxu0 %v14071_v5 }
 0x692   :  { %v5071_v7 = vadd.f32 %v5070_v0, %v5022_v33  ;;  %v5159_v33 = vshll.u32 %v18175_v19, 16  ;;  %v5168_v56 = vrot.slane %v5157_v27, 1 }
 0x694   :  { %v18172_v57 = vadd.f32 %v18110_v1, %v5071_v7  ;;  %v14070_v1 = vld [vmem:[#allocation2 + $0x468] sm:$0xff]  ;;  %v5169_v7 = vrot.slane %v5159_v33, 2 }
 0x695   :  { %v4977_v63 = vpop.f32.mrf.mxu1  ;;  %v18178_v52 = vpop.f32.mrf.mxu0  ;;  %6266 = vmatpush.bf16.msra.mxu0 %v14070_v1 }
 0x696   :  { %v4978_v13 = vadd.f32 %v4977_v63, %v17997_v37  ;;  %v14049_v37 = vld [vmem:[#allocation2 + $0x3c0] sm:$0xff] }
 0x697   :  { %v5072_v58 = vpop.f32.mrf.mxu3  ;;  %v5023_v18 = vpop.f32.mrf.mxu2  ;;  %v14069_v63 = vld [vmem:[#allocation2 + $0x460] sm:$0xff]  ;;  %6173 = vmatpush.bf16.msrb.mxu2 %v14049_v37 }
 0x698   :  { %v5024_v0 = vadd.f32 %v5023_v18, %v4975_v14  ;;  %5555 = vmatmul.bf16.gmra.mxu1 %v20096_v60  ;;  %v14057_v14 = vld [vmem:[#allocation2 + $0x400] sm:$0xff]  ;;  %v5170_v18 = vor.u32 %v5169_v7, %v5168_v56 }
 0x699   :  { %6222 = vmatpush.bf16.msrb.mxu3 %v14057_v14  ;;  %6267 = vmatpush.bf16.msra.mxu0 %v14069_v63  ;;  %v14041_v7 = vld [vmem:[#allocation2 + $0x380] sm:$0xff] }
 0x69a   :  { %v5073_v51 = vadd.f32 %v5072_v58, %v5024_v0  ;;  %5725 = vmatpush.bf16.msrb.mxu1 %v14041_v7 }
 0x69c   :  { %5653 = vmatmul.bf16.gmra.mxu3 %v18013_v36  ;;  %v18185_v6 = vadd.f32 %v18130_v4, %v5073_v51  ;;  %5604 = vmatmul.bf16.gmra.mxu2 %v18004_v8  ;;  %v18191_v36 = vunpack.c.l.b16 %v5170_v18  ;;  %v14068_v51 = vld [vmem:[#allocation2 + $0x458] sm:$0xff] }
 0x69d   :  { %v4979_v30 = vpop.f32.mrf.mxu1  ;;  %v18189_v0 = vpop.f32.mrf.mxu0  ;;  %6268 = vmatpush.bf16.msra.mxu0 %v14068_v51  ;;  %v14088_v18 = vld [vmem:[#allocation2 + $0x4f8] sm:$0xff]  ;;  %v14065_v51 = vld [vmem:[#allocation2 + $0x440] sm:$0xff] }
 0x69e   :  { %v4980_v58 = vadd.f32 %v4979_v30, %v18016_v31  ;;  %20097 = vst [vmem:[#allocation55_spill] sm:$0xff] %v18191_v36  ;;  %v18195_v1 = vpack.c.b16 %v18191_v36, %v17824_v22  ;;  %v14067_v30 = vld [vmem:[#allocation2 + $0x450] sm:$0xff]  ;;  %6362 = vmatpush.bf16.msra.mxu2 %v14088_v18 }
 0x69f   :  { %v5075_v5 = vpop.f32.mrf.mxu3  ;;  %v5026_v10 = vpop.f32.mrf.mxu2 }
 0x6a0   :  { %v5027_v4 = vadd.f32 %v5026_v10, %v4978_v13  ;;  %20098 = vst [vmem:[#allocation88_spill] sm:$0xff] %v18195_v1  ;;  %5712 = vmatmul.bf16.gmra.mxu0 %v18195_v1 }
 0x6a1   :  { %6269 = vmatpush.bf16.msra.mxu0 %v14067_v30 }
 0x6a2   :  { %v5076_v23 = vadd.f32 %v5075_v5, %v5027_v4  ;;  %v14066_v5 = vld [vmem:[#allocation2 + $0x448] sm:$0xff]  ;;  %v14096_v4 = vld [vmem:[#allocation2 + $0x538] sm:$0xff] }
 0x6a3   :  { %6810 = vmatpush.bf16.msra.mxu3 %v14096_v4  ;;  %v14080_v4 = vld [vmem:[#allocation2 + $0x4b8] sm:$0xff] }
 0x6a4   :  { %v18199_v56 = vadd.f32 %v18145_v16, %v5076_v23  ;;  %v5161_v16 = vrot.slane %v5159_v33, 1  ;;  %6313 = vmatpush.bf16.msra.mxu1 %v14080_v4 }
 0x6a5   :  { %v4982_v37 = vpop.f32.mrf.mxu1  ;;  %v18202_v13 = vpop.f32.mrf.mxu0  ;;  %6270 = vmatpush.bf16.msra.mxu0 %v14066_v5  ;;  %v20101_v5 = vld [vmem:[#allocation25_spill] sm:$0xff] }
 0x6a6   :  { %20099 = vst [vmem:[#allocation60_spill] sm:$0xff] %v18199_v56  ;;  %v4983_v10 = vadd.f32 %v4982_v37, %v18021_v50 }
 0x6a7   :  { %v5077_v31 = vpop.f32.mrf.mxu3  ;;  %v5028_v14 = vpop.f32.mrf.mxu2 }
 0x6a8   :  { %v5029_v22 = vadd.f32 %v5028_v14, %v4980_v58  ;;  %5560 = vmatmul.bf16.gmra.mxu1 %v17840_v2  ;;  %v5164_v58 = vrot.slane %v18175_v19, 1  ;;  %v18214_v14 = vor.u32 %v5161_v16, %v5157_v27  ;;  %v20105_v27 = vld [vmem:[#allocation40_spill] sm:$0xff]  ;;  %v14103_v2 = vld [vmem:[#allocation2 + $0x570] sm:$0xff] }
 0x6a9   :  { %6271 = vmatpush.bf16.msra.mxu0 %v14065_v51 }
 0x6aa   :  { %v5078_v63 = vadd.f32 %v5077_v31, %v5029_v22  ;;  %v18216_v22 = vunpack.c.l.b16 %v5164_v58  ;;  %v19604_v18 = vunpack.c.l.b16 %v18214_v14  ;;  %v20107_v58 = vld [vmem:[#allocation31_spill] sm:$0xff] }
 0x6ac   :  { %5658 = vmatmul.bf16.gmra.mxu3 %v18039_v20  ;;  %v18207_v23 = vadd.f32 %v18152_v55, %v5078_v63  ;;  %5609 = vmatmul.bf16.gmra.mxu2 %v18028_v44  ;;  %v20103_v20 = vld [vmem:[#allocation23_spill] sm:$0xff]  ;;  %v18229_v16 = vpack.c.b16 %v18216_v22, %v20105_v27 }
 0x6ad   :  { %v4984_v7 = vpop.f32.mrf.mxu1  ;;  %v18212_v37 = vpop.f32.mrf.mxu0 }
 0x6ae   :  { %20100 = vst [vmem:[#allocation84_spill] sm:$0xff] %v18207_v23  ;;  %v4985_v31 = vadd.f32 %v4984_v7, %v18042_v43  ;;  %v18225_v43 = vpack.c.b16 %v18168_v48, %v20103_v20 }
 0x6af   :  { %v5080_v50 = vpop.f32.mrf.mxu3  ;;  %v5031_v30 = vpop.f32.mrf.mxu2  ;;  %20106 = vst [vmem:[#allocation86_spill] sm:$0xff] %v18229_v16 }
 0x6b0   :  { %v5032_v55 = vadd.f32 %v5031_v30, %v4983_v10  ;;  %6272 = vmatmul.bf16.vlgmr.msra.gmra.mxu0 %v20101_v5  ;;  %20104 = vst [vmem:[#allocation89_spill] sm:$0xff] %v18225_v43  ;;  %v20108_v30 = vunpack.c.l.b16 %v20107_v58  ;;  %v14087_v5 = vld [vmem:[#allocation2 + $0x4f0] sm:$0xff] }
 0x6b1   :  { %6363 = vmatpush.bf16.msra.mxu2 %v14087_v5 }
 0x6b2   :  { %v5081_v33 = vadd.f32 %v5080_v50, %v5032_v55  ;;  %v18236_v55 = vpack.c.b16 %v19604_v18, %v20108_v30 }
 0x6b4   :  { %v18220_v63 = vadd.f32 %v18166_v17, %v5081_v33  ;;  %20109 = vst [vmem:[#allocation53_spill] sm:$0xff] %v18236_v55 }
 0x6b5   :  { %v4987_v10 = vpop.f32.mrf.mxu1  ;;  %v5680_v7 = vpop.f32.mrf.mxu0 }
 0x6b6   :  { %20102 = vst [vmem:[#allocation87_spill] sm:$0xff] %v18220_v63  ;;  %v4988_v51 = vadd.f32 %v4987_v10, %v18049_v62  ;;  %v14095_v62 = vld [vmem:[#allocation2 + $0x530] sm:$0xff]  ;;  %v20125_v63 = vld [vmem:[#allocation71_spill] sm:$0xff] }
 0x6b7   :  { %v5082_v1 = vpop.f32.mrf.mxu3  ;;  %v5033_v50 = vpop.f32.mrf.mxu2  ;;  %6811 = vmatpush.bf16.msra.mxu3 %v14095_v62 }
 0x6b8   :  { %v5034_v17 = vadd.f32 %v5033_v50, %v4985_v31  ;;  %5565 = vmatmul.bf16.gmra.mxu1 %v18225_v43 }
 0x6ba   :  { %v5083_v20 = vadd.f32 %v5082_v1, %v5034_v17  ;;  %v20111_v1 = vld [vmem:[#allocation39_spill] sm:$0xff] }
 0x6bc   :  { %5663 = vmatmul.bf16.gmra.mxu3 %v18229_v16  ;;  %v18241_v33 = vadd.f32 %v18178_v52, %v5083_v20  ;;  %5614 = vmatmul.bf16.gmra.mxu2 %v18236_v55  ;;  %v14079_v52 = vld [vmem:[#allocation2 + $0x4b0] sm:$0xff] }
 0x6bd   :  { %v4989_v31 = vpop.f32.mrf.mxu1  ;;  %v5683_v50 = vpop.f32.mrf.mxu0  ;;  %6314 = vmatpush.bf16.msra.mxu1 %v14079_v52 }
 0x6be   :  { %20110 = vst [vmem:[#allocation62_spill] sm:$0xff] %v18241_v33  ;;  %v4990_v27 = vadd.f32 %v4989_v31, %v18056_v12  ;;  %v20113_v12 = vld [vmem:[#allocation76_spill] sm:$0xff] }
 0x6bf   :  { %v5085_v4 = vpop.f32.mrf.mxu3  ;;  %v5036_v10 = vpop.f32.mrf.mxu2  ;;  %v14094_v31 = vld [vmem:[#allocation2 + $0x528] sm:$0xff] }
 0x6c0   :  { %v5037_v58 = vadd.f32 %v5036_v10, %v4988_v51  ;;  %6277 = vmatmul.bf16.gmra.mxu0 %v20111_v1  ;;  %6812 = vmatpush.bf16.msra.mxu3 %v14094_v31 }
 0x6c2   :  { %v5086_v30 = vadd.f32 %v5085_v4, %v5037_v58  ;;  %v20115_v4 = vld [vmem:[#allocation54_spill] sm:$0xff] }
 0x6c4   :  { %v18247_v17 = vadd.f32 %v18189_v0, %v5086_v30  ;;  %v14086_v0 = vld [vmem:[#allocation2 + $0x4e8] sm:$0xff] }
 0x6c5   :  { %v5531_v18 = vpop.f32.mrf.mxu1  ;;  %v18249_v36 = vpop.f32.mrf.mxu0  ;;  %6364 = vmatpush.bf16.msra.mxu2 %v14086_v0 }
 0x6c6   :  { %20112 = vst [vmem:[#allocation83_spill] sm:$0xff] %v18247_v17 }
 0x6c7   :  { %v5087_v20 = vpop.f32.mrf.mxu3  ;;  %v5038_v16 = vpop.f32.mrf.mxu2 }
 0x6c8   :  { %v5039_v5 = vadd.f32 %v5038_v16, %v4990_v27  ;;  %5726 = vmatmul.bf16.vlgmr.msrb.gmra.mxu1 %v17854_v26  ;;  %v20116_v26 = vld [vmem:[#allocation37_spill] sm:$0xff] }
 0x6c9   :  { %v3442_v52 = vpack.c.bf16 %v20116_v26, %v20116_v26  ;;  %v20119_v26 = vld [vmem:[#allocation79_spill] sm:$0xff] }
 0x6ca   :  { %v5088_v62 = vadd.f32 %v5087_v20, %v5039_v5  ;;  %v20117_v20 = vld [vmem:[#allocation35_spill] sm:$0xff] }
 0x6cb   :  { %v20118_v5 = vld [vmem:[#allocation43_spill] sm:$0xff]  ;;  %v18267_v31 = vunpack.c.l.b16 %v3442_v52 }
 0x6cc   :  { %6223 = vmatmul.bf16.vlgmr.msrb.gmra.mxu3 %v20113_v12  ;;  %v18254_v51 = vadd.f32 %v18202_v13, %v5088_v62  ;;  %6174 = vmatmul.bf16.vlgmr.msrb.gmra.mxu2 %v20115_v4  ;;  %v3443_v13 = vpack.c.bf16 %v20117_v20, %v20117_v20  ;;  %v14078_v12 = vld [vmem:[#allocation2 + $0x4a8] sm:$0xff]  ;;  %v14093_v52 = vld [vmem:[#allocation2 + $0x520] sm:$0xff] }
 0x6cd   :  { %v5533_v58 = vpop.f32.mrf.mxu1  ;;  %v18257_v1 = vpop.f32.mrf.mxu0  ;;  %6315 = vmatpush.bf16.msra.mxu1 %v14078_v12  ;;  %6813 = vmatpush.bf16.msra.mxu3 %v14093_v52 }
 0x6ce   :  { %20114 = vst [vmem:[#allocation92_spill] sm:$0xff] %v18254_v51  ;;  %v5788_v51 = vunpack.c.l.b16 %v3443_v13 }
 0x6cf   :  { %v5629_v10 = vpop.f32.mrf.mxu3  ;;  %v5580_v30 = vpop.f32.mrf.mxu2 }
 0x6d0   :  { %v5581_v16 = vadd.f32 %v5580_v30, %v5531_v18  ;;  %6282 = vmatmul.bf16.gmra.mxu0 %v20118_v5  ;;  %v18274_v20 = vpack.c.b16 %v5788_v51, %v18267_v31  ;;  %v14085_v5 = vld [vmem:[#allocation2 + $0x4e0] sm:$0xff] }
 0x6d1   :  { %6365 = vmatpush.bf16.msra.mxu2 %v14085_v5 }
 0x6d2   :  { %v5630_v27 = vadd.f32 %v5629_v10, %v5581_v16  ;;  %v5807_v13 = vrot.slane %v18274_v20, 1  ;;  %v19608_v33 = vshll.u32 %v18274_v20, 16 }
 0x6d4   :  { %v18265_v62 = vadd.f32 %v18212_v37, %v5630_v27  ;;  %v20120_v27 = vld [vmem:[#allocation42_spill] sm:$0xff] }
 0x6d5   :  { %v5536_v0 = vpop.f32.mrf.mxu1  ;;  %v18269_v10 = vpop.f32.mrf.mxu0 }
 0x6d7   :  { %v5631_v4 = vpop.f32.mrf.mxu3  ;;  %v5582_v18 = vpop.f32.mrf.mxu2 }
 0x6d8   :  { %v5583_v30 = vadd.f32 %v5582_v18, %v5533_v58  ;;  %5731 = vmatmul.bf16.gmra.mxu1 %v17869_v29  ;;  %v18280_v58 = vunpack.c.l.b16 %v5807_v13 }
 0x6da   :  { %v5632_v16 = vadd.f32 %v5631_v4, %v5583_v30  ;;  %20121 = vst [vmem:[#allocation96_spill] sm:$0xff] %v18280_v58  ;;  %v5908_v51 = vpack.c.b16 %v18280_v58, %v18114_v42  ;;  %v19612_v42 = vshrl.u32 %v18274_v20, 16 }
 0x6dc   :  { %6228 = vmatmul.bf16.gmra.mxu3 %v20119_v26  ;;  %v18276_v37 = vadd.f32 %v5680_v7, %v5632_v16  ;;  %6179 = vmatmul.bf16.gmra.mxu2 %v20120_v27  ;;  %v14077_v26 = vld [vmem:[#allocation2 + $0x4a0] sm:$0xff] }
 0x6dd   :  { %v5538_v17 = vpop.f32.mrf.mxu1  ;;  %v5693_v30 = vpop.f32.mrf.mxu0  ;;  %6316 = vmatpush.bf16.msra.mxu1 %v14077_v26 }
 0x6df   :  { %v5634_v12 = vpop.f32.mrf.mxu3  ;;  %v5585_v4 = vpop.f32.mrf.mxu2 }
 0x6e0   :  { %v5586_v18 = vadd.f32 %v5585_v4, %v5536_v0  ;;  %6287 = vmatmul.bf16.gmra.mxu0 %v5908_v51  ;;  %v20122_v4 = vld [vmem:[#allocation33_spill] sm:$0xff]  ;;  %v14084_v51 = vld [vmem:[#allocation2 + $0x4d8] sm:$0xff] }
 0x6e1   :  { %6366 = vmatpush.bf16.msra.mxu2 %v14084_v51 }
 0x6e2   :  { %v5635_v7 = vadd.f32 %v5634_v12, %v5586_v18  ;;  %v20123_v18 = vld [vmem:[#allocation47_spill] sm:$0xff] }
 0x6e4   :  { %v18284_v16 = vadd.f32 %v5683_v50, %v5635_v7  ;;  %v5798_v50 = vrot.slane %v19608_v33, 1  ;;  %v14092_v7 = vld [vmem:[#allocation2 + $0x518] sm:$0xff] }
 0x6e5   :  { %v5541_v29 = vpop.f32.mrf.mxu1  ;;  %v5695_v13 = vpop.f32.mrf.mxu0  ;;  %6814 = vmatpush.bf16.msra.mxu3 %v14092_v7 }
 0x6e7   :  { %v5636_v27 = vpop.f32.mrf.mxu3  ;;  %v5587_v5 = vpop.f32.mrf.mxu2 }
 0x6e8   :  { %v5588_v52 = vadd.f32 %v5587_v5, %v5538_v17  ;;  %5736 = vmatmul.bf16.gmra.mxu1 %v17897_v47  ;;  %v5171_v17 = vrot.slane %v18073_v53, 2  ;;  %v14076_v53 = vld [vmem:[#allocation2 + $0x498] sm:$0xff] }
 0x6e9   :  { %6317 = vmatpush.bf16.msra.mxu1 %v14076_v53 }
 0x6ea   :  { %v5637_v0 = vadd.f32 %v5636_v27, %v5588_v52  ;;  %v18299_v27 = vor.u32 %v5798_v50, %v19612_v42  ;;  %v18301_v58 = vunpack.c.l.b16 %v5171_v17  ;;  %v20128_v42 = vld [vmem:[#allocation45_spill] sm:$0xff] }
 0x6ec   :  { %6233 = vmatmul.bf16.gmra.mxu3 %v20122_v4  ;;  %v18293_v12 = vadd.f32 %v18249_v36, %v5637_v0  ;;  %6184 = vmatmul.bf16.gmra.mxu2 %v20123_v18  ;;  %v19613_v0 = vunpack.c.l.b16 %v18299_v27  ;;  %v20124_v18 = vld [vmem:[#allocation73_spill] sm:$0xff]  ;;  %v18310_v50 = vpack.c.b16 %v18301_v58, %v20125_v63 }
 0x6ed   :  { %v5543_v5 = vpop.f32.mrf.mxu1  ;;  %v5698_v33 = vpop.f32.mrf.mxu0 }
 0x6ee   :  { %20126 = vst [vmem:[#allocation41_spill] sm:$0xff] %v18310_v50 }
 0x6ef   :  { %v5639_v26 = vpop.f32.mrf.mxu3  ;;  %v5590_v52 = vpop.f32.mrf.mxu2 }
 0x6f0   :  { %v5591_v4 = vadd.f32 %v5590_v52, %v5541_v29  ;;  %6292 = vmatmul.bf16.gmra.mxu0 %v20124_v18  ;;  %v20127_v29 = vunpack.c.l.b16 %v18112_v34  ;;  %v5906_v52 = vpack.c.b16 %v18267_v31, %v18067_v41  ;;  %v14083_v34 = vld [vmem:[#allocation2 + $0x4d0] sm:$0xff] }
 0x6f1   :  { %6367 = vmatpush.bf16.msra.mxu2 %v14083_v34 }
 0x6f2   :  { %v5640_v36 = vadd.f32 %v5639_v26, %v5591_v4  ;;  %v5907_v7 = vpack.c.b16 %v19613_v0, %v20127_v29 }
 0x6f4   :  { %v18306_v47 = vadd.f32 %v18257_v1, %v5640_v36  ;;  %v14091_v36 = vld [vmem:[#allocation2 + $0x510] sm:$0xff] }
 0x6f5   :  { %v5546_v51 = vpop.f32.mrf.mxu1  ;;  %v18318_v1 = vpop.f32.mrf.mxu0  ;;  %6815 = vmatpush.bf16.msra.mxu3 %v14091_v36  ;;  %v20129_v36 = vld [vmem:[#allocation74_spill] sm:$0xff] }
 0x6f7   :  { %v5641_v43 = vpop.f32.mrf.mxu3  ;;  %v5592_v26 = vpop.f32.mrf.mxu2 }
 0x6f8   :  { %v5593_v17 = vadd.f32 %v5592_v26, %v5543_v5  ;;  %5741 = vmatmul.bf16.gmra.mxu1 %v18310_v50 }
 0x6fa   :  { %v5642_v4 = vadd.f32 %v5641_v43, %v5593_v17  ;;  %v14075_v43 = vld [vmem:[#allocation2 + $0x490] sm:$0xff] }
 0x6fb   :  { %6318 = vmatpush.bf16.msra.mxu1 %v14075_v43  ;;  %v3367_v43 = vld.sshfl [vmem:[#allocation1] sm:$0xff pattern:$0x75316420] }
 0x6fc   :  { %6238 = vmatmul.bf16.gmra.mxu3 %v5907_v7  ;;  %v18322_v63 = vadd.f32 %v18269_v10, %v5642_v4  ;;  %6189 = vmatmul.bf16.gmra.mxu2 %v5906_v52 }
 0x6fd   :  { %v5548_v29 = vpop.f32.mrf.mxu1  ;;  %v18324_v26 = vpop.f32.mrf.mxu0 }
 0x6ff   :  { %v5644_v18 = vpop.f32.mrf.mxu3  ;;  %v5595_v5 = vpop.f32.mrf.mxu2 }
 0x700   :  { %v5596_v53 = vadd.f32 %v5595_v5, %v5546_v51  ;;  %6297 = vmatmul.bf16.gmra.mxu0 %v20128_v42  ;;  %v14082_v42 = vld [vmem:[#allocation2 + $0x4c8] sm:$0xff] }
 0x701   :  { %6368 = vmatpush.bf16.msra.mxu2 %v14082_v42 }
 0x702   :  { %v5645_v41 = vadd.f32 %v5644_v18, %v5596_v53  ;;  %v20130_v18 = vld [vmem:[#allocation21_spill] sm:$0xff] }
 0x704   :  { %v18327_v0 = vadd.f32 %v5693_v30, %v5645_v41  ;;  %v14090_v30 = vld [vmem:[#allocation2 + $0x508] sm:$0xff] }
 0x705   :  { %v5551_v10 = vpop.f32.mrf.mxu1  ;;  %v18329_v4 = vpop.f32.mrf.mxu0  ;;  %6816 = vmatpush.bf16.msra.mxu3 %v14090_v30 }
 0x707   :  { %v5646_v7 = vpop.f32.mrf.mxu3  ;;  %v5597_v17 = vpop.f32.mrf.mxu2 }
 0x708   :  { %v5598_v52 = vadd.f32 %v5597_v17, %v5548_v29  ;;  %5746 = vmatmul.bf16.gmra.mxu1 %v17952_v25  ;;  %v3368_v29 = vld.sshfl [vmem:[#allocation1 + $0x10] sm:$0xff pattern:$0x75316420]  ;;  %v14104_v25 = vld [vmem:[#allocation2 + $0x578] sm:$0xff] }
 0x709   :  { %6859 = vmatpush.bf16.msrb.mxu0 %v14104_v25  ;;  %v20133_v25 = vld [vmem:[#allocation48_spill] sm:$0xff] }
 0x70a   :  { %v5647_v34 = vadd.f32 %v5646_v7, %v5598_v52  ;;  %v3466_v52 = vpack.c.bf16 %v3367_v43, %v3367_v43 }
 0x70c   :  { %6243 = vmatmul.bf16.gmra.mxu3 %v20129_v36  ;;  %v18333_v51 = vadd.f32 %v5695_v13, %v5647_v34  ;;  %6194 = vmatmul.bf16.gmra.mxu2 %v20130_v18  ;;  %v3467_v36 = vpack.c.bf16 %v3368_v29, %v3368_v29  ;;  %v20131_v13 = vld [vmem:[#allocation44_spill] sm:$0xff]  ;;  %v18341_v30 = vunpack.c.l.b16 %v3466_v52 }
 0x70d   :  { %v5553_v53 = vpop.f32.mrf.mxu1  ;;  %v18336_v50 = vpop.f32.mrf.mxu0  ;;  %v14074_v18 = vld [vmem:[#allocation2 + $0x488] sm:$0xff]  ;;  %6860 = vmatpush.bf16.msrb.mxu0 %v14103_v2 }
 0x70e   :  { %6319 = vmatpush.bf16.msra.mxu1 %v14074_v18  ;;  %v5790_v56 = vunpack.c.l.b16 %v3467_v36  ;;  %v14101_v36 = vld [vmem:[#allocation2 + $0x560] sm:$0xff] }
 0x70f   :  { %v5649_v5 = vpop.f32.mrf.mxu3  ;;  %v5600_v41 = vpop.f32.mrf.mxu2 }
 0x710   :  { %v5601_v17 = vadd.f32 %v5600_v41, %v5551_v10  ;;  %6302 = vmatmul.bf16.gmra.mxu0 %v20131_v13  ;;  %v18348_v29 = vpack.c.b16 %v5790_v56, %v18341_v30 }
 0x712   :  { %v5650_v7 = vadd.f32 %v5649_v5, %v5601_v17  ;;  %v14102_v5 = vld [vmem:[#allocation2 + $0x568] sm:$0xff]  ;;  %v5808_v52 = vrot.slane %v18348_v29, 1 }
 0x713   :  { %6861 = vmatpush.bf16.msrb.mxu0 %v14102_v5 }
 0x714   :  { %v18339_v34 = vadd.f32 %v5698_v33, %v5650_v7  ;;  %v20132_v33 = vld [vmem:[#allocation29_spill] sm:$0xff]  ;;  %v14081_v7 = vld [vmem:[#allocation2 + $0x4c0] sm:$0xff] }
 0x715   :  { %v5556_v42 = vpop.f32.mrf.mxu1  ;;  %v18343_v55 = vpop.f32.mrf.mxu0  ;;  %6369 = vmatpush.bf16.msra.mxu2 %v14081_v7  ;;  %v14099_v7 = vld [vmem:[#allocation2 + $0x550] sm:$0xff] }
 0x717   :  { %v5651_v23 = vpop.f32.mrf.mxu3  ;;  %v5602_v10 = vpop.f32.mrf.mxu2  ;;  %6862 = vmatpush.bf16.msrb.mxu0 %v14101_v36 }
 0x718   :  { %v5603_v41 = vadd.f32 %v5602_v10, %v5553_v53  ;;  %5751 = vmatmul.bf16.gmra.mxu1 %v17967_v46  ;;  %v14089_v53 = vld [vmem:[#allocation2 + $0x500] sm:$0xff] }
 0x719   :  { %6817 = vmatpush.bf16.msra.mxu3 %v14089_v53 }
 0x71a   :  { %v5652_v43 = vadd.f32 %v5651_v23, %v5603_v41  ;;  %v18355_v23 = vunpack.c.l.b16 %v5808_v52  ;;  %v14100_v41 = vld [vmem:[#allocation2 + $0x558] sm:$0xff]  ;;  %v19618_v52 = vshll.u32 %v18348_v29, 16 }
 0x71b   :  { %6863 = vmatpush.bf16.msrb.mxu0 %v14100_v41 }
 0x71c   :  { %6248 = vmatmul.bf16.gmra.mxu3 %v20132_v33  ;;  %v18351_v17 = vadd.f32 %v18318_v1, %v5652_v43  ;;  %6199 = vmatmul.bf16.gmra.mxu2 %v20133_v25  ;;  %20134 = vst [vmem:[#allocation26_spill] sm:$0xff] %v18355_v23  ;;  %v5913_v1 = vpack.c.b16 %v18355_v23, %v18216_v22  ;;  %v14073_v33 = vld [vmem:[#allocation2 + $0x480] sm:$0xff]  ;;  %v14098_v22 = vld [vmem:[#allocation2 + $0x548] sm:$0xff] }
 0x71d   :  { %v5558_v13 = vpop.f32.mrf.mxu1  ;;  %v18357_v10 = vpop.f32.mrf.mxu0  ;;  %6320 = vmatpush.bf16.msra.mxu1 %v14073_v33  ;;  %v14128_v33 = vld [vmem:[#allocation2 + $0x638] sm:$0xff]  ;;  %v14097_v23 = vld [vmem:[#allocation2 + $0x540] sm:$0xff] }
 0x71e   :  { %7006 = vmatpush.bf16.msrb.mxu3 %v14128_v33 }
 0x71f   :  { %v5654_v2 = vpop.f32.mrf.mxu3  ;;  %v5605_v18 = vpop.f32.mrf.mxu2  ;;  %6864 = vmatpush.bf16.msrb.mxu0 %v14099_v7 }
 0x720   :  { %v5606_v56 = vadd.f32 %v5605_v18, %v5556_v42  ;;  %6307 = vmatmul.bf16.gmra.mxu0 %v5913_v1  ;;  %v5805_v1 = vrot.slane %v19618_v52, 1 }
 0x722   :  { %v5655_v5 = vadd.f32 %v5654_v2, %v5606_v56  ;;  %v20135_v56 = vld [vmem:[#allocation65_spill] sm:$0xff] }
 0x723   :  { %6865 = vmatpush.bf16.msrb.mxu0 %v14098_v22 }
 0x724   :  { %v18362_v43 = vadd.f32 %v18324_v26, %v5655_v5  ;;  %v19620_v26 = vshrl.u32 %v18348_v29, 16  ;;  %v20136_v5 = vld [vmem:[#allocation46_spill] sm:$0xff] }
 0x725   :  { %v5561_v53 = vpop.f32.mrf.mxu1  ;;  %v18365_v36 = vpop.f32.mrf.mxu0 }
 0x727   :  { %v5656_v25 = vpop.f32.mrf.mxu3  ;;  %v5607_v42 = vpop.f32.mrf.mxu2  ;;  %6866 = vmatpush.bf16.msrb.mxu0 %v14097_v23  ;;  %v20137_v23 = vunpack.c.l.b16 %v18214_v14 }
 0x728   :  { %v5608_v18 = vadd.f32 %v5607_v42, %v5558_v13  ;;  %5756 = vmatmul.bf16.gmra.mxu1 %v17995_v9  ;;  %v14120_v13 = vld [vmem:[#allocation2 + $0x5f8] sm:$0xff]  ;;  %v5172_v42 = vrot.slane %v18175_v19, 2 }
 0x729   :  { %6957 = vmatpush.bf16.msrb.mxu2 %v14120_v13  ;;  %v14112_v9 = vld [vmem:[#allocation2 + $0x5b8] sm:$0xff] }
 0x72a   :  { %v5657_v2 = vadd.f32 %v5656_v25, %v5608_v18  ;;  %v18379_v18 = vor.u32 %v5805_v1, %v19620_v26  ;;  %6908 = vmatpush.bf16.msrb.mxu1 %v14112_v9  ;;  %v14111_v26 = vld [vmem:[#allocation2 + $0x5b0] sm:$0xff] }
 0x72c   :  { %6253 = vmatmul.bf16.gmra.mxu3 %v20135_v56  ;;  %v18373_v41 = vadd.f32 %v18329_v4, %v5657_v2  ;;  %6204 = vmatmul.bf16.gmra.mxu2 %v20136_v5  ;;  %v18381_v2 = vunpack.c.l.b16 %v5172_v42  ;;  %v5821_v5 = vunpack.c.l.b16 %v18379_v18  ;;  %v20159_v18 = vshrl.u32 %v18348_v29, 16 }
 0x72d   :  { %v5563_v25 = vpop.f32.mrf.mxu1  ;;  %v6273_v4 = vpop.f32.mrf.mxu0 }
 0x72e   :  { %v18390_v13 = vpack.c.b16 %v18381_v2, %v17830_v39  ;;  %v14119_v39 = vld [vmem:[#allocation2 + $0x5f0] sm:$0xff]  ;;  %6909 = vmatpush.bf16.msrb.mxu1 %v14111_v26  ;;  %v14118_v26 = vld [vmem:[#allocation2 + $0x5e8] sm:$0xff] }
 0x72f   :  { %v5659_v7 = vpop.f32.mrf.mxu3  ;;  %v5610_v56 = vpop.f32.mrf.mxu2  ;;  %6958 = vmatpush.bf16.msrb.mxu2 %v14119_v39 }
 0x730   :  { %v5611_v52 = vadd.f32 %v5610_v56, %v5561_v53  ;;  %6867 = vmatmul.bf16.vlgmr.msrb.gmra.mxu0 %v17908_v3  ;;  %v5911_v3 = vpack.c.b16 %v18341_v30, %v18168_v48  ;;  %v14127_v56 = vld [vmem:[#allocation2 + $0x630] sm:$0xff] }
 0x731   :  { %7007 = vmatpush.bf16.msrb.mxu3 %v14127_v56  ;;  %v20138_v56 = vld [vmem:[#allocation68_spill] sm:$0xff] }
 0x732   :  { %v5660_v22 = vadd.f32 %v5659_v7, %v5611_v52  ;;  %v5912_v52 = vpack.c.b16 %v5821_v5, %v20137_v23 }
 0x733   :  { %6959 = vmatpush.bf16.msrb.mxu2 %v14118_v26 }
 0x734   :  { %v18386_v19 = vadd.f32 %v18336_v50, %v5660_v22 }
 0x735   :  { %v5566_v53 = vpop.f32.mrf.mxu1  ;;  %v6275_v42 = vpop.f32.mrf.mxu0 }
 0x737   :  { %v5661_v1 = vpop.f32.mrf.mxu3  ;;  %v5612_v33 = vpop.f32.mrf.mxu2 }
 0x738   :  { %v5613_v7 = vadd.f32 %v5612_v33, %v5563_v25  ;;  %5761 = vmatmul.bf16.gmra.mxu1 %v18390_v13 }
 0x73a   :  { %v5662_v9 = vadd.f32 %v5661_v1, %v5613_v7 }
 0x73c   :  { %6258 = vmatmul.bf16.gmra.mxu3 %v5912_v52  ;;  %v18400_v50 = vadd.f32 %v18343_v55, %v5662_v9  ;;  %6209 = vmatmul.bf16.gmra.mxu2 %v5911_v3 }
 0x73d   :  { %v5568_v22 = vpop.f32.mrf.mxu1  ;;  %v18402_v33 = vpop.f32.mrf.mxu0 }
 0x73f   :  { %v5664_v14 = vpop.f32.mrf.mxu3  ;;  %v5615_v23 = vpop.f32.mrf.mxu2 }
 0x740   :  { %v5616_v25 = vadd.f32 %v5615_v23, %v5566_v53  ;;  %6872 = vmatmul.bf16.gmra.mxu0 %v17933_v15  ;;  %v14126_v23 = vld [vmem:[#allocation2 + $0x628] sm:$0xff] }
 0x741   :  { %7008 = vmatpush.bf16.msrb.mxu3 %v14126_v23 }
 0x742   :  { %v5665_v48 = vadd.f32 %v5664_v14, %v5616_v25 }
 0x744   :  { %v18406_v1 = vadd.f32 %v18357_v10, %v5665_v48  ;;  %v20139_v10 = vld [vmem:[#allocation66_spill] sm:$0xff] }
 0x745   :  { %v5727_v52 = vpop.f32.mrf.mxu1  ;;  %v18409_v39 = vpop.f32.mrf.mxu0 }
 0x746   :  { %v5728_v3 = vadd.f32 %v5727_v52, %v18265_v62 }
 0x747   :  { %v5666_v55 = vpop.f32.mrf.mxu3  ;;  %v5617_v7 = vpop.f32.mrf.mxu2 }
 0x748   :  { %v5618_v9 = vadd.f32 %v5617_v7, %v5568_v22  ;;  %v18412_v53 = vadd.f32 %v5728_v3, %v18070_v35  ;;  %6321 = vmatmul.bf16.vlgmr.msra.gmra.mxu1 %v20138_v56  ;;  %v20140_v7 = vld [vmem:[#allocation38_spill] sm:$0xff] }
 0x749   :  { %v3444_v3 = vpack.c.bf16 %v20140_v7, %v20140_v7 }
 0x74a   :  { %v5667_v14 = vadd.f32 %v5666_v55, %v5618_v9  ;;  %v20141_v9 = vld [vmem:[#allocation30_spill] sm:$0xff] }
 0x74b   :  { %v3445_v56 = vpack.c.bf16 %v20141_v9, %v20141_v9  ;;  %v14125_v9 = vld [vmem:[#allocation2 + $0x620] sm:$0xff] }
 0x74c   :  { %6818 = vmatmul.bf16.vlgmr.msra.gmra.mxu3 %v20082_v11  ;;  %v18417_v15 = vadd.f32 %v18365_v36, %v5667_v14  ;;  %6370 = vmatmul.bf16.vlgmr.msra.gmra.mxu2 %v20139_v10  ;;  %v14110_v36 = vld [vmem:[#allocation2 + $0x5a8] sm:$0xff]  ;;  %v18433_v14 = vunpack.c.l.b16 %v3444_v3  ;;  %v14117_v3 = vld [vmem:[#allocation2 + $0x5e0] sm:$0xff] }
 0x74d   :  { %v5729_v62 = vpop.f32.mrf.mxu1  ;;  %v18421_v52 = vpop.f32.mrf.mxu0  ;;  %6910 = vmatpush.bf16.msrb.mxu1 %v14110_v36  ;;  %6960 = vmatpush.bf16.msrb.mxu2 %v14117_v3 }
 0x74e   :  { %v5730_v35 = vadd.f32 %v5729_v62, %v18276_v37  ;;  %v6432_v37 = vunpack.c.l.b16 %v3445_v56  ;;  %7009 = vmatpush.bf16.msrb.mxu3 %v14125_v9 }
 0x74f   :  { %v6224_v25 = vpop.f32.mrf.mxu3  ;;  %v6175_v22 = vpop.f32.mrf.mxu2 }
 0x750   :  { %v6225_v48 = vadd.f32 %v6224_v25, %v6175_v22  ;;  %v18424_v55 = vadd.f32 %v5730_v35, %v18083_v59  ;;  %6877 = vmatmul.bf16.gmra.mxu0 %v18136_v21  ;;  %v18436_v59 = vpack.c.b16 %v6432_v37, %v18433_v14  ;;  %v20142_v21 = vld [vmem:[#allocation64_spill] sm:$0xff] }
 0x752   :  { %v18426_v11 = vadd.f32 %v6273_v4, %v6225_v48  ;;  %v19621_v22 = vshll.u32 %v18436_v59, 16  ;;  %v6438_v36 = vshrl.u32 %v18436_v59, 16 }
 0x754   :  { %v6442_v7 = vrot.slane %v19621_v22, 1  ;;  %v14109_v22 = vld [vmem:[#allocation2 + $0x5a0] sm:$0xff] }
 0x755   :  { %v5732_v26 = vpop.f32.mrf.mxu1  ;;  %v18439_v62 = vpop.f32.mrf.mxu0  ;;  %6911 = vmatpush.bf16.msrb.mxu1 %v14109_v22 }
 0x756   :  { %v5733_v23 = vadd.f32 %v5732_v26, %v18284_v16  ;;  %v20143_v16 = vld [vmem:[#allocation69_spill] sm:$0xff] }
 0x757   :  { %v6226_v10 = vpop.f32.mrf.mxu3  ;;  %v6177_v4 = vpop.f32.mrf.mxu2 }
 0x758   :  { %v6227_v25 = vadd.f32 %v6226_v10, %v6177_v4  ;;  %v18443_v35 = vadd.f32 %v5733_v23, %v18097_v45  ;;  %6326 = vmatmul.bf16.gmra.mxu1 %v20142_v21  ;;  %v6443_v45 = vor.u32 %v6442_v7, %v6438_v36 }
 0x75a   :  { %v18446_v48 = vadd.f32 %v6275_v42, %v6227_v25  ;;  %v20144_v25 = vunpack.c.l.b16 %v18299_v27  ;;  %v20146_v27 = vshrl.u32 %v18274_v20, 16 }
 0x75c   :  { %6823 = vmatmul.bf16.gmra.mxu3 %v20085_v40  ;;  %6375 = vmatmul.bf16.gmra.mxu2 %v20143_v16  ;;  %v6461_v40 = vunpack.c.l.b16 %v6443_v45 }
 0x75d   :  { %v5734_v37 = vpop.f32.mrf.mxu1  ;;  %v6288_v23 = vpop.f32.mrf.mxu0 }
 0x75e   :  { %v5735_v10 = vadd.f32 %v5734_v37, %v18293_v12  ;;  %v6551_v21 = vpack.c.b16 %v6461_v40, %v20144_v25  ;;  %v5809_v37 = vrot.slane %v20146_v27, 1  ;;  %v20148_v40 = vld [vmem:[#allocation75_spill] sm:$0xff] }
 0x75f   :  { %v6229_v56 = vpop.f32.mrf.mxu3  ;;  %v6180_v42 = vpop.f32.mrf.mxu2 }
 0x760   :  { %v6230_v26 = vadd.f32 %v6229_v56, %v6180_v42  ;;  %v18457_v4 = vadd.f32 %v5735_v10, %v18105_v28  ;;  %6882 = vmatmul.bf16.gmra.mxu0 %v6551_v21  ;;  %v20145_v28 = vld [vmem:[#allocation82_spill] sm:$0xff] }
 0x762   :  { %v18462_v16 = vadd.f32 %v18402_v33, %v6230_v26  ;;  %v20147_v33 = vshll.u32 %v18274_v20, 16  ;;  %v14124_v26 = vld [vmem:[#allocation2 + $0x618] sm:$0xff] }
 0x763   :  { %7010 = vmatpush.bf16.msrb.mxu3 %v14124_v26 }
 0x764   :  { %v5810_v42 = vrot.slane %v20147_v33, 2 }
 0x765   :  { %v5737_v3 = vpop.f32.mrf.mxu1  ;;  %v6290_v22 = vpop.f32.mrf.mxu0 }
 0x766   :  { %v5738_v12 = vadd.f32 %v5737_v3, %v18306_v47  ;;  %v14116_v47 = vld [vmem:[#allocation2 + $0x5d8] sm:$0xff]  ;;  %v5811_v25 = vor.u32 %v5810_v42, %v5809_v37 }
 0x767   :  { %v6231_v7 = vpop.f32.mrf.mxu3  ;;  %v6182_v9 = vpop.f32.mrf.mxu2  ;;  %6961 = vmatpush.bf16.msrb.mxu2 %v14116_v47 }
 0x768   :  { %v6232_v45 = vadd.f32 %v6231_v7, %v6182_v9  ;;  %v18466_v56 = vadd.f32 %v5738_v12, %v18118_v61  ;;  %6331 = vmatmul.bf16.gmra.mxu1 %v20145_v28  ;;  %v5815_v12 = vrot.slane %v18274_v20, 2  ;;  %v14108_v28 = vld [vmem:[#allocation2 + $0x598] sm:$0xff] }
 0x769   :  { %6912 = vmatpush.bf16.msrb.mxu1 %v14108_v28 }
 0x76a   :  { %v18474_v10 = vadd.f32 %v18409_v39, %v6232_v45  ;;  %v18489_v27 = vunpack.c.l.b16 %v5815_v12 }
 0x76c   :  { %6828 = vmatmul.bf16.gmra.mxu3 %v18123_v38  ;;  %6380 = vmatmul.bf16.gmra.mxu2 %v20148_v40  ;;  %v18483_v38 = vunpack.c.l.b16 %v5811_v25  ;;  %v5910_v47 = vpack.c.b16 %v18489_v27, %v18301_v58 }
 0x76d   :  { %v5739_v21 = vpop.f32.mrf.mxu1  ;;  %v6293_v33 = vpop.f32.mrf.mxu0 }
 0x76e   :  { %v5740_v3 = vadd.f32 %v5739_v21, %v18322_v63  ;;  %v5909_v63 = vpack.c.b16 %v18483_v38, %v18089_v24  ;;  %v14115_v24 = vld [vmem:[#allocation2 + $0x5d0] sm:$0xff] }
 0x76f   :  { %v6234_v61 = vpop.f32.mrf.mxu3  ;;  %v6185_v7 = vpop.f32.mrf.mxu2  ;;  %6962 = vmatpush.bf16.msrb.mxu2 %v14115_v24  ;;  %v3372_v24 = vld.sshfl [vmem:[#allocation1 + $0x20] sm:$0xff pattern:$0x75316420] }
 0x770   :  { %v6235_v9 = vadd.f32 %v6234_v61, %v6185_v7  ;;  %v18481_v39 = vadd.f32 %v5740_v3, %v18141_v54  ;;  %6887 = vmatmul.bf16.gmra.mxu0 %v18004_v8  ;;  %v6550_v54 = vpack.c.b16 %v18433_v14, %v18267_v31  ;;  %v14123_v61 = vld [vmem:[#allocation2 + $0x610] sm:$0xff] }
 0x771   :  { %7011 = vmatpush.bf16.msrb.mxu3 %v14123_v61 }
 0x772   :  { %v18486_v45 = vadd.f32 %v18421_v52, %v6235_v9 }
 0x775   :  { %v5742_v20 = vpop.f32.mrf.mxu1  ;;  %v6295_v21 = vpop.f32.mrf.mxu0 }
 0x776   :  { %v5743_v40 = vadd.f32 %v5742_v20, %v18327_v0 }
 0x777   :  { %v6236_v37 = vpop.f32.mrf.mxu3  ;;  %v6187_v42 = vpop.f32.mrf.mxu2 }
 0x778   :  { %v6237_v52 = vadd.f32 %v6236_v37, %v6187_v42  ;;  %v18499_v8 = vadd.f32 %v5743_v40, %v18149_v49  ;;  %6336 = vmatmul.bf16.gmra.mxu1 %v5909_v63 }
 0x77a   :  { %v18502_v26 = vadd.f32 %v18439_v62, %v6237_v52  ;;  %v14107_v62 = vld [vmem:[#allocation2 + $0x590] sm:$0xff] }
 0x77b   :  { %6913 = vmatpush.bf16.msrb.mxu1 %v14107_v62 }
 0x77c   :  { %6833 = vmatmul.bf16.gmra.mxu3 %v6550_v54  ;;  %6385 = vmatmul.bf16.gmra.mxu2 %v5910_v47  ;;  %v14122_v54 = vld [vmem:[#allocation2 + $0x608] sm:$0xff] }
 0x77d   :  { %v5744_v31 = vpop.f32.mrf.mxu1  ;;  %v6298_v20 = vpop.f32.mrf.mxu0  ;;  %7012 = vmatpush.bf16.msrb.mxu3 %v14122_v54  ;;  %v20154_v54 = vld [vmem:[#allocation102_spill] sm:$0xff] }
 0x77e   :  { %v5745_v14 = vadd.f32 %v5744_v31, %v18333_v51  ;;  %v20149_v51 = vld [vmem:[#allocation93_spill] sm:$0xff] }
 0x77f   :  { %v6239_v25 = vpop.f32.mrf.mxu3  ;;  %v6190_v0 = vpop.f32.mrf.mxu2 }
 0x780   :  { %v6240_v58 = vadd.f32 %v6239_v25, %v6190_v0  ;;  %v18506_v49 = vadd.f32 %v5745_v14, %v18157_v32  ;;  %6892 = vmatmul.bf16.gmra.mxu0 %v18028_v44  ;;  %v14114_v44 = vld [vmem:[#allocation2 + $0x5c8] sm:$0xff]  ;;  %v3468_v25 = vpack.c.bf16 %v3372_v24, %v3372_v24 }
 0x781   :  { %6963 = vmatpush.bf16.msrb.mxu2 %v14114_v44  ;;  %v20151_v14 = vld [vmem:[#allocation53_spill] sm:$0xff] }
 0x782   :  { %v18508_v7 = vadd.f32 %v6288_v23, %v6240_v58  ;;  %v20150_v23 = vld [vmem:[#allocation95_spill] sm:$0xff]  ;;  %v18527_v58 = vunpack.c.l.b16 %v3468_v25 }
 0x785   :  { %v5747_v9 = vpop.f32.mrf.mxu1  ;;  %v6300_v0 = vpop.f32.mrf.mxu0 }
 0x786   :  { %v5748_v28 = vadd.f32 %v5747_v9, %v18339_v34 }
 0x787   :  { %v6241_v3 = vpop.f32.mrf.mxu3  ;;  %v6192_v12 = vpop.f32.mrf.mxu2 }
 0x788   :  { %v6242_v37 = vadd.f32 %v6241_v3, %v6192_v12  ;;  %v18513_v63 = vadd.f32 %v5748_v28, %v18172_v57  ;;  %6341 = vmatmul.bf16.gmra.mxu1 %v20149_v51 }
 0x78a   :  { %v18516_v32 = vadd.f32 %v6290_v22, %v6242_v37  ;;  %v3373_v22 = vld.sshfl [vmem:[#allocation1 + $0x30] sm:$0xff pattern:$0x75316420] }
 0x78b   :  { %v3469_v31 = vpack.c.bf16 %v3373_v22, %v3373_v22  ;;  %v20152_v37 = vld [vmem:[#allocation60_spill] sm:$0xff] }
 0x78c   :  { %6838 = vmatmul.bf16.gmra.mxu3 %v20096_v60  ;;  %6390 = vmatmul.bf16.gmra.mxu2 %v20150_v23  ;;  %v14106_v60 = vld [vmem:[#allocation2 + $0x588] sm:$0xff]  ;;  %v20153_v23 = vld [vmem:[#allocation98_spill] sm:$0xff] }
 0x78d   :  { %v5749_v40 = vpop.f32.mrf.mxu1  ;;  %6914 = vmatpush.bf16.msrb.mxu1 %v14106_v60  ;;  %v6434_v62 = vunpack.c.l.b16 %v3469_v31  ;;  %v6303_v24 = vpop.f32.mrf.mxu0 }
 0x78e   :  { %v5750_v52 = vadd.f32 %v5749_v40, %v18351_v17 }
 0x78f   :  { %v6244_v42 = vpop.f32.mrf.mxu3  ;;  %v6195_v34 = vpop.f32.mrf.mxu2  ;;  %v18530_v9 = vpack.c.b16 %v6434_v62, %v18527_v58  ;;  %v20156_v62 = vld [vmem:[#allocation84_spill] sm:$0xff] }
 0x790   :  { %v6245_v57 = vadd.f32 %v6244_v42, %v6195_v34  ;;  %v18522_v47 = vadd.f32 %v5750_v52, %v18185_v6  ;;  %6897 = vmatmul.bf16.gmra.mxu0 %v20151_v14  ;;  %v20155_v34 = vld [vmem:[#allocation100_spill] sm:$0xff] }
 0x791   :  { %v6447_v28 = vshll.u32 %v18530_v9, 16  ;;  %v6445_v42 = vshrl.u32 %v18530_v9, 16  ;;  %v14121_v52 = vld [vmem:[#allocation2 + $0x600] sm:$0xff] }
 0x792   :  { %v18524_v61 = vadd.f32 %v6293_v33, %v6245_v57  ;;  %7013 = vmatpush.bf16.msrb.mxu3 %v14121_v52  ;;  %v20158_v52 = vld [vmem:[#allocation101_spill] sm:$0xff] }
 0x793   :  { %v6449_v40 = vrot.slane %v6447_v28, 1 }
 0x795   :  { %v5752_v17 = vpop.f32.mrf.mxu1  ;;  %v6450_v22 = vor.u32 %v6449_v40, %v6445_v42  ;;  %v6305_v40 = vpop.f32.mrf.mxu0 }
 0x796   :  { %v5753_v12 = vadd.f32 %v5752_v17, %v18362_v43  ;;  %v14113_v43 = vld [vmem:[#allocation2 + $0x5c0] sm:$0xff] }
 0x797   :  { %v6246_v3 = vpop.f32.mrf.mxu3  ;;  %v6197_v6 = vpop.f32.mrf.mxu2  ;;  %6964 = vmatpush.bf16.msrb.mxu2 %v14113_v43  ;;  %v6465_v31 = vunpack.c.l.b16 %v6450_v22 }
 0x798   :  { %v6247_v33 = vadd.f32 %v6246_v3, %v6197_v6  ;;  %v18535_v51 = vadd.f32 %v5753_v12, %v20152_v37  ;;  %6346 = vmatmul.bf16.gmra.mxu1 %v20153_v23  ;;  %v14105_v12 = vld [vmem:[#allocation2 + $0x580] sm:$0xff] }
 0x799   :  { %v6556_v17 = vpack.c.b16 %v6465_v31, %v5821_v5  ;;  %6915 = vmatpush.bf16.msrb.mxu1 %v14105_v12  ;;  %v5812_v5 = vrot.slane %v20159_v18, 1  ;;  %v5816_v12 = vrot.slane %v18348_v29, 2 }
 0x79a   :  { %v18538_v44 = vadd.f32 %v6295_v21, %v6247_v33 }
 0x79c   :  { %6843 = vmatmul.bf16.gmra.mxu3 %v20154_v54  ;;  %6395 = vmatmul.bf16.gmra.mxu2 %v20155_v34  ;;  %v20157_v34 = vld [vmem:[#allocation87_spill] sm:$0xff] }
 0x79d   :  { %v5754_v60 = vpop.f32.mrf.mxu1 }
 0x79e   :  { %v5755_v25 = vadd.f32 %v5754_v60, %v18373_v41  ;;  %v20161_v60 = vld [vmem:[#allocation89_spill] sm:$0xff] }
 0x79f   :  { %v6249_v57 = vpop.f32.mrf.mxu3  ;;  %v6200_v21 = vpop.f32.mrf.mxu2 }
 0x7a0   :  { %v6250_v14 = vadd.f32 %v6249_v57, %v6200_v21  ;;  %v18549_v3 = vadd.f32 %v5755_v25, %v20156_v62  ;;  %6902 = vmatmul.bf16.gmra.mxu0 %v6556_v17  ;;  %v20162_v21 = vld [vmem:[#allocation103_spill] sm:$0xff] }
 0x7a2   :  { %v18553_v6 = vadd.f32 %v6298_v20, %v6250_v14  ;;  %v20160_v20 = vshll.u32 %v18348_v29, 16 }
 0x7a4   :  { %v5813_v57 = vrot.slane %v20160_v20, 2 }
 0x7a5   :  { %v5757_v37 = vpop.f32.mrf.mxu1 }
 0x7a6   :  { %v5758_v54 = vadd.f32 %v5757_v37, %v18386_v19  ;;  %v5814_v25 = vor.u32 %v5813_v57, %v5812_v5 }
 0x7a7   :  { %v6251_v33 = vpop.f32.mrf.mxu3  ;;  %v6202_v23 = vpop.f32.mrf.mxu2 }
 0x7a8   :  { %v6252_v41 = vadd.f32 %v6251_v33, %v6202_v23  ;;  %v18557_v43 = vadd.f32 %v5758_v54, %v20157_v34  ;;  %6351 = vmatmul.bf16.gmra.mxu1 %v20158_v52  ;;  %v20163_v33 = vld [vmem:[#allocation62_spill] sm:$0xff]  ;;  %v18573_v23 = vunpack.c.l.b16 %v5814_v25  ;;  %v20164_v52 = vld [vmem:[#allocation55_spill] sm:$0xff] }
 0x7aa   :  { %v18564_v22 = vadd.f32 %v6300_v0, %v6252_v41  ;;  %v6308_v0 = vpop.f32.mrf.mxu0  ;;  %v18577_v41 = vunpack.c.l.b16 %v5816_v12  ;;  %v5914_v18 = vpack.c.b16 %v18573_v23, %v20164_v52 }
 0x7ac   :  { %6848 = vmatmul.bf16.gmra.mxu3 %v20161_v60  ;;  %6400 = vmatmul.bf16.gmra.mxu2 %v20162_v21  ;;  %v5915_v60 = vpack.c.b16 %v18577_v41, %v18381_v2  ;;  %v20165_v21 = vld [vmem:[#allocation83_spill] sm:$0xff] }
 0x7ad   :  { %v5759_v31 = vpop.f32.mrf.mxu1 }
 0x7ae   :  { %v5760_v62 = vadd.f32 %v5759_v31, %v18400_v50  ;;  %v6555_v50 = vpack.c.b16 %v18527_v58, %v18341_v30 }
 0x7af   :  { %v6254_v19 = vpop.f32.mrf.mxu3  ;;  %v6205_v14 = vpop.f32.mrf.mxu2 }
 0x7b0   :  { %v6255_v17 = vadd.f32 %v6254_v19, %v6205_v14  ;;  %v18571_v37 = vadd.f32 %v5760_v62, %v20163_v33 }
 0x7b2   :  { %v18575_v54 = vadd.f32 %v6303_v24, %v6255_v17  ;;  %v6310_v25 = vpop.f32.mrf.mxu0 }
 0x7b5   :  { %v5762_v5 = vpop.f32.mrf.mxu1 }
 0x7b6   :  { %v5763_v29 = vadd.f32 %v5762_v5, %v18406_v1  ;;  %v20166_v1 = vld [vmem:[#allocation92_spill] sm:$0xff]  ;;  %v20167_v5 = vld [vmem:[#allocation58_spill] sm:$0xff] }
 0x7b7   :  { %v6256_v34 = vpop.f32.mrf.mxu3  ;;  %v6207_v20 = vpop.f32.mrf.mxu2 }
 0x7b8   :  { %v6257_v57 = vadd.f32 %v6256_v34, %v6207_v20  ;;  %v18587_v24 = vadd.f32 %v5763_v29, %v20165_v21  ;;  %6356 = vmatmul.bf16.gmra.mxu1 %v5914_v18  ;;  %v20168_v20 = vld [vmem:[#allocation104_spill] sm:$0xff] }
 0x7ba   :  { %v18589_v19 = vadd.f32 %v6305_v40, %v6257_v57  ;;  %v6868_v33 = vpop.f32.mrf.mxu0 }
 0x7bc   :  { %6853 = vmatmul.bf16.gmra.mxu3 %v6555_v50  ;;  %6405 = vmatmul.bf16.gmra.mxu2 %v5915_v60 }
 0x7bd   :  { %v5764_v14 = vpop.f32.mrf.mxu1 }
 0x7be   :  { %v5765_v30 = vadd.f32 %v5764_v14, %v18417_v15  ;;  %v20169_v15 = vld [vmem:[#allocation67_spill] sm:$0xff] }
 0x7bf   :  { %v6259_v31 = vpop.f32.mrf.mxu3  ;;  %v6210_v62 = vpop.f32.mrf.mxu2 }
 0x7c0   :  { %v6260_v58 = vadd.f32 %v6259_v31, %v6210_v62  ;;  %v18593_v17 = vadd.f32 %v5765_v30, %v20166_v1 }
 0x7c2   :  { %v18595_v12 = vadd.f32 %v6308_v0, %v6260_v58  ;;  %v6870_v31 = vpop.f32.mrf.mxu0 }
 0x7c5   :  { %v6322_v34 = vpop.f32.mrf.mxu1 }
 0x7c6   :  { %v6323_v40 = vadd.f32 %v6322_v34, %v18426_v11  ;;  %v20170_v34 = vld [vmem:[#allocation78_spill] sm:$0xff] }
 0x7c7   :  { %v6261_v2 = vpop.f32.mrf.mxu3  ;;  %v6212_v52 = vpop.f32.mrf.mxu2 }
 0x7c8   :  { %v6262_v18 = vadd.f32 %v6261_v2, %v6212_v52  ;;  %6916 = vmatmul.bf16.vlgmr.msrb.gmra.mxu1 %v20167_v5 }
 0x7ca   :  { %v18599_v50 = vadd.f32 %v6310_v25, %v6262_v18 }
 0x7cc   :  { %7014 = vmatmul.bf16.vlgmr.msrb.gmra.mxu3 %v20168_v20  ;;  %6965 = vmatmul.bf16.vlgmr.msrb.gmra.mxu2 %v20169_v15 }
 0x7cd   :  { %v6324_v0 = vpop.f32.mrf.mxu1 }
 0x7ce   :  { %v6325_v21 = vadd.f32 %v6324_v0, %v18446_v48  ;;  %v20171_v48 = vld [vmem:[#allocation105_spill] sm:$0xff] }
 0x7cf   :  { %v6819_v29 = vpop.f32.mrf.mxu3  ;;  %v6371_v60 = vpop.f32.mrf.mxu2 }
 0x7d0   :  { %v18603_v57 = vadd.f32 %v6868_v33, %v6819_v29  ;;  %v6372_v14 = vadd.f32 %v6371_v60, %v6323_v40  ;;  %v6873_v33 = vpop.f32.mrf.mxu0  ;;  %v20172_v40 = vld [vmem:[#allocation24_spill] sm:$0xff] }
 0x7d2   :  { %v18607_v11 = vadd.f32 %v6372_v14, %v18412_v53 }
 0x7d5   :  { %v6327_v25 = vpop.f32.mrf.mxu1 }
 0x7d6   :  { %v6328_v1 = vadd.f32 %v6327_v25, %v18462_v16  ;;  %v20173_v25 = vld [vmem:[#allocation91_spill] sm:$0xff] }
 0x7d7   :  { %v6821_v62 = vpop.f32.mrf.mxu3  ;;  %v6373_v58 = vpop.f32.mrf.mxu2 }
 0x7d8   :  { %v18609_v30 = vadd.f32 %v6870_v31, %v6821_v62  ;;  %v6374_v2 = vadd.f32 %v6373_v58, %v6325_v21  ;;  %6921 = vmatmul.bf16.gmra.mxu1 %v20170_v34  ;;  %v6875_v0 = vpop.f32.mrf.mxu0 }
 0x7da   :  { %v18614_v52 = vadd.f32 %v6374_v2, %v18424_v55  ;;  %v20174_v2 = vld [vmem:[#allocation41_spill] sm:$0xff] }
 0x7dc   :  { %7019 = vmatmul.bf16.gmra.mxu3 %v20171_v48  ;;  %6970 = vmatmul.bf16.gmra.mxu2 %v20172_v40 }
 0x7dd   :  { %v6329_v5 = vpop.f32.mrf.mxu1 }
 0x7de   :  { %v6330_v15 = vadd.f32 %v6329_v5, %v18474_v10  ;;  %v20175_v10 = vld [vmem:[#allocation63_spill] sm:$0xff] }
 0x7df   :  { %v6824_v53 = vpop.f32.mrf.mxu3  ;;  %v6376_v20 = vpop.f32.mrf.mxu2 }
 0x7e0   :  { %v18618_v18 = vadd.f32 %v6873_v33, %v6824_v53  ;;  %v6377_v29 = vadd.f32 %v6376_v20, %v6328_v1  ;;  %v20176_v1 = vshll.u32 %v18436_v59, 16  ;;  %v6878_v48 = vpop.f32.mrf.mxu0 }
 0x7e2   :  { %v18622_v16 = vadd.f32 %v6377_v29, %v18443_v35  ;;  %v6453_v35 = vrot.slane %v6438_v36, 1  ;;  %v6454_v34 = vrot.slane %v20176_v1, 2 }
 0x7e4   :  { %v6455_v29 = vor.u32 %v6454_v34, %v6453_v35 }
 0x7e5   :  { %v6332_v55 = vpop.f32.mrf.mxu1 }
 0x7e6   :  { %v6333_v14 = vadd.f32 %v6332_v55, %v18486_v45  ;;  %v6451_v45 = vrot.slane %v18436_v59, 1  ;;  %v6463_v55 = vunpack.c.l.b16 %v6455_v29 }
 0x7e7   :  { %v6826_v60 = vpop.f32.mrf.mxu3  ;;  %v6378_v31 = vpop.f32.mrf.mxu2 }
 0x7e8   :  { %v18624_v21 = vadd.f32 %v6875_v0, %v6826_v60  ;;  %v6379_v62 = vadd.f32 %v6378_v31, %v6330_v15  ;;  %6926 = vmatmul.bf16.gmra.mxu1 %v20173_v25  ;;  %v6462_v0 = vunpack.c.l.b16 %v6451_v45 }
 0x7ea   :  { %v18629_v58 = vadd.f32 %v6379_v62, %v18457_v4  ;;  %v6459_v4 = vrot.slane %v18436_v59, 2  ;;  %v20177_v62 = vld [vmem:[#allocation96_spill] sm:$0xff] }
 0x7eb   :  { %v6552_v25 = vpack.c.b16 %v6462_v0, %v20177_v62 }
 0x7ec   :  { %7024 = vmatmul.bf16.gmra.mxu3 %v20174_v2  ;;  %6975 = vmatmul.bf16.gmra.mxu2 %v20175_v10  ;;  %v6464_v60 = vunpack.c.l.b16 %v6459_v4 }
 0x7ed   :  { %v6334_v53 = vpop.f32.mrf.mxu1 }
 0x7ee   :  { %v6335_v20 = vadd.f32 %v6334_v53, %v18502_v26  ;;  %v6554_v10 = vpack.c.b16 %v6464_v60, %v18489_v27  ;;  %v6553_v26 = vpack.c.b16 %v6463_v55, %v18483_v38 }
 0x7ef   :  { %v6829_v33 = vpop.f32.mrf.mxu3  ;;  %v6381_v5 = vpop.f32.mrf.mxu2 }
 0x7f0   :  { %v18638_v40 = vadd.f32 %v6878_v48, %v6829_v33  ;;  %v6382_v15 = vadd.f32 %v6381_v5, %v6333_v14  ;;  %v20178_v5 = vld [vmem:[#allocation49_spill] sm:$0xff] }
 0x7f2   :  { %v18643_v36 = vadd.f32 %v6382_v15, %v18466_v56  ;;  %v20179_v15 = vld [vmem:[#allocation81_spill] sm:$0xff] }
 0x7f5   :  { %v6337_v2 = vpop.f32.mrf.mxu1 }
 0x7f6   :  { %v6338_v59 = vadd.f32 %v6337_v2, %v18508_v7 }
 0x7f7   :  { %v18645_v31 = vpop.f32.mrf.mxu3  ;;  %v6383_v1 = vpop.f32.mrf.mxu2 }
 0x7f8   :  { %v6384_v33 = vadd.f32 %v6383_v1, %v6335_v20  ;;  %6931 = vmatmul.bf16.gmra.mxu1 %v6552_v25  ;;  %v20181_v1 = vld [vmem:[#allocation77_spill] sm:$0xff] }
 0x7fa   :  { %v18652_v14 = vadd.f32 %v6384_v33, %v18481_v39 }
 0x7fc   :  { %7029 = vmatmul.bf16.gmra.mxu3 %v6554_v10  ;;  %6980 = vmatmul.bf16.gmra.mxu2 %v6553_v26 }
 0x7fd   :  { %v6339_v35 = vpop.f32.mrf.mxu1 }
 0x7fe   :  { %v6340_v48 = vadd.f32 %v6339_v35, %v18516_v32 }
 0x7ff   :  { %v18654_v56 = vpop.f32.mrf.mxu3  ;;  %v6386_v34 = vpop.f32.mrf.mxu2 }
 0x800   :  { %v6387_v45 = vadd.f32 %v6386_v34, %v6338_v59  ;;  %v20182_v59 = vld [vmem:[#allocation90_spill] sm:$0xff] }
 0x802   :  { %v18658_v27 = vadd.f32 %v6387_v45, %v18499_v8 }
 0x805   :  { %v6342_v53 = vpop.f32.mrf.mxu1 }
 0x806   :  { %v6343_v4 = vadd.f32 %v6342_v53, %v18524_v61 }
 0x807   :  { %v18660_v7 = vpop.f32.mrf.mxu3  ;;  %v6388_v38 = vpop.f32.mrf.mxu2 }
 0x808   :  { %v6389_v39 = vadd.f32 %v6388_v38, %v6340_v48  ;;  %6936 = vmatmul.bf16.gmra.mxu1 %v20178_v5  ;;  %v20183_v38 = vld [vmem:[#allocation86_spill] sm:$0xff] }
 0x80a   :  { %v18665_v20 = vadd.f32 %v6389_v39, %v18506_v49  ;;  %v20184_v39 = vld [vmem:[#allocation88_spill] sm:$0xff] }
 0x80c   :  { %7034 = vmatmul.bf16.gmra.mxu3 %v17967_v46  ;;  %6985 = vmatmul.bf16.gmra.mxu2 %v20179_v15  ;;  %v20180_v46 = vld [vmem:[#allocation57_spill] sm:$0xff] }
 0x80d   :  { %v6344_v8 = vpop.f32.mrf.mxu1 }
 0x80e   :  { %v6345_v0 = vadd.f32 %v6344_v8, %v18538_v44  ;;  %v6460_v8 = vrot.slane %v18530_v9, 2 }
 0x80f   :  { %v18669_v32 = vpop.f32.mrf.mxu3  ;;  %v6391_v29 = vpop.f32.mrf.mxu2 }
 0x810   :  { %v6392_v60 = vadd.f32 %v6391_v29, %v6343_v4 }
 0x812   :  { %v18673_v55 = vadd.f32 %v6392_v60, %v18513_v63 }
 0x815   :  { %v6347_v62 = vpop.f32.mrf.mxu1 }
 0x816   :  { %v6348_v49 = vadd.f32 %v6347_v62, %v18553_v6 }
 0x817   :  { %v18675_v61 = vpop.f32.mrf.mxu3  ;;  %v6393_v25 = vpop.f32.mrf.mxu2 }
 0x818   :  { %v6394_v2 = vadd.f32 %v6393_v25, %v6345_v0  ;;  %6941 = vmatmul.bf16.gmra.mxu1 %v20180_v46 }
 0x81a   :  { %v18680_v10 = vadd.f32 %v6394_v2, %v18522_v47 }
 0x81c   :  { %7039 = vmatmul.bf16.gmra.mxu3 %v20181_v1  ;;  %6990 = vmatmul.bf16.gmra.mxu2 %v20182_v59 }
 0x81d   :  { %v6349_v63 = vpop.f32.mrf.mxu1 }
 0x81e   :  { %v6350_v26 = vadd.f32 %v6349_v63, %v18564_v22  ;;  %v6457_v22 = vrot.slane %v6447_v28, 2  ;;  %v20185_v28 = vld [vmem:[#allocation26_spill] sm:$0xff] }
 0x81f   :  { %v18684_v44 = vpop.f32.mrf.mxu3  ;;  %v6396_v33 = vpop.f32.mrf.mxu2 }
 0x820   :  { %v6397_v35 = vadd.f32 %v6396_v33, %v6348_v49 }
 0x822   :  { %v18688_v34 = vadd.f32 %v6397_v35, %v18535_v51  ;;  %v6456_v51 = vrot.slane %v6445_v42, 1  ;;  %v6468_v42 = vunpack.c.l.b16 %v6460_v8 }
 0x824   :  { %v6559_v1 = vpack.c.b16 %v6468_v42, %v18577_v41 }
 0x825   :  { %v6352_v48 = vpop.f32.mrf.mxu1 }
 0x826   :  { %v6353_v47 = vadd.f32 %v6352_v48, %v18575_v54  ;;  %v6452_v54 = vrot.slane %v18530_v9, 1 }
 0x827   :  { %v18690_v6 = vpop.f32.mrf.mxu3  ;;  %v6398_v45 = vpop.f32.mrf.mxu2 }
 0x828   :  { %v6399_v53 = vadd.f32 %v6398_v45, %v6350_v26  ;;  %6946 = vmatmul.bf16.gmra.mxu1 %v20183_v38  ;;  %v6466_v60 = vunpack.c.l.b16 %v6452_v54 }
 0x82a   :  { %v18695_v4 = vadd.f32 %v6399_v53, %v18549_v3  ;;  %v6557_v2 = vpack.c.b16 %v6466_v60, %v20185_v28 }
 0x82c   :  { %7044 = vmatmul.bf16.gmra.mxu3 %v18390_v13  ;;  %6995 = vmatmul.bf16.gmra.mxu2 %v20184_v39  ;;  %v6458_v13 = vor.u32 %v6457_v22, %v6456_v51 }
 0x82d   :  { %v6354_v15 = vpop.f32.mrf.mxu1 }
 0x82e   :  { %v6355_v3 = vadd.f32 %v6354_v15, %v18589_v19  ;;  %v6467_v25 = vunpack.c.l.b16 %v6458_v13 }
 0x82f   :  { %v18703_v5 = vpop.f32.mrf.mxu3  ;;  %v6401_v29 = vpop.f32.mrf.mxu2 }
 0x830   :  { %v6402_v0 = vadd.f32 %v6401_v29, %v6353_v47  ;;  %v6558_v19 = vpack.c.b16 %v6467_v25, %v18573_v23 }
 0x832   :  { %v18709_v62 = vadd.f32 %v6402_v0, %v18557_v43 }
 0x835   :  { %v6357_v46 = vpop.f32.mrf.mxu1 }
 0x836   :  { %v6358_v9 = vadd.f32 %v6357_v46, %v18595_v12 }
 0x837   :  { %v18711_v49 = vpop.f32.mrf.mxu3  ;;  %v6403_v59 = vpop.f32.mrf.mxu2 }
 0x838   :  { %v6404_v63 = vadd.f32 %v6403_v59, %v6355_v3  ;;  %6951 = vmatmul.bf16.gmra.mxu1 %v6557_v2 }
 0x83a   :  { %v18718_v33 = vadd.f32 %v6404_v63, %v18571_v37  ;;  %v20186_v63 = vld [vmem:[#allocation61_spill] sm:$0xff] }
 0x83c   :  { %7049 = vmatmul.bf16.gmra.mxu3 %v6559_v1  ;;  %7000 = vmatmul.bf16.gmra.mxu2 %v6558_v19  ;;  %v18739_v19 = vperm.slane %v20186_v63, 3 }
 0x83d   :  { %v6359_v26 = vpop.f32.mrf.mxu1 }
 0x83e   :  { %v6360_v48 = vadd.f32 %v6359_v26, %v18599_v50 }
 0x83f   :  { %v18720_v43 = vpop.f32.mrf.mxu3  ;;  %v6406_v35 = vpop.f32.mrf.mxu2 }
 0x840   :  { %v6407_v45 = vadd.f32 %v6406_v35, %v6358_v9 }
 0x842   :  { %v18724_v41 = vadd.f32 %v6407_v45, %v18587_v24 }
 0x845   :  { %v6917_v47 = vpop.f32.mrf.mxu1 }
 0x846   :  { %v6918_v53 = vadd.f32 %v6917_v47, %v18603_v57 }
 0x847   :  { %v18726_v12 = vpop.f32.mrf.mxu3  ;;  %v6408_v23 = vpop.f32.mrf.mxu2 }
 0x848   :  { %v6409_v37 = vadd.f32 %v6408_v23, %v6360_v48 }
 0x84a   :  { %v18730_v38 = vadd.f32 %v6409_v37, %v18593_v17  ;;  %v6880_v17 = vpop.f32.mrf.mxu0 }
 0x84d   :  { %v6919_v51 = vpop.f32.mrf.mxu1 }
 0x84e   :  { %v6920_v54 = vadd.f32 %v6919_v51, %v18609_v30 }
 0x84f   :  { %v7015_v39 = vpop.f32.mrf.mxu3  ;;  %v6966_v22 = vpop.f32.mrf.mxu2 }
 0x850   :  { %v6967_v50 = vadd.f32 %v6966_v22, %v6918_v53 }
 0x852   :  { %v7016_v15 = vadd.f32 %v7015_v39, %v6967_v50  ;;  %v6883_v9 = vpop.f32.mrf.mxu0 }
 0x854   :  { %v7055_v24 = vadd.f32 %v7016_v15, %v18607_v11 }
 0x855   :  { %v6922_v29 = vpop.f32.mrf.mxu1 }
 0x856   :  { %v6923_v0 = vadd.f32 %v6922_v29, %v18618_v18  ;;  %v7072_v45 = vadd.f32 %v18739_v19, %v7055_v24 }
 0x857   :  { %v7017_v8 = vpop.f32.mrf.mxu3  ;;  %v6968_v3 = vpop.f32.mrf.mxu2 }
 0x858   :  { %v6969_v13 = vadd.f32 %v6968_v3, %v6920_v54  ;;  %v18749_v39 = vmax.f32 %v7072_v45, 0.0 }
 0x85a   :  { %v7018_v57 = vadd.f32 %v7017_v8, %v6969_v13  ;;  %v6885_v54 = vpop.f32.mrf.mxu0  ;;  %v6881_v8 = vadd.f32 %v6880_v17, %v18645_v31 }
 0x85c   :  { %v7056_v60 = vadd.f32 %v7018_v57, %v18614_v52 }
 0x85d   :  { %v6924_v25 = vpop.f32.mrf.mxu1 }
 0x85e   :  { %v6925_v2 = vadd.f32 %v6924_v25, %v18624_v21  ;;  %v7073_v35 = vadd.f32 %v18739_v19, %v7056_v60 }
 0x85f   :  { %v7020_v42 = vpop.f32.mrf.mxu3  ;;  %v6971_v28 = vpop.f32.mrf.mxu2 }
 0x860   :  { %v6972_v30 = vadd.f32 %v6971_v28, %v6923_v0 }
 0x862   :  { %v7021_v46 = vadd.f32 %v7020_v42, %v6972_v30 }
 0x864   :  { %v7057_v1 = vadd.f32 %v7021_v46, %v18622_v16  ;;  %v18746_v16 = vmax.f32 %v7073_v35, 0.0 }
 0x865   :  { %v6927_v59 = vpop.f32.mrf.mxu1 }
 0x866   :  { %v6928_v26 = vadd.f32 %v6927_v59, %v18638_v40  ;;  %v7074_v21 = vadd.f32 %v18739_v19, %v7057_v1  ;;  %v7127_v50 = vmul.f32 %v18746_v16, %v18746_v16  ;;  %v7104_v29 = vadd.f32 %v18746_v16, %v18749_v39 }
 0x867   :  { %v7022_v11 = vpop.f32.mrf.mxu3  ;;  %v6973_v18 = vpop.f32.mrf.mxu2 }
 0x868   :  { %v6974_v52 = vadd.f32 %v6973_v18, %v6925_v2  ;;  %v18751_v40 = vmax.f32 %v7074_v21, 0.0 }
 0x86a   :  { %v7023_v48 = vadd.f32 %v7022_v11, %v6974_v52  ;;  %v7128_v3 = vmul.f32 %v18751_v40, %v18751_v40  ;;  %v7105_v60 = vadd.f32 %v7104_v29, %v18751_v40  ;;  %v6884_v52 = vadd.f32 %v6883_v9, %v18654_v56 }
 0x86b   :  { %v6886_v56 = vadd.f32 %v6885_v54, %v18660_v7 }
 0x86c   :  { %v7058_v47 = vadd.f32 %v7023_v48, %v18629_v58  ;;  %v7126_v58 = vmul.f32 %v18749_v39, %v18749_v39 }
 0x86d   :  { %v6929_v37 = vpop.f32.mrf.mxu1 }
 0x86e   :  { %v7075_v53 = vadd.f32 %v18739_v19, %v7058_v47  ;;  %v7142_v13 = vadd.f32 %v7127_v50, %v7126_v58  ;;  %v6930_v28 = vadd.f32 %v6929_v37, %v6881_v8 }
 0x86f   :  { %v7025_v23 = vpop.f32.mrf.mxu3  ;;  %v6976_v51 = vpop.f32.mrf.mxu2 }
 0x870   :  { %v6977_v22 = vadd.f32 %v6976_v51, %v6928_v26  ;;  %v18755_v15 = vmax.f32 %v7075_v53, 0.0  ;;  %v7143_v17 = vadd.f32 %v7142_v13, %v7128_v3  ;;  %v6888_v26 = vpop.f32.mrf.mxu0 }
 0x871   :  { %v6889_v7 = vadd.f32 %v6888_v26, %v18669_v32 }
 0x872   :  { %v7026_v24 = vadd.f32 %v7025_v23, %v6977_v22  ;;  %v7129_v42 = vmul.f32 %v18755_v15, %v18755_v15  ;;  %v7106_v30 = vadd.f32 %v7105_v60, %v18755_v15 }
 0x874   :  { %v7059_v0 = vadd.f32 %v7026_v24, %v18643_v36  ;;  %v7144_v11 = vadd.f32 %v7143_v17, %v7129_v42 }
 0x875   :  { %v6932_v2 = vpop.f32.mrf.mxu1 }
 0x876   :  { %v7076_v25 = vadd.f32 %v18739_v19, %v7059_v0  ;;  %v6933_v47 = vadd.f32 %v6932_v2, %v6884_v52 }
 0x877   :  { %v7027_v57 = vpop.f32.mrf.mxu3  ;;  %v6978_v31 = vpop.f32.mrf.mxu2 }
 0x878   :  { %v18770_v46 = vmax.f32 %v7076_v25, 0.0  ;;  %v6979_v1 = vadd.f32 %v6978_v31, %v6930_v28  ;;  %v6890_v58 = vpop.f32.mrf.mxu0 }
 0x879   :  { %v6891_v32 = vadd.f32 %v6890_v58, %v18675_v61 }
 0x87a   :  { %v7107_v36 = vadd.f32 %v7106_v30, %v18770_v46  ;;  %v7130_v59 = vmul.f32 %v18770_v46, %v18770_v46  ;;  %v7028_v18 = vadd.f32 %v7027_v57, %v6979_v1 }
 0x87c   :  { %v7145_v35 = vadd.f32 %v7144_v11, %v7130_v59  ;;  %v7060_v48 = vadd.f32 %v7028_v18, %v18652_v14 }
 0x87d   :  { %v6934_v23 = vpop.f32.mrf.mxu1 }
 0x87e   :  { %v7077_v21 = vadd.f32 %v18739_v19, %v7060_v48  ;;  %v6935_v3 = vadd.f32 %v6934_v23, %v6886_v56 }
 0x87f   :  { %v7030_v45 = vpop.f32.mrf.mxu3  ;;  %v6981_v53 = vpop.f32.mrf.mxu2 }
 0x880   :  { %v18778_v37 = vmax.f32 %v7077_v21, 0.0  ;;  %v6982_v51 = vadd.f32 %v6981_v53, %v6933_v47  ;;  %v6893_v1 = vpop.f32.mrf.mxu0 }
 0x881   :  { %v6894_v61 = vadd.f32 %v6893_v1, %v18684_v44 }
 0x882   :  { %v7108_v22 = vadd.f32 %v7107_v36, %v18778_v37  ;;  %v7131_v50 = vmul.f32 %v18778_v37, %v18778_v37  ;;  %v7031_v24 = vadd.f32 %v7030_v45, %v6982_v51 }
 0x884   :  { %v7146_v9 = vadd.f32 %v7145_v35, %v7131_v50  ;;  %v7061_v14 = vadd.f32 %v7031_v24, %v18658_v27 }
 0x885   :  { %v6937_v0 = vpop.f32.mrf.mxu1 }
 0x886   :  { %v7078_v29 = vadd.f32 %v18739_v19, %v7061_v14  ;;  %v6938_v17 = vadd.f32 %v6937_v0, %v6889_v7 }
 0x887   :  { %v7032_v8 = vpop.f32.mrf.mxu3  ;;  %v6983_v13 = vpop.f32.mrf.mxu2 }
 0x888   :  { %v18786_v57 = vmax.f32 %v7078_v29, 0.0  ;;  %v6984_v60 = vadd.f32 %v6983_v13, %v6935_v3 }
 0x88a   :  { %v7109_v42 = vadd.f32 %v7108_v22, %v18786_v57  ;;  %v7132_v25 = vmul.f32 %v18786_v57, %v18786_v57  ;;  %v7033_v28 = vadd.f32 %v7032_v8, %v6984_v60  ;;  %v6895_v22 = vpop.f32.mrf.mxu0 }
 0x88b   :  { %v6896_v44 = vadd.f32 %v6895_v22, %v18690_v6 }
 0x88c   :  { %v7147_v54 = vadd.f32 %v7146_v9, %v7132_v25  ;;  %v7062_v27 = vadd.f32 %v7033_v28, %v18665_v20 }
 0x88d   :  { %v6939_v30 = vpop.f32.mrf.mxu1 }
 0x88e   :  { %v7079_v31 = vadd.f32 %v18739_v19, %v7062_v27  ;;  %v6940_v21 = vadd.f32 %v6939_v30, %v6891_v32 }
 0x88f   :  { %v7035_v2 = vpop.f32.mrf.mxu3  ;;  %v6986_v11 = vpop.f32.mrf.mxu2 }
 0x890   :  { %v18794_v36 = vmax.f32 %v7079_v31, 0.0  ;;  %v6987_v59 = vadd.f32 %v6986_v11, %v6938_v17 }
 0x892   :  { %v7110_v18 = vadd.f32 %v7109_v42, %v18794_v36  ;;  %v7133_v52 = vmul.f32 %v18794_v36, %v18794_v36  ;;  %v7036_v35 = vadd.f32 %v7035_v2, %v6987_v59  ;;  %v6898_v28 = vpop.f32.mrf.mxu0 }
 0x893   :  { %v6899_v6 = vadd.f32 %v6898_v28, %v18703_v5 }
 0x894   :  { %v7148_v26 = vadd.f32 %v7147_v54, %v7133_v52  ;;  %v7063_v20 = vadd.f32 %v7036_v35, %v18673_v55 }
 0x895   :  { %v6942_v47 = vpop.f32.mrf.mxu1 }
 0x896   :  { %v7080_v45 = vadd.f32 %v18739_v19, %v7063_v20  ;;  %v6943_v8 = vadd.f32 %v6942_v47, %v6894_v61 }
 0x897   :  { %v7037_v48 = vpop.f32.mrf.mxu3  ;;  %v6988_v23 = vpop.f32.mrf.mxu2 }
 0x898   :  { %v18802_v53 = vmax.f32 %v7080_v45, 0.0  ;;  %v6989_v51 = vadd.f32 %v6988_v23, %v6940_v21 }
 0x89a   :  { %v7111_v50 = vadd.f32 %v7110_v18, %v18802_v53  ;;  %v7134_v24 = vmul.f32 %v18802_v53, %v18802_v53  ;;  %v7038_v56 = vadd.f32 %v7037_v48, %v6989_v51  ;;  %v6900_v35 = vpop.f32.mrf.mxu0 }
 0x89b   :  { %v6901_v5 = vadd.f32 %v6900_v35, %v18711_v49 }
 0x89c   :  { %v7149_v9 = vadd.f32 %v7148_v26, %v7134_v24  ;;  %v7064_v55 = vadd.f32 %v7038_v56, %v18680_v10 }
 0x89d   :  { %v6944_v29 = vpop.f32.mrf.mxu1 }
 0x89e   :  { %v7081_v58 = vadd.f32 %v18739_v19, %v7064_v55  ;;  %v6945_v2 = vadd.f32 %v6944_v29, %v6896_v44 }
 0x89f   :  { %v7040_v14 = vpop.f32.mrf.mxu3  ;;  %v6991_v3 = vpop.f32.mrf.mxu2 }
 0x8a0   :  { %v18810_v0 = vmax.f32 %v7081_v58, 0.0  ;;  %v6992_v13 = vadd.f32 %v6991_v3, %v6943_v8 }
 0x8a2   :  { %v7112_v60 = vadd.f32 %v7111_v50, %v18810_v0  ;;  %v7135_v42 = vmul.f32 %v18810_v0, %v18810_v0  ;;  %v7041_v25 = vadd.f32 %v7040_v14, %v6992_v13 }
 0x8a4   :  { %v7150_v7 = vadd.f32 %v7149_v9, %v7135_v42  ;;  %v7065_v10 = vadd.f32 %v7041_v25, %v18688_v34  ;;  %v6903_v9 = vpop.f32.mrf.mxu0 }
 0x8a5   :  { %v6947_v31 = vpop.f32.mrf.mxu1  ;;  %v6904_v49 = vadd.f32 %v6903_v9, %v18720_v43 }
 0x8a6   :  { %v7082_v27 = vadd.f32 %v18739_v19, %v7065_v10  ;;  %v6948_v20 = vadd.f32 %v6947_v31, %v6899_v6 }
 0x8a7   :  { %v7042_v54 = vpop.f32.mrf.mxu3  ;;  %v6993_v17 = vpop.f32.mrf.mxu2 }
 0x8a8   :  { %v18818_v30 = vmax.f32 %v7082_v27, 0.0  ;;  %v6994_v1 = vadd.f32 %v6993_v17, %v6945_v2 }
 0x8aa   :  { %v7113_v11 = vadd.f32 %v7112_v60, %v18818_v30  ;;  %v7136_v59 = vmul.f32 %v18818_v30, %v18818_v30  ;;  %v7043_v18 = vadd.f32 %v7042_v54, %v6994_v1 }
 0x8ac   :  { %v7151_v52 = vadd.f32 %v7150_v7, %v7136_v59  ;;  %v7066_v34 = vadd.f32 %v7043_v18, %v18695_v4  ;;  %v6905_v54 = vpop.f32.mrf.mxu0 }
 0x8ad   :  { %v6949_v45 = vpop.f32.mrf.mxu1  ;;  %v6906_v43 = vadd.f32 %v6905_v54, %v18726_v12 }
 0x8ae   :  { %v7083_v26 = vadd.f32 %v18739_v19, %v7066_v34  ;;  %v6950_v61 = vadd.f32 %v6949_v45, %v6901_v5 }
 0x8af   :  { %v7045_v32 = vpop.f32.mrf.mxu3  ;;  %v6996_v48 = vpop.f32.mrf.mxu2 }
 0x8b0   :  { %v18826_v21 = vmax.f32 %v7083_v26, 0.0  ;;  %v6997_v47 = vadd.f32 %v6996_v48, %v6948_v20 }
 0x8b2   :  { %v7114_v23 = vadd.f32 %v7113_v11, %v18826_v21  ;;  %v7137_v51 = vmul.f32 %v18826_v21, %v18826_v21  ;;  %v7046_v22 = vadd.f32 %v7045_v32, %v6997_v47 }
 0x8b4   :  { %v7152_v50 = vadd.f32 %v7151_v52, %v7137_v51  ;;  %v7067_v4 = vadd.f32 %v7046_v22, %v18709_v62 }
 0x8b5   :  { %v6952_v8 = vpop.f32.mrf.mxu1 }
 0x8b6   :  { %v7084_v56 = vadd.f32 %v18739_v19, %v7067_v4  ;;  %v6953_v25 = vadd.f32 %v6952_v8, %v6904_v49 }
 0x8b7   :  { %v7047_v24 = vpop.f32.mrf.mxu3  ;;  %v6998_v55 = vpop.f32.mrf.mxu2 }
 0x8b8   :  { %v18834_v14 = vmax.f32 %v7084_v56, 0.0  ;;  %v6999_v58 = vadd.f32 %v6998_v55, %v6950_v61 }
 0x8ba   :  { %v7115_v29 = vadd.f32 %v7114_v23, %v18834_v14  ;;  %v7138_v3 = vmul.f32 %v18834_v14, %v18834_v14  ;;  %v7048_v13 = vadd.f32 %v7047_v24, %v6999_v58 }
 0x8bc   :  { %v7153_v60 = vadd.f32 %v7152_v50, %v7138_v3  ;;  %v7068_v62 = vadd.f32 %v7048_v13, %v18718_v33 }
 0x8bd   :  { %v6954_v17 = vpop.f32.mrf.mxu1 }
 0x8be   :  { %v7085_v42 = vadd.f32 %v18739_v19, %v7068_v62  ;;  %v6955_v59 = vadd.f32 %v6954_v17, %v6906_v43  ;;  %v7210_v43 = vperm.slane %v20186_v63, 4 }
 0x8bf   :  { %v7001_v28 = vpop.f32.mrf.mxu2  ;;  %v7050_v44 = vpop.f32.mrf.mxu3 }
 0x8c0   :  { %v18842_v7 = vmax.f32 %v7085_v42, 0.0  ;;  %v7002_v10 = vadd.f32 %v7001_v28, %v6953_v25 }
 0x8c2   :  { %v7116_v27 = vadd.f32 %v7115_v29, %v18842_v7  ;;  %v7139_v2 = vmul.f32 %v18842_v7, %v18842_v7  ;;  %v7051_v31 = vadd.f32 %v7050_v44, %v7002_v10 }
 0x8c4   :  { %v7154_v1 = vadd.f32 %v7153_v60, %v7139_v2  ;;  %v7069_v33 = vadd.f32 %v7051_v31, %v18724_v41 }
 0x8c6   :  { %v7086_v11 = vadd.f32 %v18739_v19, %v7069_v33 }
 0x8c7   :  { %v7003_v18 = vpop.f32.mrf.mxu2  ;;  %v7052_v34 = vpop.f32.mrf.mxu3 }
 0x8c8   :  { %v18850_v6 = vmax.f32 %v7086_v11, 0.0  ;;  %v7004_v52 = vadd.f32 %v7003_v18, %v6955_v59 }
 0x8ca   :  { %v7117_v35 = vadd.f32 %v7116_v27, %v18850_v6  ;;  %v7140_v32 = vmul.f32 %v18850_v6, %v18850_v6  ;;  %v7053_v26 = vadd.f32 %v7052_v34, %v7004_v52 }
 0x8cc   :  { %v7155_v20 = vadd.f32 %v7154_v1, %v7140_v32  ;;  %v7070_v12 = vadd.f32 %v7053_v26, %v18730_v38  ;;  %v7227_v1 = vperm.slane %v20186_v63, 5 }
 0x8ce   :  { %v7087_v48 = vadd.f32 %v18739_v19, %v7070_v12 }
 0x8d0   :  { %v18857_v41 = vmax.f32 %v7087_v48, 0.0 }
 0x8d2   :  { %v7118_v45 = vadd.f32 %v7117_v35, %v18857_v41  ;;  %v7141_v47 = vmul.f32 %v18857_v41, %v18857_v41 }
 0x8d4   :  { %v7119_v23 = vrot.slane %v7118_v45, 4  ;;  %v7156_v51 = vadd.f32 %v7155_v20, %v7141_v47 }
 0x8d6   :  { %v7120_v22 = vadd.f32 %v7119_v23, %v7118_v45  ;;  %v7157_v5 = vrot.slane %v7156_v51, 4 }
 0x8d8   :  { %v7121_v50 = vrot.slane %v7120_v22, 2  ;;  %v7158_v4 = vadd.f32 %v7157_v5, %v7156_v51 }
 0x8da   :  { %v7122_v24 = vadd.f32 %v7121_v50, %v7120_v22  ;;  %v7159_v56 = vrot.slane %v7158_v4, 2 }
 0x8dc   :  { %v7123_v61 = vrot.slane %v7122_v24, 1  ;;  %v7160_v9 = vadd.f32 %v7159_v56, %v7158_v4 }
 0x8de   :  { %v7124_v38 = vadd.f32 %v7123_v61, %v7122_v24  ;;  %v7161_v55 = vrot.slane %v7160_v9, 1 }
 0x8e0   :  { %v7125_v19 = vmul.f32 0.0078125, %v7124_v38  ;;  %v7162_v58 = vadd.f32 %v7161_v55, %v7160_v9 }
 0x8e2   :  { %v7163_v8 = vmul.f32 0.0078125, %v7162_v58  ;;  %v7164_v29 = vmul.f32 %v7125_v19, %v7125_v19  ;;  %v7170_v3 = vsub.f32 %v18755_v15, %v7125_v19  ;;  %v7171_v13 = vsub.f32 %v18770_v46, %v7125_v19 }
 0x8e3   :  { %v7172_v49 = vsub.f32 %v18778_v37, %v7125_v19  ;;  %v7173_v62 = vsub.f32 %v18786_v57, %v7125_v19  ;;  %v7174_v42 = vsub.f32 %v18794_v36, %v7125_v19  ;;  %v7175_v25 = vsub.f32 %v18802_v53, %v7125_v19 }
 0x8e4   :  { %v7165_v60 = vsub.f32 %v7163_v8, %v7164_v29  ;;  %v7176_v28 = vsub.f32 %v18810_v0, %v7125_v19  ;;  %v7177_v44 = vsub.f32 %v18818_v30, %v7125_v19  ;;  %v7178_v10 = vsub.f32 %v18826_v21, %v7125_v19 }
 0x8e5   :  { %v7179_v54 = vsub.f32 %v18834_v14, %v7125_v19  ;;  %v7180_v46 = vsub.f32 %v18842_v7, %v7125_v19  ;;  %v7181_v37 = vsub.f32 %v18850_v6, %v7125_v19  ;;  %v7182_v27 = vsub.f32 %v18857_v41, %v7125_v19 }
 0x8e6   :  { %v7166_v15 = vmax.f32 %v7165_v60, 0.0  ;;  %v7167_v21 = vsub.f32 %v18749_v39, %v7125_v19  ;;  %v7168_v14 = vsub.f32 %v18746_v16, %v7125_v19  ;;  %v7169_v7 = vsub.f32 %v18751_v40, %v7125_v19 }
 0x8e8   :  { %v7183_v57 = vadd.f32 1e-05, %v7166_v15 }
 0x8ea   :  { %14467 = vrsqrt.f32 %v7183_v57  ;;  %vm7190_vm9 = vweird.f32 %v7183_v57 }
 0x8f0   :  { %v14468_v36 = vpop.eup %14467 }
 0x8f1   :  { %v7185_v2 = vmul.f32 %v14468_v36, %v7183_v57  ;;  %vm7191_vm8 = vweird.f32 %v14468_v36 }
 0x8f2   :  { %vm7192_vm10 = vmor %vm7190_vm9, %vm7191_vm8 }
 0x8f3   :  { %v7186_v53 = vmul.f32 %v14468_v36, %v7185_v2 }
 0x8f5   :  { %v7187_v31 = vmul.f32 0.5, %v7186_v53 }
 0x8f7   :  { %v7188_v0 = vsub.f32 1.5, %v7187_v31 }
 0x8f9   :  { %v7189_v30 = vmul.f32 %v14468_v36, %v7188_v0 }
 0x8fb   :  { %v7193_v17 = vsel %vm7192_vm10, %v14468_v36, %v7189_v30 }
 0x8fc   :  { %v7194_v33 = vmul.f32 %v7193_v17, %v7167_v21  ;;  %v7195_v11 = vmul.f32 %v7193_v17, %v7168_v14  ;;  %v7196_v59 = vmul.f32 %v7193_v17, %v7169_v7  ;;  %v7197_v18 = vmul.f32 %v7193_v17, %v7170_v3 }
 0x8fd   :  { %v7198_v6 = vmul.f32 %v7193_v17, %v7171_v13  ;;  %v7199_v52 = vmul.f32 %v7193_v17, %v7172_v49  ;;  %v7200_v34 = vmul.f32 %v7193_v17, %v7173_v62  ;;  %v7201_v35 = vmul.f32 %v7193_v17, %v7174_v42 }
 0x8fe   :  { %v7202_v32 = vmul.f32 %v7193_v17, %v7175_v25  ;;  %v7203_v39 = vmul.f32 %v7193_v17, %v7176_v28  ;;  %v7204_v26 = vmul.f32 %v7193_v17, %v7177_v44  ;;  %v7205_v16 = vmul.f32 %v7193_v17, %v7178_v10 }
 0x8ff   :  { %v7206_v20 = vmul.f32 %v7193_v17, %v7179_v54  ;;  %v7207_v40 = vmul.f32 %v7193_v17, %v7180_v46  ;;  %v7208_v12 = vmul.f32 %v7193_v17, %v7181_v37  ;;  %v7209_v48 = vmul.f32 %v7193_v17, %v7182_v27 }
 0x900   :  { %v7211_v41 = vmul.f32 %v7210_v43, %v7194_v33  ;;  %v7212_v45 = vmul.f32 %v7210_v43, %v7195_v11  ;;  %v7213_v47 = vmul.f32 %v7210_v43, %v7196_v59  ;;  %v7214_v23 = vmul.f32 %v7210_v43, %v7197_v18 }
 0x901   :  { %v7215_v51 = vmul.f32 %v7210_v43, %v7198_v6  ;;  %v7216_v22 = vmul.f32 %v7210_v43, %v7199_v52  ;;  %v7217_v5 = vmul.f32 %v7210_v43, %v7200_v34  ;;  %v7218_v50 = vmul.f32 %v7210_v43, %v7201_v35 }
 0x902   :  { %v7219_v4 = vmul.f32 %v7210_v43, %v7202_v32  ;;  %v7220_v24 = vmul.f32 %v7210_v43, %v7203_v39  ;;  %v7221_v56 = vmul.f32 %v7210_v43, %v7204_v26  ;;  %v7222_v61 = vmul.f32 %v7210_v43, %v7205_v16 }
 0x903   :  { %v7223_v9 = vmul.f32 %v7210_v43, %v7206_v20  ;;  %v7224_v38 = vmul.f32 %v7210_v43, %v7207_v40  ;;  %v7225_v55 = vmul.f32 %v7210_v43, %v7208_v12  ;;  %v7226_v19 = vmul.f32 %v7210_v43, %v7209_v48 }
 0x904   :  { %v18880_v58 = vadd.f32 %v7227_v1, %v7211_v41  ;;  %v7229_v8 = vadd.f32 %v7227_v1, %v7212_v45  ;;  %v7230_v29 = vadd.f32 %v7227_v1, %v7213_v47  ;;  %v7231_v3 = vadd.f32 %v7227_v1, %v7214_v23 }
 0x905   :  { %v7232_v13 = vadd.f32 %v7227_v1, %v7215_v51  ;;  %v18882_v49 = vadd.f32 %v7227_v1, %v7216_v22  ;;  %v18884_v60 = vadd.f32 %v7227_v1, %v7217_v5  ;;  %v18886_v62 = vadd.f32 %v7227_v1, %v7218_v50 }
 0x906   :  { %v18888_v42 = vadd.f32 %v7227_v1, %v7219_v4  ;;  %v7237_v25 = vadd.f32 %v7227_v1, %v7220_v24  ;;  %v7238_v28 = vadd.f32 %v7227_v1, %v7221_v56  ;;  %v7239_v44 = vadd.f32 %v7227_v1, %v7222_v61 }
 0x907   :  { %v7240_v10 = vadd.f32 %v7227_v1, %v7223_v9  ;;  %v18890_v54 = vadd.f32 %v7227_v1, %v7224_v38  ;;  %v18892_v15 = vadd.f32 %v7227_v1, %v7225_v55  ;;  %v18894_v46 = vadd.f32 %v7227_v1, %v7226_v19 }
 0x908   :  { %14569 = dma.done.wait [#allocation5 + $0x1], 25600 }
 0x909   :  { %14570 = vsyncadd [#allocation5 + $0x1], 4294941696  ;;  %v18896_v37 = vpack.c.bf16 %v7229_v8, %v7229_v8  ;;  %v18898_v27 = vpack.c.bf16 %v7230_v29, %v7230_v29  ;;  %v18900_v57 = vpack.c.bf16 %v7231_v3, %v7231_v3  ;;  %v18902_v36 = vpack.c.bf16 %v7232_v13, %v7232_v13  ;;  %v14176_v26 = vld [vmem:[#allocation3 + $0x178] sm:$0xff]  ;;  %v14175_v23 = vld [vmem:[#allocation3 + $0x170] sm:$0xff] }
 0x90a   :  { %v18904_v2 = vpack.c.bf16 %v7237_v25, %v7237_v25  ;;  %vm7406_vm11 = vcmask 1041408   ;;  %v18910_v21 = vpack.c.bf16 %v7238_v28, %v7238_v28  ;;  %v18912_v14 = vpack.c.bf16 %v7239_v44, %v7239_v44  ;;  %7967 = vmatpush.bf16.msra.mxu0 %v14176_v26  ;;  %v14174_v25 = vld [vmem:[#allocation3 + $0x168] sm:$0xff] }
 0x90b   :  { %v7271_v53 = vunpack.c.l.b16 %v18896_v37  ;;  %v7272_v31 = vunpack.c.l.b16 %v18898_v27  ;;  %v7273_v0 = vunpack.c.l.b16 %v18900_v57  ;;  %v7547_v30 = vunpack.c.l.b16 %v18902_v36 }
 0x90c   :  { %v18914_v7 = vpack.c.bf16 %v7240_v10, %v7240_v10  ;;  %v7275_v17 = vunpack.c.l.b16 %v18904_v2  ;;  %vm7410_vm12 = vcmask 1045508   ;;  %vm7414_vm13 = vcmask 1043456  }
 0x90d   :  { %v18917_v43 = vpack.c.b16 %v7271_v53, %v7271_v53  ;;  %v18919_v1 = vpack.c.b16 %v7272_v31, %v7272_v31  ;;  %v18921_v33 = vpack.c.b16 %v7273_v0, %v7273_v0  ;;  %v18923_v11 = vpack.c.b16 %v7547_v30, %v7547_v30 }
 0x90e   :  { %v7276_v59 = vunpack.c.l.b16 %v18910_v21  ;;  %v7277_v18 = vunpack.c.l.b16 %v18912_v14  ;;  %v18927_v6 = vpack.c.b16 %v7275_v17, %v7275_v17  ;;  %v7548_v52 = vunpack.c.l.b16 %v18914_v7  ;;  %7968 = vmatpush.bf16.msra.mxu0 %v14175_v23 }
 0x90f   :  { %v7294_v34 = vshrl.u32 %v18917_v43, 16  ;;  %v7296_v35 = vshll.u32 %v18917_v43, 16  ;;  %v7301_v32 = vshrl.u32 %v18919_v1, 16  ;;  %v7303_v39 = vshll.u32 %v18919_v1, 16 }
 0x910   :  { %v7308_v16 = vshrl.u32 %v18921_v33, 16  ;;  %v7310_v20 = vshll.u32 %v18921_v33, 16  ;;  %v12542_v40 = vrot.slane %v18917_v43, 5  ;;  %v18937_v12 = vpack.c.b16 %v7276_v59, %v7276_v59 }
 0x911   :  { %v7298_v48 = vrot.slane %v7296_v35, 1  ;;  %v7305_v41 = vrot.slane %v7303_v39, 1  ;;  %v7353_v45 = vrot.slane %v7294_v34, 1  ;;  %v18939_v47 = vpack.c.b16 %v7277_v18, %v7277_v18 }
 0x912   :  { %v7312_v51 = vrot.slane %v7310_v20, 1  ;;  %v7354_v22 = vrot.slane %v7296_v35, 2  ;;  %v7356_v5 = vrot.slane %v7301_v32, 1  ;;  %v7357_v50 = vrot.slane %v7303_v39, 2  ;;  %7969 = vmatpush.bf16.msra.mxu0 %v14174_v25 }
 0x913   :  { %v7299_v4 = vor.u32 %v7298_v48, %v7294_v34  ;;  %v7306_v24 = vor.u32 %v7305_v41, %v7301_v32  ;;  %v7359_v56 = vrot.slane %v7308_v16, 1  ;;  %v7360_v61 = vrot.slane %v7310_v20, 2 }
 0x914   :  { %v7313_v9 = vor.u32 %v7312_v51, %v7308_v16  ;;  %v7355_v38 = vor.u32 %v7354_v22, %v7353_v45  ;;  %v7358_v55 = vor.u32 %v7357_v50, %v7356_v5  ;;  %v12543_v19 = vrot.slane %v18919_v1, 5 }
 0x915   :  { %v7361_v8 = vor.u32 %v7360_v61, %v7359_v56  ;;  %v7385_v29 = vrot.slane %v7299_v4, 6  ;;  %v7388_v3 = vrot.slane %v7306_v24, 6  ;;  %v12544_v13 = vrot.slane %v18921_v33, 5 }
 0x916   :  { %v7387_v28 = vrot.slane %v7355_v38, 2  ;;  %v7390_v44 = vrot.slane %v7358_v55, 2  ;;  %v7391_v10 = vrot.slane %v7313_v9, 6  ;;  %v7552_v53 = vshrl.u32 %v18923_v11, 16  ;;  %v14172_v9 = vld [vmem:[#allocation3 + $0x158] sm:$0xff] }
 0x917   :  { %v7393_v31 = vrot.slane %v7361_v8, 2  ;;  %v7418_v0 = vsel %vm7406_vm11, %v18896_v37, %v7385_v29  ;;  %v7425_v30 = vsel %vm7406_vm11, %v18898_v27, %v7388_v3  ;;  %v7554_v17 = vshll.u32 %v18923_v11, 16  ;;  %v14173_v27 = vld [vmem:[#allocation3 + $0x160] sm:$0xff] }
 0x918   :  { %v7421_v59 = vsel %vm7410_vm12, %v12542_v40, %v7387_v28  ;;  %v7428_v18 = vsel %vm7410_vm12, %v12543_v19, %v7390_v44  ;;  %v7432_v34 = vsel %vm7406_vm11, %v18900_v57, %v7391_v10  ;;  %v7567_v35 = vrot.slane %v7552_v53, 1  ;;  %7970 = vmatpush.bf16.msra.mxu0 %v14173_v27 }
 0x919   :  { %v18954_v32 = vsel %vm7414_vm13, %v7418_v0, %v7421_v59  ;;  %v18957_v39 = vsel %vm7414_vm13, %v7425_v30, %v7428_v18  ;;  %v7435_v37 = vsel %vm7410_vm12, %v12544_v13, %v7393_v31  ;;  %v7556_v26 = vrot.slane %v7554_v17, 1  ;;  %v14171_v31 = vld [vmem:[#allocation3 + $0x150] sm:$0xff] }
 0x91a   :  { %v18961_v16 = vsel %vm7414_vm13, %v7432_v34, %v7435_v37  ;;  %v7568_v20 = vrot.slane %v7554_v17, 2  ;;  %v12549_v40 = vrot.slane %v18923_v11, 5  ;;  %7676 = vst [vmem:[#allocation1] ss:$4 sm:$0xff] %v18954_v32  ;;  %v7322_v57 = vshrl.u32 %v18927_v6, 16 }
 0x91b   :  { %v7557_v48 = vor.u32 %v7556_v26, %v7552_v53  ;;  %7678 = vst [vmem:[#allocation1 + $0x1] ss:$4 sm:$0xff] %v18957_v39  ;;  %v7324_v41 = vshll.u32 %v18927_v6, 16  ;;  %v7329_v45 = vshrl.u32 %v18937_v12, 16  ;;  %v7331_v23 = vshll.u32 %v18937_v12, 16 }
 0x91c   :  { %v7569_v51 = vor.u32 %v7568_v20, %v7567_v35  ;;  %7680 = vst [vmem:[#allocation1 + $0x2] ss:$4 sm:$0xff] %v18961_v16  ;;  %v7336_v22 = vshrl.u32 %v18939_v47, 16  ;;  %v7338_v5 = vshll.u32 %v18939_v47, 16  ;;  %v7365_v50 = vrot.slane %v7322_v57, 1  ;;  %7971 = vmatpush.bf16.msra.mxu0 %v14172_v9 }
 0x91d   :  { %v7575_v4 = vrot.slane %v7557_v48, 6  ;;  %v7326_v24 = vrot.slane %v7324_v41, 1  ;;  %v7333_v56 = vrot.slane %v7331_v23, 1  ;;  %v7366_v61 = vrot.slane %v7324_v41, 2  ;;  %v14170_v41 = vld [vmem:[#allocation3 + $0x148] sm:$0xff] }
 0x91e   :  { %v7577_v38 = vrot.slane %v7569_v51, 2  ;;  %v7340_v55 = vrot.slane %v7338_v5, 1  ;;  %v7368_v19 = vrot.slane %v7329_v45, 1  ;;  %v7369_v8 = vrot.slane %v7331_v23, 2 }
 0x91f   :  { %v7583_v29 = vsel %vm7406_vm11, %v18902_v36, %v7575_v4  ;;  %v7327_v3 = vor.u32 %v7326_v24, %v7322_v57  ;;  %v7334_v13 = vor.u32 %v7333_v56, %v7329_v45  ;;  %v7367_v25 = vor.u32 %v7366_v61, %v7365_v50  ;;  %v14169_v50 = vld [vmem:[#allocation3 + $0x140] sm:$0xff] }
 0x920   :  { %v7586_v28 = vsel %vm7410_vm12, %v12549_v40, %v7577_v38  ;;  %v7341_v44 = vor.u32 %v7340_v55, %v7336_v22  ;;  %v7370_v10 = vor.u32 %v7369_v8, %v7368_v19  ;;  %v7371_v53 = vrot.slane %v7336_v22, 1  ;;  %7972 = vmatpush.bf16.msra.mxu0 %v14171_v31  ;;  %v14182_v31 = vld [vmem:[#allocation3 + $0x1a8] sm:$0xff] }
 0x921   :  { %v18977_v0 = vsel %vm7414_vm13, %v7583_v29, %v7586_v28  ;;  %v7372_v30 = vrot.slane %v7338_v5, 2  ;;  %v7397_v17 = vrot.slane %v7327_v3, 6  ;;  %v12546_v59 = vrot.slane %v18927_v6, 5  ;;  %v14184_v3 = vld [vmem:[#allocation3 + $0x1b8] sm:$0xff] }
 0x922   :  { %7682 = vst [vmem:[#allocation1 + $0x3] ss:$4 sm:$0xff] %v18977_v0  ;;  %v7399_v36 = vrot.slane %v7367_v25, 2  ;;  %v7400_v18 = vrot.slane %v7334_v13, 6  ;;  %v12547_v34 = vrot.slane %v18937_v12, 5  ;;  %v7402_v35 = vrot.slane %v7370_v10, 2 }
 0x923   :  { %v7373_v37 = vor.u32 %v7372_v30, %v7371_v53  ;;  %v7403_v26 = vrot.slane %v7341_v44, 6  ;;  %v12548_v27 = vrot.slane %v18939_v47, 5  ;;  %v7446_v20 = vsel %vm7406_vm11, %v18904_v2, %v7397_v17  ;;  %v14183_v10 = vld [vmem:[#allocation3 + $0x1b0] sm:$0xff]  ;;  %v14181_v30 = vld [vmem:[#allocation3 + $0x1a0] sm:$0xff]  ;;  %v14180_v17 = vld [vmem:[#allocation3 + $0x198] sm:$0xff] }
 0x924   :  { %v7449_v40 = vsel %vm7410_vm12, %v12546_v59, %v7399_v36  ;;  %v18989_v57 = vpack.c.b16 %v7548_v52, %v7548_v52  ;;  %v7453_v45 = vsel %vm7406_vm11, %v18910_v21, %v7400_v18  ;;  %v7456_v23 = vsel %vm7410_vm12, %v12547_v34, %v7402_v35  ;;  %7973 = vmatpush.bf16.msra.mxu0 %v14170_v41  ;;  %v14179_v36 = vld [vmem:[#allocation3 + $0x190] sm:$0xff]  ;;  %v14144_v18 = vld [vmem:[#allocation3 + $0x78] sm:$0xff]  ;;  %v14178_v34 = vld [vmem:[#allocation3 + $0x188] sm:$0xff] }
 0x925   :  { %v7405_v48 = vrot.slane %v7373_v37, 2  ;;  %v18997_v2 = vsel %vm7414_vm13, %v7446_v20, %v7449_v40  ;;  %v7460_v5 = vsel %vm7406_vm11, %v18912_v14, %v7403_v26  ;;  %v19004_v38 = vsel %vm7414_vm13, %v7453_v45, %v7456_v23  ;;  %8366 = vmatpush.bf16.msra.mxu3 %v14144_v18  ;;  %v14135_v35 = vld [vmem:[#allocation3 + $0x30] sm:$0xff]  ;;  %v14208_v37 = vld [vmem:[#allocation3 + $0x278] sm:$0xff]  ;;  %v14134_v40 = vld [vmem:[#allocation3 + $0x28] sm:$0xff] }
 0x926   :  { %v7559_v51 = vshrl.u32 %v18989_v57, 16  ;;  %v7561_v22 = vshll.u32 %v18989_v57, 16  ;;  %v12550_v21 = vrot.slane %v18989_v57, 5  ;;  %v14143_v26 = vld [vmem:[#allocation3 + $0x70] sm:$0xff]  ;;  %8043 = vmatpush.bf16.msra.mxu1 %v14208_v37  ;;  %v14192_v20 = vld [vmem:[#allocation3 + $0x1f8] sm:$0xff]  ;;  %v14142_v41 = vld [vmem:[#allocation3 + $0x68] sm:$0xff]  ;;  %v7246_v23 = vpack.c.bf16 %v18880_v58, %v18880_v58 }
 0x927   :  { %v7463_v52 = vsel %vm7410_vm12, %v12548_v27, %v7405_v48  ;;  %v14177_v27 = vld [vmem:[#allocation3 + $0x180] sm:$0xff]  ;;  %v14207_v48 = vld [vmem:[#allocation3 + $0x270] sm:$0xff]  ;;  %v14138_v37 = vld [vmem:[#allocation3 + $0x48] sm:$0xff] }
 0x928   :  { %v7563_v4 = vrot.slane %v7561_v22, 1  ;;  %v7570_v24 = vrot.slane %v7559_v51, 1  ;;  %v7571_v56 = vrot.slane %v7561_v22, 2  ;;  %v19011_v14 = vsel %vm7414_vm13, %v7460_v5, %v7463_v52  ;;  %7974 = vmatpush.bf16.msra.mxu0 %v14169_v50  ;;  %v14191_v45 = vld [vmem:[#allocation3 + $0x1f0] sm:$0xff]  ;;  %v14190_v22 = vld [vmem:[#allocation3 + $0x1e8] sm:$0xff]  ;;  %v14133_v5 = vld [vmem:[#allocation3 + $0x20] sm:$0xff] }
 0x929   :  { %v7695_v61 = vld.sshfl [vmem:[#allocation1] sm:$0xff pattern:$0x73625140]  ;;  %v7696_v9 = vld.sshfl [vmem:[#allocation1 + $0x8] sm:$0xff pattern:$0x73625140]  ;;  %8367 = vmatpush.bf16.msra.mxu3 %v14143_v26 }
 0x92a   :  { %v19006_v55 = vld.sshfl [vmem:[#allocation1 + $0x10] sm:$0xff pattern:$0x73625140]  ;;  %v19008_v19 = vld.sshfl [vmem:[#allocation1 + $0x18] sm:$0xff pattern:$0x73625140]  ;;  %v7564_v8 = vor.u32 %v7563_v4, %v7559_v51  ;;  %v7572_v29 = vor.u32 %v7571_v56, %v7570_v24  ;;  %8044 = vmatpush.bf16.msra.mxu1 %v14207_v48  ;;  %v7270_v51 = vunpack.c.l.b16 %v7246_v23 }
 0x92b   :  { %7700 = vst [vmem:[#allocation1] ss:$4 sm:$0xff] %v18997_v2  ;;  %7975 = vmatmul.bf16.vlgmr.msra.gmra.mxu0 %v7695_v61  ;;  %v14206_v52 = vld [vmem:[#allocation3 + $0x268] sm:$0xff]  ;;  %v14141_v50 = vld [vmem:[#allocation3 + $0x60] sm:$0xff]  ;;  %v14132_v24 = vld [vmem:[#allocation3 + $0x18] sm:$0xff] }
 0x92c   :  { %v7578_v13 = vrot.slane %v7564_v8, 6  ;;  %v7580_v25 = vrot.slane %v7572_v29, 2  ;;  %7701 = vst [vmem:[#allocation1 + $0x1] ss:$4 sm:$0xff] %v19004_v38  ;;  %7986 = vmatpush.bf16.msrb.mxu0 %v14184_v3  ;;  %v19025_v4 = vpack.c.b16 %v7270_v51, %v7270_v51  ;;  %v14205_v56 = vld [vmem:[#allocation3 + $0x260] sm:$0xff] }
 0x92d   :  { %7702 = vst [vmem:[#allocation1 + $0x2] ss:$4 sm:$0xff] %v19011_v14  ;;  %8368 = vmatpush.bf16.msra.mxu3 %v14142_v41  ;;  %v14189_v58 = vld [vmem:[#allocation3 + $0x1e0] sm:$0xff]  ;;  %v14186_v41 = vld [vmem:[#allocation3 + $0x1c8] sm:$0xff] }
 0x92e   :  { %v7590_v28 = vsel %vm7406_vm11, %v18914_v7, %v7578_v13  ;;  %v7593_v44 = vsel %vm7410_vm12, %v12550_v21, %v7580_v25  ;;  %v14136_v7 = vld [vmem:[#allocation3 + $0x38] sm:$0xff]  ;;  %8045 = vmatpush.bf16.msra.mxu1 %v14206_v52  ;;  %v7287_v61 = vshrl.u32 %v19025_v4, 16  ;;  %v7289_v8 = vshll.u32 %v19025_v4, 16  ;;  %v14137_v51 = vld [vmem:[#allocation3 + $0x40] sm:$0xff] }
 0x92f   :  { %v19020_v53 = vsel %vm7414_vm13, %v7590_v28, %v7593_v44  ;;  %8347 = vmatpush.bf16.msra.mxu2 %v14136_v7  ;;  %v14140_v21 = vld [vmem:[#allocation3 + $0x58] sm:$0xff]  ;;  %v14131_v28 = vld [vmem:[#allocation3 + $0x10] sm:$0xff]  ;;  %v12541_v7 = vrot.slane %v19025_v4, 5  ;;  %v14185_v52 = vld [vmem:[#allocation3 + $0x1c0] sm:$0xff] }
 0x930   :  { %7703 = vst [vmem:[#allocation1 + $0x3] ss:$4 sm:$0xff] %v19020_v53  ;;  %7987 = vmatpush.bf16.msrb.mxu0 %v14183_v10  ;;  %v7291_v3 = vrot.slane %v7289_v8, 1  ;;  %v7351_v13 = vrot.slane %v7289_v8, 2  ;;  %v14204_v44 = vld [vmem:[#allocation3 + $0x258] sm:$0xff]  ;;  %v14139_v10 = vld [vmem:[#allocation3 + $0x50] sm:$0xff] }
 0x931   :  { %8369 = vmatpush.bf16.msra.mxu3 %v14141_v50  ;;  %v14168_v50 = vld [vmem:[#allocation3 + $0x138] sm:$0xff] }
 0x932   :  { %8046 = vmatpush.bf16.msra.mxu1 %v14205_v56  ;;  %v14200_v56 = vld [vmem:[#allocation3 + $0x238] sm:$0xff] }
 0x933   :  { %8348 = vmatpush.bf16.msra.mxu2 %v14135_v35  ;;  %v14203_v35 = vld [vmem:[#allocation3 + $0x250] sm:$0xff]  ;;  %v14160_v8 = vld [vmem:[#allocation3 + $0xf8] sm:$0xff] }
 0x934   :  { %7988 = vmatpush.bf16.msrb.mxu0 %v14182_v31 }
 0x935   :  { %8370 = vmatpush.bf16.msra.mxu3 %v14140_v21  ;;  %v14201_v21 = vld [vmem:[#allocation3 + $0x240] sm:$0xff] }
 0x936   :  { %8047 = vmatpush.bf16.msra.mxu1 %v14204_v44 }
 0x937   :  { %v7712_v59 = vld.sshfl [vmem:[#allocation1] sm:$0xff pattern:$0x73625140]  ;;  %8349 = vmatpush.bf16.msra.mxu2 %v14134_v40  ;;  %v19029_v29 = vld.sshfl [vmem:[#allocation1 + $0x18] sm:$0xff pattern:$0x73625140]  ;;  %v19042_v40 = vpack.c.bf16 %v18888_v42, %v18888_v42 }
 0x938   :  { %7989 = vmatpush.bf16.msrb.mxu0 %v14181_v30  ;;  %v7713_v25 = vld.sshfl [vmem:[#allocation1 + $0x8] sm:$0xff pattern:$0x73625140]  ;;  %v19031_v31 = vld.sshfl [vmem:[#allocation1 + $0x10] sm:$0xff pattern:$0x73625140]  ;;  %v7292_v30 = vor.u32 %v7291_v3, %v7287_v61 }
 0x939   :  { %8064 = vst [vmem:[#allocation1 + $0x1] ss:$4 sm:$0xff] %v18954_v32  ;;  %8371 = vmatpush.bf16.msra.mxu3 %v14139_v10  ;;  %v14187_v32 = vld [vmem:[#allocation3 + $0x1d0] sm:$0xff]  ;;  %v7274_v48 = vunpack.c.l.b16 %v19042_v40  ;;  %v14216_v42 = vld [vmem:[#allocation3 + $0x2b8] sm:$0xff]  ;;  %v19065_v10 = vrot.slane %v18923_v11, 2 }
 0x93a   :  { %8066 = vst [vmem:[#allocation1 + $0x2] ss:$4 sm:$0xff] %v18957_v39  ;;  %8048 = vmatpush.bf16.msra.mxu1 %v14203_v35 }
 0x93b   :  { %7980 = vmatmul.bf16.gmra.mxu0 %v7712_v59  ;;  %8350 = vmatpush.bf16.msra.mxu2 %v14133_v5  ;;  %v14188_v59 = vld [vmem:[#allocation3 + $0x1d8] sm:$0xff]  ;;  %8068 = vst [vmem:[#allocation1 + $0x3] ss:$4 sm:$0xff] %v18961_v16  ;;  %v19046_v5 = vpack.c.b16 %v7274_v48, %v7274_v48  ;;  %v19078_v48 = vpack.c.bf16 %v18882_v49, %v18882_v49 }
 0x93c   :  { %7990 = vmatpush.bf16.msrb.mxu0 %v14180_v17  ;;  %7694 = vst [vmem:[#allocation1 + $0x23] ss:$4 sm:$0xff] %v19065_v10 }
 0x93d   :  { %8372 = vmatpush.bf16.msra.mxu3 %v14138_v37  ;;  %v7317_v44 = vshll.u32 %v19046_v5, 16 }
 0x93f   :  { %8351 = vmatpush.bf16.msra.mxu2 %v14132_v24  ;;  %v19049_v24 = vrot.slane %v18919_v1, 2 }
 0x940   :  { %7991 = vmatpush.bf16.msrb.mxu0 %v14179_v36  ;;  %v7382_v36 = vrot.slane %v7292_v30, 6 }
 0x941   :  { %8373 = vmatpush.bf16.msra.mxu3 %v14137_v51  ;;  %7688 = vst [vmem:[#allocation1 + $0x21] ss:$4 sm:$0xff] %v19049_v24  ;;  %v7379_v51 = vrot.slane %v18927_v6, 2 }
 0x942   :  { %v7409_v26 = vsel %vm7406_vm11, %v7246_v23, %v7382_v36  ;;  %v14202_v23 = vld [vmem:[#allocation3 + $0x248] sm:$0xff]  ;;  %v14159_v36 = vld [vmem:[#allocation3 + $0xf0] sm:$0xff] }
 0x943   :  { %8352 = vmatpush.bf16.msra.mxu2 %v14131_v28  ;;  %8049 = vmatpush.bf16.msra.mxu1 %v14202_v23  ;;  %v14215_v28 = vld [vmem:[#allocation3 + $0x2b0] sm:$0xff]  ;;  %v14213_v23 = vld [vmem:[#allocation3 + $0x2a0] sm:$0xff] }
 0x944   :  { %7992 = vmatpush.bf16.msrb.mxu0 %v14178_v34  ;;  %v14130_v34 = vld [vmem:[#allocation3 + $0x8] sm:$0xff] }
 0x945   :  { %8858 = vmatpush.bf16.msrb.mxu3 %v14216_v42  ;;  %v14197_v42 = vld [vmem:[#allocation3 + $0x220] sm:$0xff] }
 0x947   :  { %8353 = vmatpush.bf16.msra.mxu2 %v14130_v34  ;;  %8050 = vmatpush.bf16.msra.mxu1 %v14201_v21  ;;  %v12545_v34 = vrot.slane %v19046_v5, 5  ;;  %v19090_v21 = vrot.slane %v18989_v57, 2  ;;  %v14163_v57 = vld [vmem:[#allocation3 + $0x110] sm:$0xff] }
 0x948   :  { %7993 = vmatpush.bf16.msrb.mxu0 %v14177_v27 }
 0x949   :  { %8859 = vmatpush.bf16.msrb.mxu3 %v14215_v28 }
 0x94b   :  { %7994 = vmatmul.bf16.vlgmr.msrb.gmra.mxu0 %v7696_v9  ;;  %v7350_v9 = vrot.slane %v7287_v61, 1  ;;  %v14167_v61 = vld [vmem:[#allocation3 + $0x130] sm:$0xff]  ;;  %8404 = vmatpush.bf16.msrb.mxu1 %v14160_v8 }
 0x94c   :  { %8005 = vmatpush.bf16.msra.mxu0 %v14192_v20 }
 0x94d   :  { %v7352_v17 = vor.u32 %v7351_v13, %v7350_v9 }
 0x94f   :  { %v7384_v18 = vrot.slane %v7352_v17, 2  ;;  %v14166_v17 = vld [vmem:[#allocation3 + $0x128] sm:$0xff]  ;;  %8405 = vmatpush.bf16.msrb.mxu1 %v14159_v36  ;;  %v14195_v36 = vld [vmem:[#allocation3 + $0x210] sm:$0xff] }
 0x950   :  { %8006 = vmatpush.bf16.msra.mxu0 %v14191_v45  ;;  %v14129_v45 = vld [vmem:[#allocation3] sm:$0xff] }
 0x951   :  { %v7413_v27 = vsel %vm7410_vm12, %v12541_v7, %v7384_v18  ;;  %8354 = vmatpush.bf16.msra.mxu2 %v14129_v45  ;;  %v14214_v7 = vld [vmem:[#allocation3 + $0x2a8] sm:$0xff] }
 0x952   :  { %v7415_v20 = vsel %vm7414_vm13, %v7409_v26, %v7413_v27  ;;  %v14198_v26 = vld [vmem:[#allocation3 + $0x228] sm:$0xff]  ;;  %8860 = vmatpush.bf16.msrb.mxu3 %v14214_v7 }
 0x953   :  { %8062 = vst [vmem:[#allocation1] ss:$4 sm:$0xff] %v7415_v20  ;;  %v14158_v45 = vld [vmem:[#allocation3 + $0xe8] sm:$0xff] }
 0x954   :  { %8007 = vmatpush.bf16.msra.mxu0 %v14190_v22  ;;  %v7375_v22 = vrot.slane %v18917_v43, 2  ;;  %8406 = vmatpush.bf16.msrb.mxu1 %v14158_v45  ;;  %v14162_v7 = vld [vmem:[#allocation3 + $0x108] sm:$0xff] }
 0x955   :  { %8423 = vmatpush.bf16.msrb.mxu2 %v14168_v50  ;;  %v8444_v50 = vunpack.c.l.b16 %v19078_v48 }
 0x956   :  { %7685 = vst [vmem:[#allocation1 + $0x20] ss:$4 sm:$0xff] %v7375_v22  ;;  %8861 = vmatpush.bf16.msrb.mxu3 %v14213_v23  ;;  %v19118_v23 = vpack.c.bf16 %v18890_v54, %v18890_v54  ;;  %v14248_v54 = vld [vmem:[#allocation3 + $0x3b8] sm:$0xff] }
 0x958   :  { %8008 = vmatpush.bf16.msra.mxu0 %v14189_v58  ;;  %v7315_v58 = vshrl.u32 %v19046_v5, 16 }
 0x959   :  { %8424 = vmatpush.bf16.msrb.mxu2 %v14167_v61  ;;  %v14196_v61 = vld [vmem:[#allocation3 + $0x218] sm:$0xff] }
 0x95a   :  { %v8078_v3 = vld.sshfl [vmem:[#allocation1] sm:$0xff pattern:$0x73625140]  ;;  %v19054_v9 = vld.sshfl [vmem:[#allocation1 + $0x10] sm:$0xff pattern:$0x73625140] }
 0x95b   :  { %7999 = vmatmul.bf16.gmra.mxu0 %v7713_v25  ;;  %v19056_v13 = vld.sshfl [vmem:[#allocation1 + $0x18] sm:$0xff pattern:$0x73625140]  ;;  %8355 = vmatmul.bf16.vlgmr.msra.gmra.mxu2 %v8078_v3  ;;  %v8079_v1 = vld.sshfl [vmem:[#allocation1 + $0x8] sm:$0xff pattern:$0x73625140] }
 0x95c   :  { %8009 = vmatpush.bf16.msra.mxu0 %v14188_v59  ;;  %8374 = vmatmul.bf16.vlgmr.msra.gmra.mxu3 %v8079_v1  ;;  %8084 = vst [vmem:[#allocation1 + $0x1] ss:$4 sm:$0xff] %v18997_v2  ;;  %v19060_v25 = vrot.slane %v18921_v33, 2  ;;  %v7362_v30 = vrot.slane %v7315_v58, 1  ;;  %v7319_v59 = vrot.slane %v7317_v44, 1  ;;  %v7363_v2 = vrot.slane %v7317_v44, 2 }
 0x95d   :  { %8085 = vst [vmem:[#allocation1 + $0x2] ss:$4 sm:$0xff] %v19004_v38  ;;  %v14199_v33 = vld [vmem:[#allocation3 + $0x230] sm:$0xff]  ;;  %8425 = vmatpush.bf16.msrb.mxu2 %v14166_v17 }
 0x95e   :  { %8086 = vst [vmem:[#allocation1 + $0x3] ss:$4 sm:$0xff] %v19011_v14  ;;  %v7320_v11 = vor.u32 %v7319_v59, %v7315_v58  ;;  %v7364_v18 = vor.u32 %v7363_v2, %v7362_v30  ;;  %v14156_v58 = vld [vmem:[#allocation3 + $0xd8] sm:$0xff]  ;;  %v14211_v3 = vld [vmem:[#allocation3 + $0x290] sm:$0xff] }
 0x95f   :  { %7691 = vst [vmem:[#allocation1 + $0x22] ss:$4 sm:$0xff] %v19060_v25 }
 0x960   :  { %8010 = vmatpush.bf16.msra.mxu0 %v14187_v32  ;;  %v7394_v35 = vrot.slane %v7320_v11, 6  ;;  %v7396_v37 = vrot.slane %v7364_v18, 2  ;;  %v14210_v11 = vld [vmem:[#allocation3 + $0x288] sm:$0xff] }
 0x962   :  { %v7439_v27 = vsel %vm7406_vm11, %v19042_v40, %v7394_v35  ;;  %v7442_v32 = vsel %vm7410_vm12, %v12545_v34, %v7396_v37  ;;  %v19086_v40 = vrot.slane %v18939_v47, 2  ;;  %v14157_v47 = vld [vmem:[#allocation3 + $0xe0] sm:$0xff]  ;;  %v14155_v37 = vld [vmem:[#allocation3 + $0xd0] sm:$0xff] }
 0x963   :  { %v7443_v20 = vsel %vm7414_vm13, %v7439_v27, %v7442_v32  ;;  %8407 = vmatpush.bf16.msrb.mxu1 %v14157_v47  ;;  %v14239_v47 = vld [vmem:[#allocation3 + $0x370] sm:$0xff] }
 0x964   :  { %8011 = vmatpush.bf16.msra.mxu0 %v14186_v41  ;;  %v14165_v41 = vld [vmem:[#allocation3 + $0x120] sm:$0xff]  ;;  %8083 = vst [vmem:[#allocation1] ss:$4 sm:$0xff] %v7443_v20  ;;  %v14194_v20 = vld [vmem:[#allocation3 + $0x208] sm:$0xff] }
 0x965   :  { %8426 = vmatpush.bf16.msrb.mxu2 %v14165_v41 }
 0x966   :  { %v7699_v49 = vld.sshfl [vmem:[#allocation1 + $0x20] sm:$0xff pattern:$0x73625140] }
 0x967   :  { %8051 = vmatmul.bf16.vlgmr.msra.gmra.mxu1 %v7699_v49  ;;  %7705 = vst [vmem:[#allocation1 + $0x20] ss:$4 sm:$0xff] %v7379_v51  ;;  %v14240_v49 = vld [vmem:[#allocation3 + $0x378] sm:$0xff] }
 0x968   :  { %8012 = vmatpush.bf16.msra.mxu0 %v14185_v52  ;;  %v19083_v52 = vrot.slane %v18937_v12, 2  ;;  %v19094_v12 = vpack.c.b16 %v8444_v50, %v8444_v50  ;;  %7709 = vst [vmem:[#allocation1 + $0x22] ss:$4 sm:$0xff] %v19086_v40  ;;  %8408 = vmatpush.bf16.msrb.mxu1 %v14156_v58  ;;  %v14209_v50 = vld [vmem:[#allocation3 + $0x280] sm:$0xff]  ;;  %v14151_v58 = vld [vmem:[#allocation3 + $0xb0] sm:$0xff] }
 0x969   :  { %7711 = vst [vmem:[#allocation1 + $0x23] ss:$4 sm:$0xff] %v19090_v21 }
 0x96a   :  { %7707 = vst [vmem:[#allocation1 + $0x21] ss:$4 sm:$0xff] %v19083_v52  ;;  %v8449_v8 = vshrl.u32 %v19094_v12, 16  ;;  %v8451_v1 = vshll.u32 %v19094_v12, 16  ;;  %v12871_v35 = vrot.slane %v19094_v12, 5 }
 0x96b   :  { %8013 = vmatmul.bf16.vlgmr.msra.gmra.mxu0 %v19006_v55  ;;  %v14212_v55 = vld [vmem:[#allocation3 + $0x298] sm:$0xff]  ;;  %v19101_v44 = vld.sshfl [vmem:[#allocation1 + $0x10] sm:$0xff pattern:$0x73625140] }
 0x96c   :  { %8024 = vmatpush.bf16.msrb.mxu0 %v14200_v56  ;;  %v14164_v56 = vld [vmem:[#allocation3 + $0x118] sm:$0xff]  ;;  %8862 = vmatpush.bf16.msrb.mxu3 %v14212_v55  ;;  %v19103_v30 = vld.sshfl [vmem:[#allocation1 + $0x18] sm:$0xff pattern:$0x73625140]  ;;  %v8453_v59 = vrot.slane %v8451_v1, 1  ;;  %v8464_v2 = vrot.slane %v8449_v8, 1 }
 0x96d   :  { %8427 = vmatpush.bf16.msrb.mxu2 %v14164_v56  ;;  %v8092_v28 = vld.sshfl [vmem:[#allocation1] sm:$0xff pattern:$0x73625140]  ;;  %v8093_v17 = vld.sshfl [vmem:[#allocation1 + $0x8] sm:$0xff pattern:$0x73625140]  ;;  %8409 = vmatpush.bf16.msrb.mxu1 %v14155_v37 }
 0x96e   :  { %8360 = vmatmul.bf16.gmra.mxu2 %v8092_v28  ;;  %8379 = vmatmul.bf16.gmra.mxu3 %v8093_v17  ;;  %8573 = vst [vmem:[#allocation1] ss:$4 sm:$0xff] %v18957_v39  ;;  %v8454_v18 = vor.u32 %v8453_v59, %v8449_v8  ;;  %v14152_v56 = vld [vmem:[#allocation3 + $0xb8] sm:$0xff] }
 0x96f   :  { %8575 = vst [vmem:[#allocation1 + $0x1] ss:$4 sm:$0xff] %v18961_v16 }
 0x970   :  { %8025 = vmatpush.bf16.msrb.mxu0 %v14199_v33  ;;  %v8465_v33 = vrot.slane %v8451_v1, 2  ;;  %8577 = vst [vmem:[#allocation1 + $0x2] ss:$4 sm:$0xff] %v18977_v0  ;;  %8863 = vmatpush.bf16.msrb.mxu3 %v14211_v3  ;;  %v8472_v27 = vrot.slane %v8454_v18, 6  ;;  %v14247_v3 = vld [vmem:[#allocation3 + $0x3b0] sm:$0xff] }
 0x971   :  { %8428 = vmatpush.bf16.msrb.mxu2 %v14163_v57  ;;  %v7716_v39 = vld.sshfl [vmem:[#allocation1 + $0x20] sm:$0xff pattern:$0x73625140] }
 0x972   :  { %v8466_v34 = vor.u32 %v8465_v33, %v8464_v2  ;;  %8073 = vst [vmem:[#allocation1 + $0x21] ss:$4 sm:$0xff] %v7375_v22  ;;  %v8480_v41 = vsel %vm7406_vm11, %v19078_v48, %v8472_v27  ;;  %v14154_v22 = vld [vmem:[#allocation3 + $0xc8] sm:$0xff]  ;;  %v8445_v48 = vunpack.c.l.b16 %v19118_v23 }
 0x973   :  { %8075 = vst [vmem:[#allocation1 + $0x22] ss:$4 sm:$0xff] %v19049_v24  ;;  %8410 = vmatpush.bf16.msrb.mxu1 %v14154_v22  ;;  %v14246_v27 = vld [vmem:[#allocation3 + $0x3a8] sm:$0xff]  ;;  %v14236_v22 = vld [vmem:[#allocation3 + $0x358] sm:$0xff] }
 0x974   :  { %8026 = vmatpush.bf16.msrb.mxu0 %v14198_v26  ;;  %v7374_v26 = vrot.slane %v19025_v4, 2  ;;  %v8474_v32 = vrot.slane %v8466_v34, 2  ;;  %8864 = vmatpush.bf16.msrb.mxu3 %v14210_v11  ;;  %8077 = vst [vmem:[#allocation1 + $0x23] ss:$4 sm:$0xff] %v19060_v25  ;;  %v14161_v4 = vld [vmem:[#allocation3 + $0x100] sm:$0xff]  ;;  %v19127_v55 = vpack.c.b16 %v8445_v48, %v8445_v48  ;;  %v7378_v34 = vrot.slane %v19046_v5, 2 }
 0x975   :  { %8429 = vmatpush.bf16.msrb.mxu2 %v14162_v7  ;;  %v14150_v7 = vld [vmem:[#allocation3 + $0xa8] sm:$0xff]  ;;  %v14229_v48 = vld [vmem:[#allocation3 + $0x320] sm:$0xff] }
 0x976   :  { %v8483_v45 = vsel %vm7410_vm12, %v12871_v35, %v8474_v32  ;;  %8071 = vst [vmem:[#allocation1 + $0x20] ss:$4 sm:$0xff] %v7374_v26  ;;  %v8456_v8 = vshrl.u32 %v19127_v55, 16  ;;  %v8458_v57 = vshll.u32 %v19127_v55, 16  ;;  %v12872_v37 = vrot.slane %v19127_v55, 5  ;;  %v14231_v26 = vld [vmem:[#allocation3 + $0x330] sm:$0xff] }
 0x977   :  { %v19122_v43 = vsel %vm7414_vm13, %v8480_v41, %v8483_v45  ;;  %8056 = vmatmul.bf16.gmra.mxu1 %v7716_v39  ;;  %v14237_v41 = vld [vmem:[#allocation3 + $0x360] sm:$0xff]  ;;  %v14230_v45 = vld [vmem:[#allocation3 + $0x328] sm:$0xff] }
 0x978   :  { %8027 = vmatpush.bf16.msrb.mxu0 %v14197_v42  ;;  %v14193_v42 = vld [vmem:[#allocation3 + $0x200] sm:$0xff]  ;;  %8579 = vst [vmem:[#allocation1 + $0x3] ss:$4 sm:$0xff] %v19122_v43  ;;  %8865 = vmatpush.bf16.msrb.mxu3 %v14209_v50  ;;  %v8460_v1 = vrot.slane %v8458_v57, 1  ;;  %v8467_v28 = vrot.slane %v8456_v8, 1  ;;  %v8468_v17 = vrot.slane %v8458_v57, 2 }
 0x979   :  { %8430 = vmatpush.bf16.msrb.mxu2 %v14161_v4  ;;  %v14245_v4 = vld [vmem:[#allocation3 + $0x3a0] sm:$0xff]  ;;  %v14147_v50 = vld [vmem:[#allocation3 + $0x90] sm:$0xff] }
 0x97a   :  { %v8461_v33 = vor.u32 %v8460_v1, %v8456_v8  ;;  %v14242_v8 = vld [vmem:[#allocation3 + $0x388] sm:$0xff]  ;;  %v14145_v57 = vld [vmem:[#allocation3 + $0x80] sm:$0xff] }
 0x97b   :  { %8018 = vmatmul.bf16.gmra.mxu0 %v19031_v31  ;;  %v14153_v31 = vld [vmem:[#allocation3 + $0xc0] sm:$0xff]  ;;  %v14226_v1 = vld [vmem:[#allocation3 + $0x308] sm:$0xff] }
 0x97c   :  { %8028 = vmatpush.bf16.msrb.mxu0 %v14196_v61  ;;  %8934 = vmatpush.bf16.msra.mxu3 %v14248_v54  ;;  %v14232_v61 = vld [vmem:[#allocation3 + $0x338] sm:$0xff]  ;;  %v8475_v35 = vrot.slane %v8461_v33, 6  ;;  %v14235_v54 = vld [vmem:[#allocation3 + $0x350] sm:$0xff] }
 0x97d   :  { %8915 = vmatpush.bf16.msra.mxu2 %v14240_v49  ;;  %v8082_v59 = vld.sshfl [vmem:[#allocation1 + $0x20] sm:$0xff pattern:$0x73625140]  ;;  %8411 = vmatpush.bf16.msrb.mxu1 %v14153_v31  ;;  %v14243_v31 = vld [vmem:[#allocation3 + $0x390] sm:$0xff] }
 0x97e   :  { %8431 = vmatmul.bf16.vlgmr.msrb.gmra.mxu2 %v8082_v59  ;;  %8089 = vst [vmem:[#allocation1 + $0x21] ss:$4 sm:$0xff] %v7379_v51  ;;  %v14238_v51 = vld [vmem:[#allocation3 + $0x368] sm:$0xff]  ;;  %v8487_v32 = vsel %vm7406_vm11, %v19118_v23, %v8475_v35  ;;  %v14148_v23 = vld [vmem:[#allocation3 + $0x98] sm:$0xff]  ;;  %v7252_v35 = vpack.c.bf16 %v18884_v60, %v18884_v60 }
 0x97f   :  { %v8589_v2 = vld.sshfl [vmem:[#allocation1] sm:$0xff pattern:$0x73625140]  ;;  %8090 = vst [vmem:[#allocation1 + $0x22] ss:$4 sm:$0xff] %v19083_v52 }
 0x980   :  { %8029 = vmatpush.bf16.msrb.mxu0 %v14195_v36  ;;  %v8469_v36 = vor.u32 %v8468_v17, %v8467_v28  ;;  %v19134_v11 = vld.sshfl [vmem:[#allocation1 + $0x8] sm:$0xff pattern:$0x73625140]  ;;  %8866 = vmatmul.bf16.vlgmr.msrb.gmra.mxu3 %v8589_v2  ;;  %8091 = vst [vmem:[#allocation1 + $0x23] ss:$4 sm:$0xff] %v19086_v40  ;;  %v14272_v17 = vld [vmem:[#allocation3 + $0x478] sm:$0xff] }
 0x981   :  { %8916 = vmatpush.bf16.msra.mxu2 %v14239_v47  ;;  %8896 = vmatpush.bf16.msra.mxu1 %v14232_v61  ;;  %v19137_v18 = vld.sshfl [vmem:[#allocation1 + $0x10] sm:$0xff pattern:$0x73625140]  ;;  %v19140_v6 = vld.sshfl [vmem:[#allocation1 + $0x18] sm:$0xff pattern:$0x73625140] }
 0x982   :  { %8935 = vmatpush.bf16.msra.mxu3 %v14247_v3  ;;  %8594 = vst [vmem:[#allocation1] ss:$4 sm:$0xff] %v19004_v38  ;;  %v8477_v39 = vrot.slane %v8469_v36, 2  ;;  %v14234_v47 = vld [vmem:[#allocation3 + $0x348] sm:$0xff]  ;;  %v19159_v61 = vrot.slane %v19094_v12, 2  ;;  %v14233_v3 = vld [vmem:[#allocation3 + $0x340] sm:$0xff] }
 0x983   :  { %8595 = vst [vmem:[#allocation1 + $0x1] ss:$4 sm:$0xff] %v19011_v14  ;;  %v14241_v28 = vld [vmem:[#allocation3 + $0x380] sm:$0xff]  ;;  %v14223_v12 = vld [vmem:[#allocation3 + $0x2f0] sm:$0xff]  ;;  %v14280_v33 = vld [vmem:[#allocation3 + $0x4b8] sm:$0xff] }
 0x984   :  { %8030 = vmatpush.bf16.msrb.mxu0 %v14194_v20  ;;  %v14149_v20 = vld [vmem:[#allocation3 + $0xa0] sm:$0xff]  ;;  %8596 = vst [vmem:[#allocation1 + $0x2] ss:$4 sm:$0xff] %v19020_v53  ;;  %v8490_v5 = vsel %vm7410_vm12, %v12872_v37, %v8477_v39  ;;  %v14271_v36 = vld [vmem:[#allocation3 + $0x470] sm:$0xff]  ;;  %v14278_v39 = vld [vmem:[#allocation3 + $0x4a8] sm:$0xff] }
 0x985   :  { %8917 = vmatpush.bf16.msra.mxu2 %v14238_v51  ;;  %8897 = vmatpush.bf16.msra.mxu1 %v14231_v26  ;;  %8088 = vst [vmem:[#allocation1 + $0x20] ss:$4 sm:$0xff] %v7378_v34  ;;  %v19150_v38 = vsel %vm7414_vm13, %v8487_v32, %v8490_v5  ;;  %v14225_v2 = vld [vmem:[#allocation3 + $0x300] sm:$0xff]  ;;  %v14270_v51 = vld [vmem:[#allocation3 + $0x468] sm:$0xff]  ;;  %v8959_v26 = vunpack.c.l.b16 %v7252_v35 }
 0x986   :  { %8936 = vmatpush.bf16.msra.mxu3 %v14246_v27  ;;  %8597 = vst [vmem:[#allocation1 + $0x3] ss:$4 sm:$0xff] %v19150_v38  ;;  %v14221_v34 = vld [vmem:[#allocation3 + $0x2e0] sm:$0xff]  ;;  %v14220_v27 = vld [vmem:[#allocation3 + $0x2d8] sm:$0xff] }
 0x987   :  { %8412 = vmatmul.bf16.vlgmr.msrb.gmra.mxu1 %v19056_v13  ;;  %v14146_v13 = vld [vmem:[#allocation3 + $0x88] sm:$0xff]  ;;  %v14269_v32 = vld [vmem:[#allocation3 + $0x460] sm:$0xff]  ;;  %v19177_v5 = vpack.c.b16 %v8959_v26, %v8959_v26 }
 0x988   :  { %8031 = vmatpush.bf16.msrb.mxu0 %v14193_v42  ;;  %v14244_v42 = vld [vmem:[#allocation3 + $0x398] sm:$0xff] }
 0x989   :  { %8918 = vmatpush.bf16.msra.mxu2 %v14237_v41  ;;  %8898 = vmatpush.bf16.msra.mxu1 %v14230_v45  ;;  %v8964_v60 = vshrl.u32 %v19177_v5, 16  ;;  %v8966_v41 = vshll.u32 %v19177_v5, 16  ;;  %v14219_v45 = vld [vmem:[#allocation3 + $0x2d0] sm:$0xff] }
 0x98a   :  { %8937 = vmatpush.bf16.msra.mxu3 %v14245_v4  ;;  %v14268_v4 = vld [vmem:[#allocation3 + $0x458] sm:$0xff] }
 0x98b   :  { %8032 = vmatmul.bf16.vlgmr.msrb.gmra.mxu0 %v19008_v19  ;;  %v14228_v19 = vld [vmem:[#allocation3 + $0x318] sm:$0xff] }
 0x98c   :  { %8385 = vmatpush.bf16.msra.mxu0 %v14152_v56  ;;  %v8096_v49 = vld.sshfl [vmem:[#allocation1 + $0x20] sm:$0xff pattern:$0x73625140] }
 0x98d   :  { %8919 = vmatpush.bf16.msra.mxu2 %v14236_v22  ;;  %8581 = vst [vmem:[#allocation1 + $0x20] ss:$4 sm:$0xff] %v19049_v24  ;;  %v8603_v56 = vld.sshfl [vmem:[#allocation1] sm:$0xff pattern:$0x73625140]  ;;  %8899 = vmatpush.bf16.msra.mxu1 %v14229_v48  ;;  %v14227_v24 = vld [vmem:[#allocation3 + $0x310] sm:$0xff] }
 0x98e   :  { %8938 = vmatpush.bf16.msra.mxu3 %v14244_v42  ;;  %8436 = vmatmul.bf16.gmra.mxu2 %v8096_v49  ;;  %8583 = vst [vmem:[#allocation1 + $0x21] ss:$4 sm:$0xff] %v19060_v25  ;;  %v8968_v22 = vrot.slane %v8966_v41, 1  ;;  %v14261_v49 = vld [vmem:[#allocation3 + $0x420] sm:$0xff] }
 0x98f   :  { %8585 = vst [vmem:[#allocation1 + $0x22] ss:$4 sm:$0xff] %v19065_v10 }
 0x990   :  { %8386 = vmatpush.bf16.msra.mxu0 %v14151_v58  ;;  %8871 = vmatmul.bf16.gmra.mxu3 %v8603_v56  ;;  %8588 = vst [vmem:[#allocation1 + $0x23] ss:$4 sm:$0xff] %v19159_v61  ;;  %v14224_v58 = vld [vmem:[#allocation3 + $0x2f8] sm:$0xff] }
 0x991   :  { %8920 = vmatpush.bf16.msra.mxu2 %v14235_v54  ;;  %8900 = vmatpush.bf16.msra.mxu1 %v14228_v19  ;;  %v14276_v54 = vld [vmem:[#allocation3 + $0x498] sm:$0xff]  ;;  %v8969_v19 = vor.u32 %v8968_v22, %v8964_v60  ;;  %v14303_v22 = vld [vmem:[#allocation3 + $0x570] sm:$0xff] }
 0x992   :  { %8939 = vmatpush.bf16.msra.mxu3 %v14243_v31  ;;  %v14218_v31 = vld [vmem:[#allocation3 + $0x2c8] sm:$0xff] }
 0x994   :  { %8387 = vmatpush.bf16.msra.mxu0 %v14150_v7  ;;  %v14264_v7 = vld [vmem:[#allocation3 + $0x438] sm:$0xff] }
 0x995   :  { %8921 = vmatpush.bf16.msra.mxu2 %v14234_v47  ;;  %8901 = vmatpush.bf16.msra.mxu1 %v14227_v24  ;;  %v14275_v47 = vld [vmem:[#allocation3 + $0x490] sm:$0xff]  ;;  %v8987_v24 = vrot.slane %v8969_v19, 6 }
 0x996   :  { %8940 = vmatpush.bf16.msra.mxu3 %v14242_v8  ;;  %v13033_v8 = vrot.slane %v19177_v5, 5 }
 0x997   :  { %8417 = vmatmul.bf16.gmra.mxu1 %v19103_v30  ;;  %v8593_v59 = vld.sshfl [vmem:[#allocation1 + $0x20] sm:$0xff pattern:$0x73625140]  ;;  %v14279_v30 = vld [vmem:[#allocation3 + $0x4b0] sm:$0xff] }
 0x998   :  { %8388 = vmatpush.bf16.msra.mxu0 %v14149_v20  ;;  %8598 = vst [vmem:[#allocation1 + $0x20] ss:$4 sm:$0xff] %v19083_v52  ;;  %v19169_v52 = vrot.slane %v19127_v55, 2  ;;  %v14262_v55 = vld [vmem:[#allocation3 + $0x428] sm:$0xff]  ;;  %v14277_v20 = vld [vmem:[#allocation3 + $0x4a0] sm:$0xff] }
 0x999   :  { %8922 = vmatpush.bf16.msra.mxu2 %v14233_v3  ;;  %8902 = vmatpush.bf16.msra.mxu1 %v14226_v1  ;;  %8599 = vst [vmem:[#allocation1 + $0x21] ss:$4 sm:$0xff] %v19086_v40  ;;  %v14217_v1 = vld [vmem:[#allocation3 + $0x2c0] sm:$0xff] }
 0x99a   :  { %8941 = vmatpush.bf16.msra.mxu3 %v14241_v28  ;;  %8600 = vst [vmem:[#allocation1 + $0x22] ss:$4 sm:$0xff] %v19090_v21  ;;  %v14266_v28 = vld [vmem:[#allocation3 + $0x448] sm:$0xff] }
 0x99b   :  { %8037 = vmatmul.bf16.gmra.mxu0 %v19029_v29  ;;  %v14222_v29 = vld [vmem:[#allocation3 + $0x2e8] sm:$0xff]  ;;  %8602 = vst [vmem:[#allocation1 + $0x23] ss:$4 sm:$0xff] %v19169_v52 }
 0x99c   :  { %8389 = vmatpush.bf16.msra.mxu0 %v14148_v23  ;;  %v8606_v23 = vld.sshfl [vmem:[#allocation1 + $0x18] sm:$0xff pattern:$0x73625140] }
 0x99d   :  { %9411 = vmatpush.bf16.msrb.mxu2 %v14272_v17  ;;  %8903 = vmatpush.bf16.msra.mxu1 %v14225_v2 }
 0x99e   :  { %8923 = vmatmul.bf16.vlgmr.msra.gmra.mxu2 %v19140_v6  ;;  %9430 = vmatpush.bf16.msrb.mxu3 %v14280_v33  ;;  %v14263_v6 = vld [vmem:[#allocation3 + $0x430] sm:$0xff]  ;;  %v14256_v33 = vld [vmem:[#allocation3 + $0x3f8] sm:$0xff] }
 0x9a0   :  { %8390 = vmatpush.bf16.msra.mxu0 %v14147_v50  ;;  %8942 = vmatmul.bf16.vlgmr.msra.gmra.mxu3 %v8593_v59  ;;  %v8980_v50 = vrot.slane %v8966_v41, 2  ;;  %v7260_v59 = vpack.c.bf16 %v18892_v15, %v18892_v15  ;;  %v14258_v15 = vld [vmem:[#allocation3 + $0x408] sm:$0xff] }
 0x9a1   :  { %9412 = vmatpush.bf16.msrb.mxu2 %v14271_v36  ;;  %9392 = vmatpush.bf16.msrb.mxu1 %v14264_v7  ;;  %v14259_v36 = vld [vmem:[#allocation3 + $0x410] sm:$0xff]  ;;  %v14274_v7 = vld [vmem:[#allocation3 + $0x488] sm:$0xff] }
 0x9a2   :  { %9431 = vmatpush.bf16.msrb.mxu3 %v14279_v30  ;;  %v8607_v42 = vld.sshfl [vmem:[#allocation1 + $0x20] sm:$0xff pattern:$0x73625140]  ;;  %v14273_v30 = vld [vmem:[#allocation3 + $0x480] sm:$0xff] }
 0x9a3   :  { %9096 = vst [vmem:[#allocation1 + $0x20] ss:$4 sm:$0xff] %v19060_v25  ;;  %v8605_v25 = vld.sshfl [vmem:[#allocation1 + $0x10] sm:$0xff pattern:$0x73625140] }
 0x9a4   :  { %8391 = vmatpush.bf16.msra.mxu0 %v14146_v13  ;;  %9098 = vst [vmem:[#allocation1 + $0x21] ss:$4 sm:$0xff] %v19065_v10  ;;  %v14260_v13 = vld [vmem:[#allocation3 + $0x418] sm:$0xff] }
 0x9a5   :  { %9413 = vmatpush.bf16.msrb.mxu2 %v14270_v51  ;;  %9393 = vmatpush.bf16.msrb.mxu1 %v14263_v6  ;;  %9100 = vst [vmem:[#allocation1 + $0x22] ss:$4 sm:$0xff] %v19159_v61  ;;  %v14255_v51 = vld [vmem:[#allocation3 + $0x3f0] sm:$0xff] }
 0x9a6   :  { %9432 = vmatpush.bf16.msrb.mxu3 %v14278_v39  ;;  %v14304_v39 = vld [vmem:[#allocation3 + $0x578] sm:$0xff] }
 0x9a7   :  { %8904 = vmatmul.bf16.vlgmr.msra.gmra.mxu1 %v19137_v18  ;;  %v14267_v18 = vld [vmem:[#allocation3 + $0x450] sm:$0xff] }
 0x9a8   :  { %8392 = vmatpush.bf16.msra.mxu0 %v14145_v57  ;;  %v19173_v37 = vpop.f32.mrf.mxu0 }
 0x9a9   :  { %9414 = vmatpush.bf16.msrb.mxu2 %v14269_v32  ;;  %9394 = vmatpush.bf16.msrb.mxu1 %v14262_v55  ;;  %v14254_v55 = vld [vmem:[#allocation3 + $0x3e8] sm:$0xff] }
 0x9aa   :  { %9433 = vmatpush.bf16.msrb.mxu3 %v14277_v20  ;;  %v14257_v20 = vld [vmem:[#allocation3 + $0x400] sm:$0xff] }
 0x9ab   :  { %8393 = vmatmul.bf16.vlgmr.msra.gmra.mxu0 %v19054_v9  ;;  %v8979_v9 = vrot.slane %v8964_v60, 1  ;;  %v14312_v60 = vld [vmem:[#allocation3 + $0x5b8] sm:$0xff] }
 0x9ac   :  { %8877 = vmatpush.bf16.msrb.mxu0 %v14224_v58  ;;  %v8995_v58 = vsel %vm7406_vm11, %v7252_v35, %v8987_v24 }
 0x9ad   :  { %9415 = vmatpush.bf16.msrb.mxu2 %v14268_v4  ;;  %v8981_v56 = vor.u32 %v8980_v50, %v8979_v9  ;;  %9395 = vmatpush.bf16.msrb.mxu1 %v14261_v49  ;;  %v14296_v9 = vld [vmem:[#allocation3 + $0x538] sm:$0xff]  ;;  %v14311_v50 = vld [vmem:[#allocation3 + $0x5b0] sm:$0xff] }
 0x9ae   :  { %8928 = vmatmul.bf16.gmra.mxu2 %v8606_v23  ;;  %9434 = vmatpush.bf16.msrb.mxu3 %v14276_v54 }
 0x9af   :  { %v8989_v57 = vrot.slane %v8981_v56, 2 }
 0x9b0   :  { %8878 = vmatpush.bf16.msrb.mxu0 %v14223_v12  ;;  %v19182_v48 = vpop.f32.mrf.mxu0  ;;  %8947 = vmatmul.bf16.gmra.mxu3 %v8607_v42  ;;  %v19190_v12 = vld.sshfl [vmem:[#allocation1 + $0x8] sm:$0xff pattern:$0x73625140] }
 0x9b1   :  { %9416 = vmatpush.bf16.msrb.mxu2 %v14267_v18  ;;  %v8998_v3 = vsel %vm7410_vm12, %v13033_v8, %v8989_v57  ;;  %9396 = vmatpush.bf16.msrb.mxu1 %v14260_v13  ;;  %9088 = vst [vmem:[#allocation1] ss:$4 sm:$0xff] %v18961_v16  ;;  %v14265_v16 = vld [vmem:[#allocation3 + $0x440] sm:$0xff]  ;;  %v14302_v13 = vld [vmem:[#allocation3 + $0x568] sm:$0xff]  ;;  %v7253_v8 = vpack.c.bf16 %v18886_v62, %v18886_v62 }
 0x9b2   :  { %9435 = vmatpush.bf16.msrb.mxu3 %v14275_v47  ;;  %v19194_v17 = vsel %vm7414_vm13, %v8995_v58, %v8998_v3  ;;  %9090 = vst [vmem:[#allocation1 + $0x1] ss:$4 sm:$0xff] %v18977_v0  ;;  %v14253_v18 = vld [vmem:[#allocation3 + $0x3e0] sm:$0xff]  ;;  %v14295_v58 = vld [vmem:[#allocation3 + $0x530] sm:$0xff]  ;;  %v14310_v3 = vld [vmem:[#allocation3 + $0x5a8] sm:$0xff] }
 0x9b3   :  { %9092 = vst [vmem:[#allocation1 + $0x2] ss:$4 sm:$0xff] %v19122_v43  ;;  %v14294_v62 = vld [vmem:[#allocation3 + $0x528] sm:$0xff] }
 0x9b4   :  { %8879 = vmatpush.bf16.msrb.mxu0 %v14222_v29  ;;  %v8960_v29 = vunpack.c.l.b16 %v7260_v59  ;;  %9094 = vst [vmem:[#allocation1 + $0x3] ss:$4 sm:$0xff] %v19194_v17 }
 0x9b5   :  { %9417 = vmatpush.bf16.msrb.mxu2 %v14266_v28  ;;  %9397 = vmatpush.bf16.msrb.mxu1 %v14259_v36  ;;  %v14301_v28 = vld [vmem:[#allocation3 + $0x560] sm:$0xff]  ;;  %v14251_v36 = vld [vmem:[#allocation3 + $0x3d0] sm:$0xff] }
 0x9b6   :  { %9436 = vmatpush.bf16.msrb.mxu3 %v14274_v7 }
 0x9b7   :  { %8909 = vmatmul.bf16.gmra.mxu1 %v8605_v25  ;;  %v14252_v25 = vld [vmem:[#allocation3 + $0x3d8] sm:$0xff] }
 0x9b8   :  { %8880 = vmatpush.bf16.msrb.mxu0 %v14221_v34  ;;  %v19198_v2 = vpop.f32.mrf.mxu0  ;;  %v19204_v34 = vpack.c.b16 %v8960_v29, %v8960_v29  ;;  %v14300_v29 = vld [vmem:[#allocation3 + $0x558] sm:$0xff] }
 0x9b9   :  { %9418 = vmatpush.bf16.msrb.mxu2 %v14265_v16  ;;  %9398 = vmatpush.bf16.msrb.mxu1 %v14258_v15 }
 0x9ba   :  { %v8971_v35 = vshrl.u32 %v19204_v34, 16  ;;  %v8973_v6 = vshll.u32 %v19204_v34, 16  ;;  %9437 = vmatpush.bf16.msrb.mxu3 %v14273_v30  ;;  %v13034_v49 = vrot.slane %v19204_v34, 5 }
 0x9bb   :  { %8398 = vmatmul.bf16.gmra.mxu0 %v19101_v44  ;;  %v9106_v41 = vld.sshfl [vmem:[#allocation1 + $0x10] sm:$0xff pattern:$0x73625140]  ;;  %v9105_v19 = vld.sshfl [vmem:[#allocation1 + $0x8] sm:$0xff pattern:$0x73625140] }
 0x9bc   :  { %8881 = vmatpush.bf16.msrb.mxu0 %v14220_v27  ;;  %v8975_v26 = vrot.slane %v8973_v6, 1  ;;  %v8982_v27 = vrot.slane %v8971_v35, 1  ;;  %v8983_v32 = vrot.slane %v8973_v6, 2  ;;  %v19213_v47 = vld.sshfl [vmem:[#allocation1] sm:$0xff pattern:$0x73625140] }
 0x9bd   :  { %9907 = vmatpush.bf16.msra.mxu2 %v14304_v39  ;;  %9399 = vmatpush.bf16.msrb.mxu1 %v14257_v20  ;;  %v14308_v6 = vld [vmem:[#allocation3 + $0x598] sm:$0xff] }
 0x9be   :  { %v8976_v4 = vor.u32 %v8975_v26, %v8971_v35  ;;  %v8984_v23 = vor.u32 %v8983_v32, %v8982_v27  ;;  %9926 = vmatpush.bf16.msra.mxu3 %v14312_v60  ;;  %9419 = vmatmul.bf16.vlgmr.msrb.gmra.mxu2 %v9106_v41  ;;  %v14293_v35 = vld [vmem:[#allocation3 + $0x520] sm:$0xff] }
 0x9bf   :  { %v14249_v41 = vld [vmem:[#allocation3 + $0x3c0] sm:$0xff] }
 0x9c0   :  { %8882 = vmatpush.bf16.msrb.mxu0 %v14219_v45  ;;  %v19208_v44 = vpop.f32.mrf.mxu0  ;;  %v9107_v45 = vld.sshfl [vmem:[#allocation1 + $0x18] sm:$0xff pattern:$0x73625140]  ;;  %v8990_v42 = vrot.slane %v8976_v4, 6  ;;  %v8992_v54 = vrot.slane %v8984_v23, 2 }
 0x9c1   :  { %9438 = vmatmul.bf16.vlgmr.msrb.gmra.mxu3 %v9107_v45  ;;  %9908 = vmatpush.bf16.msra.mxu2 %v14303_v22  ;;  %9109 = vst [vmem:[#allocation1] ss:$4 sm:$0xff] %v19011_v14  ;;  %v9474_v14 = vunpack.c.l.b16 %v7253_v8  ;;  %v14292_v22 = vld [vmem:[#allocation3 + $0x518] sm:$0xff] }
 0x9c2   :  { %9888 = vmatpush.bf16.msra.mxu1 %v14296_v9  ;;  %v9002_v56 = vsel %vm7406_vm11, %v7260_v59, %v8990_v42  ;;  %9927 = vmatpush.bf16.msra.mxu3 %v14311_v50  ;;  %9110 = vst [vmem:[#allocation1 + $0x1] ss:$4 sm:$0xff] %v19020_v53  ;;  %v14309_v59 = vld [vmem:[#allocation3 + $0x5a0] sm:$0xff]  ;;  %v14307_v9 = vld [vmem:[#allocation3 + $0x590] sm:$0xff]  ;;  %v14288_v50 = vld [vmem:[#allocation3 + $0x4f8] sm:$0xff] }
 0x9c3   :  { %9111 = vst [vmem:[#allocation1 + $0x2] ss:$4 sm:$0xff] %v19150_v38 }
 0x9c4   :  { %8883 = vmatpush.bf16.msrb.mxu0 %v14218_v31  ;;  %v9005_v31 = vsel %vm7410_vm12, %v13034_v49, %v8992_v54 }
 0x9c5   :  { %v19217_v24 = vsel %vm7414_vm13, %v9002_v56, %v9005_v31  ;;  %9909 = vmatpush.bf16.msra.mxu2 %v14302_v13  ;;  %v14306_v56 = vld [vmem:[#allocation3 + $0x588] sm:$0xff]  ;;  %v14287_v13 = vld [vmem:[#allocation3 + $0x4f0] sm:$0xff] }
 0x9c6   :  { %9889 = vmatpush.bf16.msra.mxu1 %v14295_v58  ;;  %9928 = vmatpush.bf16.msra.mxu3 %v14310_v3  ;;  %9112 = vst [vmem:[#allocation1 + $0x3] ss:$4 sm:$0xff] %v19217_v24 }
 0x9c7   :  { %9400 = vmatmul.bf16.vlgmr.msrb.gmra.mxu1 %v9105_v19  ;;  %v14291_v19 = vld [vmem:[#allocation3 + $0x510] sm:$0xff] }
 0x9c8   :  { %8884 = vmatpush.bf16.msrb.mxu0 %v14217_v1  ;;  %v7995_v57 = vpop.f32.mrf.mxu0 }
 0x9c9   :  { %v19223_v1 = vadd.f32 %v7995_v57, %v19173_v37  ;;  %9910 = vmatpush.bf16.msra.mxu2 %v14301_v28  ;;  %v14290_v57 = vld [vmem:[#allocation3 + $0x508] sm:$0xff] }
 0x9ca   :  { %9890 = vmatpush.bf16.msra.mxu1 %v14294_v62  ;;  %9929 = vmatpush.bf16.msra.mxu3 %v14309_v59 }
 0x9cb   :  { %8885 = vmatmul.bf16.vlgmr.msrb.gmra.mxu0 %v19134_v11  ;;  %v14250_v11 = vld [vmem:[#allocation3 + $0x3c8] sm:$0xff] }
 0x9cc   :  { %9373 = vmatpush.bf16.msra.mxu0 %v14256_v33  ;;  %v19228_v33 = vpack.c.b16 %v9474_v14, %v9474_v14 }
 0x9cd   :  { %v9120_v26 = vld.sshfl [vmem:[#allocation1 + $0x10] sm:$0xff pattern:$0x73625140]  ;;  %9911 = vmatpush.bf16.msra.mxu2 %v14300_v29  ;;  %v19235_v27 = vld.sshfl [vmem:[#allocation1] sm:$0xff pattern:$0x73625140] }
 0x9ce   :  { %v9479_v37 = vshrl.u32 %v19228_v33, 16  ;;  %v9481_v7 = vshll.u32 %v19228_v33, 16  ;;  %v9119_v20 = vld.sshfl [vmem:[#allocation1 + $0x8] sm:$0xff pattern:$0x73625140]  ;;  %9891 = vmatpush.bf16.msra.mxu1 %v14293_v35  ;;  %9930 = vmatpush.bf16.msra.mxu3 %v14308_v6  ;;  %v13195_v4 = vrot.slane %v19228_v33, 5 }
 0x9cf   :  { %v9121_v60 = vld.sshfl [vmem:[#allocation1 + $0x18] sm:$0xff pattern:$0x73625140]  ;;  %9424 = vmatmul.bf16.gmra.mxu2 %v9120_v26 }
 0x9d0   :  { %9374 = vmatpush.bf16.msra.mxu0 %v14255_v51  ;;  %v9483_v16 = vrot.slane %v9481_v7, 1  ;;  %v9494_v15 = vrot.slane %v9479_v37, 1  ;;  %v9495_v30 = vrot.slane %v9481_v7, 2  ;;  %v7997_v51 = vpop.f32.mrf.mxu0  ;;  %9603 = vst [vmem:[#allocation1] ss:$4 sm:$0xff] %v18977_v0  ;;  %v7261_v0 = vpack.c.bf16 %v18894_v46, %v18894_v46  ;;  %v14286_v46 = vld [vmem:[#allocation3 + $0x4e8] sm:$0xff] }
 0x9d1   :  { %v19233_v39 = vadd.f32 %v7997_v51, %v19182_v48  ;;  %9443 = vmatmul.bf16.gmra.mxu3 %v9121_v60  ;;  %9605 = vst [vmem:[#allocation1 + $0x1] ss:$4 sm:$0xff] %v19122_v43  ;;  %v14299_v48 = vld [vmem:[#allocation3 + $0x550] sm:$0xff]  ;;  %v14289_v7 = vld [vmem:[#allocation3 + $0x500] sm:$0xff]  ;;  %v8985_v51 = vrot.slane %v19177_v5, 2 }
 0x9d2   :  { %v9484_v32 = vor.u32 %v9483_v16, %v9479_v37  ;;  %9607 = vst [vmem:[#allocation1 + $0x2] ss:$4 sm:$0xff] %v19194_v17  ;;  %9912 = vmatpush.bf16.msra.mxu2 %v14299_v48  ;;  %9892 = vmatpush.bf16.msra.mxu1 %v14292_v22  ;;  %v9475_v17 = vunpack.c.l.b16 %v7261_v0  ;;  %v14285_v16 = vld [vmem:[#allocation3 + $0x4e0] sm:$0xff]  ;;  %v14327_v60 = vld [vmem:[#allocation3 + $0x630] sm:$0xff]  ;;  %v14282_v48 = vld [vmem:[#allocation3 + $0x4c8] sm:$0xff] }
 0x9d3   :  { %9931 = vmatpush.bf16.msra.mxu3 %v14307_v9  ;;  %9103 = vst [vmem:[#allocation1 + $0x23] ss:$4 sm:$0xff] %v8985_v51  ;;  %v14325_v9 = vld [vmem:[#allocation3 + $0x620] sm:$0xff] }
 0x9d4   :  { %9375 = vmatpush.bf16.msra.mxu0 %v14254_v55  ;;  %v9496_v55 = vor.u32 %v9495_v30, %v9494_v15  ;;  %v9502_v45 = vrot.slane %v9484_v32, 6  ;;  %v19250_v58 = vpack.c.b16 %v9475_v17, %v9475_v17  ;;  %v14328_v30 = vld [vmem:[#allocation3 + $0x638] sm:$0xff]  ;;  %v14318_v17 = vld [vmem:[#allocation3 + $0x5e8] sm:$0xff] }
 0x9d5   :  { %v14284_v32 = vld [vmem:[#allocation3 + $0x4d8] sm:$0xff] }
 0x9d6   :  { %v9504_v23 = vrot.slane %v9496_v55, 2  ;;  %v9510_v42 = vsel %vm7406_vm11, %v7253_v8, %v9502_v45  ;;  %9893 = vmatpush.bf16.msra.mxu1 %v14291_v19  ;;  %v14297_v8 = vld [vmem:[#allocation3 + $0x540] sm:$0xff]  ;;  %v9486_v3 = vshrl.u32 %v19250_v58, 16  ;;  %v13196_v26 = vrot.slane %v19250_v58, 5  ;;  %v14283_v45 = vld [vmem:[#allocation3 + $0x4d0] sm:$0xff] }
 0x9d7   :  { %9932 = vmatpush.bf16.msra.mxu3 %v14306_v56  ;;  %9405 = vmatmul.bf16.gmra.mxu1 %v9119_v20  ;;  %v14323_v56 = vld [vmem:[#allocation3 + $0x610] sm:$0xff] }
 0x9d8   :  { %9376 = vmatpush.bf16.msra.mxu0 %v14253_v18  ;;  %v9513_v49 = vsel %vm7410_vm12, %v13195_v4, %v9504_v23  ;;  %v14298_v18 = vld [vmem:[#allocation3 + $0x548] sm:$0xff]  ;;  %v8000_v43 = vpop.f32.mrf.mxu0 }
 0x9d9   :  { %v9514_v54 = vsel %vm7414_vm13, %v9510_v42, %v9513_v49  ;;  %v19247_v31 = vadd.f32 %v8000_v43, %v19198_v2  ;;  %9913 = vmatpush.bf16.msra.mxu2 %v14298_v18  ;;  %v9488_v2 = vshll.u32 %v19250_v58, 16  ;;  %v14326_v4 = vld [vmem:[#allocation3 + $0x628] sm:$0xff]  ;;  %v8986_v49 = vrot.slane %v19204_v34, 2  ;;  %v14320_v18 = vld [vmem:[#allocation3 + $0x5f8] sm:$0xff]  ;;  %v14319_v43 = vld [vmem:[#allocation3 + $0x5f0] sm:$0xff] }
 0x9da   :  { %9609 = vst [vmem:[#allocation1 + $0x3] ss:$4 sm:$0xff] %v9514_v54  ;;  %9894 = vmatpush.bf16.msra.mxu1 %v14290_v57  ;;  %v19275_v23 = vld.sshfl [vmem:[#allocation1 + $0x20] sm:$0xff pattern:$0x73625140] }
 0x9db   :  { %8890 = vmatmul.bf16.gmra.mxu0 %v19190_v12  ;;  %v9490_v62 = vrot.slane %v9488_v2, 1  ;;  %v9497_v12 = vrot.slane %v9486_v3, 1  ;;  %v9498_v59 = vrot.slane %v9488_v2, 2  ;;  %9113 = vst [vmem:[#allocation1 + $0x20] ss:$4 sm:$0xff] %v19086_v40  ;;  %v14324_v40 = vld [vmem:[#allocation3 + $0x618] sm:$0xff] }
 0x9dc   :  { %9377 = vmatpush.bf16.msra.mxu0 %v14252_v25  ;;  %v14305_v25 = vld [vmem:[#allocation3 + $0x580] sm:$0xff]  ;;  %9114 = vst [vmem:[#allocation1 + $0x21] ss:$4 sm:$0xff] %v19090_v21 }
 0x9dd   :  { %9914 = vmatpush.bf16.msra.mxu2 %v14297_v8  ;;  %9933 = vmatpush.bf16.msra.mxu3 %v14305_v25  ;;  %v9499_v35 = vor.u32 %v9498_v59, %v9497_v12  ;;  %9115 = vst [vmem:[#allocation1 + $0x22] ss:$4 sm:$0xff] %v19169_v52  ;;  %v14322_v25 = vld [vmem:[#allocation3 + $0x608] sm:$0xff]  ;;  %v14316_v12 = vld [vmem:[#allocation3 + $0x5d8] sm:$0xff] }
 0x9de   :  { %9895 = vmatpush.bf16.msra.mxu1 %v14289_v7  ;;  %9117 = vst [vmem:[#allocation1 + $0x23] ss:$4 sm:$0xff] %v8986_v49  ;;  %v14314_v7 = vld [vmem:[#allocation3 + $0x5c8] sm:$0xff] }
 0x9df   :  { %v8375_v19 = vpop.f32.mrf.mxu3 }
 0x9e0   :  { %9378 = vmatpush.bf16.msra.mxu0 %v14251_v36  ;;  %v8002_v36 = vpop.f32.mrf.mxu0 }
 0x9e1   :  { %v19254_v14 = vld.sshfl [vmem:[#allocation1 + $0x18] sm:$0xff pattern:$0x73625140]  ;;  %v9620_v28 = vld.sshfl [vmem:[#allocation1 + $0x8] sm:$0xff pattern:$0x73625140]  ;;  %v19257_v29 = vadd.f32 %v8002_v36, %v19208_v44 }
 0x9e2   :  { %v9621_v37 = vld.sshfl [vmem:[#allocation1 + $0x10] sm:$0xff pattern:$0x73625140]  ;;  %v9619_v15 = vld.sshfl [vmem:[#allocation1] sm:$0xff pattern:$0x73625140]  ;;  %9915 = vmatmul.bf16.vlgmr.msra.gmra.mxu2 %v9620_v28  ;;  %9964 = vmatpush.bf16.msrb.mxu1 %v14328_v30 }
 0x9e3   :  { %9624 = vst [vmem:[#allocation1] ss:$4 sm:$0xff] %v19020_v53  ;;  %v9507_v44 = vrot.slane %v9499_v35, 2  ;;  %9934 = vmatmul.bf16.vlgmr.msra.gmra.mxu3 %v9621_v37  ;;  %v14321_v28 = vld [vmem:[#allocation3 + $0x600] sm:$0xff] }
 0x9e4   :  { %9379 = vmatpush.bf16.msra.mxu0 %v14250_v11  ;;  %v9491_v11 = vor.u32 %v9490_v62, %v9486_v3  ;;  %9625 = vst [vmem:[#allocation1 + $0x1] ss:$4 sm:$0xff] %v19150_v38  ;;  %v14317_v3 = vld [vmem:[#allocation3 + $0x5e0] sm:$0xff] }
 0x9e5   :  { %9626 = vst [vmem:[#allocation1 + $0x2] ss:$4 sm:$0xff] %v19217_v24  ;;  %v9520_v53 = vsel %vm7410_vm12, %v13196_v26, %v9507_v44  ;;  %v19272_v24 = vpop.f32.mrf.mxu1  ;;  %v9122_v57 = vld.sshfl [vmem:[#allocation1 + $0x20] sm:$0xff pattern:$0x73625140] }
 0x9e6   :  { %v9505_v6 = vrot.slane %v9491_v11, 6  ;;  %9965 = vmatpush.bf16.msrb.mxu1 %v14327_v60  ;;  %9611 = vst [vmem:[#allocation1 + $0x20] ss:$4 sm:$0xff] %v19065_v10  ;;  %v14315_v10 = vld [vmem:[#allocation3 + $0x5d0] sm:$0xff] }
 0x9e7   :  { %9896 = vmatmul.bf16.vlgmr.msra.gmra.mxu1 %v9619_v15  ;;  %9613 = vst [vmem:[#allocation1 + $0x21] ss:$4 sm:$0xff] %v19159_v61  ;;  %v8377_v62 = vpop.f32.mrf.mxu3 }
 0x9e8   :  { %9380 = vmatpush.bf16.msra.mxu0 %v14249_v41  ;;  %v9517_v55 = vsel %vm7406_vm11, %v7261_v0, %v9505_v6  ;;  %v8014_v38 = vpop.f32.mrf.mxu0  ;;  %v8356_v0 = vpop.f32.mrf.mxu2  ;;  %9615 = vst [vmem:[#allocation1 + $0x22] ss:$4 sm:$0xff] %v8985_v51 }
 0x9e9   :  { %v9521_v20 = vsel %vm7414_vm13, %v9517_v55, %v9520_v53  ;;  %v19270_v41 = vadd.f32 %v8014_v38, %v19223_v1 }
 0x9ea   :  { %9627 = vst [vmem:[#allocation1 + $0x3] ss:$4 sm:$0xff] %v9521_v20  ;;  %9966 = vmatpush.bf16.msrb.mxu1 %v14326_v4 }
 0x9eb   :  { %9381 = vmatmul.bf16.vlgmr.msra.gmra.mxu0 %v19213_v47  ;;  %v14281_v47 = vld [vmem:[#allocation3 + $0x4c0] sm:$0xff] }
 0x9ec   :  { %9449 = vmatpush.bf16.msrb.mxu0 %v14288_v50 }
 0x9ed   :  { %v19284_v54 = vpop.f32.mrf.mxu1 }
 0x9ee   :  { %9967 = vmatpush.bf16.msrb.mxu1 %v14325_v9 }
 0x9f0   :  { %9450 = vmatpush.bf16.msrb.mxu0 %v14287_v13  ;;  %v8016_v1 = vpop.f32.mrf.mxu0  ;;  %v8358_v2 = vpop.f32.mrf.mxu2 }
 0x9f1   :  { %v9634_v22 = vld.sshfl [vmem:[#allocation1 + $0x8] sm:$0xff pattern:$0x73625140]  ;;  %v19281_v50 = vadd.f32 %v8016_v1, %v19233_v39  ;;  %v9635_v42 = vld.sshfl [vmem:[#allocation1 + $0x10] sm:$0xff pattern:$0x73625140]  ;;  %v8380_v15 = vpop.f32.mrf.mxu3 }
 0x9f2   :  { %9920 = vmatmul.bf16.gmra.mxu2 %v9634_v22  ;;  %9968 = vmatpush.bf16.msrb.mxu1 %v14324_v40  ;;  %v9633_v8 = vld.sshfl [vmem:[#allocation1] sm:$0xff pattern:$0x73625140] }
 0x9f3   :  { %9939 = vmatmul.bf16.gmra.mxu3 %v9635_v42 }
 0x9f4   :  { %9451 = vmatpush.bf16.msrb.mxu0 %v14286_v46  ;;  %v9500_v46 = vrot.slane %v19228_v33, 2 }
 0x9f5   :  { %v8057_v34 = vpop.f32.mrf.mxu1 }
 0x9f6   :  { %9969 = vmatpush.bf16.msrb.mxu1 %v14323_v56  ;;  %9618 = vst [vmem:[#allocation1 + $0x23] ss:$4 sm:$0xff] %v9500_v46 }
 0x9f7   :  { %9901 = vmatmul.bf16.gmra.mxu1 %v9633_v8 }
 0x9f8   :  { %9452 = vmatpush.bf16.msrb.mxu0 %v14285_v16  ;;  %v8019_v39 = vpop.f32.mrf.mxu0  ;;  %v8361_v36 = vpop.f32.mrf.mxu2  ;;  %v9501_v16 = vrot.slane %v19250_v58, 2 }
 0x9f9   :  { %v8020_v13 = vadd.f32 %v8019_v39, %v19247_v31 }
 0x9fa   :  { %9970 = vmatpush.bf16.msrb.mxu1 %v14322_v25 }
 0x9fb   :  { %9386 = vmatmul.bf16.gmra.mxu0 %v19235_v27 }
 0x9fc   :  { %9453 = vmatpush.bf16.msrb.mxu0 %v14284_v32  ;;  %v8382_v32 = vpop.f32.mrf.mxu3 }
 0x9fd   :  { %v8059_v33 = vpop.f32.mrf.mxu1  ;;  %v9623_v61 = vld.sshfl [vmem:[#allocation1 + $0x20] sm:$0xff pattern:$0x73625140] }
 0x9fe   :  { %9971 = vmatpush.bf16.msrb.mxu1 %v14321_v28  ;;  %9628 = vst [vmem:[#allocation1 + $0x20] ss:$4 sm:$0xff] %v19090_v21  ;;  %v14313_v21 = vld [vmem:[#allocation3 + $0x5c0] sm:$0xff] }
 0x9ff   :  { %9629 = vst [vmem:[#allocation1 + $0x21] ss:$4 sm:$0xff] %v19169_v52 }
 0xa00   :  { %9454 = vmatpush.bf16.msrb.mxu0 %v14283_v45  ;;  %v8021_v31 = vpop.f32.mrf.mxu0  ;;  %9630 = vst [vmem:[#allocation1 + $0x22] ss:$4 sm:$0xff] %v8986_v49  ;;  %v8363_v26 = vpop.f32.mrf.mxu2 }
 0xa01   :  { %v8022_v27 = vadd.f32 %v8021_v31, %v19257_v29  ;;  %9632 = vst [vmem:[#allocation1 + $0x23] ss:$4 sm:$0xff] %v9501_v16 }
 0xa04   :  { %9455 = vmatpush.bf16.msrb.mxu0 %v14282_v48 }
 0xa05   :  { %v8413_v37 = vpop.f32.mrf.mxu1 }
 0xa07   :  { %9972 = vmatmul.bf16.vlgmr.msrb.gmra.mxu1 %v9623_v61 }
 0xa08   :  { %9456 = vmatpush.bf16.msrb.mxu0 %v14281_v47  ;;  %v8033_v59 = vpop.f32.mrf.mxu0  ;;  %v9637_v38 = vld.sshfl [vmem:[#allocation1 + $0x20] sm:$0xff pattern:$0x73625140]  ;;  %v8432_v45 = vpop.f32.mrf.mxu2 }
 0xa09   :  { %v8034_v5 = vadd.f32 %v8033_v59, %v19270_v41 }
 0xa0b   :  { %v8053_v29 = vadd.f32 %v19272_v24, %v8034_v5  ;;  %9457 = vmatmul.bf16.vlgmr.msrb.gmra.mxu0 %v19275_v23  ;;  %v8867_v23 = vpop.f32.mrf.mxu3 }
 0xa0c   :  { %9945 = vmatpush.bf16.msra.mxu0 %v14320_v18 }
 0xa0d   :  { %v8357_v30 = vadd.f32 %v8356_v0, %v8053_v29  ;;  %v8415_v35 = vpop.f32.mrf.mxu1 }
 0xa0f   :  { %v8376_v52 = vadd.f32 %v8375_v19, %v8357_v30 }
 0xa10   :  { %9946 = vmatpush.bf16.msra.mxu0 %v14319_v43  ;;  %v8035_v51 = vpop.f32.mrf.mxu0  ;;  %v8434_v42 = vpop.f32.mrf.mxu2 }
 0xa11   :  { %v8036_v11 = vadd.f32 %v8035_v51, %v19281_v50 }
 0xa13   :  { %v8055_v6 = vadd.f32 %v19284_v54, %v8036_v11  ;;  %v8869_v54 = vpop.f32.mrf.mxu3 }
 0xa14   :  { %9947 = vmatpush.bf16.msra.mxu0 %v14318_v17 }
 0xa15   :  { %v8359_v44 = vadd.f32 %v8358_v2, %v8055_v6  ;;  %v8418_v20 = vpop.f32.mrf.mxu1 }
 0xa17   :  { %v8378_v55 = vadd.f32 %v8377_v62, %v8359_v44  ;;  %9977 = vmatmul.bf16.gmra.mxu1 %v9637_v38 }
 0xa18   :  { %9948 = vmatpush.bf16.msra.mxu0 %v14317_v3  ;;  %v8038_v53 = vpop.f32.mrf.mxu0  ;;  %v8437_v19 = vpop.f32.mrf.mxu2 }
 0xa19   :  { %v8039_v58 = vadd.f32 %v8038_v53, %v8020_v13 }
 0xa1b   :  { %v8058_v60 = vadd.f32 %v8057_v34, %v8039_v58  ;;  %9462 = vmatmul.bf16.gmra.mxu0 %v9122_v57  ;;  %v8872_v13 = vpop.f32.mrf.mxu3  ;;  %v9636_v57 = vld.sshfl [vmem:[#allocation1 + $0x18] sm:$0xff pattern:$0x73625140] }
 0xa1c   :  { %9949 = vmatpush.bf16.msra.mxu0 %v14316_v12 }
 0xa1d   :  { %v8362_v41 = vadd.f32 %v8361_v36, %v8058_v60  ;;  %v8420_v1 = vpop.f32.mrf.mxu1 }
 0xa1f   :  { %v8381_v24 = vadd.f32 %v8380_v15, %v8362_v41 }
 0xa20   :  { %9950 = vmatpush.bf16.msra.mxu0 %v14315_v10  ;;  %v8040_v4 = vpop.f32.mrf.mxu0  ;;  %v8439_v3 = vpop.f32.mrf.mxu2 }
 0xa21   :  { %v8041_v48 = vadd.f32 %v8040_v4, %v8022_v27 }
 0xa23   :  { %v8060_v22 = vadd.f32 %v8059_v33, %v8041_v48  ;;  %v8874_v2 = vpop.f32.mrf.mxu3 }
 0xa24   :  { %9951 = vmatpush.bf16.msra.mxu0 %v14314_v7 }
 0xa25   :  { %v8364_v9 = vadd.f32 %v8363_v26, %v8060_v22  ;;  %v8905_v40 = vpop.f32.mrf.mxu1 }
 0xa27   :  { %v8383_v50 = vadd.f32 %v8382_v32, %v8364_v9 }
 0xa28   :  { %9952 = vmatpush.bf16.msra.mxu0 %v14313_v21  ;;  %v8394_v47 = vpop.f32.mrf.mxu0  ;;  %v8924_v12 = vpop.f32.mrf.mxu2 }
 0xa29   :  { %v8395_v49 = vadd.f32 %v8394_v47, %v8376_v52 }
 0xa2b   :  { %v8414_v18 = vadd.f32 %v8413_v37, %v8395_v49  ;;  %9953 = vmatmul.bf16.vlgmr.msra.gmra.mxu0 %v19254_v14  ;;  %v8943_v10 = vpop.f32.mrf.mxu3 }
 0xa2d   :  { %v8433_v0 = vadd.f32 %v8432_v45, %v8414_v18  ;;  %v8907_v17 = vpop.f32.mrf.mxu1 }
 0xa30   :  { %v8396_v43 = vpop.f32.mrf.mxu0  ;;  %v8926_v29 = vpop.f32.mrf.mxu2 }
 0xa31   :  { %v8397_v39 = vadd.f32 %v8396_v43, %v8378_v55 }
 0xa33   :  { %v8416_v56 = vadd.f32 %v8415_v35, %v8397_v39  ;;  %v8945_v21 = vpop.f32.mrf.mxu3 }
 0xa35   :  { %v8435_v34 = vadd.f32 %v8434_v42, %v8416_v56  ;;  %v8910_v27 = vpop.f32.mrf.mxu1 }
 0xa38   :  { %v8399_v8 = vpop.f32.mrf.mxu0  ;;  %v8929_v32 = vpop.f32.mrf.mxu2 }
 0xa39   :  { %v8400_v25 = vadd.f32 %v8399_v8, %v8381_v24 }
 0xa3b   :  { %v8419_v46 = vadd.f32 %v8418_v20, %v8400_v25  ;;  %9958 = vmatmul.bf16.gmra.mxu0 %v9636_v57  ;;  %v8948_v53 = vpop.f32.mrf.mxu3 }
 0xa3d   :  { %v8438_v31 = vadd.f32 %v8437_v19, %v8419_v46  ;;  %v8912_v5 = vpop.f32.mrf.mxu1 }
 0xa40   :  { %v8401_v28 = vpop.f32.mrf.mxu0  ;;  %v8931_v4 = vpop.f32.mrf.mxu2 }
 0xa41   :  { %v8402_v14 = vadd.f32 %v8401_v28, %v8383_v50 }
 0xa43   :  { %v8421_v62 = vadd.f32 %v8420_v1, %v8402_v14  ;;  %v8950_v48 = vpop.f32.mrf.mxu3 }
 0xa45   :  { %v8440_v33 = vadd.f32 %v8439_v3, %v8421_v62  ;;  %v9401_v51 = vpop.f32.mrf.mxu1 }
 0xa48   :  { %v8886_v61 = vpop.f32.mrf.mxu0  ;;  %v9420_v49 = vpop.f32.mrf.mxu2 }
 0xa49   :  { %v8887_v59 = vadd.f32 %v8886_v61, %v8867_v23 }
 0xa4b   :  { %v8906_v36 = vadd.f32 %v8905_v40, %v8887_v59  ;;  %v9439_v40 = vpop.f32.mrf.mxu3 }
 0xa4d   :  { %v8925_v37 = vadd.f32 %v8924_v12, %v8906_v36  ;;  %v9403_v20 = vpop.f32.mrf.mxu1 }
 0xa4f   :  { %v8944_v7 = vadd.f32 %v8943_v10, %v8925_v37 }
 0xa50   :  { %v8888_v16 = vpop.f32.mrf.mxu0  ;;  %v9422_v43 = vpop.f32.mrf.mxu2 }
 0xa51   :  { %v8889_v15 = vadd.f32 %v8888_v16, %v8869_v54  ;;  %v8953_v30 = vadd.f32 %v8944_v7, %v8433_v0 }
 0xa53   :  { %v8908_v52 = vadd.f32 %v8907_v17, %v8889_v15  ;;  %v9441_v19 = vpop.f32.mrf.mxu3 }
 0xa55   :  { %v8927_v11 = vadd.f32 %v8926_v29, %v8908_v52  ;;  %v9406_v9 = vpop.f32.mrf.mxu1 }
 0xa57   :  { %v8946_v35 = vadd.f32 %v8945_v21, %v8927_v11 }
 0xa58   :  { %v8891_v6 = vpop.f32.mrf.mxu0 }
 0xa59   :  { %v8892_v26 = vadd.f32 %v8891_v6, %v8872_v13  ;;  %v8954_v44 = vadd.f32 %v8946_v35, %v8435_v34  ;;  %v9425_v34 = vpop.f32.mrf.mxu2 }
 0xa5b   :  { %v8911_v55 = vadd.f32 %v8910_v27, %v8892_v26  ;;  %v9444_v46 = vpop.f32.mrf.mxu3 }
 0xa5d   :  { %v8930_v58 = vadd.f32 %v8929_v32, %v8911_v55  ;;  %v9408_v18 = vpop.f32.mrf.mxu1 }
 0xa5f   :  { %v8949_v38 = vadd.f32 %v8948_v53, %v8930_v58 }
 0xa60   :  { %v8893_v60 = vpop.f32.mrf.mxu0 }
 0xa61   :  { %v8894_v41 = vadd.f32 %v8893_v60, %v8874_v2  ;;  %v8955_v45 = vadd.f32 %v8949_v38, %v8438_v31  ;;  %v9427_v28 = vpop.f32.mrf.mxu2 }
 0xa63   :  { %v8913_v24 = vadd.f32 %v8912_v5, %v8894_v41  ;;  %v9446_v61 = vpop.f32.mrf.mxu3 }
 0xa65   :  { %v8932_v23 = vadd.f32 %v8931_v4, %v8913_v24  ;;  %v9897_v39 = vpop.f32.mrf.mxu1 }
 0xa67   :  { %v8951_v1 = vadd.f32 %v8950_v48, %v8932_v23 }
 0xa68   :  { %v9382_v22 = vpop.f32.mrf.mxu0 }
 0xa69   :  { %v9402_v50 = vadd.f32 %v9401_v51, %v9382_v22  ;;  %v19303_v47 = vadd.f32 %v8951_v1, %v8440_v33  ;;  %v9916_v36 = vpop.f32.mrf.mxu2 }
 0xa6a   :  { %v9917_v21 = vadd.f32 %v9916_v36, %v9897_v39 }
 0xa6b   :  { %v9421_v13 = vadd.f32 %v9420_v49, %v9402_v50  ;;  %v9935_v16 = vpop.f32.mrf.mxu3 }
 0xa6c   :  { %v9936_v51 = vadd.f32 %v9935_v16, %v9917_v21 }
 0xa6d   :  { %v9899_v17 = vpop.f32.mrf.mxu1  ;;  %v9440_v8 = vadd.f32 %v9439_v40, %v9421_v13 }
 0xa70   :  { %v9384_v42 = vpop.f32.mrf.mxu0 }
 0xa71   :  { %v9404_v54 = vadd.f32 %v9403_v20, %v9384_v42  ;;  %v9918_v52 = vpop.f32.mrf.mxu2  ;;  %v9987_v20 = vperm.slane %v20186_v63, 6 }
 0xa72   :  { %v9919_v26 = vadd.f32 %v9918_v52, %v9899_v17 }
 0xa73   :  { %v9423_v3 = vadd.f32 %v9422_v43, %v9404_v54  ;;  %v9937_v11 = vpop.f32.mrf.mxu3 }
 0xa74   :  { %v9938_v53 = vadd.f32 %v9937_v11, %v9919_v26 }
 0xa75   :  { %v9442_v27 = vadd.f32 %v9441_v19, %v9423_v3  ;;  %v9902_v62 = vpop.f32.mrf.mxu1 }
 0xa78   :  { %v9387_v0 = vpop.f32.mrf.mxu0 }
 0xa79   :  { %v9407_v2 = vadd.f32 %v9406_v9, %v9387_v0  ;;  %v9921_v55 = vpop.f32.mrf.mxu2 }
 0xa7b   :  { %v9426_v12 = vadd.f32 %v9425_v34, %v9407_v2  ;;  %v9940_v41 = vpop.f32.mrf.mxu3 }
 0xa7d   :  { %v9445_v59 = vadd.f32 %v9444_v46, %v9426_v12  ;;  %v9904_v7 = vpop.f32.mrf.mxu1 }
 0xa80   :  { %v9389_v56 = vpop.f32.mrf.mxu0 }
 0xa81   :  { %v9409_v23 = vadd.f32 %v9408_v18, %v9389_v56  ;;  %v9923_v22 = vpop.f32.mrf.mxu2 }
 0xa82   :  { %v9924_v43 = vadd.f32 %v9923_v22, %v9904_v7  ;;  %v10042_v22 = vperm.slane %v20186_v63, 7 }
 0xa83   :  { %v9428_v54 = vadd.f32 %v9427_v28, %v9409_v23  ;;  %v9942_v13 = vpop.f32.mrf.mxu3 }
 0xa85   :  { %v9447_v34 = vadd.f32 %v9446_v61, %v9428_v54 }
 0xa88   :  { %v9458_v57 = vpop.f32.mrf.mxu0 }
 0xa89   :  { %v9459_v25 = vadd.f32 %v9458_v57, %v9440_v8  ;;  %v9943_v57 = vadd.f32 %v9942_v13, %v9924_v43 }
 0xa8b   :  { %v9468_v31 = vadd.f32 %v9459_v25, %v8953_v30  ;;  %v9973_v30 = vpop.f32.mrf.mxu1 }
 0xa90   :  { %v9460_v14 = vpop.f32.mrf.mxu0 }
 0xa91   :  { %v9461_v33 = vadd.f32 %v9460_v14, %v9442_v27 }
 0xa93   :  { %v9469_v10 = vadd.f32 %v9461_v33, %v8954_v44  ;;  %v9975_v44 = vpop.f32.mrf.mxu1 }
 0xa98   :  { %v9463_v5 = vpop.f32.mrf.mxu0 }
 0xa99   :  { %v9464_v37 = vadd.f32 %v9463_v5, %v9445_v59 }
 0xa9b   :  { %v9470_v29 = vadd.f32 %v9464_v37, %v8955_v45  ;;  %v9922_v45 = vadd.f32 %v9921_v55, %v9902_v62  ;;  %v9978_v42 = vpop.f32.mrf.mxu1 }
 0xa9d   :  { %v9941_v1 = vadd.f32 %v9940_v41, %v9922_v45 }
 0xaa0   :  { %v9465_v15 = vpop.f32.mrf.mxu0 }
 0xaa1   :  { %v9466_v25 = vadd.f32 %v9465_v15, %v9447_v34 }
 0xaa3   :  { %v9980_v28 = vpop.f32.mrf.mxu1  ;;  %v9471_v27 = vadd.f32 %v9466_v25, %v19303_v47 }
 0xaa8   :  { %v9954_v35 = vpop.f32.mrf.mxu0 }
 0xaa9   :  { %v9955_v6 = vadd.f32 %v9954_v35, %v9936_v51 }
 0xaab   :  { %v9974_v32 = vadd.f32 %v9973_v30, %v9955_v6 }
 0xaad   :  { %v9983_v58 = vadd.f32 %v9974_v32, %v9468_v31 }
 0xaaf   :  { %v9988_v24 = vadd.f32 %v9987_v20, %v9983_v58 }
 0xab0   :  { %v9956_v38 = vpop.f32.mrf.mxu0 }
 0xab1   :  { %v9957_v60 = vadd.f32 %v9956_v38, %v9938_v53  ;;  %v19306_v9 = vmax.f32 %v9988_v24, 0.0 }
 0xab3   :  { %v9976_v4 = vadd.f32 %v9975_v44, %v9957_v60  ;;  %v10006_v39 = vmul.f32 %v19306_v9, %v19306_v9 }
 0xab5   :  { %v9984_v48 = vadd.f32 %v9976_v4, %v9469_v10 }
 0xab7   :  { %v9989_v50 = vadd.f32 %v9987_v20, %v9984_v48 }
 0xab8   :  { %v9959_v49 = vpop.f32.mrf.mxu0 }
 0xab9   :  { %v19308_v40 = vmax.f32 %v9989_v50, 0.0  ;;  %v9960_v0 = vadd.f32 %v9959_v49, %v9941_v1  ;;  %v20187_v50 = vld [vmem:[#allocation20_spill] sm:$0xff] }
 0xabb   :  { %v9996_v19 = vadd.f32 %v19308_v40, %v19306_v9  ;;  %v10007_v18 = vmul.f32 %v19308_v40, %v19308_v40  ;;  %v9979_v56 = vadd.f32 %v9978_v42, %v9960_v0  ;;  %v10047_v42 = vperm.slane %v20187_v50, 0 }
 0xabd   :  { %v10010_v17 = vadd.f32 %v10007_v18, %v10006_v39  ;;  %v9985_v8 = vadd.f32 %v9979_v56, %v9470_v29 }
 0xabf   :  { %v9990_v46 = vadd.f32 %v9987_v20, %v9985_v8 }
 0xac0   :  { %v9961_v3 = vpop.f32.mrf.mxu0 }
 0xac1   :  { %v9994_v31 = vmax.f32 %v9990_v46, 0.0  ;;  %v9962_v2 = vadd.f32 %v9961_v3, %v9943_v57 }
 0xac3   :  { %v9997_v14 = vadd.f32 %v9996_v19, %v9994_v31  ;;  %v10008_v62 = vmul.f32 %v9994_v31, %v9994_v31  ;;  %v9981_v33 = vadd.f32 %v9980_v28, %v9962_v2 }
 0xac5   :  { %v10011_v12 = vadd.f32 %v10010_v17, %v10008_v62  ;;  %v9986_v10 = vadd.f32 %v9981_v33, %v9471_v27 }
 0xac7   :  { %v9991_v59 = vadd.f32 %v9987_v20, %v9986_v10 }
 0xac9   :  { %v9995_v5 = vmax.f32 %v9991_v59, 0.0 }
 0xacb   :  { %v9998_v36 = vadd.f32 %v9997_v14, %v9995_v5  ;;  %v10009_v61 = vmul.f32 %v9995_v5, %v9995_v5 }
 0xacd   :  { %v9999_v37 = vrot.slane %v9998_v36, 4  ;;  %v10012_v7 = vadd.f32 %v10011_v12, %v10009_v61 }
 0xacf   :  { %v10000_v29 = vadd.f32 %v9999_v37, %v9998_v36  ;;  %v10013_v16 = vrot.slane %v10012_v7, 4 }
 0xad1   :  { %v10001_v15 = vrot.slane %v10000_v29, 2  ;;  %v10014_v21 = vadd.f32 %v10013_v16, %v10012_v7 }
 0xad3   :  { %v10002_v52 = vadd.f32 %v10001_v15, %v10000_v29  ;;  %v10015_v30 = vrot.slane %v10014_v21, 2 }
 0xad5   :  { %v10003_v51 = vrot.slane %v10002_v52, 1  ;;  %v10016_v11 = vadd.f32 %v10015_v30, %v10014_v21 }
 0xad7   :  { %v10004_v47 = vadd.f32 %v10003_v51, %v10002_v52  ;;  %v10017_v35 = vrot.slane %v10016_v11, 1 }
 0xad9   :  { %v10005_v6 = vmul.f32 0.03125, %v10004_v47  ;;  %v10018_v26 = vadd.f32 %v10017_v35, %v10016_v11 }
 0xadb   :  { %v10019_v32 = vmul.f32 0.03125, %v10018_v26  ;;  %v10020_v55 = vmul.f32 %v10005_v6, %v10005_v6  ;;  %v10023_v44 = vsub.f32 %v19306_v9, %v10005_v6  ;;  %v10024_v53 = vsub.f32 %v19308_v40, %v10005_v6 }
 0xadc   :  { %v10025_v58 = vsub.f32 %v9994_v31, %v10005_v6  ;;  %v10026_v20 = vsub.f32 %v9995_v5, %v10005_v6 }
 0xadd   :  { %v10021_v38 = vsub.f32 %v10019_v32, %v10020_v55 }
 0xadf   :  { %v10022_v60 = vmax.f32 %v10021_v38, 0.0 }
 0xae1   :  { %v10027_v41 = vadd.f32 1e-05, %v10022_v60 }
 0xae3   :  { %14469 = vrsqrt.f32 %v10027_v41  ;;  %vm10034_vm15 = vweird.f32 %v10027_v41 }
 0xae9   :  { %v14470_v45 = vpop.eup %14469 }
 0xaea   :  { %v10029_v24 = vmul.f32 %v14470_v45, %v10027_v41  ;;  %vm10035_vm14 = vweird.f32 %v14470_v45 }
 0xaeb   :  { %vm10036_vm0 = vmor %vm10034_vm15, %vm10035_vm14 }
 0xaec   :  { %v10030_v4 = vmul.f32 %v14470_v45, %v10029_v24 }
 0xaee   :  { %v10031_v23 = vmul.f32 0.5, %v10030_v4 }
 0xaf0   :  { %v10032_v48 = vsub.f32 1.5, %v10031_v23 }
 0xaf2   :  { %v10033_v1 = vmul.f32 %v14470_v45, %v10032_v48 }
 0xaf4   :  { %v10037_v9 = vsel %vm10036_vm0, %v14470_v45, %v10033_v1 }
 0xaf5   :  { %v10038_v49 = vmul.f32 %v10037_v9, %v10023_v44  ;;  %v10039_v54 = vmul.f32 %v10037_v9, %v10024_v53  ;;  %v10040_v40 = vmul.f32 %v10037_v9, %v10025_v58  ;;  %v10041_v0 = vmul.f32 %v10037_v9, %v10026_v20 }
 0xaf7   :  { %v10043_v43 = vmul.f32 %v10042_v22, %v10038_v49  ;;  %v10044_v39 = vmul.f32 %v10042_v22, %v10039_v54  ;;  %v10045_v19 = vmul.f32 %v10042_v22, %v10040_v40  ;;  %v10046_v18 = vmul.f32 %v10042_v22, %v10041_v0 }
 0xaf9   :  { %v10048_v56 = vadd.f32 %v10047_v42, %v10043_v43  ;;  %v19321_v13 = vadd.f32 %v10047_v42, %v10044_v39  ;;  %v10050_v34 = vadd.f32 %v10047_v42, %v10045_v19  ;;  %v19323_v17 = vadd.f32 %v10047_v42, %v10046_v18 }
 0xafa   :  { %14571 = dma.done.wait [#allocation5 + $0x2], 16384 }
 0xafb   :  { %14572 = vsyncadd [#allocation5 + $0x2], 4294950912  ;;  %10060 = vst [vmem:[#allocation1] ss:$9 sm:$0xff] %v10048_v56  ;;  %v14336_v63 = vld [vmem:[#allocation4 + $0x38] sm:$0xff]  ;;  %v14335_v46 = vld [vmem:[#allocation4 + $0x30] sm:$0xff] }
 0xafc   :  { %10062 = vst [vmem:[#allocation1 + $0x1] ss:$9 sm:$0xff] %v10050_v34  ;;  %v14344_v8 = vld [vmem:[#allocation4 + $0x78] sm:$0xff]  ;;  %11138 = vmatpush.bf16.msrb.mxu2 %v14336_v63  ;;  %v14343_v3 = vld [vmem:[#allocation4 + $0x70] sm:$0xff]  ;;  %v14334_v28 = vld [vmem:[#allocation4 + $0x28] sm:$0xff]  ;;  %s14582_s4 = smov [#allocation6]  }
 0xafd   :  { %v14352_v57 = vld [vmem:[#allocation4 + $0xb8] sm:$0xff]  ;;  %11151 = vmatpush.bf16.msrb.mxu3 %v14344_v8  ;;  %v14351_v31 = vld [vmem:[#allocation4 + $0xb0] sm:$0xff]  ;;  %v14342_v27 = vld [vmem:[#allocation4 + $0x68] sm:$0xff]  ;;  %s11352_s5 = sshll.u32 %s14582_s4, 4  ;;  %s11354_s7 = sshll.u32 %s19337_s6, 4  ;;  %s11353_s5 = int_to_ptr.vmem [resolvable:$true] %s11352_s5  ;;  %s11355_s7 = int_to_ptr.hbm [resolvable:$true] %s11354_s7 }
 0xafe   :  { %v14360_v25 = vld [vmem:[#allocation4 + $0xf8] sm:$0xff]  ;;  %11164 = vmatpush.bf16.msrb.mxu0 %v14352_v57  ;;  %v14359_v2 = vld [vmem:[#allocation4 + $0xf0] sm:$0xff]  ;;  %v14350_v14 = vld [vmem:[#allocation4 + $0xa8] sm:$0xff] }
 0xaff   :  { %11177 = vmatpush.bf16.msra.mxu1 %v14360_v25  ;;  %v14358_v62 = vld [vmem:[#allocation4 + $0xe8] sm:$0xff]  ;;  %v14333_v33 = vld [vmem:[#allocation4 + $0x20] sm:$0xff]  ;;  %v14332_v5 = vld [vmem:[#allocation4 + $0x18] sm:$0xff] }
 0xb00   :  { %11139 = vmatpush.bf16.msrb.mxu2 %v14335_v46  ;;  %v14341_v12 = vld [vmem:[#allocation4 + $0x60] sm:$0xff]  ;;  %v14340_v36 = vld [vmem:[#allocation4 + $0x58] sm:$0xff]  ;;  %v14331_v7 = vld [vmem:[#allocation4 + $0x10] sm:$0xff] }
 0xb01   :  { %11152 = vmatpush.bf16.msrb.mxu3 %v14343_v3  ;;  %v14349_v10 = vld [vmem:[#allocation4 + $0xa0] sm:$0xff]  ;;  %v14348_v61 = vld [vmem:[#allocation4 + $0x98] sm:$0xff]  ;;  %v14339_v29 = vld [vmem:[#allocation4 + $0x50] sm:$0xff] }
 0xb02   :  { %11165 = vmatpush.bf16.msrb.mxu0 %v14351_v31  ;;  %v14357_v59 = vld [vmem:[#allocation4 + $0xe0] sm:$0xff]  ;;  %v14356_v37 = vld [vmem:[#allocation4 + $0xd8] sm:$0xff]  ;;  %v14347_v16 = vld [vmem:[#allocation4 + $0x90] sm:$0xff] }
 0xb03   :  { %11178 = vmatpush.bf16.msra.mxu1 %v14359_v2  ;;  %v14355_v15 = vld [vmem:[#allocation4 + $0xd0] sm:$0xff]  ;;  %v14330_v21 = vld [vmem:[#allocation4 + $0x8] sm:$0xff]  ;;  %v14329_v11 = vld [vmem:[#allocation4] sm:$0xff] }
 0xb04   :  { %11140 = vmatpush.bf16.msrb.mxu2 %v14334_v28  ;;  %v14338_v52 = vld [vmem:[#allocation4 + $0x48] sm:$0xff]  ;;  %v14337_v47 = vld [vmem:[#allocation4 + $0x40] sm:$0xff]  ;;  %v14368_v26 = vld [vmem:[#allocation4 + $0x138] sm:$0xff] }
 0xb05   :  { %11153 = vmatpush.bf16.msrb.mxu3 %v14342_v27  ;;  %v14346_v30 = vld [vmem:[#allocation4 + $0x88] sm:$0xff]  ;;  %v14345_v35 = vld [vmem:[#allocation4 + $0x80] sm:$0xff]  ;;  %v10063_v32 = vld [vmem:[#allocation1] sm:$0xff] }
 0xb06   :  { %11166 = vmatpush.bf16.msrb.mxu0 %v14350_v14  ;;  %v14354_v51 = vld [vmem:[#allocation4 + $0xc8] sm:$0xff]  ;;  %v14353_v6 = vld [vmem:[#allocation4 + $0xc0] sm:$0xff]  ;;  %v14376_v44 = vld [vmem:[#allocation4 + $0x178] sm:$0xff]  ;;  %v10097_v60 = vpack.c.bf16 %v10063_v32, %v10063_v32 }
 0xb07   :  { %11179 = vmatpush.bf16.msra.mxu1 %v14358_v62  ;;  %v10064_v55 = vld [vmem:[#allocation1 + $0x9] sm:$0xff]  ;;  %v10065_v53 = vld [vmem:[#allocation1 + $0x12] sm:$0xff]  ;;  %v10066_v58 = vld [vmem:[#allocation1 + $0x1b] sm:$0xff] }
 0xb08   :  { %11141 = vmatpush.bf16.msrb.mxu2 %v14333_v33  ;;  %v14384_v20 = vld [vmem:[#allocation4 + $0x1b8] sm:$0xff]  ;;  %v10098_v41 = vpack.c.bf16 %v10064_v55, %v10064_v55  ;;  %v10099_v45 = vpack.c.bf16 %v10065_v53, %v10065_v53  ;;  %v10100_v24 = vpack.c.bf16 %v10066_v58, %v10066_v58  ;;  %v14367_v4 = vld [vmem:[#allocation4 + $0x130] sm:$0xff]  ;;  %v14366_v22 = vld [vmem:[#allocation4 + $0x128] sm:$0xff] }
 0xb09   :  { %11154 = vmatpush.bf16.msrb.mxu3 %v14341_v12  ;;  %v14392_v38 = vld [vmem:[#allocation4 + $0x1f8] sm:$0xff]  ;;  %v14375_v23 = vld [vmem:[#allocation4 + $0x170] sm:$0xff]  ;;  %v14374_v9 = vld [vmem:[#allocation4 + $0x168] sm:$0xff] }
 0xb0a   :  { %11167 = vmatpush.bf16.msrb.mxu0 %v14349_v10  ;;  %v14383_v48 = vld [vmem:[#allocation4 + $0x1b0] sm:$0xff]  ;;  %v14382_v42 = vld [vmem:[#allocation4 + $0x1a8] sm:$0xff]  ;;  %v14365_v54 = vld [vmem:[#allocation4 + $0x120] sm:$0xff] }
 0xb0b   :  { %11180 = vmatpush.bf16.msra.mxu1 %v14357_v59  ;;  %v14391_v1 = vld [vmem:[#allocation4 + $0x1f0] sm:$0xff]  ;;  %v14390_v49 = vld [vmem:[#allocation4 + $0x1e8] sm:$0xff]  ;;  %v14373_v40 = vld [vmem:[#allocation4 + $0x160] sm:$0xff] }
 0xb0c   :  { %11142 = vmatpush.bf16.msrb.mxu2 %v14332_v5  ;;  %v14381_v0 = vld [vmem:[#allocation4 + $0x1a0] sm:$0xff]  ;;  %v10069_v18 = vld [vmem:[#allocation1 + $0x36] sm:$0xff]  ;;  %v10070_v56 = vld [vmem:[#allocation1 + $0x3f] sm:$0xff] }
 0xb0d   :  { %11155 = vmatpush.bf16.msrb.mxu3 %v14340_v36  ;;  %v14389_v43 = vld [vmem:[#allocation4 + $0x1e0] sm:$0xff]  ;;  %v14364_v34 = vld [vmem:[#allocation4 + $0x118] sm:$0xff]  ;;  %v14363_v25 = vld [vmem:[#allocation4 + $0x110] sm:$0xff] }
 0xb0e   :  { %11168 = vmatpush.bf16.msrb.mxu0 %v14348_v61  ;;  %v10067_v39 = vld [vmem:[#allocation1 + $0x24] sm:$0xff]  ;;  %v10068_v19 = vld [vmem:[#allocation1 + $0x2d] sm:$0xff]  ;;  %v14371_v46 = vld [vmem:[#allocation4 + $0x150] sm:$0xff] }
 0xb0f   :  { %11181 = vmatpush.bf16.msra.mxu1 %v14356_v37  ;;  %v14372_v63 = vld [vmem:[#allocation4 + $0x158] sm:$0xff]  ;;  %10071 = vst [vmem:[#allocation1] ss:$9 sm:$0xff] %v19321_v13  ;;  %v14379_v3 = vld [vmem:[#allocation4 + $0x190] sm:$0xff]  ;;  %v14362_v2 = vld [vmem:[#allocation4 + $0x108] sm:$0xff]  ;;  %v10101_v36 = vpack.c.bf16 %v10067_v39, %v10067_v39  ;;  %v10102_v61 = vpack.c.bf16 %v10068_v19, %v10068_v19  ;;  %v10103_v37 = vpack.c.bf16 %v10069_v18, %v10069_v18 }
 0xb10   :  { %11143 = vmatpush.bf16.msrb.mxu2 %v14331_v7  ;;  %v14380_v8 = vld [vmem:[#allocation4 + $0x198] sm:$0xff]  ;;  %10072 = vst [vmem:[#allocation1 + $0x1] ss:$9 sm:$0xff] %v19323_v17  ;;  %v14387_v31 = vld [vmem:[#allocation4 + $0x1d0] sm:$0xff]  ;;  %v14370_v28 = vld [vmem:[#allocation4 + $0x148] sm:$0xff]  ;;  %v10104_v7 = vpack.c.bf16 %v10070_v56, %v10070_v56 }
 0xb11   :  { %11156 = vmatpush.bf16.msrb.mxu3 %v14339_v29  ;;  %v14388_v57 = vld [vmem:[#allocation4 + $0x1d8] sm:$0xff]  ;;  %v14378_v13 = vld [vmem:[#allocation4 + $0x188] sm:$0xff]  ;;  %v14361_v14 = vld [vmem:[#allocation4 + $0x100] sm:$0xff] }
 0xb12   :  { %11169 = vmatpush.bf16.msrb.mxu0 %v14347_v16  ;;  %v14386_v27 = vld [vmem:[#allocation4 + $0x1c8] sm:$0xff]  ;;  %v14369_v17 = vld [vmem:[#allocation4 + $0x140] sm:$0xff]  ;;  %v14400_v12 = vld [vmem:[#allocation4 + $0x238] sm:$0xff] }
 0xb13   :  { %11182 = vmatpush.bf16.msra.mxu1 %v14355_v15  ;;  %v14377_v62 = vld [vmem:[#allocation4 + $0x180] sm:$0xff]  ;;  %v14408_v10 = vld [vmem:[#allocation4 + $0x278] sm:$0xff]  ;;  %v14399_v29 = vld [vmem:[#allocation4 + $0x230] sm:$0xff] }
 0xb14   :  { %11144 = vmatpush.bf16.msrb.mxu2 %v14330_v21  ;;  %v14385_v33 = vld [vmem:[#allocation4 + $0x1c0] sm:$0xff]  ;;  %v14416_v59 = vld [vmem:[#allocation4 + $0x2b8] sm:$0xff]  ;;  %v14407_v16 = vld [vmem:[#allocation4 + $0x270] sm:$0xff] }
 0xb15   :  { %11157 = vmatpush.bf16.msrb.mxu3 %v14338_v52  ;;  %v14424_v5 = vld [vmem:[#allocation4 + $0x2f8] sm:$0xff]  ;;  %v14415_v15 = vld [vmem:[#allocation4 + $0x2b0] sm:$0xff]  ;;  %v14398_v52 = vld [vmem:[#allocation4 + $0x228] sm:$0xff] }
 0xb16   :  { %11170 = vmatpush.bf16.msrb.mxu0 %v14346_v30  ;;  %v14423_v21 = vld [vmem:[#allocation4 + $0x2f0] sm:$0xff]  ;;  %v14406_v30 = vld [vmem:[#allocation4 + $0x268] sm:$0xff]  ;;  %v14396_v32 = vld [vmem:[#allocation4 + $0x218] sm:$0xff] }
 0xb17   :  { %11183 = vmatpush.bf16.msra.mxu1 %v14354_v51  ;;  %v14414_v51 = vld [vmem:[#allocation4 + $0x2a8] sm:$0xff]  ;;  %v14404_v55 = vld [vmem:[#allocation4 + $0x258] sm:$0xff]  ;;  %v14395_v58 = vld [vmem:[#allocation4 + $0x210] sm:$0xff] }
 0xb18   :  { %11145 = vmatpush.bf16.msrb.mxu2 %v14329_v11  ;;  %v14422_v11 = vld [vmem:[#allocation4 + $0x2e8] sm:$0xff]  ;;  %v14420_v53 = vld [vmem:[#allocation4 + $0x2d8] sm:$0xff] }
 0xb19   :  { %11158 = vmatpush.bf16.msrb.mxu3 %v14337_v47  ;;  %v14397_v47 = vld [vmem:[#allocation4 + $0x220] sm:$0xff]  ;;  %v14456_v39 = vld [vmem:[#allocation4 + $0x3f8] sm:$0xff] }
 0xb1a   :  { %11171 = vmatpush.bf16.msrb.mxu0 %v14345_v35  ;;  %v14405_v35 = vld [vmem:[#allocation4 + $0x260] sm:$0xff] }
 0xb1b   :  { %11184 = vmatpush.bf16.msra.mxu1 %v14353_v6  ;;  %11146 = vmatmul.bf16.vlgmr.msrb.gmra.mxu2 %v10097_v60  ;;  %v14413_v6 = vld [vmem:[#allocation4 + $0x2a0] sm:$0xff]  ;;  %v14419_v60 = vld [vmem:[#allocation4 + $0x2d0] sm:$0xff] }
 0xb1c   :  { %11190 = vmatpush.bf16.msra.mxu2 %v14368_v26  ;;  %11159 = vmatmul.bf16.vlgmr.msrb.gmra.mxu3 %v10098_v41  ;;  %v14421_v26 = vld [vmem:[#allocation4 + $0x2e0] sm:$0xff]  ;;  %v14394_v41 = vld [vmem:[#allocation4 + $0x208] sm:$0xff] }
 0xb1d   :  { %11203 = vmatpush.bf16.msra.mxu3 %v14376_v44  ;;  %11172 = vmatmul.bf16.vlgmr.msrb.gmra.mxu0 %v10099_v45  ;;  %v14412_v44 = vld [vmem:[#allocation4 + $0x298] sm:$0xff]  ;;  %v14402_v45 = vld [vmem:[#allocation4 + $0x248] sm:$0xff] }
 0xb1e   :  { %11216 = vmatpush.bf16.msra.mxu0 %v14384_v20  ;;  %11185 = vmatmul.bf16.vlgmr.msra.gmra.mxu1 %v10100_v24  ;;  %v14403_v20 = vld [vmem:[#allocation4 + $0x250] sm:$0xff]  ;;  %v14410_v24 = vld [vmem:[#allocation4 + $0x288] sm:$0xff] }
 0xb1f   :  { %11229 = vmatpush.bf16.msrb.mxu1 %v14392_v38  ;;  %v14411_v38 = vld [vmem:[#allocation4 + $0x290] sm:$0xff] }
 0xb20   :  { %11191 = vmatpush.bf16.msra.mxu2 %v14367_v4  ;;  %v14418_v4 = vld [vmem:[#allocation4 + $0x2c8] sm:$0xff] }
 0xb21   :  { %11204 = vmatpush.bf16.msra.mxu3 %v14375_v23  ;;  %v14393_v23 = vld [vmem:[#allocation4 + $0x200] sm:$0xff] }
 0xb22   :  { %11217 = vmatpush.bf16.msra.mxu0 %v14383_v48  ;;  %v14401_v48 = vld [vmem:[#allocation4 + $0x240] sm:$0xff] }
 0xb23   :  { %11230 = vmatpush.bf16.msrb.mxu1 %v14391_v1  ;;  %v14409_v1 = vld [vmem:[#allocation4 + $0x280] sm:$0xff] }
 0xb24   :  { %11192 = vmatpush.bf16.msra.mxu2 %v14366_v22  ;;  %v14417_v22 = vld [vmem:[#allocation4 + $0x2c0] sm:$0xff] }
 0xb25   :  { %11205 = vmatpush.bf16.msra.mxu3 %v14374_v9  ;;  %v14432_v9 = vld [vmem:[#allocation4 + $0x338] sm:$0xff] }
 0xb26   :  { %11218 = vmatpush.bf16.msra.mxu0 %v14382_v42  ;;  %v10073_v42 = vld [vmem:[#allocation1] sm:$0xff] }
 0xb27   :  { %11231 = vmatpush.bf16.msrb.mxu1 %v14390_v49  ;;  %v10074_v49 = vld [vmem:[#allocation1 + $0x9] sm:$0xff]  ;;  %v10105_v19 = vpack.c.bf16 %v10073_v42, %v10073_v42 }
 0xb28   :  { %11193 = vmatpush.bf16.msra.mxu2 %v14365_v54  ;;  %v14440_v54 = vld [vmem:[#allocation4 + $0x378] sm:$0xff]  ;;  %v10106_v18 = vpack.c.bf16 %v10074_v49, %v10074_v49 }
 0xb29   :  { %11206 = vmatpush.bf16.msra.mxu3 %v14373_v40  ;;  %v10075_v40 = vld [vmem:[#allocation1 + $0x12] sm:$0xff] }
 0xb2a   :  { %11219 = vmatpush.bf16.msra.mxu0 %v14381_v0  ;;  %v10076_v0 = vld [vmem:[#allocation1 + $0x1b] sm:$0xff]  ;;  %v10107_v56 = vpack.c.bf16 %v10075_v40, %v10075_v40 }
 0xb2b   :  { %11232 = vmatpush.bf16.msrb.mxu1 %v14389_v43  ;;  %v14448_v43 = vld [vmem:[#allocation4 + $0x3b8] sm:$0xff] }
 0xb2c   :  { %11194 = vmatpush.bf16.msra.mxu2 %v14364_v34  ;;  %v10108_v34 = vpack.c.bf16 %v10076_v0, %v10076_v0 }
 0xb2d   :  { %11207 = vmatpush.bf16.msra.mxu3 %v14372_v63  ;;  %v14431_v63 = vld [vmem:[#allocation4 + $0x330] sm:$0xff] }
 0xb2e   :  { %11220 = vmatpush.bf16.msra.mxu0 %v14380_v8  ;;  %v14439_v8 = vld [vmem:[#allocation4 + $0x370] sm:$0xff] }
 0xb2f   :  { %11233 = vmatpush.bf16.msrb.mxu1 %v14388_v57  ;;  %v14447_v57 = vld [vmem:[#allocation4 + $0x3b0] sm:$0xff] }
 0xb30   :  { %11195 = vmatpush.bf16.msra.mxu2 %v14363_v25  ;;  %v14455_v25 = vld [vmem:[#allocation4 + $0x3f0] sm:$0xff] }
 0xb31   :  { %11208 = vmatpush.bf16.msra.mxu3 %v14371_v46  ;;  %v14430_v46 = vld [vmem:[#allocation4 + $0x328] sm:$0xff] }
 0xb32   :  { %11221 = vmatpush.bf16.msra.mxu0 %v14379_v3  ;;  %v14438_v3 = vld [vmem:[#allocation4 + $0x368] sm:$0xff] }
 0xb33   :  { %11234 = vmatpush.bf16.msrb.mxu1 %v14387_v31  ;;  %v14446_v31 = vld [vmem:[#allocation4 + $0x3a8] sm:$0xff] }
 0xb34   :  { %11196 = vmatpush.bf16.msra.mxu2 %v14362_v2  ;;  %v14454_v2 = vld [vmem:[#allocation4 + $0x3e8] sm:$0xff] }
 0xb35   :  { %11209 = vmatpush.bf16.msra.mxu3 %v14370_v28  ;;  %v14429_v28 = vld [vmem:[#allocation4 + $0x320] sm:$0xff] }
 0xb36   :  { %11222 = vmatpush.bf16.msra.mxu0 %v14378_v13  ;;  %v14437_v13 = vld [vmem:[#allocation4 + $0x360] sm:$0xff] }
 0xb37   :  { %11235 = vmatpush.bf16.msrb.mxu1 %v14386_v27  ;;  %v14445_v27 = vld [vmem:[#allocation4 + $0x3a0] sm:$0xff] }
 0xb38   :  { %11197 = vmatpush.bf16.msra.mxu2 %v14361_v14  ;;  %v14453_v14 = vld [vmem:[#allocation4 + $0x3e0] sm:$0xff] }
 0xb39   :  { %11210 = vmatpush.bf16.msra.mxu3 %v14369_v17  ;;  %v14428_v17 = vld [vmem:[#allocation4 + $0x318] sm:$0xff] }
 0xb3a   :  { %11223 = vmatpush.bf16.msra.mxu0 %v14377_v62  ;;  %v14436_v62 = vld [vmem:[#allocation4 + $0x358] sm:$0xff] }
 0xb3b   :  { %11236 = vmatpush.bf16.msrb.mxu1 %v14385_v33  ;;  %11198 = vmatmul.bf16.vlgmr.msra.gmra.mxu2 %v10101_v36  ;;  %v14444_v33 = vld [vmem:[#allocation4 + $0x398] sm:$0xff]  ;;  %v14451_v36 = vld [vmem:[#allocation4 + $0x3d0] sm:$0xff] }
 0xb3c   :  { %11242 = vmatpush.bf16.msrb.mxu2 %v14400_v12  ;;  %11211 = vmatmul.bf16.vlgmr.msra.gmra.mxu3 %v10102_v61  ;;  %v14452_v12 = vld [vmem:[#allocation4 + $0x3d8] sm:$0xff]  ;;  %v14426_v61 = vld [vmem:[#allocation4 + $0x308] sm:$0xff] }
 0xb3d   :  { %11255 = vmatpush.bf16.msrb.mxu3 %v14408_v10  ;;  %11224 = vmatmul.bf16.vlgmr.msra.gmra.mxu0 %v10103_v37  ;;  %v14427_v10 = vld [vmem:[#allocation4 + $0x310] sm:$0xff]  ;;  %v14434_v37 = vld [vmem:[#allocation4 + $0x348] sm:$0xff] }
 0xb3e   :  { %11268 = vmatpush.bf16.msrb.mxu0 %v14416_v59  ;;  %11237 = vmatmul.bf16.vlgmr.msrb.gmra.mxu1 %v10104_v7  ;;  %v14435_v59 = vld [vmem:[#allocation4 + $0x350] sm:$0xff]  ;;  %v14442_v7 = vld [vmem:[#allocation4 + $0x388] sm:$0xff] }
 0xb3f   :  { %11281 = vmatpush.bf16.msra.mxu1 %v14424_v5  ;;  %v14443_v5 = vld [vmem:[#allocation4 + $0x390] sm:$0xff] }
 0xb40   :  { %11243 = vmatpush.bf16.msrb.mxu2 %v14399_v29  ;;  %v14450_v29 = vld [vmem:[#allocation4 + $0x3c8] sm:$0xff] }
 0xb41   :  { %11256 = vmatpush.bf16.msrb.mxu3 %v14407_v16  ;;  %v14425_v16 = vld [vmem:[#allocation4 + $0x300] sm:$0xff] }
 0xb42   :  { %11269 = vmatpush.bf16.msrb.mxu0 %v14415_v15  ;;  %v14433_v15 = vld [vmem:[#allocation4 + $0x340] sm:$0xff] }
 0xb43   :  { %11282 = vmatpush.bf16.msra.mxu1 %v14423_v21  ;;  %v14441_v21 = vld [vmem:[#allocation4 + $0x380] sm:$0xff] }
 0xb44   :  { %11244 = vmatpush.bf16.msrb.mxu2 %v14398_v52  ;;  %v10077_v52 = vld [vmem:[#allocation1 + $0x24] sm:$0xff] }
 0xb45   :  { %11257 = vmatpush.bf16.msrb.mxu3 %v14406_v30  ;;  %v10078_v30 = vld [vmem:[#allocation1 + $0x2d] sm:$0xff] }
 0xb46   :  { %11270 = vmatpush.bf16.msrb.mxu0 %v14414_v51  ;;  %v14449_v51 = vld [vmem:[#allocation4 + $0x3c0] sm:$0xff] }
 0xb47   :  { %11283 = vmatpush.bf16.msra.mxu1 %v14422_v11  ;;  %v10079_v11 = vld [vmem:[#allocation1 + $0x36] sm:$0xff] }
 0xb48   :  { %11245 = vmatpush.bf16.msrb.mxu2 %v14397_v47  ;;  %v10080_v47 = vld [vmem:[#allocation1 + $0x3f] sm:$0xff] }
 0xb49   :  { %11258 = vmatpush.bf16.msrb.mxu3 %v14405_v35  ;;  %v10109_v35 = vpack.c.bf16 %v10077_v52, %v10077_v52 }
 0xb4a   :  { %11271 = vmatpush.bf16.msrb.mxu0 %v14413_v6  ;;  %v10110_v6 = vpack.c.bf16 %v10078_v30, %v10078_v30 }
 0xb4b   :  { %11284 = vmatpush.bf16.msra.mxu1 %v14421_v26  ;;  %v10111_v26 = vpack.c.bf16 %v10079_v11, %v10079_v11 }
 0xb4c   :  { %11246 = vmatpush.bf16.msrb.mxu2 %v14396_v32  ;;  %v10112_v32 = vpack.c.bf16 %v10080_v47, %v10080_v47 }
 0xb4d   :  { %11259 = vmatpush.bf16.msrb.mxu3 %v14404_v55 }
 0xb4e   :  { %11272 = vmatpush.bf16.msrb.mxu0 %v14412_v44 }
 0xb4f   :  { %11285 = vmatpush.bf16.msra.mxu1 %v14420_v53  ;;  %v10369_v53 = vperm.slane %v20187_v50, 1 }
 0xb50   :  { %11247 = vmatpush.bf16.msrb.mxu2 %v14395_v58 }
 0xb51   :  { %11260 = vmatpush.bf16.msrb.mxu3 %v14403_v20 }
 0xb52   :  { %11273 = vmatpush.bf16.msrb.mxu0 %v14411_v38 }
 0xb53   :  { %11286 = vmatpush.bf16.msra.mxu1 %v14419_v60 }
 0xb54   :  { %11248 = vmatpush.bf16.msrb.mxu2 %v14394_v41 }
 0xb55   :  { %11261 = vmatpush.bf16.msrb.mxu3 %v14402_v45 }
 0xb56   :  { %11274 = vmatpush.bf16.msrb.mxu0 %v14410_v24 }
 0xb57   :  { %11287 = vmatpush.bf16.msra.mxu1 %v14418_v4 }
 0xb58   :  { %11249 = vmatpush.bf16.msrb.mxu2 %v14393_v23 }
 0xb59   :  { %11262 = vmatpush.bf16.msrb.mxu3 %v14401_v48 }
 0xb5a   :  { %11275 = vmatpush.bf16.msrb.mxu0 %v14409_v1 }
 0xb5b   :  { %11288 = vmatpush.bf16.msra.mxu1 %v14417_v22  ;;  %11250 = vmatmul.bf16.vlgmr.msrb.gmra.mxu2 %v10105_v19 }
 0xb5c   :  { %11294 = vmatpush.bf16.msra.mxu2 %v14432_v9  ;;  %11263 = vmatmul.bf16.vlgmr.msrb.gmra.mxu3 %v10106_v18 }
 0xb5d   :  { %11307 = vmatpush.bf16.msra.mxu3 %v14440_v54  ;;  %11276 = vmatmul.bf16.vlgmr.msrb.gmra.mxu0 %v10107_v56 }
 0xb5e   :  { %11320 = vmatpush.bf16.msra.mxu0 %v14448_v43  ;;  %11289 = vmatmul.bf16.vlgmr.msra.gmra.mxu1 %v10108_v34 }
 0xb5f   :  { %11333 = vmatpush.bf16.msrb.mxu1 %v14456_v39 }
 0xb60   :  { %11295 = vmatpush.bf16.msra.mxu2 %v14431_v63 }
 0xb61   :  { %11308 = vmatpush.bf16.msra.mxu3 %v14439_v8 }
 0xb62   :  { %11321 = vmatpush.bf16.msra.mxu0 %v14447_v57 }
 0xb63   :  { %11334 = vmatpush.bf16.msrb.mxu1 %v14455_v25 }
 0xb64   :  { %11296 = vmatpush.bf16.msra.mxu2 %v14430_v46 }
 0xb65   :  { %11309 = vmatpush.bf16.msra.mxu3 %v14438_v3 }
 0xb66   :  { %11322 = vmatpush.bf16.msra.mxu0 %v14446_v31 }
 0xb67   :  { %11335 = vmatpush.bf16.msrb.mxu1 %v14454_v2 }
 0xb68   :  { %11297 = vmatpush.bf16.msra.mxu2 %v14429_v28 }
 0xb69   :  { %11310 = vmatpush.bf16.msra.mxu3 %v14437_v13 }
 0xb6a   :  { %11323 = vmatpush.bf16.msra.mxu0 %v14445_v27 }
 0xb6b   :  { %11336 = vmatpush.bf16.msrb.mxu1 %v14453_v14 }
 0xb6c   :  { %11298 = vmatpush.bf16.msra.mxu2 %v14428_v17 }
 0xb6d   :  { %11311 = vmatpush.bf16.msra.mxu3 %v14436_v62 }
 0xb6e   :  { %11324 = vmatpush.bf16.msra.mxu0 %v14444_v33 }
 0xb6f   :  { %11337 = vmatpush.bf16.msrb.mxu1 %v14452_v12 }
 0xb70   :  { %11299 = vmatpush.bf16.msra.mxu2 %v14427_v10 }
 0xb71   :  { %11312 = vmatpush.bf16.msra.mxu3 %v14435_v59 }
 0xb72   :  { %11325 = vmatpush.bf16.msra.mxu0 %v14443_v5 }
 0xb73   :  { %11338 = vmatpush.bf16.msrb.mxu1 %v14451_v36 }
 0xb74   :  { %11300 = vmatpush.bf16.msra.mxu2 %v14426_v61 }
 0xb75   :  { %11313 = vmatpush.bf16.msra.mxu3 %v14434_v37 }
 0xb76   :  { %11326 = vmatpush.bf16.msra.mxu0 %v14442_v7 }
 0xb77   :  { %11339 = vmatpush.bf16.msrb.mxu1 %v14450_v29 }
 0xb78   :  { %11301 = vmatpush.bf16.msra.mxu2 %v14425_v16 }
 0xb79   :  { %11314 = vmatpush.bf16.msra.mxu3 %v14433_v15 }
 0xb7a   :  { %11327 = vmatpush.bf16.msra.mxu0 %v14441_v21 }
 0xb7b   :  { %11340 = vmatpush.bf16.msrb.mxu1 %v14449_v51  ;;  %11302 = vmatmul.bf16.vlgmr.msra.gmra.mxu2 %v10109_v35 }
 0xb7c   :  { %11315 = vmatmul.bf16.vlgmr.msra.gmra.mxu3 %v10110_v6 }
 0xb7d   :  { %11328 = vmatmul.bf16.vlgmr.msra.gmra.mxu0 %v10111_v26 }
 0xb7e   :  { %11341 = vmatmul.bf16.vlgmr.msrb.gmra.mxu1 %v10112_v32 }
 0xb9a   :  { %v11173_v55 = vpop.f32.mrf.mxu0 }
 0xb9b   :  { %v11186_v44 = vpop.f32.mrf.mxu1 }
 0xb9e   :  { %v11147_v58 = vpop.f32.mrf.mxu2 }
 0xb9f   :  { %v11160_v20 = vpop.f32.mrf.mxu3  ;;  %v11148_v38 = vadd.f32 %v11147_v58, %v10369_v53 }
 0xba1   :  { %v11161_v60 = vadd.f32 %v11160_v20, %v11148_v38 }
 0xba2   :  { %v11175_v41 = vpop.f32.mrf.mxu0 }
 0xba3   :  { %v11188_v45 = vpop.f32.mrf.mxu1  ;;  %v11174_v24 = vadd.f32 %v11173_v55, %v11161_v60 }
 0xba5   :  { %v11187_v4 = vadd.f32 %v11186_v44, %v11174_v24 }
 0xba6   :  { %v11149_v23 = vpop.f32.mrf.mxu2 }
 0xba7   :  { %v11162_v48 = vpop.f32.mrf.mxu3 }
 0xbba   :  { %v11225_v1 = vpop.f32.mrf.mxu0 }
 0xbbb   :  { %v11238_v22 = vpop.f32.mrf.mxu1 }
 0xbbe   :  { %v11199_v9 = vpop.f32.mrf.mxu2 }
 0xbbf   :  { %v11212_v42 = vpop.f32.mrf.mxu3  ;;  %v11200_v18 = vadd.f32 %v11199_v9, %v11187_v4 }
 0xbc1   :  { %v11213_v63 = vadd.f32 %v11212_v42, %v11200_v18 }
 0xbc2   :  { %v11227_v49 = vpop.f32.mrf.mxu0 }
 0xbc3   :  { %v11240_v54 = vpop.f32.mrf.mxu1  ;;  %v11226_v25 = vadd.f32 %v11225_v1, %v11213_v63 }
 0xbc5   :  { %v11239_v46 = vadd.f32 %v11238_v22, %v11226_v25 }
 0xbc6   :  { %v11201_v40 = vpop.f32.mrf.mxu2 }
 0xbc7   :  { %v11214_v0 = vpop.f32.mrf.mxu3 }
 0xbda   :  { %v11277_v43 = vpop.f32.mrf.mxu0 }
 0xbdb   :  { %v11290_v50 = vpop.f32.mrf.mxu1 }
 0xbde   :  { %v11251_v39 = vpop.f32.mrf.mxu2 }
 0xbdf   :  { %v11264_v19 = vpop.f32.mrf.mxu3  ;;  %v11252_v3 = vadd.f32 %v11251_v39, %v11239_v46 }
 0xbe1   :  { %v11265_v31 = vadd.f32 %v11264_v19, %v11252_v3 }
 0xbe2   :  { %v11279_v56 = vpop.f32.mrf.mxu0 }
 0xbe3   :  { %v11292_v34 = vpop.f32.mrf.mxu1  ;;  %v11278_v2 = vadd.f32 %v11277_v43, %v11265_v31 }
 0xbe5   :  { %v11291_v27 = vadd.f32 %v11290_v50, %v11278_v2 }
 0xbe6   :  { %v11253_v8 = vpop.f32.mrf.mxu2 }
 0xbe7   :  { %v11266_v57 = vpop.f32.mrf.mxu3 }
 0xbfa   :  { %v11329_v28 = vpop.f32.mrf.mxu0 }
 0xbfb   :  { %v11342_v13 = vpop.f32.mrf.mxu1 }
 0xbfe   :  { %v11303_v14 = vpop.f32.mrf.mxu2 }
 0xbff   :  { %v11316_v17 = vpop.f32.mrf.mxu3  ;;  %v11304_v62 = vadd.f32 %v11303_v14, %v11291_v27 }
 0xc01   :  { %v11317_v33 = vadd.f32 %v11316_v17, %v11304_v62 }
 0xc02   :  { %v11331_v12 = vpop.f32.mrf.mxu0 }
 0xc03   :  { %v11344_v10 = vpop.f32.mrf.mxu1  ;;  %v11330_v59 = vadd.f32 %v11329_v28, %v11317_v33 }
 0xc05   :  { %v11343_v5 = vadd.f32 %v11342_v13, %v11330_v59 }
 0xc06   :  { %v11305_v36 = vpop.f32.mrf.mxu2 }
 0xc07   :  { %v11318_v61 = vpop.f32.mrf.mxu3  ;;  %11346 = vst [vmem:[#allocation6] sm:$0x3] %v11343_v5 }
 0xc08   :  { %11357 = dma.vmem_to_hbm [thread:$0]  %s11353_s5, 32, %s11355_s7, [#allocation7]  }
 0xc09   :  { %14573 = dma.done.wait [#allocation7], 32  }
 0xc0a   :  { %14574 = vsyncadd [#allocation7], 4294967264 }
 0xc0b   :  { %11362 = vsyncpa [#allocation7], 1 }
 0xc0c   :  { %11363 = vsyncmov [#allocation5] }
 0xc0f   :  { %s11364_s9 = vpop.sfrf %11363 }
 0xc10   :  { %p13869_p0 = scmp.ne.s32.totalorder %s11364_s9, 0 }
 0xc12   :  { %11368 = shalt.err (%p13869_p0)  }
 0xc13   :  { %11370 = vsyncmov [#allocation5 + $0x1] }
 0xc16   :  { %s11371_s10 = vpop.sfrf %11370 }
 0xc17   :  { %p13870_p1 = scmp.ne.s32.totalorder %s11371_s10, 0 }
 0xc19   :  { %11375 = shalt.err (%p13870_p1)  }
 0xc1a   :  { %11377 = vsyncmov [#allocation5 + $0x2] }
 0xc1d   :  { %s11378_s6 = vpop.sfrf %11377 }
 0xc1e   :  { %p13871_p2 = scmp.ne.s32.totalorder %s11378_s6, 0 }
 0xc20   :  { %11382 = shalt.err (%p13871_p2)  }

</bundles_post_ra>
